<compile_context>
chip_gen: v6e
topology: v6e:2x2x1
jax: 0.10.0
libtpu: 0.0.40
codegen_flags: <defaults>
</compile_context>

<pallas_src>
import jax
import jax.numpy as jnp
from jax.experimental import pallas as pl
from jax.experimental.pallas import tpu as pltpu


IN_FEATURES = 1024 * 10 * 10   # 102400, fixed by the PyTorch module
HIDDEN = 256
OUT_FEATURES = 6
OUT_PAD = 128                  # lane-dense padded output width
DEFAULT_BLOCK_K = 12800        # 102400 / 12800 = 8 grid steps


# ----------------------------------------------------------------------------
# Fused kernel: (B,K)x(K,256) tiled over K  ->  +b1, ReLU  ->  (B,256)x(256,128)
# ----------------------------------------------------------------------------
def _infonet_kernel(x_ref, w1_ref, b1_ref, w2_ref, b2_ref, o_ref, acc_ref):
    k = pl.program_id(0)

    @pl.when(k == 0)
    def _init():
        acc_ref[...] = jnp.zeros_like(acc_ref)

    # First linear layer, K-tiled, f32 accumulation on the MXU.
    acc_ref[...] += jnp.dot(
        x_ref[...], w1_ref[...], preferred_element_type=jnp.float32
    )

    @pl.when(k == pl.num_programs(0) - 1)
    def _finalize():
        h = jnp.maximum(acc_ref[...] + b1_ref[...], 0.0)          # (B, 256) f32
        h = h.astype(w2_ref.dtype)                                # bf16 for MXU
        o_ref[...] = (
            jnp.dot(h, w2_ref[...], preferred_element_type=jnp.float32)
            + b2_ref[...]
        )


def infonet_forward(params, z, *, block_k=DEFAULT_BLOCK_K):
    """Forward pass of InfoNet.

    z: (B, 1024, 10, 10) float32 (PyTorch NCHW layout).
    Returns (B, 6) float32.
    """
    w1, b1, w2p, b2p = params
    B = z.shape[0]
    x = z.reshape(B, -1).astype(jnp.bfloat16)                     # (B, 102400)
    K = x.shape[1]
    assert K % block_k == 0, (K, block_k)
    n_k = K // block_k

    flops = 2 * B * K * HIDDEN + 2 * B * HIDDEN * OUT_PAD
    bytes_accessed = (
        B * K * 2                       # x (bf16)
        + K * HIDDEN * 2                # w1 (bf16) -- dominant term
        + HIDDEN * OUT_PAD * 2          # w2 (bf16, padded)
        + HIDDEN * 4 + OUT_PAD * 4      # biases (f32)
        + B * OUT_PAD * 4               # output (f32)
    )

    out_padded = pl.pallas_call(
        _infonet_kernel,
        out_shape=jax.ShapeDtypeStruct((B, OUT_PAD), jnp.float32),
        grid_spec=pltpu.PrefetchScalarGridSpec(
            num_scalar_prefetch=0,
            grid=(n_k,),
            in_specs=[
                pl.BlockSpec((B, block_k), lambda k: (0, k)),       # x tile
                pl.BlockSpec((block_k, HIDDEN), lambda k: (k, 0)),  # w1 tile
                pl.BlockSpec((1, HIDDEN), lambda k: (0, 0)),        # b1
                pl.BlockSpec((HIDDEN, OUT_PAD), lambda k: (0, 0)),  # w2 (padded)
                pl.BlockSpec((1, OUT_PAD), lambda k: (0, 0)),       # b2 (padded)
            ],
            out_specs=pl.BlockSpec((B, OUT_PAD), lambda k: (0, 0)),
            scratch_shapes=[pltpu.VMEM((B, HIDDEN), jnp.float32)],
        ),
        compiler_params=pltpu.CompilerParams(
            dimension_semantics=("arbitrary",),   # K is a reduction axis
            vmem_limit_bytes=32 * 1024 * 1024,    # footprint ~13.3 MiB
        ),
        cost_estimate=pl.CostEstimate(
            flops=flops, transcendentals=0, bytes_accessed=bytes_accessed
        ),
    )(x, w1, b1, w2p, b2p)

    return out_padded[:, :OUT_FEATURES]


# ----------------------------------------------------------------------------
# Deterministic parameter construction (PyTorch Linear default init ranges).
# ----------------------------------------------------------------------------
def init_params(key):
    k1, k2, k3, k4 = jax.random.split(key, 4)

    bound1 = 1.0 / (IN_FEATURES ** 0.5)
    w1 = jax.random.uniform(
        k1, (IN_FEATURES, HIDDEN), jnp.float32, -bound1, bound1
    ).astype(jnp.bfloat16)
    b1 = jax.random.uniform(k2, (1, HIDDEN), jnp.float32, -bound1, bound1)

    bound2 = 1.0 / (HIDDEN ** 0.5)
    w2 = jax.random.uniform(
        k3, (HIDDEN, OUT_FEATURES), jnp.float32, -bound2, bound2
    )
    b2 = jax.random.uniform(k4, (1, OUT_FEATURES), jnp.float32, -bound2, bound2)

    # Zero-pad the tiny second layer to a lane-dense width of 128.
    w2p = (
        jnp.zeros((HIDDEN, OUT_PAD), jnp.float32)
        .at[:, :OUT_FEATURES].set(w2)
        .astype(jnp.bfloat16)
    )
    b2p = jnp.zeros((1, OUT_PAD), jnp.float32).at[:, :OUT_FEATURES].set(b2)

    return (w1, b1, w2p, b2p)


# ----------------------------------------------------------------------------
# Pure-JAX reference (mirrors the kernel's bf16-weight / f32-accumulate math).
# ----------------------------------------------------------------------------
def infonet_ref(params, z):
    w1, b1, w2p, b2p = params
    x = z.reshape(z.shape[0], -1).astype(jnp.bfloat16).astype(jnp.float32)
    h = jnp.maximum(jnp.dot(x, w1.astype(jnp.float32)) + b1, 0.0)
    h = h.astype(jnp.bfloat16).astype(jnp.float32)
    o = jnp.dot(h, w2p.astype(jnp.float32)) + b2p
    return o[:, :OUT_FEATURES]


# ----------------------------------------------------------------------------
if __name__ == "__main__":
    key = jax.random.PRNGKey(0)
    kp, kz = jax.random.split(key)

    params = init_params(kp)

    B = 2
    z = jax.random.normal(kz, (B, 1024, 10, 10), jnp.float32)

    fwd = jax.jit(infonet_forward)
    out = jax.block_until_ready(fwd(params, z))

    assert out.shape == (B, OUT_FEATURES), out.shape
    assert bool(jnp.all(jnp.isfinite(out)))

    ref = infonet_ref(params, z)
    max_err = float(jnp.max(jnp.abs(out - ref)))
    assert max_err < 5e-2, max_err

    print("KERNEL_OK")
</pallas_src>

<mosaic_0001>
module attributes {stable_mosaic.version = 11 : i64} {
  func.func @_infonet_kernel(%arg0: i32, %arg1: memref<2x12800xbf16, #tpu.memory_space<vmem>>, %arg2: memref<12800x256xbf16, #tpu.memory_space<vmem>>, %arg3: memref<1x256xf32, #tpu.memory_space<vmem>>, %arg4: memref<256x128xbf16, #tpu.memory_space<vmem>>, %arg5: memref<1x128xf32, #tpu.memory_space<vmem>>, %arg6: memref<2x128xf32, #tpu.memory_space<vmem>>, %arg7: memref<2x256xf32, #tpu.memory_space<vmem>>) attributes {dimension_semantics = [#tpu.dimension_semantics<arbitrary>], iteration_bounds = array<i64: 8>, scalar_prefetch = 0 : i64, scratch_operands = 1 : i64, tpu.core_type = #tpu.core_type<tc>, window_params = [{transform_indices = @transform_0, window_bounds = array<i64: 2, 12800>}, {transform_indices = @transform_1, window_bounds = array<i64: 12800, 256>}, {pipeline_mode = #tpu.pipeline_mode<synchronous>, transform_indices = @transform_2, window_bounds = array<i64: 1, 256>}, {pipeline_mode = #tpu.pipeline_mode<synchronous>, transform_indices = @transform_3, window_bounds = array<i64: 256, 128>}, {pipeline_mode = #tpu.pipeline_mode<synchronous>, transform_indices = @transform_4, window_bounds = array<i64: 1, 128>}, {pipeline_mode = #tpu.pipeline_mode<synchronous>, transform_indices = @transform_5, window_bounds = array<i64: 2, 128>}]} {
    %c0_i32 = arith.constant 0 : i32
    %0 = arith.cmpi eq, %arg0, %c0_i32 : i32
    %1 = arith.extui %0 : i1 to i32
    %c0_i32_0 = arith.constant 0 : i32
    %2 = arith.cmpi ne, %1, %c0_i32_0 : i32
    scf.if %2 {
      %cst_9 = arith.constant 0.000000e+00 : f32
      %12 = vector.broadcast %cst_9 : f32 to vector<2x256xf32>
      %c0_10 = arith.constant 0 : index
      %c0_11 = arith.constant 0 : index
      %13 = vector.load %arg7[%c0_10, %c0_11] : memref<2x256xf32, #tpu.memory_space<vmem>>, vector<2x256xf32>
      tpu.vector_store %arg7[%c0_10, %c0_11], %12 {strides = array<i32>} : memref<2x256xf32, #tpu.memory_space<vmem>>, vector<2x256xf32>,
    } else {
    }
    %c0 = arith.constant 0 : index
    %c0_1 = arith.constant 0 : index
    %3 = vector.load %arg7[%c0, %c0_1] : memref<2x256xf32, #tpu.memory_space<vmem>>, vector<2x256xf32>
    %c0_2 = arith.constant 0 : index
    %c0_3 = arith.constant 0 : index
    %4 = vector.load %arg1[%c0_2, %c0_3] : memref<2x12800xbf16, #tpu.memory_space<vmem>>, vector<2x12800xbf16>
    %c0_4 = arith.constant 0 : index
    %c0_5 = arith.constant 0 : index
    %5 = vector.load %arg2[%c0_4, %c0_5] : memref<12800x256xbf16, #tpu.memory_space<vmem>>, vector<12800x256xbf16>
    %cst = arith.constant dense<0.000000e+00> : vector<2x256xf32>
    %6 = tpu.matmul %4, %5, %cst {dimension_numbers = #tpu.dot_dimension_numbers<[1], [0], [0], [1], [0, 0, 1, 1], [], []>} : vector<2x12800xbf16>, vector<12800x256xbf16>, vector<2x256xf32> -> vector<2x256xf32>
    %7 = arith.addf %3, %6 : vector<2x256xf32>
    %c0_6 = arith.constant 0 : index
    %c0_7 = arith.constant 0 : index
    %8 = vector.load %arg7[%c0_6, %c0_7] : memref<2x256xf32, #tpu.memory_space<vmem>>, vector<2x256xf32>
    tpu.vector_store %arg7[%c0_6, %c0_7], %7 {strides = array<i32>} : memref<2x256xf32, #tpu.memory_space<vmem>>, vector<2x256xf32>,
    %c7_i32 = arith.constant 7 : i32
    %9 = arith.cmpi eq, %arg0, %c7_i32 : i32
    %10 = arith.extui %9 : i1 to i32
    %c0_i32_8 = arith.constant 0 : i32
    %11 = arith.cmpi ne, %10, %c0_i32_8 : i32
    scf.if %11 {
      %c0_9 = arith.constant 0 : index
      %c0_10 = arith.constant 0 : index
      %12 = vector.load %arg7[%c0_9, %c0_10] : memref<2x256xf32, #tpu.memory_space<vmem>>, vector<2x256xf32>
      %c0_11 = arith.constant 0 : index
      %c0_12 = arith.constant 0 : index
      %13 = vector.load %arg3[%c0_11, %c0_12] : memref<1x256xf32, #tpu.memory_space<vmem>>, vector<1x256xf32>
      %14 = vector.broadcast %13 : vector<1x256xf32> to vector<2x256xf32>
      %15 = arith.addf %12, %14 : vector<2x256xf32>
      %cst_13 = arith.constant 0.000000e+00 : f32
      %16 = vector.broadcast %cst_13 : f32 to vector<2x256xf32>
      %17 = arith.maximumf %15, %16 : vector<2x256xf32>
      %18 = arith.truncf %17 : vector<2x256xf32> to vector<2x256xbf16>
      %c0_14 = arith.constant 0 : index
      %c0_15 = arith.constant 0 : index
      %19 = vector.load %arg4[%c0_14, %c0_15] : memref<256x128xbf16, #tpu.memory_space<vmem>>, vector<256x128xbf16>
      %cst_16 = arith.constant dense<0.000000e+00> : vector<2x128xf32>
      %20 = tpu.matmul %18, %19, %cst_16 {dimension_numbers = #tpu.dot_dimension_numbers<[1], [0], [0], [1], [0, 0, 1, 1], [], []>} : vector<2x256xbf16>, vector<256x128xbf16>, vector<2x128xf32> -> vector<2x128xf32>
      %c0_17 = arith.constant 0 : index
      %c0_18 = arith.constant 0 : index
      %21 = vector.load %arg5[%c0_17, %c0_18] : memref<1x128xf32, #tpu.memory_space<vmem>>, vector<1x128xf32>
      %22 = vector.broadcast %21 : vector<1x128xf32> to vector<2x128xf32>
      %23 = arith.addf %20, %22 : vector<2x128xf32>
      %c0_19 = arith.constant 0 : index
      %c0_20 = arith.constant 0 : index
      %24 = vector.load %arg6[%c0_19, %c0_20] : memref<2x128xf32, #tpu.memory_space<vmem>>, vector<2x128xf32>
      tpu.vector_store %arg6[%c0_19, %c0_20], %23 {strides = array<i32>} : memref<2x128xf32, #tpu.memory_space<vmem>>, vector<2x128xf32>,
    } else {
    }
    return
  }
  func.func @transform_0(%arg0: i32) -> (i32, i32) {
    %c0_i32 = arith.constant 0 : i32
    %c0_i32_0 = arith.constant 0 : i32
    return %c0_i32, %arg0 : i32, i32
  }
  func.func @transform_1(%arg0: i32) -> (i32, i32) {
    %c0_i32 = arith.constant 0 : i32
    %c0_i32_0 = arith.constant 0 : i32
    return %arg0, %c0_i32 : i32, i32
  }
  func.func @transform_2(%arg0: i32) -> (i32, i32) {
    %c0_i32 = arith.constant 0 : i32
    %c0_i32_0 = arith.constant 0 : i32
    %c0_i32_1 = arith.constant 0 : i32
    return %c0_i32, %c0_i32_0 : i32, i32
  }
  func.func @transform_3(%arg0: i32) -> (i32, i32) {
    %c0_i32 = arith.constant 0 : i32
    %c0_i32_0 = arith.constant 0 : i32
    %c0_i32_1 = arith.constant 0 : i32
    return %c0_i32, %c0_i32_0 : i32, i32
  }
  func.func @transform_4(%arg0: i32) -> (i32, i32) {
    %c0_i32 = arith.constant 0 : i32
    %c0_i32_0 = arith.constant 0 : i32
    %c0_i32_1 = arith.constant 0 : i32
    return %c0_i32, %c0_i32_0 : i32, i32
  }
  func.func @transform_5(%arg0: i32) -> (i32, i32) {
    %c0_i32 = arith.constant 0 : i32
    %c0_i32_0 = arith.constant 0 : i32
    %c0_i32_1 = arith.constant 0 : i32
    return %c0_i32, %c0_i32_0 : i32, i32
  }
}

</mosaic_0001>

<bundles_post_ra>
// kernel: infonet_forward.1
= control target key start
LH: loop header
LB: loop body
LE: loop exit
PB: predicated region body
PF: predicated region fallthrough
CT: control target
= control target key end

     0   :  { %10 = vsyncpa [#allocation4], 0  ;;  %s19569_s0 = inlined_call_operand.vmem [shape: bf16[2,102400], index: 0, kind: input, shape index: {}]   ;;  %s19570_s1 = inlined_call_operand.hbm [shape: bf16[102400,256], index: 1, kind: input, shape index: {}]   ;;  %s19571_s2 = inlined_call_operand.hbm [shape: f32[1,256], index: 2, kind: input, shape index: {}]   ;;  %s19572_s3 = inlined_call_operand.hbm [shape: bf16[256,128], index: 3, kind: input, shape index: {}]   ;;  %s19573_s4 = inlined_call_operand.hbm [shape: f32[1,128], index: 4, kind: input, shape index: {}]   ;;  %s19574_s5 = inlined_call_operand.hbm [shape: f32[2,128], index: 5, kind: output, shape index: {}]  }
   0x1   :  { %12 = vsyncpa [#allocation4 + $0x1], 0 }
   0x2   :  { %13 = vsyncpa [#allocation7], 0 }
   0x3   :  { %14 = vsyncpa [#allocation10], 0 }
   0x4   :  { %15 = vsyncpa [#allocation5], 0  ;;  %s17405_s18 = smov 0   ;;  %s17407_s19 = smov 0  }
   0x5   :  { %s17409_s20 = smov 0   ;;  %s17411_s21 = smov 0  }
   0x6 LB: > { %s17424_s22 = sadd.s32 4294967295, %s17361_s21   ;;  %p67_p0 = scmp.ne.s32.totalorder %s17353_s19, %s17349_s18  ;;  %s17361_s21 = sphi %s17411_s21, %s19592_s21   ;;  %s17357_s20 = sphi %s17409_s20, %s19591_s20   ;;  %s17353_s19 = sphi %s17407_s19, %s19590_s19   ;;  %s17349_s18 = sphi %s17405_s18, %s19589_s18  }
   0x7   : > { %p19575_p1 = scmp.eq.s32.totalorder %s17424_s22, 0  ;;  %p13011_p2 = scmp.ge.s32.totalorder %s17361_s21, 1 }
   0x8   : > { %p162_p3 = scmp.lt.s32.totalorder %s17361_s21, 9  ;;  %s17363_s25 = smov [#allocation6]  }
   0x9   : > { %p17433_p5 = por %p19575_p1, %p67_p0  ;;  %s175_s26 = sshll.u32 %s17363_s25, 4  ;;  %s176_s26 = int_to_ptr.vmem [resolvable:$true] %s175_s26 }
   0xa   : > { %p17437_p6 = pnand %p13011_p2, %p162_p3  ;;  %s17364_s27 = smov [#allocation8]  }
   0xb   : > { %s19578_s23 = scalar_select %p17433_p5, 1, 0 }
   0xc   : > { %s19579_s24 = scalar_select %p17437_p6, 1, 0 }
   0xd   : > { %p14691_p7 = pneg %p17437_p6  ;;  %s185_s28 = sshll.u32 %s17364_s27, 4  ;;  %s186_s28 = int_to_ptr.vmem [resolvable:$true] %s185_s28 }
   0xe   : > { %s17365_s30 = smov [#allocation9]   ;;  %s17196_s7 = scalar_lea.vmem %s176_s26, 32 }
   0xf   : > { %p17445_p8 = pnand %p14691_p7, %p19575_p1  ;;  %s199_s6 = sshll.u32 %s17365_s30, 4  ;;  %s200_s6 = int_to_ptr.vmem [resolvable:$true] %s199_s6 }
  0x10   : > { %p17197_p10 = scmp.ne.s32.totalorder %s176_s26, %s17196_s7  ;;  %p17204_p13 = scmp.lt.s32.totalorder %s176_s26, %s176_s26 }
  0x11   : > { %p17187_p9 = pneg %p17445_p8  ;;  %p17205_p0 = scmp.lt.s32.totalorder %s17196_s7, %s17196_s7 }
  0x13   : > { %p17199_p11 = pnand %p17197_p10, %p17187_p9  ;;  %p17206_p2 = por %p17205_p0, %p17204_p13 }
  0x15   : > { %p17200_p12 = pneg %p17199_p11 }
  0x17   : > { %p17207_p3 = pnand %p17206_p2, %p17200_p12 }
  0x19   : > { %17210 = shalt.err (!%p17207_p3)
}
  0x1a   : > { %14694 = dma.hbm_to_vmem [thread:$0]  (!%p17445_p8), %s19571_s2, 32, %s176_s26, [#allocation7]  }
  0x1b   : > { %s17222_s10 = scalar_lea.vmem %s186_s28, 2048  ;;  %p17230_p10 = scmp.lt.s32.totalorder %s186_s28, %s186_s28 }
  0x1c   : > { %p17223_p7 = scmp.ne.s32.totalorder %s186_s28, %s17222_s10  ;;  %p17231_p11 = scmp.lt.s32.totalorder %s17222_s10, %s17222_s10 }
  0x1e   : > { %p17225_p4 = pnand %p17223_p7, %p17187_p9  ;;  %p17232_p5 = por %p17231_p11, %p17230_p10 }
  0x20   : > { %p17226_p1 = pneg %p17225_p4 }
  0x22   : > { %p17233_p6 = pnand %p17232_p5, %p17226_p1 }
  0x24   : > { %17236 = shalt.err (!%p17233_p6)
}
  0x25   : > { %s17366_s11 = smov 64   ;;  %s17367_s12 = smov 4  }
  0x26   : > { %14697 = dma.hbm_to_vmem [thread:$0]  (!%p17445_p8), %s19572_s3, 2048, %s186_s28, [#allocation7], %s17366_s11, %s17366_s11, %s17367_s12  }
  0x27   : > { %s17248_s15 = scalar_lea.vmem %s200_s6, 16  ;;  %s17255_s16 = scalar_lea.vmem %s200_s6, 32 }
  0x28   : > { %p17249_p12 = scmp.ne.s32.totalorder %s200_s6, %s17248_s15  ;;  %p17256_p0 = scmp.lt.s32.totalorder %s200_s6, %s200_s6 }
  0x29   : > { %p17257_p1 = scmp.lt.s32.totalorder %s17255_s16, %s17248_s15 }
  0x2a   : > { %p17251_p4 = pnand %p17249_p12, %p17187_p9 }
  0x2b   : > { %p17258_p5 = por %p17257_p1, %p17256_p0 }
  0x2c   : > { %p17252_p13 = pneg %p17251_p4 }
  0x2e   : > { %p17259_p6 = pnand %p17258_p5, %p17252_p13 }
  0x30   : > { %17262 = shalt.err (!%p17259_p6)
}
  0x31   : > { %14700 = dma.hbm_to_vmem [thread:$0]  (!%p17445_p8), %s19573_s4, 16, %s200_s6, [#allocation10]  }
  0x32   : > { %s17476_s25 = sadd.s32 1, %s17361_s21   ;;  %s54_s27 = sadd.s32 1, %s17357_s20 }
  0x33   : > { %s51_s26 = ssub.s32 %s17361_s21, %s17476_s25  ;;  %p61_p2 = scmp.ne.s32.totalorder %s17357_s20, %s17353_s19 }
  0x34   : > { %p52_p9 = scmp.eq.s32.totalorder %s51_s26, 0  ;;  %p62_p3 = scmp.eq.s32.totalorder %s17361_s21, 0 }
  0x35   : > { %p14708_p7 = scmp.lt.s32.totalorder %s17361_s21, 8  ;;  %s218_s29 = sand.u32 1, %s17357_s20  }
  0x36   : > { %s17486_s28 = scalar_select %p52_p9, %s17357_s20, %s54_s27  }
  0x37   : > { %p63_p10 = por %p62_p3, %p61_p2  ;;  %s14671_s30 = smul.u32 12800, %s218_s29 }
  0x38   : > { %s14648_s7 = smul.u32 204800, %s17361_s21  ;;  %s17501_s13 = scalar_lea.sflag [#allocation4], %s218_s29 }
  0x39   : > { %p17490_p11 = pnand %p14708_p7, %p63_p10  ;;  %s222_s11 = scalar_lea.vmem [#allocation3], %s14671_s30 }
  0x3a   : > { %s17497_s10 = scalar_lea.hbm %s19570_s1, %s14648_s7  ;;  %s230_s12 = sshll.u32 %s222_s11, 4  ;;  %s17499_s12 = int_to_ptr.vmem [resolvable:$true] %s230_s12 }
  0x3b   : > { %s17263_s21 = scalar_lea.hbm %s17497_s10, 204800  ;;  %p17265_p12 = pneg %p17490_p11 }
  0x3c   : > { %p17264_p8 = scmp.ne.s32.totalorder %s17497_s10, %s17263_s21  ;;  %s17268_s16 = scalar_lea.hbm %s19570_s1, 1638400 }
  0x3d   : > { %p17269_p0 = scmp.lt.s32.totalorder %s17497_s10, %s19570_s1  ;;  %p17270_p1 = scmp.lt.s32.totalorder %s17268_s16, %s17263_s21 }
  0x3e   : > { %p17266_p4 = pnand %p17265_p12, %p17264_p8 }
  0x3f   : > { %p17271_p5 = por %p17270_p1, %p17269_p0 }
  0x40   : > { %p17267_p13 = pneg %p17266_p4 }
  0x42   : > { %p17272_p6 = pnand %p17271_p5, %p17267_p13 }
  0x44   : > { %17275 = shalt.err (!%p17272_p6)
}
  0x45   : > { %s17276_s26 = scalar_lea.vmem %s17499_s12, 204800  ;;  %s17368_s27 = smov [#allocation3]  }
  0x46   : > { %p17277_p9 = scmp.ne.s32.totalorder %s17499_s12, %s17276_s26  ;;  %s17281_s29 = sshll.u32 %s17368_s27, 4  ;;  %s17282_s29 = int_to_ptr.vmem [resolvable:$false] %s17281_s29 }
  0x47   : > { %s17283_s30 = scalar_lea.vmem %s17282_s29, 409600  ;;  %p17284_p7 = scmp.lt.s32.totalorder %s17499_s12, %s17282_s29 }
  0x48   : > { %p17279_p2 = pnand %p17277_p9, %p17265_p12  ;;  %p17285_p10 = scmp.lt.s32.totalorder %s17283_s30, %s17276_s26 }
  0x4a   : > { %p17280_p3 = pneg %p17279_p2  ;;  %p17286_p8 = por %p17285_p10, %p17284_p7 }
  0x4c   : > { %p17287_p4 = pnand %p17286_p8, %p17280_p3 }
  0x4e   : > { %17290 = shalt.err (!%p17287_p4)
}
  0x4f   : > { %s17369_s7 = smov 128   ;;  %s17370_s6 = smov 8  }
  0x50   : > { %14704 = dma.hbm_to_vmem [thread:$0]  (!%p17490_p11), %s17497_s10, 204800, %s17499_s12, %s17501_s13, %s17369_s7, %s17369_s7, %s17370_s6  }
  0x51   : > { %p19582_p12 = scmp.ne.s32.totalorder %s19579_s24, 0 }
  0x52   : > { %s244_s9 = sand.u32 (!%p19582_p12), 1, %s17353_s19   ;;  %p19583_p13 = scmp.ne.s32.totalorder (!%p19582_p12), %s19578_s23, 0 }
  0x53   : > { %242 = sbr.rel (%p19582_p12) target bundleno = 2159 (0x86f), region = 40  ;;  %s245_s21 = scalar_lea.sflag (!%p19582_p12), [#allocation4], %s244_s9 }
  0x54   : > { %s14672_s11 = smul.u32 (!%p19582_p12), 12800, %s244_s9 }
  0x56   : > { %s17525_s14 = scalar_lea.vmem (!%p19582_p12), [#allocation3], %s14672_s11 }
  0x58   : > { %17332 = dma.done.wait (%p19583_p13), %s245_s21, 204800  }
  0x59   : > { %17334 = vsyncadd (%p19583_p13), %s245_s21, 4294762496  ;;  %p19584_p0 = scmp.eq.s32.totalorder %s17424_s22, 0 }
  0x5b   : > { %17336 = dma.done.wait (%p19584_p0), [#allocation7], 2080   ;;  %p19585_p11 = pmov %p19584_p0 }
  0x5c   : > { %p19586_p1 = pmov %p19584_p0 }
  0x5d   : > { %17338 = vsyncadd (%p19585_p11), [#allocation7], 4294965216 }
  0x5e   : > { %17340 = dma.done.wait (%p19586_p1), [#allocation10], 16   ;;  %p19587_p5 = pmov %p19584_p0 }
  0x5f   : > { %s286_s24 = smul.u32 100, %s17424_s22  ;;  %p19588_p9 = scmp.ne.s32.totalorder %s17424_s22, 0 }
  0x60   : > { %17342 = vsyncadd (%p19587_p5), [#allocation10], 4294967280 }
  0x61   : > { %p287_p6 = scmp.lt.s32.totalorder %s286_s24, 799  ;;  %296 = sbr.rel (%p19588_p9) target bundleno = 104 (0x68), region = 60 }
  0x63   : > { %s19594_s24 = smov (!%p287_p6, %s286_s24), 799 }
  0x64   : > { %s17543_s23 = scalar_lea.vmem %s19569_s0, %s19594_s24 }
  0x66   : > { %v17371_v0 = vmov 0.0  }
  0x67   : > { %297 = vst [vmem:[#allocation2] sm:$0xf] %v17371_v0 }
  0x68 PF: > { %v14757_v1 = vld [vmem:[%s17525_s14 + $0x74] ss:$8 sps:$4 sm:$0xff]   ;;  %v14761_v3 = vld [vmem:[%s17525_s14 + $0x70] ss:$8 sps:$4 sm:$0xff]   ;;  %v14763_v5 = vld [vmem:[%s17525_s14 + $0x64] ss:$8 sps:$4 sm:$0xff]   ;;  %v1929_v39 = vlaneseq }
  0x69   : > { %v14759_v2 = vld [vmem:[%s17525_s14 + $0x174] ss:$8 sps:$4 sm:$0xff]   ;;  %10637 = vmatprep.subr.bf16.mxu0 %v14757_v1  ;;  %v14762_v4 = vld [vmem:[%s17525_s14 + $0x170] ss:$8 sps:$4 sm:$0xff]   ;;  %v14765_v6 = vld [vmem:[%s17525_s14 + $0x164] ss:$8 sps:$4 sm:$0xff]  }
  0x6a   : > { %10678 = vmatprep.subr.bf16.mxu1 %v14759_v2  ;;  %10638 = vmatpush1.bf16.msra.mxu0 %v14761_v3  ;;  %v14767_v7 = vld [vmem:[%s17525_s14 + $0x60] ss:$8 sps:$4 sm:$0xff]   ;;  %v14769_v9 = vld [vmem:[%s17525_s14 + $0x54] ss:$8 sps:$4 sm:$0xff]   ;;  %v14773_v11 = vld [vmem:[%s17525_s14 + $0x50] ss:$8 sps:$4 sm:$0xff]  }
  0x6b   : > { %10679 = vmatpush1.bf16.msra.mxu1 %v14762_v4  ;;  %10639 = vmatprep.subr.bf16.mxu0 %v14763_v5  ;;  %v14768_v8 = vld [vmem:[%s17525_s14 + $0x160] ss:$8 sps:$4 sm:$0xff]   ;;  %v14771_v10 = vld [vmem:[%s17525_s14 + $0x154] ss:$8 sps:$4 sm:$0xff]   ;;  %v14774_v12 = vld [vmem:[%s17525_s14 + $0x150] ss:$8 sps:$4 sm:$0xff]  }
  0x6c   : > { %10680 = vmatprep.subr.bf16.mxu1 %v14765_v6  ;;  %v14775_v13 = vld [vmem:[%s17525_s14 + $0x44] ss:$8 sps:$4 sm:$0xff]   ;;  %v14779_v15 = vld [vmem:[%s17525_s14 + $0x40] ss:$8 sps:$4 sm:$0xff]   ;;  %v14781_v17 = vld [vmem:[%s17525_s14 + $0x34] ss:$8 sps:$4 sm:$0xff]  }
  0x6d   : > { %v14777_v14 = vld [vmem:[%s17525_s14 + $0x144] ss:$8 sps:$4 sm:$0xff]   ;;  %v14780_v16 = vld [vmem:[%s17525_s14 + $0x140] ss:$8 sps:$4 sm:$0xff]   ;;  %v14783_v18 = vld [vmem:[%s17525_s14 + $0x134] ss:$8 sps:$4 sm:$0xff]  }
  0x6e   : > { %10640 = vmatpush1.bf16.msra.mxu0 %v14767_v7  ;;  %v14785_v19 = vld [vmem:[%s17525_s14 + $0x30] ss:$8 sps:$4 sm:$0xff]   ;;  %v14787_v21 = vld [vmem:[%s17525_s14 + $0x24] ss:$8 sps:$4 sm:$0xff]   ;;  %v14791_v23 = vld [vmem:[%s17525_s14 + $0x20] ss:$8 sps:$4 sm:$0xff]  }
  0x6f   : > { %10681 = vmatpush1.bf16.msra.mxu1 %v14768_v8  ;;  %10641 = vmatprep.subr.bf16.mxu0 %v14769_v9  ;;  %v14786_v20 = vld [vmem:[%s17525_s14 + $0x130] ss:$8 sps:$4 sm:$0xff]   ;;  %v14789_v22 = vld [vmem:[%s17525_s14 + $0x124] ss:$8 sps:$4 sm:$0xff]   ;;  %v14792_v24 = vld [vmem:[%s17525_s14 + $0x120] ss:$8 sps:$4 sm:$0xff]  }
  0x70   : > { %10682 = vmatprep.subr.bf16.mxu1 %v14771_v10  ;;  %v14793_v25 = vld [vmem:[%s17525_s14 + $0x14] ss:$8 sps:$4 sm:$0xff]   ;;  %v14797_v27 = vld [vmem:[%s17525_s14 + $0x10] ss:$8 sps:$4 sm:$0xff]   ;;  %v14799_v29 = vld [vmem:[%s17525_s14 + $0x4] ss:$8 sps:$4 sm:$0xff]  }
  0x71   : > { %v14795_v26 = vld [vmem:[%s17525_s14 + $0x114] ss:$8 sps:$4 sm:$0xff]   ;;  %v14798_v28 = vld [vmem:[%s17525_s14 + $0x110] ss:$8 sps:$4 sm:$0xff]   ;;  %v14801_v30 = vld [vmem:[%s17525_s14 + $0x104] ss:$8 sps:$4 sm:$0xff]  }
  0x72   : > { %10642 = vmatpush1.bf16.msra.mxu0 %v14773_v11  ;;  %v14803_v31 = vld [vmem:[%s17525_s14] ss:$8 sps:$4 sm:$0xff]   ;;  %v14805_v33 = vld [vmem:[%s17525_s14 + $0xf4] ss:$8 sps:$4 sm:$0xff]   ;;  %v14809_v35 = vld [vmem:[%s17525_s14 + $0xf0] ss:$8 sps:$4 sm:$0xff]  }
  0x73   : > { %10683 = vmatpush1.bf16.msra.mxu1 %v14774_v12  ;;  %10643 = vmatprep.subr.bf16.mxu0 %v14775_v13  ;;  %v14804_v32 = vld [vmem:[%s17525_s14 + $0x100] ss:$8 sps:$4 sm:$0xff]   ;;  %v14807_v34 = vld [vmem:[%s17525_s14 + $0x1f4] ss:$8 sps:$4 sm:$0xff]   ;;  %v14810_v36 = vld [vmem:[%s17525_s14 + $0x1f0] ss:$8 sps:$4 sm:$0xff]  }
  0x74   : > { %10684 = vmatprep.subr.bf16.mxu1 %v14777_v14  ;;  %v17372_v37 = vmov 1966171168   ;;  %v14811_v40 = vld [vmem:[%s17525_s14 + $0xe4] ss:$8 sps:$4 sm:$0xff]   ;;  %v14815_v42 = vld [vmem:[%s17525_s14 + $0xe0] ss:$8 sps:$4 sm:$0xff]  }
  0x75   : > { %v1927_v38 = vunpack.c.l.s4 %v17372_v37  ;;  %v14813_v41 = vld [vmem:[%s17525_s14 + $0x1e4] ss:$8 sps:$4 sm:$0xff]   ;;  %v17586_v44 = vshrl.u32 %v1929_v39, 7  ;;  %v14816_v45 = vld [vmem:[%s17525_s14 + $0x1e0] ss:$8 sps:$4 sm:$0xff]   ;;  %p14624_p2 = scmp.ne.s32.totalorder %s17424_s22, 7 }
  0x76   : > { %10644 = vmatpush1.bf16.msra.mxu0 %v14779_v15  ;;  %v14817_v46 = vld [vmem:[%s17525_s14 + $0xd4] ss:$8 sps:$4 sm:$0xff]   ;;  %v14821_v48 = vld [vmem:[%s17525_s14 + $0xd0] ss:$8 sps:$4 sm:$0xff]   ;;  %v14823_v51 = vld [vmem:[%s17525_s14 + $0xc4] ss:$8 sps:$4 sm:$0xff]  }
  0x77   : > { %10685 = vmatpush1.bf16.msra.mxu1 %v14780_v16  ;;  %10645 = vmatprep.subr.bf16.mxu0 %v14781_v17  ;;  %v1928_v43 = vunpack.c.0.s8 %v1927_v38  ;;  %v14819_v47 = vld [vmem:[%s17525_s14 + $0x1d4] ss:$8 sps:$4 sm:$0xff]   ;;  %v14822_v49 = vld [vmem:[%s17525_s14 + $0x1d0] ss:$8 sps:$4 sm:$0xff]   ;;  %v14825_v52 = vld [vmem:[%s17525_s14 + $0x1c4] ss:$8 sps:$4 sm:$0xff]  }
  0x78   : > { %10686 = vmatprep.subr.bf16.mxu1 %v14783_v18  ;;  %v299_v53 = vld [vmem:[%s17543_s23] sm:$0xff]  ;;  %v14833_v60 = vld [vmem:[%s17525_s14 + $0xb0] ss:$8 sps:$4 sm:$0xff]   ;;  %v14835_v63 = vld [vmem:[%s17525_s14 + $0xa4] ss:$8 sps:$4 sm:$0xff]  }
  0x79   : > { %v17594_v50 = vsub.s32 %v1928_v43, %v17586_v44  ;;  %v14827_v54 = vld [vmem:[%s17525_s14 + $0xc0] ss:$8 sps:$4 sm:$0xff]   ;;  %v14829_v57 = vld [vmem:[%s17525_s14 + $0xb4] ss:$8 sps:$4 sm:$0xff]   ;;  %v14834_v62 = vld [vmem:[%s17525_s14 + $0x1b0] ss:$8 sps:$4 sm:$0xff]   ;;  %v1925_v2 = vcombine.high %v299_v53, %v299_v53 }
  0x7a   : > { %10646 = vmatpush1.bf16.msra.mxu0 %v14785_v19  ;;  %v14828_v56 = vld [vmem:[%s17525_s14 + $0x1c0] ss:$8 sps:$4 sm:$0xff]   ;;  %v14831_v58 = vld [vmem:[%s17525_s14 + $0x1b4] ss:$8 sps:$4 sm:$0xff]   ;;  %v14837_v0 = vld [vmem:[%s17525_s14 + $0x1a4] ss:$8 sps:$4 sm:$0xff]  }
  0x7b   : > { %10687 = vmatpush1.bf16.msra.mxu1 %v14786_v20  ;;  %10647 = vmatprep.subr.bf16.mxu0 %v14787_v21  ;;  %v1932_v55 = vrot.slane %v299_v53, %v17594_v50  ;;  %v14839_v3 = vld [vmem:[%s17525_s14 + $0xa0] ss:$8 sps:$4 sm:$0xff]   ;;  %v14841_v5 = vld [vmem:[%s17525_s14 + $0x94] ss:$8 sps:$4 sm:$0xff]   ;;  %v17614_v7 = vrot.slane %v1925_v2, %v17594_v50  ;;  %v14845_v8 = vld [vmem:[%s17525_s14 + $0x90] ss:$8 sps:$4 sm:$0xff]  }
  0x7c   : > { %10688 = vmatprep.subr.bf16.mxu1 %v14789_v22  ;;  %v14840_v4 = vld [vmem:[%s17525_s14 + $0x1a0] ss:$8 sps:$4 sm:$0xff]   ;;  %v14843_v6 = vld [vmem:[%s17525_s14 + $0x194] ss:$8 sps:$4 sm:$0xff]   ;;  %v14846_v9 = vld [vmem:[%s17525_s14 + $0x190] ss:$8 sps:$4 sm:$0xff]  }
  0x7d   : > { %v1940_v59 = vcombine.high %v1932_v55, %v1932_v55  ;;  %v14847_v10 = vld [vmem:[%s17525_s14 + $0x84] ss:$8 sps:$4 sm:$0xff]   ;;  %v1941_v12 = vcombine.high %v17614_v7, %v17614_v7  ;;  %v14851_v13 = vld [vmem:[%s17525_s14 + $0x80] ss:$8 sps:$4 sm:$0xff]   ;;  %v1948_v14 = vrot.slane %v1932_v55, %v17594_v50  ;;  %v14856_v16 = vld [vmem:[%s17525_s14 + $0x274] ss:$8 sps:$4 sm:$0xff]  }
  0x7e   : > { %10648 = vmatpush1.bf16.msra.mxu0 %v14791_v23  ;;  %v14849_v11 = vld [vmem:[%s17525_s14 + $0x184] ss:$8 sps:$4 sm:$0xff]   ;;  %v14852_v15 = vld [vmem:[%s17525_s14 + $0x180] ss:$8 sps:$4 sm:$0xff]   ;;  %v14859_v17 = vld [vmem:[%s17525_s14 + $0x374] ss:$8 sps:$4 sm:$0xff]  }
  0x7f   : > { %10689 = vmatpush1.bf16.msra.mxu1 %v14792_v24  ;;  %10649 = vmatprep.subr.bf16.mxu0 %v14793_v25  ;;  %v1962_v61 = vrot.slane %v1940_v59, %v17594_v50  ;;  %v1969_v18 = vrot.slane %v1941_v12, %v17594_v50  ;;  %v1970_v19 = vcombine.high %v1948_v14, %v1948_v14  ;;  %v14854_v20 = vld [vmem:[%s17525_s14 + $0x270] ss:$8 sps:$4 sm:$0xff]   ;;  %v14862_v22 = vld [vmem:[%s17525_s14 + $0x264] ss:$8 sps:$4 sm:$0xff]   ;;  %v14860_v25 = vld [vmem:[%s17525_s14 + $0x260] ss:$8 sps:$4 sm:$0xff]  }
  0x80   : > { %10690 = vmatprep.subr.bf16.mxu1 %v14795_v26  ;;  %v14857_v21 = vld [vmem:[%s17525_s14 + $0x370] ss:$8 sps:$4 sm:$0xff]   ;;  %v14865_v23 = vld [vmem:[%s17525_s14 + $0x364] ss:$8 sps:$4 sm:$0xff]   ;;  %v14863_v26 = vld [vmem:[%s17525_s14 + $0x360] ss:$8 sps:$4 sm:$0xff]  }
  0x81   : > { %v1972_v1 = vcombine.high %v1962_v61, %v1962_v61  ;;  %10669 = vmatprep.mubr.bf16.mxu0 %v1962_v61  ;;  %v1973_v24 = vcombine.high %v1969_v18, %v1969_v18  ;;  %v14878_v37 = vld [vmem:[%s17525_s14 + $0x230] ss:$8 sps:$4 sm:$0xff]   ;;  %v14886_v39 = vld [vmem:[%s17525_s14 + $0x224] ss:$8 sps:$4 sm:$0xff]   ;;  %v14892_v43 = vld [vmem:[%s17525_s14 + $0x214] ss:$8 sps:$4 sm:$0xff]  }
  0x82   : > { %10650 = vmatpush1.bf16.msra.mxu0 %v14797_v27  ;;  %v14868_v27 = vld [vmem:[%s17525_s14 + $0x254] ss:$8 sps:$4 sm:$0xff]   ;;  %v14881_v38 = vld [vmem:[%s17525_s14 + $0x330] ss:$8 sps:$4 sm:$0xff]   ;;  %v14908_v59 = vld [vmem:[%s17525_s14 + $0x2e0] ss:$8 sps:$4 sm:$0xff]  }
  0x83   : > { %10691 = vmatpush1.bf16.msra.mxu1 %v14798_v28  ;;  %10651 = vmatprep.subr.bf16.mxu0 %v14799_v29  ;;  %v14871_v28 = vld [vmem:[%s17525_s14 + $0x354] ss:$8 sps:$4 sm:$0xff]   ;;  %v14866_v29 = vld [vmem:[%s17525_s14 + $0x250] ss:$8 sps:$4 sm:$0xff]   ;;  %v14925_v2 = vld [vmem:[%s17525_s14 + $0x3c4] ss:$8 sps:$4 sm:$0xff]  }
  0x84   : > { %10692 = vmatprep.subr.bf16.mxu1 %v14801_v30  ;;  %10710 = vmatprep.mubr.bf16.mxu1 %v1972_v1  ;;  %v14869_v30 = vld [vmem:[%s17525_s14 + $0x350] ss:$8 sps:$4 sm:$0xff]   ;;  %v14904_v53 = vld [vmem:[%s17525_s14 + $0x2f4] ss:$8 sps:$4 sm:$0xff]   ;;  %v14922_v1 = vld [vmem:[%s17525_s14 + $0x2c4] ss:$8 sps:$4 sm:$0xff]  }
  0x85   : > { %v14902_v55 = vld [vmem:[%s17525_s14 + $0x2f0] ss:$8 sps:$4 sm:$0xff]   ;;  %v14916_v61 = vld [vmem:[%s17525_s14 + $0x2d4] ss:$8 sps:$4 sm:$0xff]   ;;  %v14932_v12 = vld [vmem:[%s17525_s14 + $0x2a0] ss:$8 sps:$4 sm:$0xff]  }
  0x86   : > { %10652 = vmatpush1.bf16.msra.mxu0 %v14803_v31  ;;  %v14874_v31 = vld [vmem:[%s17525_s14 + $0x244] ss:$8 sps:$4 sm:$0xff]  }
  0x87   : > { %10693 = vmatpush1.bf16.msra.mxu1 %v14804_v32  ;;  %10653 = vmatprep.subr.bf16.mxu0 %v14805_v33  ;;  %v14877_v32 = vld [vmem:[%s17525_s14 + $0x344] ss:$8 sps:$4 sm:$0xff]   ;;  %v14872_v33 = vld [vmem:[%s17525_s14 + $0x240] ss:$8 sps:$4 sm:$0xff]  }
  0x88   : > { %10694 = vmatprep.subr.bf16.mxu1 %v14807_v34  ;;  %v14875_v34 = vld [vmem:[%s17525_s14 + $0x340] ss:$8 sps:$4 sm:$0xff]  }
  0x8a   : > { %10654 = vmatpush2.bf16.msra.mxu0 %v14809_v35  ;;  %v14880_v35 = vld [vmem:[%s17525_s14 + $0x234] ss:$8 sps:$4 sm:$0xff]  }
  0x8b   : > { %10695 = vmatpush2.bf16.msra.mxu1 %v14810_v36  ;;  %10655 = vmatprep.subr.bf16.mxu0 %v14811_v40  ;;  %v14883_v36 = vld [vmem:[%s17525_s14 + $0x334] ss:$8 sps:$4 sm:$0xff]   ;;  %v14889_v40 = vld [vmem:[%s17525_s14 + $0x324] ss:$8 sps:$4 sm:$0xff]  }
  0x8c   : > { %10696 = vmatprep.subr.bf16.mxu1 %v14813_v41  ;;  %v14884_v41 = vld [vmem:[%s17525_s14 + $0x220] ss:$8 sps:$4 sm:$0xff]  }
  0x8e   : > { %10656 = vmatpush2.bf16.msra.mxu0 %v14815_v42  ;;  %v14887_v42 = vld [vmem:[%s17525_s14 + $0x320] ss:$8 sps:$4 sm:$0xff]  }
  0x8f   : > { %10697 = vmatpush2.bf16.msra.mxu1 %v14816_v45  ;;  %10657 = vmatprep.subr.bf16.mxu0 %v14817_v46  ;;  %v14895_v45 = vld [vmem:[%s17525_s14 + $0x314] ss:$8 sps:$4 sm:$0xff]   ;;  %v14890_v46 = vld [vmem:[%s17525_s14 + $0x210] ss:$8 sps:$4 sm:$0xff]  }
  0x90   : > { %10698 = vmatprep.subr.bf16.mxu1 %v14819_v47  ;;  %v14893_v47 = vld [vmem:[%s17525_s14 + $0x310] ss:$8 sps:$4 sm:$0xff]  }
  0x92   : > { %10658 = vmatpush2.bf16.msra.mxu0 %v14821_v48  ;;  %v14898_v48 = vld [vmem:[%s17525_s14 + $0x204] ss:$8 sps:$4 sm:$0xff]  }
  0x93   : > { %10699 = vmatpush2.bf16.msra.mxu1 %v14822_v49  ;;  %10659 = vmatprep.subr.bf16.mxu0 %v14823_v51  ;;  %v14901_v49 = vld [vmem:[%s17525_s14 + $0x304] ss:$8 sps:$4 sm:$0xff]   ;;  %v14896_v51 = vld [vmem:[%s17525_s14 + $0x200] ss:$8 sps:$4 sm:$0xff]  }
  0x94   : > { %10700 = vmatprep.subr.bf16.mxu1 %v14825_v52  ;;  %v14899_v52 = vld [vmem:[%s17525_s14 + $0x300] ss:$8 sps:$4 sm:$0xff]  }
  0x96   : > { %10660 = vmatpush2.bf16.msra.mxu0 %v14827_v54  ;;  %v14907_v54 = vld [vmem:[%s17525_s14 + $0x3f4] ss:$8 sps:$4 sm:$0xff]  }
  0x97   : > { %10701 = vmatpush2.bf16.msra.mxu1 %v14828_v56  ;;  %10661 = vmatprep.subr.bf16.mxu0 %v14829_v57  ;;  %v14905_v56 = vld [vmem:[%s17525_s14 + $0x3f0] ss:$8 sps:$4 sm:$0xff]   ;;  %v14910_v57 = vld [vmem:[%s17525_s14 + $0x2e4] ss:$8 sps:$4 sm:$0xff]  }
  0x98   : > { %10702 = vmatprep.subr.bf16.mxu1 %v14831_v58  ;;  %v14913_v58 = vld [vmem:[%s17525_s14 + $0x3e4] ss:$8 sps:$4 sm:$0xff]  }
  0x9a   : > { %10662 = vmatpush2.bf16.msra.mxu0 %v14833_v60  ;;  %v14911_v60 = vld [vmem:[%s17525_s14 + $0x3e0] ss:$8 sps:$4 sm:$0xff]  }
  0x9b   : > { %10703 = vmatpush2.bf16.msra.mxu1 %v14834_v62  ;;  %10663 = vmatprep.subr.bf16.mxu0 %v14835_v63  ;;  %v14919_v62 = vld [vmem:[%s17525_s14 + $0x3d4] ss:$8 sps:$4 sm:$0xff]   ;;  %v14914_v63 = vld [vmem:[%s17525_s14 + $0x2d0] ss:$8 sps:$4 sm:$0xff]  }
  0x9c   : > { %10704 = vmatprep.subr.bf16.mxu1 %v14837_v0  ;;  %v14917_v0 = vld [vmem:[%s17525_s14 + $0x3d0] ss:$8 sps:$4 sm:$0xff]  }
  0x9e   : > { %10664 = vmatpush2.bf16.msra.mxu0 %v14839_v3  ;;  %v14920_v3 = vld [vmem:[%s17525_s14 + $0x2c0] ss:$8 sps:$4 sm:$0xff]  }
  0x9f   : > { %10705 = vmatpush2.bf16.msra.mxu1 %v14840_v4  ;;  %10665 = vmatprep.subr.bf16.mxu0 %v14841_v5  ;;  %v14923_v4 = vld [vmem:[%s17525_s14 + $0x3c0] ss:$8 sps:$4 sm:$0xff]   ;;  %v14928_v5 = vld [vmem:[%s17525_s14 + $0x2b4] ss:$8 sps:$4 sm:$0xff]  }
  0xa0   : > { %10706 = vmatprep.subr.bf16.mxu1 %v14843_v6  ;;  %v14931_v6 = vld [vmem:[%s17525_s14 + $0x3b4] ss:$8 sps:$4 sm:$0xff]  }
  0xa2   : > { %10666 = vmatpush2.bf16.msra.mxu0 %v14845_v8  ;;  %v14926_v8 = vld [vmem:[%s17525_s14 + $0x2b0] ss:$8 sps:$4 sm:$0xff]  }
  0xa3   : > { %10707 = vmatpush2.bf16.msra.mxu1 %v14846_v9  ;;  %10667 = vmatprep.subr.bf16.mxu0 %v14847_v10  ;;  %v14929_v9 = vld [vmem:[%s17525_s14 + $0x3b0] ss:$8 sps:$4 sm:$0xff]   ;;  %v14934_v10 = vld [vmem:[%s17525_s14 + $0x2a4] ss:$8 sps:$4 sm:$0xff]  }
  0xa4   : > { %10708 = vmatprep.subr.bf16.mxu1 %v14849_v11  ;;  %v14937_v11 = vld [vmem:[%s17525_s14 + $0x3a4] ss:$8 sps:$4 sm:$0xff]  }
  0xa6   : > { %10668 = vmatpush2.bf16.msra.mxu0 %v14851_v13  ;;  %v14935_v13 = vld [vmem:[%s17525_s14 + $0x3a0] ss:$8 sps:$4 sm:$0xff]  }
  0xa7   : > { %10709 = vmatpush2.bf16.msra.mxu1 %v14852_v15  ;;  %10719 = vmatprep.subr.bf16.mxu0 %v14856_v16  ;;  %v14943_v15 = vld [vmem:[%s17525_s14 + $0x394] ss:$8 sps:$4 sm:$0xff]   ;;  %v14938_v16 = vld [vmem:[%s17525_s14 + $0x290] ss:$8 sps:$4 sm:$0xff]  }
  0xa8   : > { %10760 = vmatprep.subr.bf16.mxu1 %v14859_v17  ;;  %v14941_v17 = vld [vmem:[%s17525_s14 + $0x390] ss:$8 sps:$4 sm:$0xff]  }
  0xa9   : > { %10670 = vmatmul.mubr.bf16.vlgmr.msra.gmra.mxu0 %v1948_v14  ;;  %v14940_v14 = vld [vmem:[%s17525_s14 + $0x294] ss:$8 sps:$4 sm:$0xff]  }
  0xaa   : > { %10711 = vmatmul.mubr.bf16.vlgmr.msra.gmra.mxu1 %v1970_v19  ;;  %10720 = vmatpush1.bf16.msra.mxu0 %v14854_v20  ;;  %v14949_v19 = vld [vmem:[%s17525_s14 + $0x384] ss:$8 sps:$4 sm:$0xff]   ;;  %v14944_v20 = vld [vmem:[%s17525_s14 + $0x280] ss:$8 sps:$4 sm:$0xff]  }
  0xab   : > { %10761 = vmatpush1.bf16.msra.mxu1 %v14857_v21  ;;  %10721 = vmatprep.subr.bf16.mxu0 %v14862_v22  ;;  %v1955_v21 = vrot.slane %v17614_v7, %v17594_v50  ;;  %v14947_v22 = vld [vmem:[%s17525_s14 + $0x380] ss:$8 sps:$4 sm:$0xff]   ;;  %v14958_v7 = vld [vmem:[%s17525_s14 + $0x464] ss:$8 sps:$4 sm:$0xff]  }
  0xac   : > { %10762 = vmatprep.subr.bf16.mxu1 %v14865_v23  ;;  %10751 = vmatprep.mubr.bf16.mxu0 %v1969_v18  ;;  %v14946_v18 = vld [vmem:[%s17525_s14 + $0x284] ss:$8 sps:$4 sm:$0xff]   ;;  %v14952_v23 = vld [vmem:[%s17525_s14 + $0x474] ss:$8 sps:$4 sm:$0xff]  }
  0xad   : > { %10792 = vmatprep.mubr.bf16.mxu1 %v1973_v24  ;;  %v14955_v24 = vld [vmem:[%s17525_s14 + $0x574] ss:$8 sps:$4 sm:$0xff]  }
  0xae   : > { %10722 = vmatpush1.bf16.msra.mxu0 %v14860_v25  ;;  %v1971_v25 = vcombine.high %v1955_v21, %v1955_v21 }
  0xaf   : > { %10763 = vmatpush1.bf16.msra.mxu1 %v14863_v26  ;;  %10723 = vmatprep.subr.bf16.mxu0 %v14868_v27  ;;  %v14950_v26 = vld [vmem:[%s17525_s14 + $0x470] ss:$8 sps:$4 sm:$0xff]  }
  0xb0   : > { %10764 = vmatprep.subr.bf16.mxu1 %v14871_v28  ;;  %v14953_v27 = vld [vmem:[%s17525_s14 + $0x570] ss:$8 sps:$4 sm:$0xff]   ;;  %v17697_v28 = vld [vmem:[%s17543_s23 + $0x8] sm:$0xff] }
  0xb2   : > { %10724 = vmatpush1.bf16.msra.mxu0 %v14866_v29  ;;  %v14961_v29 = vld [vmem:[%s17525_s14 + $0x564] ss:$8 sps:$4 sm:$0xff]  }
  0xb3   : > { %10765 = vmatpush1.bf16.msra.mxu1 %v14869_v30  ;;  %10725 = vmatprep.subr.bf16.mxu0 %v14874_v31  ;;  %v17703_v30 = vrot.slane %v17697_v28, %v17594_v50 }
  0xb4   : > { %10766 = vmatprep.subr.bf16.mxu1 %v14877_v32  ;;  %v14956_v32 = vld [vmem:[%s17525_s14 + $0x460] ss:$8 sps:$4 sm:$0xff]  }
  0xb5   : > { %v1989_v31 = vcombine.high %v17703_v30, %v17703_v30 }
  0xb6   : > { %10726 = vmatpush1.bf16.msra.mxu0 %v14872_v33  ;;  %v14959_v33 = vld [vmem:[%s17525_s14 + $0x560] ss:$8 sps:$4 sm:$0xff]  }
  0xb7   : > { %10767 = vmatpush1.bf16.msra.mxu1 %v14875_v34  ;;  %10727 = vmatprep.subr.bf16.mxu0 %v14880_v35  ;;  %v14964_v34 = vld [vmem:[%s17525_s14 + $0x454] ss:$8 sps:$4 sm:$0xff]  }
  0xb8   : > { %10768 = vmatprep.subr.bf16.mxu1 %v14883_v36  ;;  %v14967_v35 = vld [vmem:[%s17525_s14 + $0x554] ss:$8 sps:$4 sm:$0xff]   ;;  %v2011_v36 = vrot.slane %v1989_v31, %v17594_v50 }
  0xba   : > { %10728 = vmatpush1.bf16.msra.mxu0 %v14878_v37  ;;  %v2021_v37 = vcombine.high %v2011_v36, %v2011_v36 }
  0xbb   : > { %10769 = vmatpush1.bf16.msra.mxu1 %v14881_v38  ;;  %10729 = vmatprep.subr.bf16.mxu0 %v14886_v39  ;;  %v14962_v38 = vld [vmem:[%s17525_s14 + $0x450] ss:$8 sps:$4 sm:$0xff]  }
  0xbc   : > { %10770 = vmatprep.subr.bf16.mxu1 %v14889_v40  ;;  %v14965_v39 = vld [vmem:[%s17525_s14 + $0x550] ss:$8 sps:$4 sm:$0xff]   ;;  %v14970_v40 = vld [vmem:[%s17525_s14 + $0x444] ss:$8 sps:$4 sm:$0xff]  }
  0xbe   : > { %10730 = vmatpush1.bf16.msra.mxu0 %v14884_v41  ;;  %v14973_v41 = vld [vmem:[%s17525_s14 + $0x544] ss:$8 sps:$4 sm:$0xff]  }
  0xbf   : > { %10771 = vmatpush1.bf16.msra.mxu1 %v14887_v42  ;;  %10731 = vmatprep.subr.bf16.mxu0 %v14892_v43  ;;  %v14968_v42 = vld [vmem:[%s17525_s14 + $0x440] ss:$8 sps:$4 sm:$0xff]  }
  0xc0   : > { %10772 = vmatprep.subr.bf16.mxu1 %v14895_v45  ;;  %v14971_v43 = vld [vmem:[%s17525_s14 + $0x540] ss:$8 sps:$4 sm:$0xff]   ;;  %v14976_v45 = vld [vmem:[%s17525_s14 + $0x434] ss:$8 sps:$4 sm:$0xff]  }
  0xc2   : > { %10732 = vmatpush1.bf16.msra.mxu0 %v14890_v46  ;;  %v14979_v46 = vld [vmem:[%s17525_s14 + $0x534] ss:$8 sps:$4 sm:$0xff]  }
  0xc3   : > { %10773 = vmatpush1.bf16.msra.mxu1 %v14893_v47  ;;  %10733 = vmatprep.subr.bf16.mxu0 %v14898_v48  ;;  %v14974_v47 = vld [vmem:[%s17525_s14 + $0x430] ss:$8 sps:$4 sm:$0xff]  }
  0xc4   : > { %10774 = vmatprep.subr.bf16.mxu1 %v14901_v49  ;;  %v14977_v48 = vld [vmem:[%s17525_s14 + $0x530] ss:$8 sps:$4 sm:$0xff]   ;;  %v14982_v49 = vld [vmem:[%s17525_s14 + $0x424] ss:$8 sps:$4 sm:$0xff]  }
  0xc6   : > { %10734 = vmatpush1.bf16.msra.mxu0 %v14896_v51  ;;  %v14985_v51 = vld [vmem:[%s17525_s14 + $0x524] ss:$8 sps:$4 sm:$0xff]  }
  0xc7   : > { %10775 = vmatpush1.bf16.msra.mxu1 %v14899_v52  ;;  %10735 = vmatprep.subr.bf16.mxu0 %v14904_v53  ;;  %v14980_v52 = vld [vmem:[%s17525_s14 + $0x420] ss:$8 sps:$4 sm:$0xff]  }
  0xc8   : > { %10776 = vmatprep.subr.bf16.mxu1 %v14907_v54  ;;  %v14983_v53 = vld [vmem:[%s17525_s14 + $0x520] ss:$8 sps:$4 sm:$0xff]   ;;  %v14988_v54 = vld [vmem:[%s17525_s14 + $0x414] ss:$8 sps:$4 sm:$0xff]  }
  0xca   : > { %10736 = vmatpush2.bf16.msra.mxu0 %v14902_v55  ;;  %v14991_v55 = vld [vmem:[%s17525_s14 + $0x514] ss:$8 sps:$4 sm:$0xff]  }
  0xcb   : > { %10777 = vmatpush2.bf16.msra.mxu1 %v14905_v56  ;;  %10737 = vmatprep.subr.bf16.mxu0 %v14910_v57  ;;  %v14986_v56 = vld [vmem:[%s17525_s14 + $0x410] ss:$8 sps:$4 sm:$0xff]  }
  0xcc   : > { %10778 = vmatprep.subr.bf16.mxu1 %v14913_v58  ;;  %v14989_v57 = vld [vmem:[%s17525_s14 + $0x510] ss:$8 sps:$4 sm:$0xff]   ;;  %v14994_v58 = vld [vmem:[%s17525_s14 + $0x404] ss:$8 sps:$4 sm:$0xff]  }
  0xce   : > { %10738 = vmatpush2.bf16.msra.mxu0 %v14908_v59  ;;  %v14997_v59 = vld [vmem:[%s17525_s14 + $0x504] ss:$8 sps:$4 sm:$0xff]  }
  0xcf   : > { %10779 = vmatpush2.bf16.msra.mxu1 %v14911_v60  ;;  %10739 = vmatprep.subr.bf16.mxu0 %v14916_v61  ;;  %v14992_v60 = vld [vmem:[%s17525_s14 + $0x400] ss:$8 sps:$4 sm:$0xff]  }
  0xd0   : > { %10780 = vmatprep.subr.bf16.mxu1 %v14919_v62  ;;  %v14995_v61 = vld [vmem:[%s17525_s14 + $0x500] ss:$8 sps:$4 sm:$0xff]   ;;  %v15000_v62 = vld [vmem:[%s17525_s14 + $0x4f4] ss:$8 sps:$4 sm:$0xff]  }
  0xd2   : > { %10740 = vmatpush2.bf16.msra.mxu0 %v14914_v63  ;;  %v15003_v63 = vld [vmem:[%s17525_s14 + $0x5f4] ss:$8 sps:$4 sm:$0xff]  }
  0xd3   : > { %10781 = vmatpush2.bf16.msra.mxu1 %v14917_v0  ;;  %10741 = vmatprep.subr.bf16.mxu0 %v14922_v1  ;;  %v14998_v0 = vld [vmem:[%s17525_s14 + $0x4f0] ss:$8 sps:$4 sm:$0xff]  }
  0xd4   : > { %10782 = vmatprep.subr.bf16.mxu1 %v14925_v2  ;;  %v15001_v1 = vld [vmem:[%s17525_s14 + $0x5f0] ss:$8 sps:$4 sm:$0xff]   ;;  %v15006_v2 = vld [vmem:[%s17525_s14 + $0x4e4] ss:$8 sps:$4 sm:$0xff]  }
  0xd6   : > { %10742 = vmatpush2.bf16.msra.mxu0 %v14920_v3  ;;  %v15009_v3 = vld [vmem:[%s17525_s14 + $0x5e4] ss:$8 sps:$4 sm:$0xff]  }
  0xd7   : > { %10783 = vmatpush2.bf16.msra.mxu1 %v14923_v4  ;;  %10743 = vmatprep.subr.bf16.mxu0 %v14928_v5  ;;  %v15004_v4 = vld [vmem:[%s17525_s14 + $0x4e0] ss:$8 sps:$4 sm:$0xff]  }
  0xd8   : > { %10784 = vmatprep.subr.bf16.mxu1 %v14931_v6  ;;  %v15007_v5 = vld [vmem:[%s17525_s14 + $0x5e0] ss:$8 sps:$4 sm:$0xff]   ;;  %v15012_v6 = vld [vmem:[%s17525_s14 + $0x4d4] ss:$8 sps:$4 sm:$0xff]  }
  0xda   : > { %10744 = vmatpush2.bf16.msra.mxu0 %v14926_v8  ;;  %v15015_v8 = vld [vmem:[%s17525_s14 + $0x5d4] ss:$8 sps:$4 sm:$0xff]  }
  0xdb   : > { %10785 = vmatpush2.bf16.msra.mxu1 %v14929_v9  ;;  %10745 = vmatprep.subr.bf16.mxu0 %v14934_v10  ;;  %v15010_v9 = vld [vmem:[%s17525_s14 + $0x4d0] ss:$8 sps:$4 sm:$0xff]  }
  0xdc   : > { %10786 = vmatprep.subr.bf16.mxu1 %v14937_v11  ;;  %v15013_v10 = vld [vmem:[%s17525_s14 + $0x5d0] ss:$8 sps:$4 sm:$0xff]   ;;  %v15018_v11 = vld [vmem:[%s17525_s14 + $0x4c4] ss:$8 sps:$4 sm:$0xff]  }
  0xde   : > { %10746 = vmatpush2.bf16.msra.mxu0 %v14932_v12  ;;  %v15021_v12 = vld [vmem:[%s17525_s14 + $0x5c4] ss:$8 sps:$4 sm:$0xff]  }
  0xdf   : > { %10787 = vmatpush2.bf16.msra.mxu1 %v14935_v13  ;;  %10747 = vmatprep.subr.bf16.mxu0 %v14940_v14  ;;  %v15016_v13 = vld [vmem:[%s17525_s14 + $0x4c0] ss:$8 sps:$4 sm:$0xff]  }
  0xe0   : > { %10788 = vmatprep.subr.bf16.mxu1 %v14943_v15  ;;  %v15019_v14 = vld [vmem:[%s17525_s14 + $0x5c0] ss:$8 sps:$4 sm:$0xff]   ;;  %v15024_v15 = vld [vmem:[%s17525_s14 + $0x4b4] ss:$8 sps:$4 sm:$0xff]  }
  0xe2   : > { %10748 = vmatpush2.bf16.msra.mxu0 %v14938_v16  ;;  %v15027_v16 = vld [vmem:[%s17525_s14 + $0x5b4] ss:$8 sps:$4 sm:$0xff]  }
  0xe3   : > { %10789 = vmatpush2.bf16.msra.mxu1 %v14941_v17  ;;  %10749 = vmatprep.subr.bf16.mxu0 %v14946_v18  ;;  %v15022_v17 = vld [vmem:[%s17525_s14 + $0x4b0] ss:$8 sps:$4 sm:$0xff]  }
  0xe4   : > { %10790 = vmatprep.subr.bf16.mxu1 %v14949_v19  ;;  %v15025_v18 = vld [vmem:[%s17525_s14 + $0x5b0] ss:$8 sps:$4 sm:$0xff]   ;;  %v15030_v19 = vld [vmem:[%s17525_s14 + $0x4a4] ss:$8 sps:$4 sm:$0xff]  }
  0xe6   : > { %10750 = vmatpush2.bf16.msra.mxu0 %v14944_v20  ;;  %v15033_v20 = vld [vmem:[%s17525_s14 + $0x5a4] ss:$8 sps:$4 sm:$0xff]  }
  0xe7   : > { %10791 = vmatpush2.bf16.msra.mxu1 %v14947_v22  ;;  %10801 = vmatprep.subr.bf16.mxu0 %v14952_v23  ;;  %v15028_v22 = vld [vmem:[%s17525_s14 + $0x4a0] ss:$8 sps:$4 sm:$0xff]  }
  0xe8   : > { %10842 = vmatprep.subr.bf16.mxu1 %v14955_v24  ;;  %v15031_v23 = vld [vmem:[%s17525_s14 + $0x5a0] ss:$8 sps:$4 sm:$0xff]   ;;  %v15036_v24 = vld [vmem:[%s17525_s14 + $0x494] ss:$8 sps:$4 sm:$0xff]  }
  0xe9   : > { %10752 = vmatmul.mubr.bf16.vlgmr.msra.gmra.mxu0 %v1955_v21  ;;  %v1974_v21 = vcombine.high %v17697_v28, %v17697_v28  ;;  %v15037_v28 = vld [vmem:[%s17525_s14 + $0x590] ss:$8 sps:$4 sm:$0xff]  }
  0xea   : > { %10793 = vmatmul.mubr.bf16.vlgmr.msra.gmra.mxu1 %v1971_v25  ;;  %10802 = vmatpush1.bf16.msra.mxu0 %v14950_v26  ;;  %v15039_v25 = vld [vmem:[%s17525_s14 + $0x594] ss:$8 sps:$4 sm:$0xff]  }
  0xeb   : > { %10843 = vmatpush1.bf16.msra.mxu1 %v14953_v27  ;;  %10803 = vmatprep.subr.bf16.mxu0 %v14958_v7  ;;  %v17763_v26 = vrot.slane %v1974_v21, %v17594_v50  ;;  %v15034_v27 = vld [vmem:[%s17525_s14 + $0x490] ss:$8 sps:$4 sm:$0xff]   ;;  %v15042_v7 = vld [vmem:[%s17525_s14 + $0x484] ss:$8 sps:$4 sm:$0xff]  }
  0xec   : > { %10844 = vmatprep.subr.bf16.mxu1 %v14961_v29  ;;  %10833 = vmatprep.mubr.bf16.mxu0 %v2011_v36  ;;  %v15045_v29 = vld [vmem:[%s17525_s14 + $0x584] ss:$8 sps:$4 sm:$0xff]   ;;  %v15051_v36 = vld [vmem:[%s17525_s14 + $0x774] ss:$8 sps:$4 sm:$0xff]  }
  0xed   : > { %10874 = vmatprep.mubr.bf16.mxu1 %v2021_v37  ;;  %v1990_v31 = vcombine.high %v17763_v26, %v17763_v26  ;;  %v15117_v21 = vld [vmem:[%s17525_s14 + $0x7c4] ss:$8 sps:$4 sm:$0xff]  }
  0xee   : > { %10804 = vmatpush1.bf16.msra.mxu0 %v14956_v32  ;;  %v1997_v32 = vrot.slane %v17703_v30, %v17594_v50  ;;  %v15049_v30 = vld [vmem:[%s17525_s14 + $0x770] ss:$8 sps:$4 sm:$0xff]  }
  0xef   : > { %10845 = vmatpush1.bf16.msra.mxu1 %v14959_v33  ;;  %10805 = vmatprep.subr.bf16.mxu0 %v14964_v34  ;;  %v15040_v33 = vld [vmem:[%s17525_s14 + $0x480] ss:$8 sps:$4 sm:$0xff]   ;;  %v2018_v37 = vrot.slane %v1990_v31, %v17594_v50 }
  0xf0   : > { %10846 = vmatprep.subr.bf16.mxu1 %v14967_v35  ;;  %v15043_v34 = vld [vmem:[%s17525_s14 + $0x580] ss:$8 sps:$4 sm:$0xff]   ;;  %v15048_v35 = vld [vmem:[%s17525_s14 + $0x674] ss:$8 sps:$4 sm:$0xff]  }
  0xf1   : > { %v15124_v31 = vld [vmem:[%s17525_s14 + $0x6a0] ss:$8 sps:$4 sm:$0xff]  }
  0xf2   : > { %10806 = vmatpush1.bf16.msra.mxu0 %v14962_v38  ;;  %v2019_v38 = vcombine.high %v1997_v32, %v1997_v32 }
  0xf3   : > { %10847 = vmatpush1.bf16.msra.mxu1 %v14965_v39  ;;  %10807 = vmatprep.subr.bf16.mxu0 %v14970_v40  ;;  %v15046_v39 = vld [vmem:[%s17525_s14 + $0x670] ss:$8 sps:$4 sm:$0xff]   ;;  %v15054_v40 = vld [vmem:[%s17525_s14 + $0x664] ss:$8 sps:$4 sm:$0xff]  }
  0xf4   : > { %10848 = vmatprep.subr.bf16.mxu1 %v14973_v41  ;;  %v15057_v41 = vld [vmem:[%s17525_s14 + $0x764] ss:$8 sps:$4 sm:$0xff]  }
  0xf6   : > { %10808 = vmatpush1.bf16.msra.mxu0 %v14968_v42  ;;  %v2022_v42 = vcombine.high %v2018_v37, %v2018_v37 }
  0xf7   : > { %10849 = vmatpush1.bf16.msra.mxu1 %v14971_v43  ;;  %10809 = vmatprep.subr.bf16.mxu0 %v14976_v45  ;;  %v15052_v43 = vld [vmem:[%s17525_s14 + $0x660] ss:$8 sps:$4 sm:$0xff]  }
  0xf8   : > { %10850 = vmatprep.subr.bf16.mxu1 %v14979_v46  ;;  %v15055_v45 = vld [vmem:[%s17525_s14 + $0x760] ss:$8 sps:$4 sm:$0xff]   ;;  %v15060_v46 = vld [vmem:[%s17525_s14 + $0x654] ss:$8 sps:$4 sm:$0xff]  }
  0xfa   : > { %10810 = vmatpush1.bf16.msra.mxu0 %v14974_v47  ;;  %v15063_v47 = vld [vmem:[%s17525_s14 + $0x754] ss:$8 sps:$4 sm:$0xff]  }
  0xfb   : > { %10851 = vmatpush1.bf16.msra.mxu1 %v14977_v48  ;;  %10811 = vmatprep.subr.bf16.mxu0 %v14982_v49  ;;  %v15058_v48 = vld [vmem:[%s17525_s14 + $0x650] ss:$8 sps:$4 sm:$0xff]  }
  0xfc   : > { %10852 = vmatprep.subr.bf16.mxu1 %v14985_v51  ;;  %v15061_v49 = vld [vmem:[%s17525_s14 + $0x750] ss:$8 sps:$4 sm:$0xff]   ;;  %v15066_v51 = vld [vmem:[%s17525_s14 + $0x644] ss:$8 sps:$4 sm:$0xff]  }
  0xfe   : > { %10812 = vmatpush1.bf16.msra.mxu0 %v14980_v52  ;;  %v15069_v52 = vld [vmem:[%s17525_s14 + $0x744] ss:$8 sps:$4 sm:$0xff]  }
  0xff   : > { %10853 = vmatpush1.bf16.msra.mxu1 %v14983_v53  ;;  %10813 = vmatprep.subr.bf16.mxu0 %v14988_v54  ;;  %v15064_v53 = vld [vmem:[%s17525_s14 + $0x640] ss:$8 sps:$4 sm:$0xff]  }
 0x100   : > { %10854 = vmatprep.subr.bf16.mxu1 %v14991_v55  ;;  %v15067_v54 = vld [vmem:[%s17525_s14 + $0x740] ss:$8 sps:$4 sm:$0xff]   ;;  %v15072_v55 = vld [vmem:[%s17525_s14 + $0x634] ss:$8 sps:$4 sm:$0xff]  }
 0x102   : > { %10814 = vmatpush1.bf16.msra.mxu0 %v14986_v56  ;;  %v15075_v56 = vld [vmem:[%s17525_s14 + $0x734] ss:$8 sps:$4 sm:$0xff]  }
 0x103   : > { %10855 = vmatpush1.bf16.msra.mxu1 %v14989_v57  ;;  %10815 = vmatprep.subr.bf16.mxu0 %v14994_v58  ;;  %v15070_v57 = vld [vmem:[%s17525_s14 + $0x630] ss:$8 sps:$4 sm:$0xff]  }
 0x104   : > { %10856 = vmatprep.subr.bf16.mxu1 %v14997_v59  ;;  %v15073_v58 = vld [vmem:[%s17525_s14 + $0x730] ss:$8 sps:$4 sm:$0xff]   ;;  %v15078_v59 = vld [vmem:[%s17525_s14 + $0x624] ss:$8 sps:$4 sm:$0xff]  }
 0x106   : > { %10816 = vmatpush1.bf16.msra.mxu0 %v14992_v60  ;;  %v15081_v60 = vld [vmem:[%s17525_s14 + $0x724] ss:$8 sps:$4 sm:$0xff]  }
 0x107   : > { %10857 = vmatpush1.bf16.msra.mxu1 %v14995_v61  ;;  %10817 = vmatprep.subr.bf16.mxu0 %v15000_v62  ;;  %v15076_v61 = vld [vmem:[%s17525_s14 + $0x620] ss:$8 sps:$4 sm:$0xff]  }
 0x108   : > { %10858 = vmatprep.subr.bf16.mxu1 %v15003_v63  ;;  %v15079_v62 = vld [vmem:[%s17525_s14 + $0x720] ss:$8 sps:$4 sm:$0xff]   ;;  %v15084_v63 = vld [vmem:[%s17525_s14 + $0x614] ss:$8 sps:$4 sm:$0xff]  }
 0x10a   : > { %10818 = vmatpush2.bf16.msra.mxu0 %v14998_v0  ;;  %v15087_v0 = vld [vmem:[%s17525_s14 + $0x714] ss:$8 sps:$4 sm:$0xff]  }
 0x10b   : > { %10859 = vmatpush2.bf16.msra.mxu1 %v15001_v1  ;;  %10819 = vmatprep.subr.bf16.mxu0 %v15006_v2  ;;  %v15082_v1 = vld [vmem:[%s17525_s14 + $0x610] ss:$8 sps:$4 sm:$0xff]  }
 0x10c   : > { %10860 = vmatprep.subr.bf16.mxu1 %v15009_v3  ;;  %v15085_v2 = vld [vmem:[%s17525_s14 + $0x710] ss:$8 sps:$4 sm:$0xff]   ;;  %v15090_v3 = vld [vmem:[%s17525_s14 + $0x604] ss:$8 sps:$4 sm:$0xff]  }
 0x10e   : > { %10820 = vmatpush2.bf16.msra.mxu0 %v15004_v4  ;;  %v15093_v4 = vld [vmem:[%s17525_s14 + $0x704] ss:$8 sps:$4 sm:$0xff]  }
 0x10f   : > { %10861 = vmatpush2.bf16.msra.mxu1 %v15007_v5  ;;  %10821 = vmatprep.subr.bf16.mxu0 %v15012_v6  ;;  %v15088_v5 = vld [vmem:[%s17525_s14 + $0x600] ss:$8 sps:$4 sm:$0xff]  }
 0x110   : > { %10862 = vmatprep.subr.bf16.mxu1 %v15015_v8  ;;  %v15091_v6 = vld [vmem:[%s17525_s14 + $0x700] ss:$8 sps:$4 sm:$0xff]   ;;  %v15096_v8 = vld [vmem:[%s17525_s14 + $0x6f4] ss:$8 sps:$4 sm:$0xff]  }
 0x112   : > { %10822 = vmatpush2.bf16.msra.mxu0 %v15010_v9  ;;  %v15099_v9 = vld [vmem:[%s17525_s14 + $0x7f4] ss:$8 sps:$4 sm:$0xff]  }
 0x113   : > { %10863 = vmatpush2.bf16.msra.mxu1 %v15013_v10  ;;  %10823 = vmatprep.subr.bf16.mxu0 %v15018_v11  ;;  %v15094_v10 = vld [vmem:[%s17525_s14 + $0x6f0] ss:$8 sps:$4 sm:$0xff]  }
 0x114   : > { %10864 = vmatprep.subr.bf16.mxu1 %v15021_v12  ;;  %v15097_v11 = vld [vmem:[%s17525_s14 + $0x7f0] ss:$8 sps:$4 sm:$0xff]   ;;  %v15102_v12 = vld [vmem:[%s17525_s14 + $0x6e4] ss:$8 sps:$4 sm:$0xff]  }
 0x116   : > { %10824 = vmatpush2.bf16.msra.mxu0 %v15016_v13  ;;  %v15105_v13 = vld [vmem:[%s17525_s14 + $0x7e4] ss:$8 sps:$4 sm:$0xff]  }
 0x117   : > { %10865 = vmatpush2.bf16.msra.mxu1 %v15019_v14  ;;  %10825 = vmatprep.subr.bf16.mxu0 %v15024_v15  ;;  %v15100_v14 = vld [vmem:[%s17525_s14 + $0x6e0] ss:$8 sps:$4 sm:$0xff]  }
 0x118   : > { %10866 = vmatprep.subr.bf16.mxu1 %v15027_v16  ;;  %v15103_v15 = vld [vmem:[%s17525_s14 + $0x7e0] ss:$8 sps:$4 sm:$0xff]   ;;  %v15108_v16 = vld [vmem:[%s17525_s14 + $0x6d4] ss:$8 sps:$4 sm:$0xff]  }
 0x11a   : > { %10826 = vmatpush2.bf16.msra.mxu0 %v15022_v17  ;;  %v15111_v17 = vld [vmem:[%s17525_s14 + $0x7d4] ss:$8 sps:$4 sm:$0xff]  }
 0x11b   : > { %10867 = vmatpush2.bf16.msra.mxu1 %v15025_v18  ;;  %10827 = vmatprep.subr.bf16.mxu0 %v15030_v19  ;;  %v15106_v18 = vld [vmem:[%s17525_s14 + $0x6d0] ss:$8 sps:$4 sm:$0xff]  }
 0x11c   : > { %10868 = vmatprep.subr.bf16.mxu1 %v15033_v20  ;;  %v15109_v19 = vld [vmem:[%s17525_s14 + $0x7d0] ss:$8 sps:$4 sm:$0xff]   ;;  %v15114_v20 = vld [vmem:[%s17525_s14 + $0x6c4] ss:$8 sps:$4 sm:$0xff]  }
 0x11e   : > { %10828 = vmatpush2.bf16.msra.mxu0 %v15028_v22  ;;  %v15112_v22 = vld [vmem:[%s17525_s14 + $0x6c0] ss:$8 sps:$4 sm:$0xff]  }
 0x11f   : > { %10869 = vmatpush2.bf16.msra.mxu1 %v15031_v23  ;;  %10829 = vmatprep.subr.bf16.mxu0 %v15036_v24  ;;  %v15115_v23 = vld [vmem:[%s17525_s14 + $0x7c0] ss:$8 sps:$4 sm:$0xff]   ;;  %v15120_v24 = vld [vmem:[%s17525_s14 + $0x6b4] ss:$8 sps:$4 sm:$0xff]  }
 0x120   : > { %10870 = vmatprep.subr.bf16.mxu1 %v15039_v25  ;;  %v15123_v25 = vld [vmem:[%s17525_s14 + $0x7b4] ss:$8 sps:$4 sm:$0xff]  }
 0x122   : > { %10830 = vmatpush2.bf16.msra.mxu0 %v15034_v27  ;;  %v15118_v27 = vld [vmem:[%s17525_s14 + $0x6b0] ss:$8 sps:$4 sm:$0xff]  }
 0x123   : > { %10871 = vmatpush2.bf16.msra.mxu1 %v15037_v28  ;;  %10831 = vmatprep.subr.bf16.mxu0 %v15042_v7  ;;  %v15121_v28 = vld [vmem:[%s17525_s14 + $0x7b0] ss:$8 sps:$4 sm:$0xff]   ;;  %v15126_v7 = vld [vmem:[%s17525_s14 + $0x6a4] ss:$8 sps:$4 sm:$0xff]  }
 0x124   : > { %10872 = vmatprep.subr.bf16.mxu1 %v15045_v29  ;;  %v15129_v29 = vld [vmem:[%s17525_s14 + $0x7a4] ss:$8 sps:$4 sm:$0xff]  }
 0x126   : > { %10832 = vmatpush2.bf16.msra.mxu0 %v15040_v33  ;;  %v15127_v33 = vld [vmem:[%s17525_s14 + $0x7a0] ss:$8 sps:$4 sm:$0xff]  }
 0x127   : > { %10873 = vmatpush2.bf16.msra.mxu1 %v15043_v34  ;;  %10883 = vmatprep.subr.bf16.mxu0 %v15048_v35  ;;  %v15132_v34 = vld [vmem:[%s17525_s14 + $0x694] ss:$8 sps:$4 sm:$0xff]  }
 0x128   : > { %10924 = vmatprep.subr.bf16.mxu1 %v15051_v36  ;;  %v15135_v35 = vld [vmem:[%s17525_s14 + $0x794] ss:$8 sps:$4 sm:$0xff]  }
 0x129   : > { %10834 = vmatmul.mubr.bf16.vlgmr.msra.gmra.mxu0 %v1997_v32  ;;  %v17832_v32 = vld [vmem:[%s17543_s23 + $0x10] sm:$0xff] }
 0x12a   : > { %10875 = vmatmul.mubr.bf16.vlgmr.msra.gmra.mxu1 %v2019_v38  ;;  %10884 = vmatpush1.bf16.msra.mxu0 %v15046_v39  ;;  %v17839_v36 = vrot.slane %v17832_v32, %v17594_v50  ;;  %v15133_v38 = vld [vmem:[%s17525_s14 + $0x790] ss:$8 sps:$4 sm:$0xff]   ;;  %v15138_v39 = vld [vmem:[%s17525_s14 + $0x684] ss:$8 sps:$4 sm:$0xff]  }
 0x12b   : > { %10925 = vmatpush1.bf16.msra.mxu1 %v15049_v30  ;;  %10885 = vmatprep.subr.bf16.mxu0 %v15054_v40  ;;  %v15141_v30 = vld [vmem:[%s17525_s14 + $0x784] ss:$8 sps:$4 sm:$0xff]  }
 0x12c   : > { %10926 = vmatprep.subr.bf16.mxu1 %v15057_v41  ;;  %10915 = vmatprep.mubr.bf16.mxu0 %v2018_v37  ;;  %v15130_v37 = vld [vmem:[%s17525_s14 + $0x690] ss:$8 sps:$4 sm:$0xff]   ;;  %v2038_v40 = vcombine.high %v17839_v36, %v17839_v36  ;;  %v15136_v41 = vld [vmem:[%s17525_s14 + $0x680] ss:$8 sps:$4 sm:$0xff]  }
 0x12d   : > { %10956 = vmatprep.mubr.bf16.mxu1 %v2022_v42  ;;  %v2004_v42 = vrot.slane %v17763_v26, %v17594_v50  ;;  %v15154_v26 = vld [vmem:[%s17525_s14 + $0x964] ss:$8 sps:$4 sm:$0xff]  }
 0x12e   : > { %10886 = vmatpush1.bf16.msra.mxu0 %v15052_v43  ;;  %v15139_v43 = vld [vmem:[%s17525_s14 + $0x780] ss:$8 sps:$4 sm:$0xff]  }
 0x12f   : > { %10927 = vmatpush1.bf16.msra.mxu1 %v15055_v45  ;;  %10887 = vmatprep.subr.bf16.mxu0 %v15060_v46  ;;  %v15145_v45 = vld [vmem:[%s17525_s14 + $0x874] ss:$8 sps:$4 sm:$0xff]  }
 0x130   : > { %10928 = vmatprep.subr.bf16.mxu1 %v15063_v47  ;;  %v15148_v46 = vld [vmem:[%s17525_s14 + $0x974] ss:$8 sps:$4 sm:$0xff]   ;;  %v2060_v47 = vrot.slane %v2038_v40, %v17594_v50  ;;  %v15206_v40 = vld [vmem:[%s17525_s14 + $0x9d0] ss:$8 sps:$4 sm:$0xff]  }
 0x132   : > { %10888 = vmatpush1.bf16.msra.mxu0 %v15058_v48  ;;  %v2020_v48 = vcombine.high %v2004_v42, %v2004_v42 }
 0x133   : > { %10929 = vmatpush1.bf16.msra.mxu1 %v15061_v49  ;;  %10889 = vmatprep.subr.bf16.mxu0 %v15066_v51  ;;  %v15143_v49 = vld [vmem:[%s17525_s14 + $0x870] ss:$8 sps:$4 sm:$0xff]  }
 0x134   : > { %10930 = vmatprep.subr.bf16.mxu1 %v15069_v52  ;;  %v15146_v51 = vld [vmem:[%s17525_s14 + $0x970] ss:$8 sps:$4 sm:$0xff]   ;;  %v15151_v52 = vld [vmem:[%s17525_s14 + $0x864] ss:$8 sps:$4 sm:$0xff]  }
 0x136   : > { %10890 = vmatpush1.bf16.msra.mxu0 %v15064_v53  ;;  %v2070_v53 = vcombine.high %v2060_v47, %v2060_v47 }
 0x137   : > { %10931 = vmatpush1.bf16.msra.mxu1 %v15067_v54  ;;  %10891 = vmatprep.subr.bf16.mxu0 %v15072_v55 }
 0x138   : > { %10932 = vmatprep.subr.bf16.mxu1 %v15075_v56  ;;  %v15149_v56 = vld [vmem:[%s17525_s14 + $0x860] ss:$8 sps:$4 sm:$0xff]  }
 0x13a   : > { %10892 = vmatpush1.bf16.msra.mxu0 %v15070_v57  ;;  %v15152_v57 = vld [vmem:[%s17525_s14 + $0x960] ss:$8 sps:$4 sm:$0xff]  }
 0x13b   : > { %10933 = vmatpush1.bf16.msra.mxu1 %v15073_v58  ;;  %10893 = vmatprep.subr.bf16.mxu0 %v15078_v59 }
 0x13c   : > { %10934 = vmatprep.subr.bf16.mxu1 %v15081_v60 }
 0x13e   : > { %10894 = vmatpush1.bf16.msra.mxu0 %v15076_v61  ;;  %v15157_v61 = vld [vmem:[%s17525_s14 + $0x854] ss:$8 sps:$4 sm:$0xff]  }
 0x13f   : > { %10935 = vmatpush1.bf16.msra.mxu1 %v15079_v62  ;;  %10895 = vmatprep.subr.bf16.mxu0 %v15084_v63  ;;  %v15160_v62 = vld [vmem:[%s17525_s14 + $0x954] ss:$8 sps:$4 sm:$0xff]  }
 0x140   : > { %10936 = vmatprep.subr.bf16.mxu1 %v15087_v0  ;;  %v15155_v0 = vld [vmem:[%s17525_s14 + $0x850] ss:$8 sps:$4 sm:$0xff]  }
 0x142   : > { %10896 = vmatpush1.bf16.msra.mxu0 %v15082_v1  ;;  %v15158_v1 = vld [vmem:[%s17525_s14 + $0x950] ss:$8 sps:$4 sm:$0xff]  }
 0x143   : > { %10937 = vmatpush1.bf16.msra.mxu1 %v15085_v2  ;;  %10897 = vmatprep.subr.bf16.mxu0 %v15090_v3 }
 0x144   : > { %10938 = vmatprep.subr.bf16.mxu1 %v15093_v4 }
 0x146   : > { %10898 = vmatpush1.bf16.msra.mxu0 %v15088_v5 }
 0x147   : > { %10939 = vmatpush1.bf16.msra.mxu1 %v15091_v6  ;;  %10899 = vmatprep.subr.bf16.mxu0 %v15096_v8  ;;  %v15163_v6 = vld [vmem:[%s17525_s14 + $0x844] ss:$8 sps:$4 sm:$0xff]  }
 0x148   : > { %10940 = vmatprep.subr.bf16.mxu1 %v15099_v9  ;;  %v15166_v8 = vld [vmem:[%s17525_s14 + $0x944] ss:$8 sps:$4 sm:$0xff]   ;;  %v15161_v9 = vld [vmem:[%s17525_s14 + $0x840] ss:$8 sps:$4 sm:$0xff]  }
 0x14a   : > { %10900 = vmatpush2.bf16.msra.mxu0 %v15094_v10  ;;  %v15164_v10 = vld [vmem:[%s17525_s14 + $0x940] ss:$8 sps:$4 sm:$0xff]  }
 0x14b   : > { %10941 = vmatpush2.bf16.msra.mxu1 %v15097_v11  ;;  %10901 = vmatprep.subr.bf16.mxu0 %v15102_v12  ;;  %v15169_v11 = vld [vmem:[%s17525_s14 + $0x834] ss:$8 sps:$4 sm:$0xff]  }
 0x14c   : > { %10942 = vmatprep.subr.bf16.mxu1 %v15105_v13  ;;  %v15172_v12 = vld [vmem:[%s17525_s14 + $0x934] ss:$8 sps:$4 sm:$0xff]   ;;  %v15167_v13 = vld [vmem:[%s17525_s14 + $0x830] ss:$8 sps:$4 sm:$0xff]  }
 0x14e   : > { %10902 = vmatpush2.bf16.msra.mxu0 %v15100_v14  ;;  %v15170_v14 = vld [vmem:[%s17525_s14 + $0x930] ss:$8 sps:$4 sm:$0xff]  }
 0x14f   : > { %10943 = vmatpush2.bf16.msra.mxu1 %v15103_v15  ;;  %10903 = vmatprep.subr.bf16.mxu0 %v15108_v16  ;;  %v15175_v15 = vld [vmem:[%s17525_s14 + $0x824] ss:$8 sps:$4 sm:$0xff]  }
 0x150   : > { %10944 = vmatprep.subr.bf16.mxu1 %v15111_v17  ;;  %v15178_v16 = vld [vmem:[%s17525_s14 + $0x924] ss:$8 sps:$4 sm:$0xff]   ;;  %v15173_v17 = vld [vmem:[%s17525_s14 + $0x820] ss:$8 sps:$4 sm:$0xff]  }
 0x152   : > { %10904 = vmatpush2.bf16.msra.mxu0 %v15106_v18  ;;  %v15176_v18 = vld [vmem:[%s17525_s14 + $0x920] ss:$8 sps:$4 sm:$0xff]  }
 0x153   : > { %10945 = vmatpush2.bf16.msra.mxu1 %v15109_v19  ;;  %10905 = vmatprep.subr.bf16.mxu0 %v15114_v20  ;;  %v15181_v19 = vld [vmem:[%s17525_s14 + $0x814] ss:$8 sps:$4 sm:$0xff]  }
 0x154   : > { %10946 = vmatprep.subr.bf16.mxu1 %v15117_v21  ;;  %v15184_v20 = vld [vmem:[%s17525_s14 + $0x914] ss:$8 sps:$4 sm:$0xff]   ;;  %v15179_v21 = vld [vmem:[%s17525_s14 + $0x810] ss:$8 sps:$4 sm:$0xff]  }
 0x156   : > { %10906 = vmatpush2.bf16.msra.mxu0 %v15112_v22  ;;  %v15182_v22 = vld [vmem:[%s17525_s14 + $0x910] ss:$8 sps:$4 sm:$0xff]  }
 0x157   : > { %10947 = vmatpush2.bf16.msra.mxu1 %v15115_v23  ;;  %10907 = vmatprep.subr.bf16.mxu0 %v15120_v24  ;;  %v15187_v23 = vld [vmem:[%s17525_s14 + $0x804] ss:$8 sps:$4 sm:$0xff]  }
 0x158   : > { %10948 = vmatprep.subr.bf16.mxu1 %v15123_v25  ;;  %v15190_v24 = vld [vmem:[%s17525_s14 + $0x904] ss:$8 sps:$4 sm:$0xff]   ;;  %v15185_v25 = vld [vmem:[%s17525_s14 + $0x800] ss:$8 sps:$4 sm:$0xff]  }
 0x15a   : > { %10908 = vmatpush2.bf16.msra.mxu0 %v15118_v27  ;;  %v15188_v27 = vld [vmem:[%s17525_s14 + $0x900] ss:$8 sps:$4 sm:$0xff]  }
 0x15b   : > { %10949 = vmatpush2.bf16.msra.mxu1 %v15121_v28  ;;  %10909 = vmatprep.subr.bf16.mxu0 %v15126_v7  ;;  %v15193_v28 = vld [vmem:[%s17525_s14 + $0x8f4] ss:$8 sps:$4 sm:$0xff]  }
 0x15c   : > { %10950 = vmatprep.subr.bf16.mxu1 %v15129_v29  ;;  %v15196_v7 = vld [vmem:[%s17525_s14 + $0x9f4] ss:$8 sps:$4 sm:$0xff]   ;;  %v15191_v29 = vld [vmem:[%s17525_s14 + $0x8f0] ss:$8 sps:$4 sm:$0xff]  }
 0x15e   : > { %10910 = vmatpush2.bf16.msra.mxu0 %v15124_v31  ;;  %v15194_v31 = vld [vmem:[%s17525_s14 + $0x9f0] ss:$8 sps:$4 sm:$0xff]  }
 0x15f   : > { %10951 = vmatpush2.bf16.msra.mxu1 %v15127_v33  ;;  %10911 = vmatprep.subr.bf16.mxu0 %v15132_v34  ;;  %v15199_v33 = vld [vmem:[%s17525_s14 + $0x8e4] ss:$8 sps:$4 sm:$0xff]  }
 0x160   : > { %10952 = vmatprep.subr.bf16.mxu1 %v15135_v35  ;;  %v15202_v34 = vld [vmem:[%s17525_s14 + $0x9e4] ss:$8 sps:$4 sm:$0xff]   ;;  %v15197_v35 = vld [vmem:[%s17525_s14 + $0x8e0] ss:$8 sps:$4 sm:$0xff]  }
 0x162   : > { %10912 = vmatpush2.bf16.msra.mxu0 %v15130_v37  ;;  %v15200_v37 = vld [vmem:[%s17525_s14 + $0x9e0] ss:$8 sps:$4 sm:$0xff]  }
 0x163   : > { %10953 = vmatpush2.bf16.msra.mxu1 %v15133_v38  ;;  %10913 = vmatprep.subr.bf16.mxu0 %v15138_v39  ;;  %v15205_v38 = vld [vmem:[%s17525_s14 + $0x8d4] ss:$8 sps:$4 sm:$0xff]  }
 0x164   : > { %10954 = vmatprep.subr.bf16.mxu1 %v15141_v30  ;;  %v15208_v39 = vld [vmem:[%s17525_s14 + $0x9d4] ss:$8 sps:$4 sm:$0xff]   ;;  %v15203_v30 = vld [vmem:[%s17525_s14 + $0x8d0] ss:$8 sps:$4 sm:$0xff]  }
 0x166   : > { %10914 = vmatpush2.bf16.msra.mxu0 %v15136_v41  ;;  %v15211_v41 = vld [vmem:[%s17525_s14 + $0x8c4] ss:$8 sps:$4 sm:$0xff]  }
 0x167   : > { %10955 = vmatpush2.bf16.msra.mxu1 %v15139_v43  ;;  %10965 = vmatprep.subr.bf16.mxu0 %v15145_v45  ;;  %v15209_v43 = vld [vmem:[%s17525_s14 + $0x8c0] ss:$8 sps:$4 sm:$0xff]  }
 0x168   : > { %11006 = vmatprep.subr.bf16.mxu1 %v15148_v46  ;;  %v15212_v45 = vld [vmem:[%s17525_s14 + $0x9c0] ss:$8 sps:$4 sm:$0xff]   ;;  %v15217_v46 = vld [vmem:[%s17525_s14 + $0x8b4] ss:$8 sps:$4 sm:$0xff]  }
 0x169   : > { %v10671_v54 = vpop.f32.mrf.mxu0  ;;  %10916 = vmatmul.mubr.bf16.vlgmr.msra.gmra.mxu0 %v2004_v42  ;;  %v15214_v42 = vld [vmem:[%s17525_s14 + $0x9c4] ss:$8 sps:$4 sm:$0xff]  }
 0x16a   : > { %v10712_v55 = vpop.f32.mrf.mxu1  ;;  %10957 = vmatmul.mubr.bf16.vlgmr.msra.gmra.mxu1 %v2020_v48  ;;  %10966 = vmatpush1.bf16.msra.mxu0 %v15143_v49  ;;  %v15215_v48 = vld [vmem:[%s17525_s14 + $0x8b0] ss:$8 sps:$4 sm:$0xff]  }
 0x16b   : > { %v17860_v58 = vadd.f32 %v10712_v55, %v10671_v54  ;;  %11007 = vmatpush1.bf16.msra.mxu1 %v15146_v51  ;;  %v10673_v59 = vpop.f32.mrf.mxu0  ;;  %10967 = vmatprep.subr.bf16.mxu0 %v15151_v52  ;;  %v15218_v49 = vld [vmem:[%s17525_s14 + $0x9b0] ss:$8 sps:$4 sm:$0xff]   ;;  %v15223_v51 = vld [vmem:[%s17525_s14 + $0x8a4] ss:$8 sps:$4 sm:$0xff]   ;;  %v15224_v54 = vld [vmem:[%s17525_s14 + $0x9a0] ss:$8 sps:$4 sm:$0xff]  }
 0x16c   : > { %v10714_v60 = vpop.f32.mrf.mxu1  ;;  %11008 = vmatprep.subr.bf16.mxu1 %v15154_v26  ;;  %10997 = vmatprep.mubr.bf16.mxu0 %v2060_v47  ;;  %v15220_v47 = vld [vmem:[%s17525_s14 + $0x9b4] ss:$8 sps:$4 sm:$0xff]   ;;  %v15226_v52 = vld [vmem:[%s17525_s14 + $0x9a4] ss:$8 sps:$4 sm:$0xff]   ;;  %v2023_v26 = vcombine.high %v17832_v32, %v17832_v32  ;;  %v15227_v32 = vld [vmem:[%s17525_s14 + $0x890] ss:$8 sps:$4 sm:$0xff]  }
 0x16d   : > { %v17864_v63 = vadd.f32 %v10714_v60, %v10673_v59  ;;  %11038 = vmatprep.mubr.bf16.mxu1 %v2070_v53  ;;  %v10675_v2 = vpop.f32.mrf.mxu0  ;;  %v15221_v53 = vld [vmem:[%s17525_s14 + $0x8a0] ss:$8 sps:$4 sm:$0xff]   ;;  %v15229_v55 = vld [vmem:[%s17525_s14 + $0x894] ss:$8 sps:$4 sm:$0xff]   ;;  %v15230_v59 = vld [vmem:[%s17525_s14 + $0x990] ss:$8 sps:$4 sm:$0xff]  }
 0x16e   : > { %v10716_v3 = vpop.f32.mrf.mxu1  ;;  %10968 = vmatpush1.bf16.msra.mxu0 %v15149_v56  ;;  %v15232_v56 = vld [vmem:[%s17525_s14 + $0x994] ss:$8 sps:$4 sm:$0xff]   ;;  %v15235_v60 = vld [vmem:[%s17525_s14 + $0x884] ss:$8 sps:$4 sm:$0xff]   ;;  %v15236_v2 = vld [vmem:[%s17525_s14 + $0x980] ss:$8 sps:$4 sm:$0xff]  }
 0x16f   : > { %11009 = vmatpush1.bf16.msra.mxu1 %v15152_v57  ;;  %v10676_v4 = vpop.f32.mrf.mxu0  ;;  %10969 = vmatprep.subr.bf16.mxu0 %v15157_v61  ;;  %v17917_v57 = vrot.slane %v2023_v26, %v17594_v50  ;;  %v15238_v61 = vld [vmem:[%s17525_s14 + $0x984] ss:$8 sps:$4 sm:$0xff]   ;;  %v15241_v3 = vld [vmem:[%s17525_s14 + $0xa74] ss:$8 sps:$4 sm:$0xff]  }
 0x170   : > { %v10717_v5 = vpop.f32.mrf.mxu1  ;;  %11010 = vmatprep.subr.bf16.mxu1 %v15160_v62  ;;  %v15244_v4 = vld [vmem:[%s17525_s14 + $0xb74] ss:$8 sps:$4 sm:$0xff]  }
 0x171   : > { %v2039_v62 = vcombine.high %v17917_v57, %v17917_v57  ;;  %v15239_v5 = vld [vmem:[%s17525_s14 + $0xa70] ss:$8 sps:$4 sm:$0xff]   ;;  %v15292_v26 = vld [vmem:[%s17525_s14 + $0xbf4] ss:$8 sps:$4 sm:$0xff]  }
 0x172   : > { %10970 = vmatpush1.bf16.msra.mxu0 %v15155_v0  ;;  %v2046_v0 = vrot.slane %v17839_v36, %v17594_v50  ;;  %v15247_v36 = vld [vmem:[%s17525_s14 + $0xa64] ss:$8 sps:$4 sm:$0xff]  }
 0x173   : > { %11011 = vmatpush1.bf16.msra.mxu1 %v15158_v1  ;;  %10971 = vmatprep.subr.bf16.mxu0 %v15163_v6  ;;  %v15233_v1 = vld [vmem:[%s17525_s14 + $0x880] ss:$8 sps:$4 sm:$0xff]   ;;  %v15242_v6 = vld [vmem:[%s17525_s14 + $0xb70] ss:$8 sps:$4 sm:$0xff]  }
 0x174   : > { %11012 = vmatprep.subr.bf16.mxu1 %v15166_v8  ;;  %v2067_v8 = vrot.slane %v2039_v62, %v17594_v50  ;;  %v15299_v62 = vld [vmem:[%s17525_s14 + $0xad0] ss:$8 sps:$4 sm:$0xff]  }
 0x176   : > { %10972 = vmatpush1.bf16.msra.mxu0 %v15161_v9  ;;  %v2068_v9 = vcombine.high %v2046_v0, %v2046_v0 }
 0x177   : > { %11013 = vmatpush1.bf16.msra.mxu1 %v15164_v10  ;;  %10973 = vmatprep.subr.bf16.mxu0 %v15169_v11  ;;  %v15250_v10 = vld [vmem:[%s17525_s14 + $0xb64] ss:$8 sps:$4 sm:$0xff]   ;;  %v15245_v11 = vld [vmem:[%s17525_s14 + $0xa60] ss:$8 sps:$4 sm:$0xff]  }
 0x178   : > { %11014 = vmatprep.subr.bf16.mxu1 %v15172_v12  ;;  %v15248_v12 = vld [vmem:[%s17525_s14 + $0xb60] ss:$8 sps:$4 sm:$0xff]  }
 0x17a   : > { %10974 = vmatpush1.bf16.msra.mxu0 %v15167_v13  ;;  %v2071_v13 = vcombine.high %v2067_v8, %v2067_v8 }
 0x17b   : > { %11015 = vmatpush1.bf16.msra.mxu1 %v15170_v14  ;;  %10975 = vmatprep.subr.bf16.mxu0 %v15175_v15 }
 0x17c   : > { %11016 = vmatprep.subr.bf16.mxu1 %v15178_v16 }
 0x17e   : > { %10976 = vmatpush1.bf16.msra.mxu0 %v15173_v17 }
 0x17f   : > { %11017 = vmatpush1.bf16.msra.mxu1 %v15176_v18  ;;  %10977 = vmatprep.subr.bf16.mxu0 %v15181_v19  ;;  %v15253_v19 = vld [vmem:[%s17525_s14 + $0xa54] ss:$8 sps:$4 sm:$0xff]  }
 0x180   : > { %11018 = vmatprep.subr.bf16.mxu1 %v15184_v20  ;;  %v15256_v20 = vld [vmem:[%s17525_s14 + $0xb54] ss:$8 sps:$4 sm:$0xff]  }
 0x182   : > { %10978 = vmatpush1.bf16.msra.mxu0 %v15179_v21 }
 0x183   : > { %11019 = vmatpush1.bf16.msra.mxu1 %v15182_v22  ;;  %10979 = vmatprep.subr.bf16.mxu0 %v15187_v23  ;;  %v15251_v23 = vld [vmem:[%s17525_s14 + $0xa50] ss:$8 sps:$4 sm:$0xff]  }
 0x184   : > { %11020 = vmatprep.subr.bf16.mxu1 %v15190_v24  ;;  %v15254_v24 = vld [vmem:[%s17525_s14 + $0xb50] ss:$8 sps:$4 sm:$0xff]  }
 0x186   : > { %10980 = vmatpush1.bf16.msra.mxu0 %v15185_v25 }
 0x187   : > { %11021 = vmatpush1.bf16.msra.mxu1 %v15188_v27  ;;  %10981 = vmatprep.subr.bf16.mxu0 %v15193_v28 }
 0x188   : > { %11022 = vmatprep.subr.bf16.mxu1 %v15196_v7 }
 0x18a   : > { %10982 = vmatpush2.bf16.msra.mxu0 %v15191_v29  ;;  %v15262_v29 = vld [vmem:[%s17525_s14 + $0xb44] ss:$8 sps:$4 sm:$0xff]  }
 0x18b   : > { %11023 = vmatpush2.bf16.msra.mxu1 %v15194_v31  ;;  %10983 = vmatprep.subr.bf16.mxu0 %v15199_v33  ;;  %v15257_v31 = vld [vmem:[%s17525_s14 + $0xa40] ss:$8 sps:$4 sm:$0xff]  }
 0x18c   : > { %11024 = vmatprep.subr.bf16.mxu1 %v15202_v34  ;;  %v15260_v33 = vld [vmem:[%s17525_s14 + $0xb40] ss:$8 sps:$4 sm:$0xff]   ;;  %v15265_v34 = vld [vmem:[%s17525_s14 + $0xa34] ss:$8 sps:$4 sm:$0xff]  }
 0x18e   : > { %10984 = vmatpush2.bf16.msra.mxu0 %v15197_v35  ;;  %v15268_v35 = vld [vmem:[%s17525_s14 + $0xb34] ss:$8 sps:$4 sm:$0xff]  }
 0x18f   : > { %11025 = vmatpush2.bf16.msra.mxu1 %v15200_v37  ;;  %10985 = vmatprep.subr.bf16.mxu0 %v15205_v38  ;;  %v15263_v37 = vld [vmem:[%s17525_s14 + $0xa30] ss:$8 sps:$4 sm:$0xff]  }
 0x190   : > { %11026 = vmatprep.subr.bf16.mxu1 %v15208_v39  ;;  %v15266_v38 = vld [vmem:[%s17525_s14 + $0xb30] ss:$8 sps:$4 sm:$0xff]   ;;  %v15271_v39 = vld [vmem:[%s17525_s14 + $0xa24] ss:$8 sps:$4 sm:$0xff]  }
 0x192   : > { %10986 = vmatpush2.bf16.msra.mxu0 %v15203_v30  ;;  %v15274_v30 = vld [vmem:[%s17525_s14 + $0xb24] ss:$8 sps:$4 sm:$0xff]  }
 0x193   : > { %11027 = vmatpush2.bf16.msra.mxu1 %v15206_v40  ;;  %10987 = vmatprep.subr.bf16.mxu0 %v15211_v41  ;;  %v15269_v40 = vld [vmem:[%s17525_s14 + $0xa20] ss:$8 sps:$4 sm:$0xff]  }
 0x194   : > { %11028 = vmatprep.subr.bf16.mxu1 %v15214_v42  ;;  %v15272_v41 = vld [vmem:[%s17525_s14 + $0xb20] ss:$8 sps:$4 sm:$0xff]   ;;  %v15277_v42 = vld [vmem:[%s17525_s14 + $0xa14] ss:$8 sps:$4 sm:$0xff]  }
 0x196   : > { %10988 = vmatpush2.bf16.msra.mxu0 %v15209_v43  ;;  %v15280_v43 = vld [vmem:[%s17525_s14 + $0xb14] ss:$8 sps:$4 sm:$0xff]  }
 0x197   : > { %11029 = vmatpush2.bf16.msra.mxu1 %v15212_v45  ;;  %10989 = vmatprep.subr.bf16.mxu0 %v15217_v46  ;;  %v15275_v45 = vld [vmem:[%s17525_s14 + $0xa10] ss:$8 sps:$4 sm:$0xff]  }
 0x198   : > { %11030 = vmatprep.subr.bf16.mxu1 %v15220_v47  ;;  %v15278_v46 = vld [vmem:[%s17525_s14 + $0xb10] ss:$8 sps:$4 sm:$0xff]   ;;  %v15283_v47 = vld [vmem:[%s17525_s14 + $0xa04] ss:$8 sps:$4 sm:$0xff]  }
 0x19a   : > { %10990 = vmatpush2.bf16.msra.mxu0 %v15215_v48  ;;  %v15286_v48 = vld [vmem:[%s17525_s14 + $0xb04] ss:$8 sps:$4 sm:$0xff]  }
 0x19b   : > { %11031 = vmatpush2.bf16.msra.mxu1 %v15218_v49  ;;  %10991 = vmatprep.subr.bf16.mxu0 %v15223_v51  ;;  %v15281_v49 = vld [vmem:[%s17525_s14 + $0xa00] ss:$8 sps:$4 sm:$0xff]  }
 0x19c   : > { %11032 = vmatprep.subr.bf16.mxu1 %v15226_v52  ;;  %v15284_v51 = vld [vmem:[%s17525_s14 + $0xb00] ss:$8 sps:$4 sm:$0xff]   ;;  %v15289_v52 = vld [vmem:[%s17525_s14 + $0xaf4] ss:$8 sps:$4 sm:$0xff]  }
 0x19e   : > { %10992 = vmatpush2.bf16.msra.mxu0 %v15221_v53  ;;  %v15287_v53 = vld [vmem:[%s17525_s14 + $0xaf0] ss:$8 sps:$4 sm:$0xff]  }
 0x19f   : > { %11033 = vmatpush2.bf16.msra.mxu1 %v15224_v54  ;;  %10993 = vmatprep.subr.bf16.mxu0 %v15229_v55  ;;  %v15290_v54 = vld [vmem:[%s17525_s14 + $0xbf0] ss:$8 sps:$4 sm:$0xff]   ;;  %v15295_v55 = vld [vmem:[%s17525_s14 + $0xae4] ss:$8 sps:$4 sm:$0xff]  }
 0x1a0   : > { %11034 = vmatprep.subr.bf16.mxu1 %v15232_v56  ;;  %v15298_v56 = vld [vmem:[%s17525_s14 + $0xbe4] ss:$8 sps:$4 sm:$0xff]  }
 0x1a2   : > { %10994 = vmatpush2.bf16.msra.mxu0 %v15227_v32  ;;  %v15293_v32 = vld [vmem:[%s17525_s14 + $0xae0] ss:$8 sps:$4 sm:$0xff]  }
 0x1a3   : > { %11035 = vmatpush2.bf16.msra.mxu1 %v15230_v59  ;;  %10995 = vmatprep.subr.bf16.mxu0 %v15235_v60  ;;  %v15296_v59 = vld [vmem:[%s17525_s14 + $0xbe0] ss:$8 sps:$4 sm:$0xff]   ;;  %v15301_v60 = vld [vmem:[%s17525_s14 + $0xad4] ss:$8 sps:$4 sm:$0xff]  }
 0x1a4   : > { %11036 = vmatprep.subr.bf16.mxu1 %v15238_v61  ;;  %v15304_v61 = vld [vmem:[%s17525_s14 + $0xbd4] ss:$8 sps:$4 sm:$0xff]  }
 0x1a6   : > { %10996 = vmatpush2.bf16.msra.mxu0 %v15233_v1  ;;  %v15307_v1 = vld [vmem:[%s17525_s14 + $0xac4] ss:$8 sps:$4 sm:$0xff]  }
 0x1a7   : > { %11037 = vmatpush2.bf16.msra.mxu1 %v15236_v2  ;;  %11047 = vmatprep.subr.bf16.mxu0 %v15241_v3  ;;  %v15310_v2 = vld [vmem:[%s17525_s14 + $0xbc4] ss:$8 sps:$4 sm:$0xff]   ;;  %v15305_v3 = vld [vmem:[%s17525_s14 + $0xac0] ss:$8 sps:$4 sm:$0xff]  }
 0x1a8   : > { %11088 = vmatprep.subr.bf16.mxu1 %v15244_v4  ;;  %v15308_v4 = vld [vmem:[%s17525_s14 + $0xbc0] ss:$8 sps:$4 sm:$0xff]  }
 0x1a9   : > { %v10753_v14 = vpop.f32.mrf.mxu0  ;;  %10998 = vmatmul.mubr.bf16.vlgmr.msra.gmra.mxu0 %v2046_v0  ;;  %v15302_v0 = vld [vmem:[%s17525_s14 + $0xbd0] ss:$8 sps:$4 sm:$0xff]  }
 0x1aa   : > { %v10794_v15 = vpop.f32.mrf.mxu1  ;;  %11039 = vmatmul.mubr.bf16.vlgmr.msra.gmra.mxu1 %v2068_v9  ;;  %v10754_v16 = vadd.f32 %v10753_v14, %v17860_v58  ;;  %11048 = vmatpush1.bf16.msra.mxu0 %v15239_v5  ;;  %v15313_v5 = vld [vmem:[%s17525_s14 + $0xab4] ss:$8 sps:$4 sm:$0xff]   ;;  %v15314_v9 = vld [vmem:[%s17525_s14 + $0xbb0] ss:$8 sps:$4 sm:$0xff]  }
 0x1ab   : > { %11089 = vmatpush1.bf16.msra.mxu1 %v15242_v6  ;;  %v10755_v17 = vpop.f32.mrf.mxu0  ;;  %11049 = vmatprep.subr.bf16.mxu0 %v15247_v36  ;;  %v15316_v6 = vld [vmem:[%s17525_s14 + $0xbb4] ss:$8 sps:$4 sm:$0xff]   ;;  %v15319_v36 = vld [vmem:[%s17525_s14 + $0xaa4] ss:$8 sps:$4 sm:$0xff]  }
 0x1ac   : > { %v10796_v18 = vpop.f32.mrf.mxu1  ;;  %11090 = vmatprep.subr.bf16.mxu1 %v15250_v10  ;;  %v17941_v21 = vadd.f32 %v10794_v15, %v10754_v16  ;;  %v10756_v22 = vadd.f32 %v10755_v17, %v17864_v63  ;;  %11079 = vmatprep.mubr.bf16.mxu0 %v2067_v8  ;;  %v15259_v63 = vld [vmem:[%s17525_s14 + $0xa44] ss:$8 sps:$4 sm:$0xff]   ;;  %v15311_v8 = vld [vmem:[%s17525_s14 + $0xab0] ss:$8 sps:$4 sm:$0xff]   ;;  %v15325_v14 = vld [vmem:[%s17525_s14 + $0xa94] ss:$8 sps:$4 sm:$0xff]  }
 0x1ad   : > { %11120 = vmatprep.mubr.bf16.mxu1 %v2071_v13  ;;  %v10757_v58 = vpop.f32.mrf.mxu0  ;;  %v15322_v10 = vld [vmem:[%s17525_s14 + $0xba4] ss:$8 sps:$4 sm:$0xff]   ;;  %v15320_v13 = vld [vmem:[%s17525_s14 + $0xba0] ss:$8 sps:$4 sm:$0xff]   ;;  %v15328_v15 = vld [vmem:[%s17525_s14 + $0xb94] ss:$8 sps:$4 sm:$0xff]  }
 0x1ae   : > { %v10798_v25 = vpop.f32.mrf.mxu1  ;;  %v17946_v27 = vadd.f32 %v10796_v18, %v10756_v22  ;;  %11050 = vmatpush1.bf16.msra.mxu0 %v15245_v11  ;;  %v17991_v11 = vld [vmem:[%s17543_s23 + $0x18] sm:$0xff]  ;;  %v15332_v58 = vld [vmem:[%s17525_s14 + $0xb80] ss:$8 sps:$4 sm:$0xff]  }
 0x1af   : > { %11091 = vmatpush1.bf16.msra.mxu1 %v15248_v12  ;;  %v10758_v28 = vpop.f32.mrf.mxu0  ;;  %11051 = vmatprep.subr.bf16.mxu0 %v15253_v19  ;;  %v15317_v12 = vld [vmem:[%s17525_s14 + $0xaa0] ss:$8 sps:$4 sm:$0xff]   ;;  %v17999_v16 = vrot.slane %v17991_v11, %v17594_v50  ;;  %v15323_v17 = vld [vmem:[%s17525_s14 + $0xa90] ss:$8 sps:$4 sm:$0xff]   ;;  %v15331_v19 = vld [vmem:[%s17525_s14 + $0xa84] ss:$8 sps:$4 sm:$0xff]  }
 0x1b0   : > { %v10799_v7 = vpop.f32.mrf.mxu1  ;;  %11092 = vmatprep.subr.bf16.mxu1 %v15256_v20  ;;  %v15326_v18 = vld [vmem:[%s17525_s14 + $0xb90] ss:$8 sps:$4 sm:$0xff]   ;;  %v15334_v20 = vld [vmem:[%s17525_s14 + $0xb84] ss:$8 sps:$4 sm:$0xff]   ;;  %v15338_v25 = vld [vmem:[%s17525_s14 + $0xc74] ss:$8 sps:$4 sm:$0xff]  }
 0x1b1   : > { %v2087_v22 = vcombine.high %v17999_v16, %v17999_v16  ;;  %v15341_v28 = vld [vmem:[%s17525_s14 + $0xd74] ss:$8 sps:$4 sm:$0xff]   ;;  %v15336_v7 = vld [vmem:[%s17525_s14 + $0xc70] ss:$8 sps:$4 sm:$0xff]  }
 0x1b2   : > { %11052 = vmatpush1.bf16.msra.mxu0 %v15251_v23  ;;  %v2053_v23 = vrot.slane %v17917_v57, %v17594_v50  ;;  %v15344_v57 = vld [vmem:[%s17525_s14 + $0xc64] ss:$8 sps:$4 sm:$0xff]  }
 0x1b3   : > { %11093 = vmatpush1.bf16.msra.mxu1 %v15254_v24  ;;  %11053 = vmatprep.subr.bf16.mxu0 %v15259_v63  ;;  %v15329_v24 = vld [vmem:[%s17525_s14 + $0xa80] ss:$8 sps:$4 sm:$0xff]   ;;  %v15339_v63 = vld [vmem:[%s17525_s14 + $0xd70] ss:$8 sps:$4 sm:$0xff]  }
 0x1b4   : > { %11094 = vmatprep.subr.bf16.mxu1 %v15262_v29  ;;  %v2109_v29 = vrot.slane %v2087_v22, %v17594_v50  ;;  %v15401_v22 = vld [vmem:[%s17525_s14 + $0xdd4] ss:$8 sps:$4 sm:$0xff]  }
 0x1b6   : > { %11054 = vmatpush1.bf16.msra.mxu0 %v15257_v31  ;;  %v2069_v31 = vcombine.high %v2053_v23, %v2053_v23 }
 0x1b7   : > { %11095 = vmatpush1.bf16.msra.mxu1 %v15260_v33  ;;  %11055 = vmatprep.subr.bf16.mxu0 %v15265_v34  ;;  %v15347_v33 = vld [vmem:[%s17525_s14 + $0xd64] ss:$8 sps:$4 sm:$0xff]   ;;  %v15342_v34 = vld [vmem:[%s17525_s14 + $0xc60] ss:$8 sps:$4 sm:$0xff]  }
 0x1b8   : > { %11096 = vmatprep.subr.bf16.mxu1 %v15268_v35  ;;  %v15345_v35 = vld [vmem:[%s17525_s14 + $0xd60] ss:$8 sps:$4 sm:$0xff]  }
 0x1ba   : > { %11056 = vmatpush1.bf16.msra.mxu0 %v15263_v37  ;;  %v2119_v37 = vcombine.high %v2109_v29, %v2109_v29 }
 0x1bb   : > { %11097 = vmatpush1.bf16.msra.mxu1 %v15266_v38  ;;  %11057 = vmatprep.subr.bf16.mxu0 %v15271_v39 }
 0x1bc   : > { %11098 = vmatprep.subr.bf16.mxu1 %v15274_v30 }
 0x1be   : > { %11058 = vmatpush1.bf16.msra.mxu0 %v15269_v40 }
 0x1bf   : > { %11099 = vmatpush1.bf16.msra.mxu1 %v15272_v41  ;;  %11059 = vmatprep.subr.bf16.mxu0 %v15277_v42  ;;  %v15350_v42 = vld [vmem:[%s17525_s14 + $0xc54] ss:$8 sps:$4 sm:$0xff]  }
 0x1c0   : > { %11100 = vmatprep.subr.bf16.mxu1 %v15280_v43  ;;  %v15353_v43 = vld [vmem:[%s17525_s14 + $0xd54] ss:$8 sps:$4 sm:$0xff]  }
 0x1c2   : > { %11060 = vmatpush1.bf16.msra.mxu0 %v15275_v45 }
 0x1c3   : > { %11101 = vmatpush1.bf16.msra.mxu1 %v15278_v46  ;;  %11061 = vmatprep.subr.bf16.mxu0 %v15283_v47  ;;  %v15348_v47 = vld [vmem:[%s17525_s14 + $0xc50] ss:$8 sps:$4 sm:$0xff]  }
 0x1c4   : > { %11102 = vmatprep.subr.bf16.mxu1 %v15286_v48  ;;  %v15351_v48 = vld [vmem:[%s17525_s14 + $0xd50] ss:$8 sps:$4 sm:$0xff]  }
 0x1c6   : > { %11062 = vmatpush1.bf16.msra.mxu0 %v15281_v49 }
 0x1c7   : > { %11103 = vmatpush1.bf16.msra.mxu1 %v15284_v51  ;;  %11063 = vmatprep.subr.bf16.mxu0 %v15289_v52 }
 0x1c8   : > { %11104 = vmatprep.subr.bf16.mxu1 %v15292_v26 }
 0x1ca   : > { %11064 = vmatpush2.bf16.msra.mxu0 %v15287_v53  ;;  %v15359_v53 = vld [vmem:[%s17525_s14 + $0xd44] ss:$8 sps:$4 sm:$0xff]  }
 0x1cb   : > { %11105 = vmatpush2.bf16.msra.mxu1 %v15290_v54  ;;  %11065 = vmatprep.subr.bf16.mxu0 %v15295_v55  ;;  %v15354_v54 = vld [vmem:[%s17525_s14 + $0xc40] ss:$8 sps:$4 sm:$0xff]  }
 0x1cc   : > { %11106 = vmatprep.subr.bf16.mxu1 %v15298_v56  ;;  %v15357_v55 = vld [vmem:[%s17525_s14 + $0xd40] ss:$8 sps:$4 sm:$0xff]   ;;  %v15362_v56 = vld [vmem:[%s17525_s14 + $0xc34] ss:$8 sps:$4 sm:$0xff]  }
 0x1ce   : > { %11066 = vmatpush2.bf16.msra.mxu0 %v15293_v32  ;;  %v15365_v32 = vld [vmem:[%s17525_s14 + $0xd34] ss:$8 sps:$4 sm:$0xff]  }
 0x1cf   : > { %11107 = vmatpush2.bf16.msra.mxu1 %v15296_v59  ;;  %11067 = vmatprep.subr.bf16.mxu0 %v15301_v60  ;;  %v15360_v59 = vld [vmem:[%s17525_s14 + $0xc30] ss:$8 sps:$4 sm:$0xff]  }
 0x1d0   : > { %11108 = vmatprep.subr.bf16.mxu1 %v15304_v61  ;;  %v15363_v60 = vld [vmem:[%s17525_s14 + $0xd30] ss:$8 sps:$4 sm:$0xff]   ;;  %v15368_v61 = vld [vmem:[%s17525_s14 + $0xc24] ss:$8 sps:$4 sm:$0xff]  }
 0x1d2   : > { %11068 = vmatpush2.bf16.msra.mxu0 %v15299_v62  ;;  %v15371_v62 = vld [vmem:[%s17525_s14 + $0xd24] ss:$8 sps:$4 sm:$0xff]  }
 0x1d3   : > { %11109 = vmatpush2.bf16.msra.mxu1 %v15302_v0  ;;  %11069 = vmatprep.subr.bf16.mxu0 %v15307_v1  ;;  %v15366_v0 = vld [vmem:[%s17525_s14 + $0xc20] ss:$8 sps:$4 sm:$0xff]  }
 0x1d4   : > { %11110 = vmatprep.subr.bf16.mxu1 %v15310_v2  ;;  %v15369_v1 = vld [vmem:[%s17525_s14 + $0xd20] ss:$8 sps:$4 sm:$0xff]   ;;  %v15374_v2 = vld [vmem:[%s17525_s14 + $0xc14] ss:$8 sps:$4 sm:$0xff]  }
 0x1d6   : > { %11070 = vmatpush2.bf16.msra.mxu0 %v15305_v3  ;;  %v15377_v3 = vld [vmem:[%s17525_s14 + $0xd14] ss:$8 sps:$4 sm:$0xff]  }
 0x1d7   : > { %11111 = vmatpush2.bf16.msra.mxu1 %v15308_v4  ;;  %11071 = vmatprep.subr.bf16.mxu0 %v15313_v5  ;;  %v15372_v4 = vld [vmem:[%s17525_s14 + $0xc10] ss:$8 sps:$4 sm:$0xff]  }
 0x1d8   : > { %11112 = vmatprep.subr.bf16.mxu1 %v15316_v6  ;;  %v15375_v5 = vld [vmem:[%s17525_s14 + $0xd10] ss:$8 sps:$4 sm:$0xff]   ;;  %v15380_v6 = vld [vmem:[%s17525_s14 + $0xc04] ss:$8 sps:$4 sm:$0xff]  }
 0x1da   : > { %11072 = vmatpush2.bf16.msra.mxu0 %v15311_v8  ;;  %v15383_v8 = vld [vmem:[%s17525_s14 + $0xd04] ss:$8 sps:$4 sm:$0xff]  }
 0x1db   : > { %11113 = vmatpush2.bf16.msra.mxu1 %v15314_v9  ;;  %11073 = vmatprep.subr.bf16.mxu0 %v15319_v36  ;;  %v15378_v9 = vld [vmem:[%s17525_s14 + $0xc00] ss:$8 sps:$4 sm:$0xff]  }
 0x1dc   : > { %11114 = vmatprep.subr.bf16.mxu1 %v15322_v10  ;;  %v15381_v36 = vld [vmem:[%s17525_s14 + $0xd00] ss:$8 sps:$4 sm:$0xff]   ;;  %v15386_v10 = vld [vmem:[%s17525_s14 + $0xcf4] ss:$8 sps:$4 sm:$0xff]  }
 0x1de   : > { %11074 = vmatpush2.bf16.msra.mxu0 %v15317_v12  ;;  %v15389_v12 = vld [vmem:[%s17525_s14 + $0xdf4] ss:$8 sps:$4 sm:$0xff]  }
 0x1df   : > { %11115 = vmatpush2.bf16.msra.mxu1 %v15320_v13  ;;  %11075 = vmatprep.subr.bf16.mxu0 %v15325_v14  ;;  %v15384_v13 = vld [vmem:[%s17525_s14 + $0xcf0] ss:$8 sps:$4 sm:$0xff]  }
 0x1e0   : > { %11116 = vmatprep.subr.bf16.mxu1 %v15328_v15  ;;  %v15387_v14 = vld [vmem:[%s17525_s14 + $0xdf0] ss:$8 sps:$4 sm:$0xff]   ;;  %v15392_v15 = vld [vmem:[%s17525_s14 + $0xce4] ss:$8 sps:$4 sm:$0xff]  }
 0x1e2   : > { %11076 = vmatpush2.bf16.msra.mxu0 %v15323_v17  ;;  %v15395_v17 = vld [vmem:[%s17525_s14 + $0xde4] ss:$8 sps:$4 sm:$0xff]  }
 0x1e3   : > { %11117 = vmatpush2.bf16.msra.mxu1 %v15326_v18  ;;  %11077 = vmatprep.subr.bf16.mxu0 %v15331_v19  ;;  %v15390_v18 = vld [vmem:[%s17525_s14 + $0xce0] ss:$8 sps:$4 sm:$0xff]  }
 0x1e4   : > { %11118 = vmatprep.subr.bf16.mxu1 %v15334_v20  ;;  %v15393_v19 = vld [vmem:[%s17525_s14 + $0xde0] ss:$8 sps:$4 sm:$0xff]   ;;  %v15398_v20 = vld [vmem:[%s17525_s14 + $0xcd4] ss:$8 sps:$4 sm:$0xff]  }
 0x1e6   : > { %11078 = vmatpush2.bf16.msra.mxu0 %v15329_v24  ;;  %v15399_v24 = vld [vmem:[%s17525_s14 + $0xdd0] ss:$8 sps:$4 sm:$0xff]  }
 0x1e7   : > { %11119 = vmatpush2.bf16.msra.mxu1 %v15332_v58  ;;  %11129 = vmatprep.subr.bf16.mxu0 %v15338_v25  ;;  %v15404_v58 = vld [vmem:[%s17525_s14 + $0xcc4] ss:$8 sps:$4 sm:$0xff]  }
 0x1e8   : > { %11170 = vmatprep.subr.bf16.mxu1 %v15341_v28  ;;  %v15407_v25 = vld [vmem:[%s17525_s14 + $0xdc4] ss:$8 sps:$4 sm:$0xff]   ;;  %v15402_v28 = vld [vmem:[%s17525_s14 + $0xcc0] ss:$8 sps:$4 sm:$0xff]  }
 0x1e9   : > { %v10835_v38 = vpop.f32.mrf.mxu0  ;;  %11080 = vmatmul.mubr.bf16.vlgmr.msra.gmra.mxu0 %v2053_v23  ;;  %v15396_v23 = vld [vmem:[%s17525_s14 + $0xcd0] ss:$8 sps:$4 sm:$0xff]  }
 0x1ea   : > { %v10876_v39 = vpop.f32.mrf.mxu1  ;;  %11121 = vmatmul.mubr.bf16.vlgmr.msra.gmra.mxu1 %v2069_v31  ;;  %v10836_v30 = vadd.f32 %v10835_v38, %v17941_v21  ;;  %11130 = vmatpush1.bf16.msra.mxu0 %v15336_v7  ;;  %v15405_v7 = vld [vmem:[%s17525_s14 + $0xdc0] ss:$8 sps:$4 sm:$0xff]   ;;  %v15408_v31 = vld [vmem:[%s17525_s14 + $0xcb0] ss:$8 sps:$4 sm:$0xff]  }
 0x1eb   : > { %11171 = vmatpush1.bf16.msra.mxu1 %v15339_v63  ;;  %v10837_v40 = vpop.f32.mrf.mxu0  ;;  %11131 = vmatprep.subr.bf16.mxu0 %v15344_v57  ;;  %v15410_v63 = vld [vmem:[%s17525_s14 + $0xcb4] ss:$8 sps:$4 sm:$0xff]   ;;  %v15411_v57 = vld [vmem:[%s17525_s14 + $0xdb0] ss:$8 sps:$4 sm:$0xff]   ;;  %v15417_v38 = vld [vmem:[%s17525_s14 + $0xda0] ss:$8 sps:$4 sm:$0xff]  }
 0x1ec   : > { %v10878_v41 = vpop.f32.mrf.mxu1  ;;  %11172 = vmatprep.subr.bf16.mxu1 %v15347_v33  ;;  %v18023_v45 = vadd.f32 %v10876_v39, %v10836_v30  ;;  %v10838_v46 = vadd.f32 %v10837_v40, %v17946_v27  ;;  %11161 = vmatprep.mubr.bf16.mxu0 %v2109_v29  ;;  %v15356_v27 = vld [vmem:[%s17525_s14 + $0xc44] ss:$8 sps:$4 sm:$0xff]   ;;  %v15413_v29 = vld [vmem:[%s17525_s14 + $0xdb4] ss:$8 sps:$4 sm:$0xff]  }
 0x1ed   : > { %11202 = vmatprep.mubr.bf16.mxu1 %v2119_v37  ;;  %v10839_v21 = vpop.f32.mrf.mxu0  ;;  %v15416_v33 = vld [vmem:[%s17525_s14 + $0xca4] ss:$8 sps:$4 sm:$0xff]   ;;  %v15414_v37 = vld [vmem:[%s17525_s14 + $0xca0] ss:$8 sps:$4 sm:$0xff]   ;;  %v15422_v39 = vld [vmem:[%s17525_s14 + $0xc94] ss:$8 sps:$4 sm:$0xff]  }
 0x1ee   : > { %v10880_v49 = vpop.f32.mrf.mxu1  ;;  %v18028_v51 = vadd.f32 %v10878_v41, %v10838_v46  ;;  %11132 = vmatpush1.bf16.msra.mxu0 %v15342_v34  ;;  %v15419_v34 = vld [vmem:[%s17525_s14 + $0xda4] ss:$8 sps:$4 sm:$0xff]   ;;  %v15425_v30 = vld [vmem:[%s17525_s14 + $0xd94] ss:$8 sps:$4 sm:$0xff]   ;;  %v15423_v41 = vld [vmem:[%s17525_s14 + $0xd90] ss:$8 sps:$4 sm:$0xff]  }
 0x1ef   : > { %11173 = vmatpush1.bf16.msra.mxu1 %v15345_v35  ;;  %v10840_v52 = vpop.f32.mrf.mxu0  ;;  %11133 = vmatprep.subr.bf16.mxu0 %v15350_v42  ;;  %v2072_v35 = vcombine.high %v17991_v11, %v17991_v11  ;;  %v15420_v11 = vld [vmem:[%s17525_s14 + $0xc90] ss:$8 sps:$4 sm:$0xff]   ;;  %v15428_v42 = vld [vmem:[%s17525_s14 + $0xc84] ss:$8 sps:$4 sm:$0xff]   ;;  %v15429_v21 = vld [vmem:[%s17525_s14 + $0xd80] ss:$8 sps:$4 sm:$0xff]  }
 0x1f0   : > { %v10881_v26 = vpop.f32.mrf.mxu1  ;;  %11174 = vmatprep.subr.bf16.mxu1 %v15353_v43  ;;  %v15431_v43 = vld [vmem:[%s17525_s14 + $0xd84] ss:$8 sps:$4 sm:$0xff]   ;;  %v15434_v49 = vld [vmem:[%s17525_s14 + $0xe74] ss:$8 sps:$4 sm:$0xff]  }
 0x1f1   : > { %v18079_v40 = vrot.slane %v2072_v35, %v17594_v50  ;;  %v15437_v52 = vld [vmem:[%s17525_s14 + $0xf74] ss:$8 sps:$4 sm:$0xff]   ;;  %v15432_v26 = vld [vmem:[%s17525_s14 + $0xe70] ss:$8 sps:$4 sm:$0xff]  }
 0x1f2   : > { %11134 = vmatpush1.bf16.msra.mxu0 %v15348_v47  ;;  %v2095_v47 = vrot.slane %v17999_v16, %v17594_v50  ;;  %v15440_v16 = vld [vmem:[%s17525_s14 + $0xe64] ss:$8 sps:$4 sm:$0xff]   ;;  %v15485_v35 = vld [vmem:[%s17525_s14 + $0xff4] ss:$8 sps:$4 sm:$0xff]  }
 0x1f3   : > { %11175 = vmatpush1.bf16.msra.mxu1 %v15351_v48  ;;  %11135 = vmatprep.subr.bf16.mxu0 %v15356_v27  ;;  %v2088_v46 = vcombine.high %v18079_v40, %v18079_v40  ;;  %v15426_v48 = vld [vmem:[%s17525_s14 + $0xc80] ss:$8 sps:$4 sm:$0xff]   ;;  %v15435_v27 = vld [vmem:[%s17525_s14 + $0xf70] ss:$8 sps:$4 sm:$0xff]  }
 0x1f4   : > { %11176 = vmatprep.subr.bf16.mxu1 %v15359_v53 }
 0x1f5   : > { %v2116_v53 = vrot.slane %v2088_v46, %v17594_v50  ;;  %v15492_v46 = vld [vmem:[%s17525_s14 + $0xed0] ss:$8 sps:$4 sm:$0xff]  }
 0x1f6   : > { %11136 = vmatpush1.bf16.msra.mxu0 %v15354_v54  ;;  %v2117_v54 = vcombine.high %v2095_v47, %v2095_v47 }
 0x1f7   : > { %11177 = vmatpush1.bf16.msra.mxu1 %v15357_v55  ;;  %11137 = vmatprep.subr.bf16.mxu0 %v15362_v56  ;;  %v15443_v55 = vld [vmem:[%s17525_s14 + $0xf64] ss:$8 sps:$4 sm:$0xff]   ;;  %v15438_v56 = vld [vmem:[%s17525_s14 + $0xe60] ss:$8 sps:$4 sm:$0xff]  }
 0x1f8   : > { %11178 = vmatprep.subr.bf16.mxu1 %v15365_v32  ;;  %v15441_v32 = vld [vmem:[%s17525_s14 + $0xf60] ss:$8 sps:$4 sm:$0xff]  }
 0x1fa   : > { %11138 = vmatpush1.bf16.msra.mxu0 %v15360_v59  ;;  %v2120_v59 = vcombine.high %v2116_v53, %v2116_v53 }
 0x1fb   : > { %11179 = vmatpush1.bf16.msra.mxu1 %v15363_v60  ;;  %11139 = vmatprep.subr.bf16.mxu0 %v15368_v61 }
 0x1fc   : > { %11180 = vmatprep.subr.bf16.mxu1 %v15371_v62 }
 0x1fe   : > { %11140 = vmatpush1.bf16.msra.mxu0 %v15366_v0 }
 0x1ff   : > { %11181 = vmatpush1.bf16.msra.mxu1 %v15369_v1  ;;  %11141 = vmatprep.subr.bf16.mxu0 %v15374_v2  ;;  %v15446_v2 = vld [vmem:[%s17525_s14 + $0xe54] ss:$8 sps:$4 sm:$0xff]  }
 0x200   : > { %11182 = vmatprep.subr.bf16.mxu1 %v15377_v3  ;;  %v15449_v3 = vld [vmem:[%s17525_s14 + $0xf54] ss:$8 sps:$4 sm:$0xff]  }
 0x202   : > { %11142 = vmatpush1.bf16.msra.mxu0 %v15372_v4 }
 0x203   : > { %11183 = vmatpush1.bf16.msra.mxu1 %v15375_v5  ;;  %11143 = vmatprep.subr.bf16.mxu0 %v15380_v6  ;;  %v15444_v6 = vld [vmem:[%s17525_s14 + $0xe50] ss:$8 sps:$4 sm:$0xff]  }
 0x204   : > { %11184 = vmatprep.subr.bf16.mxu1 %v15383_v8  ;;  %v15447_v8 = vld [vmem:[%s17525_s14 + $0xf50] ss:$8 sps:$4 sm:$0xff]  }
 0x206   : > { %11144 = vmatpush1.bf16.msra.mxu0 %v15378_v9 }
 0x207   : > { %11185 = vmatpush1.bf16.msra.mxu1 %v15381_v36  ;;  %11145 = vmatprep.subr.bf16.mxu0 %v15386_v10 }
 0x208   : > { %11186 = vmatprep.subr.bf16.mxu1 %v15389_v12 }
 0x20a   : > { %11146 = vmatpush2.bf16.msra.mxu0 %v15384_v13  ;;  %v15455_v13 = vld [vmem:[%s17525_s14 + $0xf44] ss:$8 sps:$4 sm:$0xff]  }
 0x20b   : > { %11187 = vmatpush2.bf16.msra.mxu1 %v15387_v14  ;;  %11147 = vmatprep.subr.bf16.mxu0 %v15392_v15  ;;  %v15450_v14 = vld [vmem:[%s17525_s14 + $0xe40] ss:$8 sps:$4 sm:$0xff]  }
 0x20c   : > { %11188 = vmatprep.subr.bf16.mxu1 %v15395_v17  ;;  %v15453_v15 = vld [vmem:[%s17525_s14 + $0xf40] ss:$8 sps:$4 sm:$0xff]   ;;  %v15458_v17 = vld [vmem:[%s17525_s14 + $0xe34] ss:$8 sps:$4 sm:$0xff]  }
 0x20e   : > { %11148 = vmatpush2.bf16.msra.mxu0 %v15390_v18  ;;  %v15461_v18 = vld [vmem:[%s17525_s14 + $0xf34] ss:$8 sps:$4 sm:$0xff]  }
 0x20f   : > { %11189 = vmatpush2.bf16.msra.mxu1 %v15393_v19  ;;  %11149 = vmatprep.subr.bf16.mxu0 %v15398_v20  ;;  %v15456_v19 = vld [vmem:[%s17525_s14 + $0xe30] ss:$8 sps:$4 sm:$0xff]  }
 0x210   : > { %11190 = vmatprep.subr.bf16.mxu1 %v15401_v22  ;;  %v15459_v20 = vld [vmem:[%s17525_s14 + $0xf30] ss:$8 sps:$4 sm:$0xff]   ;;  %v15464_v22 = vld [vmem:[%s17525_s14 + $0xe24] ss:$8 sps:$4 sm:$0xff]  }
 0x212   : > { %11150 = vmatpush2.bf16.msra.mxu0 %v15396_v23  ;;  %v15467_v23 = vld [vmem:[%s17525_s14 + $0xf24] ss:$8 sps:$4 sm:$0xff]  }
 0x213   : > { %11191 = vmatpush2.bf16.msra.mxu1 %v15399_v24  ;;  %11151 = vmatprep.subr.bf16.mxu0 %v15404_v58  ;;  %v15462_v24 = vld [vmem:[%s17525_s14 + $0xe20] ss:$8 sps:$4 sm:$0xff]  }
 0x214   : > { %11192 = vmatprep.subr.bf16.mxu1 %v15407_v25  ;;  %v15465_v58 = vld [vmem:[%s17525_s14 + $0xf20] ss:$8 sps:$4 sm:$0xff]   ;;  %v15470_v25 = vld [vmem:[%s17525_s14 + $0xe14] ss:$8 sps:$4 sm:$0xff]  }
 0x216   : > { %11152 = vmatpush2.bf16.msra.mxu0 %v15402_v28  ;;  %v15473_v28 = vld [vmem:[%s17525_s14 + $0xf14] ss:$8 sps:$4 sm:$0xff]  }
 0x217   : > { %11193 = vmatpush2.bf16.msra.mxu1 %v15405_v7  ;;  %11153 = vmatprep.subr.bf16.mxu0 %v15410_v63  ;;  %v15468_v7 = vld [vmem:[%s17525_s14 + $0xe10] ss:$8 sps:$4 sm:$0xff]  }
 0x218   : > { %11194 = vmatprep.subr.bf16.mxu1 %v15413_v29  ;;  %v15471_v63 = vld [vmem:[%s17525_s14 + $0xf10] ss:$8 sps:$4 sm:$0xff]   ;;  %v15476_v29 = vld [vmem:[%s17525_s14 + $0xe04] ss:$8 sps:$4 sm:$0xff]  }
 0x21a   : > { %11154 = vmatpush2.bf16.msra.mxu0 %v15408_v31  ;;  %v15479_v31 = vld [vmem:[%s17525_s14 + $0xf04] ss:$8 sps:$4 sm:$0xff]  }
 0x21b   : > { %11195 = vmatpush2.bf16.msra.mxu1 %v15411_v57  ;;  %11155 = vmatprep.subr.bf16.mxu0 %v15416_v33  ;;  %v15474_v57 = vld [vmem:[%s17525_s14 + $0xe00] ss:$8 sps:$4 sm:$0xff]  }
 0x21c   : > { %11196 = vmatprep.subr.bf16.mxu1 %v15419_v34  ;;  %v15477_v33 = vld [vmem:[%s17525_s14 + $0xf00] ss:$8 sps:$4 sm:$0xff]   ;;  %v15482_v34 = vld [vmem:[%s17525_s14 + $0xef4] ss:$8 sps:$4 sm:$0xff]  }
 0x21e   : > { %11156 = vmatpush2.bf16.msra.mxu0 %v15414_v37  ;;  %v15480_v37 = vld [vmem:[%s17525_s14 + $0xef0] ss:$8 sps:$4 sm:$0xff]  }
 0x21f   : > { %11197 = vmatpush2.bf16.msra.mxu1 %v15417_v38  ;;  %11157 = vmatprep.subr.bf16.mxu0 %v15422_v39  ;;  %v15483_v38 = vld [vmem:[%s17525_s14 + $0xff0] ss:$8 sps:$4 sm:$0xff]   ;;  %v15488_v39 = vld [vmem:[%s17525_s14 + $0xee4] ss:$8 sps:$4 sm:$0xff]  }
 0x220   : > { %11198 = vmatprep.subr.bf16.mxu1 %v15425_v30  ;;  %v15491_v30 = vld [vmem:[%s17525_s14 + $0xfe4] ss:$8 sps:$4 sm:$0xff]  }
 0x222   : > { %11158 = vmatpush2.bf16.msra.mxu0 %v15420_v11  ;;  %v15486_v11 = vld [vmem:[%s17525_s14 + $0xee0] ss:$8 sps:$4 sm:$0xff]  }
 0x223   : > { %11199 = vmatpush2.bf16.msra.mxu1 %v15423_v41  ;;  %11159 = vmatprep.subr.bf16.mxu0 %v15428_v42  ;;  %v15489_v41 = vld [vmem:[%s17525_s14 + $0xfe0] ss:$8 sps:$4 sm:$0xff]   ;;  %v15494_v42 = vld [vmem:[%s17525_s14 + $0xed4] ss:$8 sps:$4 sm:$0xff]  }
 0x224   : > { %11200 = vmatprep.subr.bf16.mxu1 %v15431_v43  ;;  %v15497_v43 = vld [vmem:[%s17525_s14 + $0xfd4] ss:$8 sps:$4 sm:$0xff]  }
 0x226   : > { %11160 = vmatpush2.bf16.msra.mxu0 %v15426_v48  ;;  %v15500_v48 = vld [vmem:[%s17525_s14 + $0xec4] ss:$8 sps:$4 sm:$0xff]  }
 0x227   : > { %11201 = vmatpush2.bf16.msra.mxu1 %v15429_v21  ;;  %11211 = vmatprep.subr.bf16.mxu0 %v15434_v49  ;;  %v15503_v21 = vld [vmem:[%s17525_s14 + $0xfc4] ss:$8 sps:$4 sm:$0xff]   ;;  %v15498_v49 = vld [vmem:[%s17525_s14 + $0xec0] ss:$8 sps:$4 sm:$0xff]  }
 0x228   : > { %11252 = vmatprep.subr.bf16.mxu1 %v15437_v52  ;;  %v15501_v52 = vld [vmem:[%s17525_s14 + $0xfc0] ss:$8 sps:$4 sm:$0xff]  }
 0x229   : > { %v10917_v60 = vpop.f32.mrf.mxu0  ;;  %11162 = vmatmul.mubr.bf16.vlgmr.msra.gmra.mxu0 %v2095_v47  ;;  %v15495_v47 = vld [vmem:[%s17525_s14 + $0xfd0] ss:$8 sps:$4 sm:$0xff]  }
 0x22a   : > { %v10958_v61 = vpop.f32.mrf.mxu1  ;;  %11203 = vmatmul.mubr.bf16.vlgmr.msra.gmra.mxu1 %v2117_v54  ;;  %v10918_v62 = vadd.f32 %v10917_v60, %v18023_v45  ;;  %11212 = vmatpush1.bf16.msra.mxu0 %v15432_v26  ;;  %v15506_v26 = vld [vmem:[%s17525_s14 + $0xeb4] ss:$8 sps:$4 sm:$0xff]   ;;  %v15507_v54 = vld [vmem:[%s17525_s14 + $0xfb0] ss:$8 sps:$4 sm:$0xff]  }
 0x22b   : > { %11253 = vmatpush1.bf16.msra.mxu1 %v15435_v27  ;;  %v10919_v0 = vpop.f32.mrf.mxu0  ;;  %11213 = vmatprep.subr.bf16.mxu0 %v15440_v16  ;;  %v15509_v27 = vld [vmem:[%s17525_s14 + $0xfb4] ss:$8 sps:$4 sm:$0xff]   ;;  %v15512_v16 = vld [vmem:[%s17525_s14 + $0xea4] ss:$8 sps:$4 sm:$0xff]  }
 0x22c   : > { %v10960_v1 = vpop.f32.mrf.mxu1  ;;  %11254 = vmatprep.subr.bf16.mxu1 %v15443_v55  ;;  %v18103_v4 = vadd.f32 %v10958_v61, %v10918_v62  ;;  %v10920_v5 = vadd.f32 %v10919_v0, %v18028_v51  ;;  %11243 = vmatprep.mubr.bf16.mxu0 %v2116_v53  ;;  %v15452_v51 = vld [vmem:[%s17525_s14 + $0xe44] ss:$8 sps:$4 sm:$0xff]   ;;  %v15504_v53 = vld [vmem:[%s17525_s14 + $0xeb0] ss:$8 sps:$4 sm:$0xff]   ;;  %v15518_v60 = vld [vmem:[%s17525_s14 + $0xe94] ss:$8 sps:$4 sm:$0xff]  }
 0x22d   : > { %11284 = vmatprep.mubr.bf16.mxu1 %v2120_v59  ;;  %v10921_v45 = vpop.f32.mrf.mxu0  ;;  %v15515_v55 = vld [vmem:[%s17525_s14 + $0xfa4] ss:$8 sps:$4 sm:$0xff]   ;;  %v15513_v59 = vld [vmem:[%s17525_s14 + $0xfa0] ss:$8 sps:$4 sm:$0xff]   ;;  %v15521_v61 = vld [vmem:[%s17525_s14 + $0xf94] ss:$8 sps:$4 sm:$0xff]  }
 0x22e   : > { %v10962_v9 = vpop.f32.mrf.mxu1  ;;  %v18108_v36 = vadd.f32 %v10960_v1, %v10920_v5  ;;  %11214 = vmatpush1.bf16.msra.mxu0 %v15438_v56  ;;  %v18153_v56 = vld [vmem:[%s17543_s23 + $0x20] sm:$0xff]  ;;  %v15516_v0 = vld [vmem:[%s17525_s14 + $0xe90] ss:$8 sps:$4 sm:$0xff]  }
 0x22f   : > { %11255 = vmatpush1.bf16.msra.mxu1 %v15441_v32  ;;  %v10922_v10 = vpop.f32.mrf.mxu0  ;;  %11215 = vmatprep.subr.bf16.mxu0 %v15446_v2  ;;  %v15510_v32 = vld [vmem:[%s17525_s14 + $0xea0] ss:$8 sps:$4 sm:$0xff]   ;;  %v18161_v62 = vrot.slane %v18153_v56, %v17594_v50  ;;  %v15519_v1 = vld [vmem:[%s17525_s14 + $0xf90] ss:$8 sps:$4 sm:$0xff]   ;;  %v15524_v2 = vld [vmem:[%s17525_s14 + $0xe84] ss:$8 sps:$4 sm:$0xff]  }
 0x230   : > { %v10963_v12 = vpop.f32.mrf.mxu1  ;;  %11256 = vmatprep.subr.bf16.mxu1 %v15449_v3  ;;  %v15527_v3 = vld [vmem:[%s17525_s14 + $0xf84] ss:$8 sps:$4 sm:$0xff]   ;;  %v15525_v45 = vld [vmem:[%s17525_s14 + $0xf80] ss:$8 sps:$4 sm:$0xff]   ;;  %v15531_v9 = vld [vmem:[%s17525_s14 + $0x1074] ss:$8 sps:$4 sm:$0xff]  }
 0x231   : > { %v2136_v5 = vcombine.high %v18161_v62, %v18161_v62  ;;  %v15534_v10 = vld [vmem:[%s17525_s14 + $0x1174] ss:$8 sps:$4 sm:$0xff]   ;;  %v15529_v12 = vld [vmem:[%s17525_s14 + $0x1070] ss:$8 sps:$4 sm:$0xff]  }
 0x232   : > { %11216 = vmatpush1.bf16.msra.mxu0 %v15444_v6  ;;  %v2102_v6 = vrot.slane %v18079_v40, %v17594_v50  ;;  %v15537_v40 = vld [vmem:[%s17525_s14 + $0x1064] ss:$8 sps:$4 sm:$0xff]  }
 0x233   : > { %11257 = vmatpush1.bf16.msra.mxu1 %v15447_v8  ;;  %11217 = vmatprep.subr.bf16.mxu0 %v15452_v51  ;;  %v15522_v8 = vld [vmem:[%s17525_s14 + $0xe80] ss:$8 sps:$4 sm:$0xff]   ;;  %v15532_v51 = vld [vmem:[%s17525_s14 + $0x1170] ss:$8 sps:$4 sm:$0xff]  }
 0x234   : > { %11258 = vmatprep.subr.bf16.mxu1 %v15455_v13  ;;  %v2158_v13 = vrot.slane %v2136_v5, %v17594_v50  ;;  %v15594_v5 = vld [vmem:[%s17525_s14 + $0x11d4] ss:$8 sps:$4 sm:$0xff]  }
 0x236   : > { %11218 = vmatpush1.bf16.msra.mxu0 %v15450_v14  ;;  %v2118_v14 = vcombine.high %v2102_v6, %v2102_v6 }
 0x237   : > { %11259 = vmatpush1.bf16.msra.mxu1 %v15453_v15  ;;  %11219 = vmatprep.subr.bf16.mxu0 %v15458_v17  ;;  %v15540_v15 = vld [vmem:[%s17525_s14 + $0x1164] ss:$8 sps:$4 sm:$0xff]   ;;  %v15535_v17 = vld [vmem:[%s17525_s14 + $0x1060] ss:$8 sps:$4 sm:$0xff]  }
 0x238   : > { %11260 = vmatprep.subr.bf16.mxu1 %v15461_v18  ;;  %v15538_v18 = vld [vmem:[%s17525_s14 + $0x1160] ss:$8 sps:$4 sm:$0xff]  }
 0x23a   : > { %11220 = vmatpush1.bf16.msra.mxu0 %v15456_v19  ;;  %v2168_v19 = vcombine.high %v2158_v13, %v2158_v13 }
 0x23b   : > { %11261 = vmatpush1.bf16.msra.mxu1 %v15459_v20  ;;  %11221 = vmatprep.subr.bf16.mxu0 %v15464_v22 }
 0x23c   : > { %11262 = vmatprep.subr.bf16.mxu1 %v15467_v23 }
 0x23e   : > { %11222 = vmatpush1.bf16.msra.mxu0 %v15462_v24 }
 0x23f   : > { %11263 = vmatpush1.bf16.msra.mxu1 %v15465_v58  ;;  %11223 = vmatprep.subr.bf16.mxu0 %v15470_v25  ;;  %v15543_v25 = vld [vmem:[%s17525_s14 + $0x1054] ss:$8 sps:$4 sm:$0xff]  }
 0x240   : > { %11264 = vmatprep.subr.bf16.mxu1 %v15473_v28  ;;  %v15546_v28 = vld [vmem:[%s17525_s14 + $0x1154] ss:$8 sps:$4 sm:$0xff]  }
 0x242   : > { %11224 = vmatpush1.bf16.msra.mxu0 %v15468_v7 }
 0x243   : > { %11265 = vmatpush1.bf16.msra.mxu1 %v15471_v63  ;;  %11225 = vmatprep.subr.bf16.mxu0 %v15476_v29  ;;  %v15541_v29 = vld [vmem:[%s17525_s14 + $0x1050] ss:$8 sps:$4 sm:$0xff]  }
 0x244   : > { %11266 = vmatprep.subr.bf16.mxu1 %v15479_v31  ;;  %v15544_v31 = vld [vmem:[%s17525_s14 + $0x1150] ss:$8 sps:$4 sm:$0xff]  }
 0x246   : > { %11226 = vmatpush1.bf16.msra.mxu0 %v15474_v57 }
 0x247   : > { %11267 = vmatpush1.bf16.msra.mxu1 %v15477_v33  ;;  %11227 = vmatprep.subr.bf16.mxu0 %v15482_v34 }
 0x248   : > { %11268 = vmatprep.subr.bf16.mxu1 %v15485_v35 }
 0x24a   : > { %11228 = vmatpush2.bf16.msra.mxu0 %v15480_v37  ;;  %v15552_v37 = vld [vmem:[%s17525_s14 + $0x1144] ss:$8 sps:$4 sm:$0xff]  }
 0x24b   : > { %11269 = vmatpush2.bf16.msra.mxu1 %v15483_v38  ;;  %11229 = vmatprep.subr.bf16.mxu0 %v15488_v39  ;;  %v15547_v38 = vld [vmem:[%s17525_s14 + $0x1040] ss:$8 sps:$4 sm:$0xff]  }
 0x24c   : > { %11270 = vmatprep.subr.bf16.mxu1 %v15491_v30  ;;  %v15550_v39 = vld [vmem:[%s17525_s14 + $0x1140] ss:$8 sps:$4 sm:$0xff]   ;;  %v15555_v30 = vld [vmem:[%s17525_s14 + $0x1034] ss:$8 sps:$4 sm:$0xff]  }
 0x24e   : > { %11230 = vmatpush2.bf16.msra.mxu0 %v15486_v11  ;;  %v15558_v11 = vld [vmem:[%s17525_s14 + $0x1134] ss:$8 sps:$4 sm:$0xff]  }
 0x24f   : > { %11271 = vmatpush2.bf16.msra.mxu1 %v15489_v41  ;;  %11231 = vmatprep.subr.bf16.mxu0 %v15494_v42  ;;  %v15553_v41 = vld [vmem:[%s17525_s14 + $0x1030] ss:$8 sps:$4 sm:$0xff]  }
 0x250   : > { %11272 = vmatprep.subr.bf16.mxu1 %v15497_v43  ;;  %v15556_v42 = vld [vmem:[%s17525_s14 + $0x1130] ss:$8 sps:$4 sm:$0xff]   ;;  %v15561_v43 = vld [vmem:[%s17525_s14 + $0x1024] ss:$8 sps:$4 sm:$0xff]  }
 0x252   : > { %11232 = vmatpush2.bf16.msra.mxu0 %v15492_v46  ;;  %v15564_v46 = vld [vmem:[%s17525_s14 + $0x1124] ss:$8 sps:$4 sm:$0xff]  }
 0x253   : > { %11273 = vmatpush2.bf16.msra.mxu1 %v15495_v47  ;;  %11233 = vmatprep.subr.bf16.mxu0 %v15500_v48  ;;  %v15559_v47 = vld [vmem:[%s17525_s14 + $0x1020] ss:$8 sps:$4 sm:$0xff]  }
 0x254   : > { %11274 = vmatprep.subr.bf16.mxu1 %v15503_v21  ;;  %v15562_v48 = vld [vmem:[%s17525_s14 + $0x1120] ss:$8 sps:$4 sm:$0xff]   ;;  %v15567_v21 = vld [vmem:[%s17525_s14 + $0x1014] ss:$8 sps:$4 sm:$0xff]  }
 0x256   : > { %11234 = vmatpush2.bf16.msra.mxu0 %v15498_v49  ;;  %v15570_v49 = vld [vmem:[%s17525_s14 + $0x1114] ss:$8 sps:$4 sm:$0xff]  }
 0x257   : > { %11275 = vmatpush2.bf16.msra.mxu1 %v15501_v52  ;;  %11235 = vmatprep.subr.bf16.mxu0 %v15506_v26  ;;  %v15565_v52 = vld [vmem:[%s17525_s14 + $0x1010] ss:$8 sps:$4 sm:$0xff]  }
 0x258   : > { %11276 = vmatprep.subr.bf16.mxu1 %v15509_v27  ;;  %v15568_v26 = vld [vmem:[%s17525_s14 + $0x1110] ss:$8 sps:$4 sm:$0xff]   ;;  %v15573_v27 = vld [vmem:[%s17525_s14 + $0x1004] ss:$8 sps:$4 sm:$0xff]  }
 0x25a   : > { %11236 = vmatpush2.bf16.msra.mxu0 %v15504_v53  ;;  %v15576_v53 = vld [vmem:[%s17525_s14 + $0x1104] ss:$8 sps:$4 sm:$0xff]  }
 0x25b   : > { %11277 = vmatpush2.bf16.msra.mxu1 %v15507_v54  ;;  %11237 = vmatprep.subr.bf16.mxu0 %v15512_v16  ;;  %v15571_v54 = vld [vmem:[%s17525_s14 + $0x1000] ss:$8 sps:$4 sm:$0xff]  }
 0x25c   : > { %11278 = vmatprep.subr.bf16.mxu1 %v15515_v55  ;;  %v15574_v16 = vld [vmem:[%s17525_s14 + $0x1100] ss:$8 sps:$4 sm:$0xff]   ;;  %v15579_v55 = vld [vmem:[%s17525_s14 + $0x10f4] ss:$8 sps:$4 sm:$0xff]  }
 0x25e   : > { %11238 = vmatpush2.bf16.msra.mxu0 %v15510_v32  ;;  %v15582_v32 = vld [vmem:[%s17525_s14 + $0x11f4] ss:$8 sps:$4 sm:$0xff]  }
 0x25f   : > { %11279 = vmatpush2.bf16.msra.mxu1 %v15513_v59  ;;  %11239 = vmatprep.subr.bf16.mxu0 %v15518_v60  ;;  %v15577_v59 = vld [vmem:[%s17525_s14 + $0x10f0] ss:$8 sps:$4 sm:$0xff]  }
 0x260   : > { %11280 = vmatprep.subr.bf16.mxu1 %v15521_v61  ;;  %v15580_v60 = vld [vmem:[%s17525_s14 + $0x11f0] ss:$8 sps:$4 sm:$0xff]   ;;  %v15585_v61 = vld [vmem:[%s17525_s14 + $0x10e4] ss:$8 sps:$4 sm:$0xff]  }
 0x262   : > { %11240 = vmatpush2.bf16.msra.mxu0 %v15516_v0  ;;  %v15588_v0 = vld [vmem:[%s17525_s14 + $0x11e4] ss:$8 sps:$4 sm:$0xff]  }
 0x263   : > { %11281 = vmatpush2.bf16.msra.mxu1 %v15519_v1  ;;  %11241 = vmatprep.subr.bf16.mxu0 %v15524_v2  ;;  %v15583_v1 = vld [vmem:[%s17525_s14 + $0x10e0] ss:$8 sps:$4 sm:$0xff]  }
 0x264   : > { %11282 = vmatprep.subr.bf16.mxu1 %v15527_v3  ;;  %v15586_v2 = vld [vmem:[%s17525_s14 + $0x11e0] ss:$8 sps:$4 sm:$0xff]   ;;  %v15591_v3 = vld [vmem:[%s17525_s14 + $0x10d4] ss:$8 sps:$4 sm:$0xff]  }
 0x266   : > { %11242 = vmatpush2.bf16.msra.mxu0 %v15522_v8  ;;  %v15592_v8 = vld [vmem:[%s17525_s14 + $0x11d0] ss:$8 sps:$4 sm:$0xff]  }
 0x267   : > { %11283 = vmatpush2.bf16.msra.mxu1 %v15525_v45  ;;  %11293 = vmatprep.subr.bf16.mxu0 %v15531_v9  ;;  %v15597_v45 = vld [vmem:[%s17525_s14 + $0x10c4] ss:$8 sps:$4 sm:$0xff]  }
 0x268   : > { %11334 = vmatprep.subr.bf16.mxu1 %v15534_v10  ;;  %v15600_v9 = vld [vmem:[%s17525_s14 + $0x11c4] ss:$8 sps:$4 sm:$0xff]   ;;  %v15595_v10 = vld [vmem:[%s17525_s14 + $0x10c0] ss:$8 sps:$4 sm:$0xff]  }
 0x269   : > { %v10999_v20 = vpop.f32.mrf.mxu0  ;;  %11244 = vmatmul.mubr.bf16.vlgmr.msra.gmra.mxu0 %v2102_v6  ;;  %v15589_v6 = vld [vmem:[%s17525_s14 + $0x10d0] ss:$8 sps:$4 sm:$0xff]  }
 0x26a   : > { %v11040_v22 = vpop.f32.mrf.mxu1  ;;  %11285 = vmatmul.mubr.bf16.vlgmr.msra.gmra.mxu1 %v2118_v14  ;;  %v11000_v23 = vadd.f32 %v10999_v20, %v18103_v4  ;;  %11294 = vmatpush1.bf16.msra.mxu0 %v15529_v12  ;;  %v15598_v12 = vld [vmem:[%s17525_s14 + $0x11c0] ss:$8 sps:$4 sm:$0xff]   ;;  %v15601_v14 = vld [vmem:[%s17525_s14 + $0x10b0] ss:$8 sps:$4 sm:$0xff]  }
 0x26b   : > { %11335 = vmatpush1.bf16.msra.mxu1 %v15532_v51  ;;  %v11001_v24 = vpop.f32.mrf.mxu0  ;;  %11295 = vmatprep.subr.bf16.mxu0 %v15537_v40  ;;  %v15603_v51 = vld [vmem:[%s17525_s14 + $0x10b4] ss:$8 sps:$4 sm:$0xff]   ;;  %v15604_v40 = vld [vmem:[%s17525_s14 + $0x11b0] ss:$8 sps:$4 sm:$0xff]   ;;  %v15610_v20 = vld [vmem:[%s17525_s14 + $0x11a0] ss:$8 sps:$4 sm:$0xff]  }
 0x26c   : > { %v11042_v58 = vpop.f32.mrf.mxu1  ;;  %11336 = vmatprep.subr.bf16.mxu1 %v15540_v15  ;;  %v18185_v7 = vadd.f32 %v11040_v22, %v11000_v23  ;;  %v11002_v63 = vadd.f32 %v11001_v24, %v18108_v36  ;;  %11325 = vmatprep.mubr.bf16.mxu0 %v2158_v13  ;;  %v15549_v36 = vld [vmem:[%s17525_s14 + $0x1044] ss:$8 sps:$4 sm:$0xff]   ;;  %v15606_v13 = vld [vmem:[%s17525_s14 + $0x11b4] ss:$8 sps:$4 sm:$0xff]  }
 0x26d   : > { %11366 = vmatprep.mubr.bf16.mxu1 %v2168_v19  ;;  %v11003_v4 = vpop.f32.mrf.mxu0  ;;  %v15609_v15 = vld [vmem:[%s17525_s14 + $0x10a4] ss:$8 sps:$4 sm:$0xff]   ;;  %v15607_v19 = vld [vmem:[%s17525_s14 + $0x10a0] ss:$8 sps:$4 sm:$0xff]   ;;  %v15615_v22 = vld [vmem:[%s17525_s14 + $0x1094] ss:$8 sps:$4 sm:$0xff]  }
 0x26e   : > { %v11044_v57 = vpop.f32.mrf.mxu1  ;;  %v18190_v33 = vadd.f32 %v11042_v58, %v11002_v63  ;;  %11296 = vmatpush1.bf16.msra.mxu0 %v15535_v17  ;;  %v15612_v17 = vld [vmem:[%s17525_s14 + $0x11a4] ss:$8 sps:$4 sm:$0xff]   ;;  %v15618_v23 = vld [vmem:[%s17525_s14 + $0x1194] ss:$8 sps:$4 sm:$0xff]   ;;  %v15616_v58 = vld [vmem:[%s17525_s14 + $0x1190] ss:$8 sps:$4 sm:$0xff]  }
 0x26f   : > { %11337 = vmatpush1.bf16.msra.mxu1 %v15538_v18  ;;  %v11004_v34 = vpop.f32.mrf.mxu0  ;;  %11297 = vmatprep.subr.bf16.mxu0 %v15543_v25  ;;  %v2121_v18 = vcombine.high %v18153_v56, %v18153_v56  ;;  %v15613_v56 = vld [vmem:[%s17525_s14 + $0x1090] ss:$8 sps:$4 sm:$0xff]   ;;  %v15621_v25 = vld [vmem:[%s17525_s14 + $0x1084] ss:$8 sps:$4 sm:$0xff]   ;;  %v15622_v4 = vld [vmem:[%s17525_s14 + $0x1180] ss:$8 sps:$4 sm:$0xff]  }
 0x270   : > { %v11045_v35 = vpop.f32.mrf.mxu1  ;;  %11338 = vmatprep.subr.bf16.mxu1 %v15546_v28  ;;  %v15624_v28 = vld [vmem:[%s17525_s14 + $0x1184] ss:$8 sps:$4 sm:$0xff]   ;;  %v15627_v57 = vld [vmem:[%s17525_s14 + $0x1274] ss:$8 sps:$4 sm:$0xff]  }
 0x271   : > { %v18241_v24 = vrot.slane %v2121_v18, %v17594_v50  ;;  %v15630_v34 = vld [vmem:[%s17525_s14 + $0x1374] ss:$8 sps:$4 sm:$0xff]   ;;  %v15625_v35 = vld [vmem:[%s17525_s14 + $0x1270] ss:$8 sps:$4 sm:$0xff]  }
 0x272   : > { %11298 = vmatpush1.bf16.msra.mxu0 %v15541_v29  ;;  %v2144_v29 = vrot.slane %v18161_v62, %v17594_v50  ;;  %v15633_v62 = vld [vmem:[%s17525_s14 + $0x1264] ss:$8 sps:$4 sm:$0xff]   ;;  %v15678_v18 = vld [vmem:[%s17525_s14 + $0x13f4] ss:$8 sps:$4 sm:$0xff]  }
 0x273   : > { %11339 = vmatpush1.bf16.msra.mxu1 %v15544_v31  ;;  %11299 = vmatprep.subr.bf16.mxu0 %v15549_v36  ;;  %v2137_v63 = vcombine.high %v18241_v24, %v18241_v24  ;;  %v15619_v31 = vld [vmem:[%s17525_s14 + $0x1080] ss:$8 sps:$4 sm:$0xff]   ;;  %v15628_v36 = vld [vmem:[%s17525_s14 + $0x1370] ss:$8 sps:$4 sm:$0xff]  }
 0x274   : > { %11340 = vmatprep.subr.bf16.mxu1 %v15552_v37 }
 0x275   : > { %v2165_v37 = vrot.slane %v2137_v63, %v17594_v50  ;;  %v15685_v63 = vld [vmem:[%s17525_s14 + $0x12d0] ss:$8 sps:$4 sm:$0xff]  }
 0x276   : > { %11300 = vmatpush1.bf16.msra.mxu0 %v15547_v38  ;;  %v2166_v38 = vcombine.high %v2144_v29, %v2144_v29 }
 0x277   : > { %11341 = vmatpush1.bf16.msra.mxu1 %v15550_v39  ;;  %11301 = vmatprep.subr.bf16.mxu0 %v15555_v30  ;;  %v15636_v39 = vld [vmem:[%s17525_s14 + $0x1364] ss:$8 sps:$4 sm:$0xff]   ;;  %v15631_v30 = vld [vmem:[%s17525_s14 + $0x1260] ss:$8 sps:$4 sm:$0xff]  }
 0x278   : > { %11342 = vmatprep.subr.bf16.mxu1 %v15558_v11  ;;  %v15634_v11 = vld [vmem:[%s17525_s14 + $0x1360] ss:$8 sps:$4 sm:$0xff]  }
 0x27a   : > { %11302 = vmatpush1.bf16.msra.mxu0 %v15553_v41  ;;  %v2169_v41 = vcombine.high %v2165_v37, %v2165_v37 }
 0x27b   : > { %11343 = vmatpush1.bf16.msra.mxu1 %v15556_v42  ;;  %11303 = vmatprep.subr.bf16.mxu0 %v15561_v43 }
 0x27c   : > { %11344 = vmatprep.subr.bf16.mxu1 %v15564_v46 }
 0x27e   : > { %11304 = vmatpush1.bf16.msra.mxu0 %v15559_v47 }
 0x27f   : > { %11345 = vmatpush1.bf16.msra.mxu1 %v15562_v48  ;;  %11305 = vmatprep.subr.bf16.mxu0 %v15567_v21  ;;  %v15639_v21 = vld [vmem:[%s17525_s14 + $0x1254] ss:$8 sps:$4 sm:$0xff]  }
 0x280   : > { %11346 = vmatprep.subr.bf16.mxu1 %v15570_v49  ;;  %v15642_v49 = vld [vmem:[%s17525_s14 + $0x1354] ss:$8 sps:$4 sm:$0xff]  }
 0x282   : > { %11306 = vmatpush1.bf16.msra.mxu0 %v15565_v52 }
 0x283   : > { %11347 = vmatpush1.bf16.msra.mxu1 %v15568_v26  ;;  %11307 = vmatprep.subr.bf16.mxu0 %v15573_v27  ;;  %v15637_v27 = vld [vmem:[%s17525_s14 + $0x1250] ss:$8 sps:$4 sm:$0xff]  }
 0x284   : > { %11348 = vmatprep.subr.bf16.mxu1 %v15576_v53  ;;  %v15640_v53 = vld [vmem:[%s17525_s14 + $0x1350] ss:$8 sps:$4 sm:$0xff]  }
 0x286   : > { %11308 = vmatpush1.bf16.msra.mxu0 %v15571_v54 }
 0x287   : > { %11349 = vmatpush1.bf16.msra.mxu1 %v15574_v16  ;;  %11309 = vmatprep.subr.bf16.mxu0 %v15579_v55 }
 0x288   : > { %11350 = vmatprep.subr.bf16.mxu1 %v15582_v32 }
 0x28a   : > { %11310 = vmatpush2.bf16.msra.mxu0 %v15577_v59  ;;  %v15648_v59 = vld [vmem:[%s17525_s14 + $0x1344] ss:$8 sps:$4 sm:$0xff]  }
 0x28b   : > { %11351 = vmatpush2.bf16.msra.mxu1 %v15580_v60  ;;  %11311 = vmatprep.subr.bf16.mxu0 %v15585_v61  ;;  %v15643_v60 = vld [vmem:[%s17525_s14 + $0x1240] ss:$8 sps:$4 sm:$0xff]  }
 0x28c   : > { %11352 = vmatprep.subr.bf16.mxu1 %v15588_v0  ;;  %v15646_v61 = vld [vmem:[%s17525_s14 + $0x1340] ss:$8 sps:$4 sm:$0xff]   ;;  %v15651_v0 = vld [vmem:[%s17525_s14 + $0x1234] ss:$8 sps:$4 sm:$0xff]  }
 0x28e   : > { %11312 = vmatpush2.bf16.msra.mxu0 %v15583_v1  ;;  %v15654_v1 = vld [vmem:[%s17525_s14 + $0x1334] ss:$8 sps:$4 sm:$0xff]  }
 0x28f   : > { %11353 = vmatpush2.bf16.msra.mxu1 %v15586_v2  ;;  %11313 = vmatprep.subr.bf16.mxu0 %v15591_v3  ;;  %v15649_v2 = vld [vmem:[%s17525_s14 + $0x1230] ss:$8 sps:$4 sm:$0xff]  }
 0x290   : > { %11354 = vmatprep.subr.bf16.mxu1 %v15594_v5  ;;  %v15652_v3 = vld [vmem:[%s17525_s14 + $0x1330] ss:$8 sps:$4 sm:$0xff]   ;;  %v15657_v5 = vld [vmem:[%s17525_s14 + $0x1224] ss:$8 sps:$4 sm:$0xff]  }
 0x292   : > { %11314 = vmatpush2.bf16.msra.mxu0 %v15589_v6  ;;  %v15660_v6 = vld [vmem:[%s17525_s14 + $0x1324] ss:$8 sps:$4 sm:$0xff]  }
 0x293   : > { %11355 = vmatpush2.bf16.msra.mxu1 %v15592_v8  ;;  %11315 = vmatprep.subr.bf16.mxu0 %v15597_v45  ;;  %v15655_v8 = vld [vmem:[%s17525_s14 + $0x1220] ss:$8 sps:$4 sm:$0xff]  }
 0x294   : > { %11356 = vmatprep.subr.bf16.mxu1 %v15600_v9  ;;  %v15658_v45 = vld [vmem:[%s17525_s14 + $0x1320] ss:$8 sps:$4 sm:$0xff]   ;;  %v15663_v9 = vld [vmem:[%s17525_s14 + $0x1214] ss:$8 sps:$4 sm:$0xff]  }
 0x296   : > { %11316 = vmatpush2.bf16.msra.mxu0 %v15595_v10  ;;  %v15666_v10 = vld [vmem:[%s17525_s14 + $0x1314] ss:$8 sps:$4 sm:$0xff]  }
 0x297   : > { %11357 = vmatpush2.bf16.msra.mxu1 %v15598_v12  ;;  %11317 = vmatprep.subr.bf16.mxu0 %v15603_v51  ;;  %v15661_v12 = vld [vmem:[%s17525_s14 + $0x1210] ss:$8 sps:$4 sm:$0xff]  }
 0x298   : > { %11358 = vmatprep.subr.bf16.mxu1 %v15606_v13  ;;  %v15664_v51 = vld [vmem:[%s17525_s14 + $0x1310] ss:$8 sps:$4 sm:$0xff]   ;;  %v15669_v13 = vld [vmem:[%s17525_s14 + $0x1204] ss:$8 sps:$4 sm:$0xff]  }
 0x29a   : > { %11318 = vmatpush2.bf16.msra.mxu0 %v15601_v14  ;;  %v15672_v14 = vld [vmem:[%s17525_s14 + $0x1304] ss:$8 sps:$4 sm:$0xff]  }
 0x29b   : > { %11359 = vmatpush2.bf16.msra.mxu1 %v15604_v40  ;;  %11319 = vmatprep.subr.bf16.mxu0 %v15609_v15  ;;  %v15667_v40 = vld [vmem:[%s17525_s14 + $0x1200] ss:$8 sps:$4 sm:$0xff]  }
 0x29c   : > { %11360 = vmatprep.subr.bf16.mxu1 %v15612_v17  ;;  %v15670_v15 = vld [vmem:[%s17525_s14 + $0x1300] ss:$8 sps:$4 sm:$0xff]   ;;  %v15675_v17 = vld [vmem:[%s17525_s14 + $0x12f4] ss:$8 sps:$4 sm:$0xff]  }
 0x29e   : > { %11320 = vmatpush2.bf16.msra.mxu0 %v15607_v19  ;;  %v15673_v19 = vld [vmem:[%s17525_s14 + $0x12f0] ss:$8 sps:$4 sm:$0xff]  }
 0x29f   : > { %11361 = vmatpush2.bf16.msra.mxu1 %v15610_v20  ;;  %11321 = vmatprep.subr.bf16.mxu0 %v15615_v22  ;;  %v15676_v20 = vld [vmem:[%s17525_s14 + $0x13f0] ss:$8 sps:$4 sm:$0xff]   ;;  %v15681_v22 = vld [vmem:[%s17525_s14 + $0x12e4] ss:$8 sps:$4 sm:$0xff]  }
 0x2a0   : > { %11362 = vmatprep.subr.bf16.mxu1 %v15618_v23  ;;  %v15684_v23 = vld [vmem:[%s17525_s14 + $0x13e4] ss:$8 sps:$4 sm:$0xff]  }
 0x2a2   : > { %11322 = vmatpush2.bf16.msra.mxu0 %v15613_v56  ;;  %v15679_v56 = vld [vmem:[%s17525_s14 + $0x12e0] ss:$8 sps:$4 sm:$0xff]  }
 0x2a3   : > { %11363 = vmatpush2.bf16.msra.mxu1 %v15616_v58  ;;  %11323 = vmatprep.subr.bf16.mxu0 %v15621_v25  ;;  %v15682_v58 = vld [vmem:[%s17525_s14 + $0x13e0] ss:$8 sps:$4 sm:$0xff]   ;;  %v15687_v25 = vld [vmem:[%s17525_s14 + $0x12d4] ss:$8 sps:$4 sm:$0xff]  }
 0x2a4   : > { %11364 = vmatprep.subr.bf16.mxu1 %v15624_v28  ;;  %v15690_v28 = vld [vmem:[%s17525_s14 + $0x13d4] ss:$8 sps:$4 sm:$0xff]  }
 0x2a6   : > { %11324 = vmatpush2.bf16.msra.mxu0 %v15619_v31  ;;  %v15693_v31 = vld [vmem:[%s17525_s14 + $0x12c4] ss:$8 sps:$4 sm:$0xff]  }
 0x2a7   : > { %11365 = vmatpush2.bf16.msra.mxu1 %v15622_v4  ;;  %11375 = vmatprep.subr.bf16.mxu0 %v15627_v57  ;;  %v15696_v4 = vld [vmem:[%s17525_s14 + $0x13c4] ss:$8 sps:$4 sm:$0xff]   ;;  %v15691_v57 = vld [vmem:[%s17525_s14 + $0x12c0] ss:$8 sps:$4 sm:$0xff]  }
 0x2a8   : > { %11416 = vmatprep.subr.bf16.mxu1 %v15630_v34  ;;  %v15694_v34 = vld [vmem:[%s17525_s14 + $0x13c0] ss:$8 sps:$4 sm:$0xff]  }
 0x2a9   : > { %v11081_v42 = vpop.f32.mrf.mxu0  ;;  %11326 = vmatmul.mubr.bf16.vlgmr.msra.gmra.mxu0 %v2144_v29  ;;  %v15688_v29 = vld [vmem:[%s17525_s14 + $0x13d0] ss:$8 sps:$4 sm:$0xff]  }
 0x2aa   : > { %v11122_v43 = vpop.f32.mrf.mxu1  ;;  %11367 = vmatmul.mubr.bf16.vlgmr.msra.gmra.mxu1 %v2166_v38  ;;  %v11082_v46 = vadd.f32 %v11081_v42, %v18185_v7  ;;  %11376 = vmatpush1.bf16.msra.mxu0 %v15625_v35  ;;  %v15699_v35 = vld [vmem:[%s17525_s14 + $0x12b4] ss:$8 sps:$4 sm:$0xff]   ;;  %v15700_v38 = vld [vmem:[%s17525_s14 + $0x13b0] ss:$8 sps:$4 sm:$0xff]  }
 0x2ab   : > { %11417 = vmatpush1.bf16.msra.mxu1 %v15628_v36  ;;  %v11083_v47 = vpop.f32.mrf.mxu0  ;;  %11377 = vmatprep.subr.bf16.mxu0 %v15633_v62  ;;  %v15702_v36 = vld [vmem:[%s17525_s14 + $0x13b4] ss:$8 sps:$4 sm:$0xff]   ;;  %v15705_v62 = vld [vmem:[%s17525_s14 + $0x12a4] ss:$8 sps:$4 sm:$0xff]  }
 0x2ac   : > { %v11124_v48 = vpop.f32.mrf.mxu1  ;;  %11418 = vmatprep.subr.bf16.mxu1 %v15636_v39  ;;  %v18265_v52 = vadd.f32 %v11122_v43, %v11082_v46  ;;  %v11084_v26 = vadd.f32 %v11083_v47, %v18190_v33  ;;  %11407 = vmatprep.mubr.bf16.mxu0 %v2165_v37  ;;  %v15645_v33 = vld [vmem:[%s17525_s14 + $0x1244] ss:$8 sps:$4 sm:$0xff]   ;;  %v15697_v37 = vld [vmem:[%s17525_s14 + $0x12b0] ss:$8 sps:$4 sm:$0xff]   ;;  %v15711_v42 = vld [vmem:[%s17525_s14 + $0x1294] ss:$8 sps:$4 sm:$0xff]  }
 0x2ad   : > { %11448 = vmatprep.mubr.bf16.mxu1 %v2169_v41  ;;  %v11085_v7 = vpop.f32.mrf.mxu0  ;;  %v15708_v39 = vld [vmem:[%s17525_s14 + $0x13a4] ss:$8 sps:$4 sm:$0xff]   ;;  %v15706_v41 = vld [vmem:[%s17525_s14 + $0x13a0] ss:$8 sps:$4 sm:$0xff]   ;;  %v15714_v43 = vld [vmem:[%s17525_s14 + $0x1394] ss:$8 sps:$4 sm:$0xff]  }
 0x2ae   : > { %v11126_v54 = vpop.f32.mrf.mxu1  ;;  %v18270_v16 = vadd.f32 %v11124_v48, %v11084_v26  ;;  %11378 = vmatpush1.bf16.msra.mxu0 %v15631_v30  ;;  %v18315_v30 = vld [vmem:[%s17543_s23 + $0x28] sm:$0xff]  ;;  %v15709_v47 = vld [vmem:[%s17525_s14 + $0x1290] ss:$8 sps:$4 sm:$0xff]  }
 0x2af   : > { %11419 = vmatpush1.bf16.msra.mxu1 %v15634_v11  ;;  %v11086_v55 = vpop.f32.mrf.mxu0  ;;  %11379 = vmatprep.subr.bf16.mxu0 %v15639_v21  ;;  %v15703_v11 = vld [vmem:[%s17525_s14 + $0x12a0] ss:$8 sps:$4 sm:$0xff]   ;;  %v18323_v46 = vrot.slane %v18315_v30, %v17594_v50  ;;  %v15712_v48 = vld [vmem:[%s17525_s14 + $0x1390] ss:$8 sps:$4 sm:$0xff]   ;;  %v15717_v21 = vld [vmem:[%s17525_s14 + $0x1284] ss:$8 sps:$4 sm:$0xff]  }
 0x2b0   : > { %v11127_v32 = vpop.f32.mrf.mxu1  ;;  %11420 = vmatprep.subr.bf16.mxu1 %v15642_v49  ;;  %v15720_v49 = vld [vmem:[%s17525_s14 + $0x1384] ss:$8 sps:$4 sm:$0xff]   ;;  %v15718_v7 = vld [vmem:[%s17525_s14 + $0x1380] ss:$8 sps:$4 sm:$0xff]   ;;  %v15724_v54 = vld [vmem:[%s17525_s14 + $0x1474] ss:$8 sps:$4 sm:$0xff]  }
 0x2b1   : > { %v2185_v26 = vcombine.high %v18323_v46, %v18323_v46  ;;  %v15727_v55 = vld [vmem:[%s17525_s14 + $0x1574] ss:$8 sps:$4 sm:$0xff]   ;;  %v15722_v32 = vld [vmem:[%s17525_s14 + $0x1470] ss:$8 sps:$4 sm:$0xff]  }
 0x2b2   : > { %11380 = vmatpush1.bf16.msra.mxu0 %v15637_v27  ;;  %v2151_v27 = vrot.slane %v18241_v24, %v17594_v50  ;;  %v15730_v24 = vld [vmem:[%s17525_s14 + $0x1464] ss:$8 sps:$4 sm:$0xff]  }
 0x2b3   : > { %11421 = vmatpush1.bf16.msra.mxu1 %v15640_v53  ;;  %11381 = vmatprep.subr.bf16.mxu0 %v15645_v33  ;;  %v15715_v53 = vld [vmem:[%s17525_s14 + $0x1280] ss:$8 sps:$4 sm:$0xff]   ;;  %v15725_v33 = vld [vmem:[%s17525_s14 + $0x1570] ss:$8 sps:$4 sm:$0xff]  }
 0x2b4   : > { %11422 = vmatprep.subr.bf16.mxu1 %v15648_v59  ;;  %v2207_v59 = vrot.slane %v2185_v26, %v17594_v50  ;;  %v15787_v26 = vld [vmem:[%s17525_s14 + $0x15d4] ss:$8 sps:$4 sm:$0xff]  }
 0x2b6   : > { %11382 = vmatpush1.bf16.msra.mxu0 %v15643_v60  ;;  %v2167_v60 = vcombine.high %v2151_v27, %v2151_v27 }
 0x2b7   : > { %11423 = vmatpush1.bf16.msra.mxu1 %v15646_v61  ;;  %11383 = vmatprep.subr.bf16.mxu0 %v15651_v0  ;;  %v15733_v61 = vld [vmem:[%s17525_s14 + $0x1564] ss:$8 sps:$4 sm:$0xff]   ;;  %v15728_v0 = vld [vmem:[%s17525_s14 + $0x1460] ss:$8 sps:$4 sm:$0xff]  }
 0x2b8   : > { %11424 = vmatprep.subr.bf16.mxu1 %v15654_v1  ;;  %v15731_v1 = vld [vmem:[%s17525_s14 + $0x1560] ss:$8 sps:$4 sm:$0xff]  }
 0x2ba   : > { %11384 = vmatpush1.bf16.msra.mxu0 %v15649_v2  ;;  %v2217_v2 = vcombine.high %v2207_v59, %v2207_v59 }
 0x2bb   : > { %11425 = vmatpush1.bf16.msra.mxu1 %v15652_v3  ;;  %11385 = vmatprep.subr.bf16.mxu0 %v15657_v5 }
 0x2bc   : > { %11426 = vmatprep.subr.bf16.mxu1 %v15660_v6 }
 0x2be   : > { %11386 = vmatpush1.bf16.msra.mxu0 %v15655_v8 }
 0x2bf   : > { %11427 = vmatpush1.bf16.msra.mxu1 %v15658_v45  ;;  %11387 = vmatprep.subr.bf16.mxu0 %v15663_v9  ;;  %v15736_v9 = vld [vmem:[%s17525_s14 + $0x1454] ss:$8 sps:$4 sm:$0xff]  }
 0x2c0   : > { %11428 = vmatprep.subr.bf16.mxu1 %v15666_v10  ;;  %v15739_v10 = vld [vmem:[%s17525_s14 + $0x1554] ss:$8 sps:$4 sm:$0xff]  }
 0x2c2   : > { %11388 = vmatpush1.bf16.msra.mxu0 %v15661_v12 }
 0x2c3   : > { %11429 = vmatpush1.bf16.msra.mxu1 %v15664_v51  ;;  %11389 = vmatprep.subr.bf16.mxu0 %v15669_v13  ;;  %v15734_v13 = vld [vmem:[%s17525_s14 + $0x1450] ss:$8 sps:$4 sm:$0xff]  }
 0x2c4   : > { %11430 = vmatprep.subr.bf16.mxu1 %v15672_v14  ;;  %v15737_v14 = vld [vmem:[%s17525_s14 + $0x1550] ss:$8 sps:$4 sm:$0xff]  }
 0x2c6   : > { %11390 = vmatpush1.bf16.msra.mxu0 %v15667_v40 }
 0x2c7   : > { %11431 = vmatpush1.bf16.msra.mxu1 %v15670_v15  ;;  %11391 = vmatprep.subr.bf16.mxu0 %v15675_v17 }
 0x2c8   : > { %11432 = vmatprep.subr.bf16.mxu1 %v15678_v18 }
 0x2ca   : > { %11392 = vmatpush2.bf16.msra.mxu0 %v15673_v19  ;;  %v15745_v19 = vld [vmem:[%s17525_s14 + $0x1544] ss:$8 sps:$4 sm:$0xff]  }
 0x2cb   : > { %11433 = vmatpush2.bf16.msra.mxu1 %v15676_v20  ;;  %11393 = vmatprep.subr.bf16.mxu0 %v15681_v22  ;;  %v15740_v20 = vld [vmem:[%s17525_s14 + $0x1440] ss:$8 sps:$4 sm:$0xff]  }
 0x2cc   : > { %11434 = vmatprep.subr.bf16.mxu1 %v15684_v23  ;;  %v15743_v22 = vld [vmem:[%s17525_s14 + $0x1540] ss:$8 sps:$4 sm:$0xff]   ;;  %v15748_v23 = vld [vmem:[%s17525_s14 + $0x1434] ss:$8 sps:$4 sm:$0xff]  }
 0x2ce   : > { %11394 = vmatpush2.bf16.msra.mxu0 %v15679_v56  ;;  %v15751_v56 = vld [vmem:[%s17525_s14 + $0x1534] ss:$8 sps:$4 sm:$0xff]  }
 0x2cf   : > { %11435 = vmatpush2.bf16.msra.mxu1 %v15682_v58  ;;  %11395 = vmatprep.subr.bf16.mxu0 %v15687_v25  ;;  %v15746_v58 = vld [vmem:[%s17525_s14 + $0x1430] ss:$8 sps:$4 sm:$0xff]  }
 0x2d0   : > { %11436 = vmatprep.subr.bf16.mxu1 %v15690_v28  ;;  %v15749_v25 = vld [vmem:[%s17525_s14 + $0x1530] ss:$8 sps:$4 sm:$0xff]   ;;  %v15754_v28 = vld [vmem:[%s17525_s14 + $0x1424] ss:$8 sps:$4 sm:$0xff]  }
 0x2d2   : > { %11396 = vmatpush2.bf16.msra.mxu0 %v15685_v63  ;;  %v15757_v63 = vld [vmem:[%s17525_s14 + $0x1524] ss:$8 sps:$4 sm:$0xff]  }
 0x2d3   : > { %11437 = vmatpush2.bf16.msra.mxu1 %v15688_v29  ;;  %11397 = vmatprep.subr.bf16.mxu0 %v15693_v31  ;;  %v15752_v29 = vld [vmem:[%s17525_s14 + $0x1420] ss:$8 sps:$4 sm:$0xff]  }
 0x2d4   : > { %11438 = vmatprep.subr.bf16.mxu1 %v15696_v4  ;;  %v15755_v31 = vld [vmem:[%s17525_s14 + $0x1520] ss:$8 sps:$4 sm:$0xff]   ;;  %v15760_v4 = vld [vmem:[%s17525_s14 + $0x1414] ss:$8 sps:$4 sm:$0xff]  }
 0x2d6   : > { %11398 = vmatpush2.bf16.msra.mxu0 %v15691_v57  ;;  %v15763_v57 = vld [vmem:[%s17525_s14 + $0x1514] ss:$8 sps:$4 sm:$0xff]  }
 0x2d7   : > { %11439 = vmatpush2.bf16.msra.mxu1 %v15694_v34  ;;  %11399 = vmatprep.subr.bf16.mxu0 %v15699_v35  ;;  %v15758_v34 = vld [vmem:[%s17525_s14 + $0x1410] ss:$8 sps:$4 sm:$0xff]  }
 0x2d8   : > { %11440 = vmatprep.subr.bf16.mxu1 %v15702_v36  ;;  %v15761_v35 = vld [vmem:[%s17525_s14 + $0x1510] ss:$8 sps:$4 sm:$0xff]   ;;  %v15766_v36 = vld [vmem:[%s17525_s14 + $0x1404] ss:$8 sps:$4 sm:$0xff]  }
 0x2da   : > { %11400 = vmatpush2.bf16.msra.mxu0 %v15697_v37  ;;  %v15769_v37 = vld [vmem:[%s17525_s14 + $0x1504] ss:$8 sps:$4 sm:$0xff]  }
 0x2db   : > { %11441 = vmatpush2.bf16.msra.mxu1 %v15700_v38  ;;  %11401 = vmatprep.subr.bf16.mxu0 %v15705_v62  ;;  %v15764_v38 = vld [vmem:[%s17525_s14 + $0x1400] ss:$8 sps:$4 sm:$0xff]  }
 0x2dc   : > { %11442 = vmatprep.subr.bf16.mxu1 %v15708_v39  ;;  %v15767_v62 = vld [vmem:[%s17525_s14 + $0x1500] ss:$8 sps:$4 sm:$0xff]   ;;  %v15772_v39 = vld [vmem:[%s17525_s14 + $0x14f4] ss:$8 sps:$4 sm:$0xff]  }
 0x2de   : > { %11402 = vmatpush2.bf16.msra.mxu0 %v15703_v11  ;;  %v15775_v11 = vld [vmem:[%s17525_s14 + $0x15f4] ss:$8 sps:$4 sm:$0xff]  }
 0x2df   : > { %11443 = vmatpush2.bf16.msra.mxu1 %v15706_v41  ;;  %11403 = vmatprep.subr.bf16.mxu0 %v15711_v42  ;;  %v15770_v41 = vld [vmem:[%s17525_s14 + $0x14f0] ss:$8 sps:$4 sm:$0xff]  }
 0x2e0   : > { %11444 = vmatprep.subr.bf16.mxu1 %v15714_v43  ;;  %v15773_v42 = vld [vmem:[%s17525_s14 + $0x15f0] ss:$8 sps:$4 sm:$0xff]   ;;  %v15778_v43 = vld [vmem:[%s17525_s14 + $0x14e4] ss:$8 sps:$4 sm:$0xff]  }
 0x2e2   : > { %11404 = vmatpush2.bf16.msra.mxu0 %v15709_v47  ;;  %v15781_v47 = vld [vmem:[%s17525_s14 + $0x15e4] ss:$8 sps:$4 sm:$0xff]  }
 0x2e3   : > { %11445 = vmatpush2.bf16.msra.mxu1 %v15712_v48  ;;  %11405 = vmatprep.subr.bf16.mxu0 %v15717_v21  ;;  %v15776_v48 = vld [vmem:[%s17525_s14 + $0x14e0] ss:$8 sps:$4 sm:$0xff]  }
 0x2e4   : > { %11446 = vmatprep.subr.bf16.mxu1 %v15720_v49  ;;  %v15779_v21 = vld [vmem:[%s17525_s14 + $0x15e0] ss:$8 sps:$4 sm:$0xff]   ;;  %v15784_v49 = vld [vmem:[%s17525_s14 + $0x14d4] ss:$8 sps:$4 sm:$0xff]  }
 0x2e6   : > { %11406 = vmatpush2.bf16.msra.mxu0 %v15715_v53  ;;  %v15785_v53 = vld [vmem:[%s17525_s14 + $0x15d0] ss:$8 sps:$4 sm:$0xff]  }
 0x2e7   : > { %11447 = vmatpush2.bf16.msra.mxu1 %v15718_v7  ;;  %11457 = vmatprep.subr.bf16.mxu0 %v15724_v54  ;;  %v15790_v7 = vld [vmem:[%s17525_s14 + $0x14c4] ss:$8 sps:$4 sm:$0xff]  }
 0x2e8   : > { %11498 = vmatprep.subr.bf16.mxu1 %v15727_v55  ;;  %v15793_v54 = vld [vmem:[%s17525_s14 + $0x15c4] ss:$8 sps:$4 sm:$0xff]   ;;  %v15788_v55 = vld [vmem:[%s17525_s14 + $0x14c0] ss:$8 sps:$4 sm:$0xff]  }
 0x2e9   : > { %v11163_v3 = vpop.f32.mrf.mxu0  ;;  %11408 = vmatmul.mubr.bf16.vlgmr.msra.gmra.mxu0 %v2151_v27  ;;  %v15782_v27 = vld [vmem:[%s17525_s14 + $0x14d0] ss:$8 sps:$4 sm:$0xff]  }
 0x2ea   : > { %v11204_v5 = vpop.f32.mrf.mxu1  ;;  %11449 = vmatmul.mubr.bf16.vlgmr.msra.gmra.mxu1 %v2167_v60  ;;  %v11164_v6 = vadd.f32 %v11163_v3, %v18265_v52  ;;  %11458 = vmatpush1.bf16.msra.mxu0 %v15722_v32  ;;  %v15791_v32 = vld [vmem:[%s17525_s14 + $0x15c0] ss:$8 sps:$4 sm:$0xff]   ;;  %v15794_v60 = vld [vmem:[%s17525_s14 + $0x14b0] ss:$8 sps:$4 sm:$0xff]  }
 0x2eb   : > { %11499 = vmatpush1.bf16.msra.mxu1 %v15725_v33  ;;  %v11165_v8 = vpop.f32.mrf.mxu0  ;;  %11459 = vmatprep.subr.bf16.mxu0 %v15730_v24  ;;  %v15796_v33 = vld [vmem:[%s17525_s14 + $0x14b4] ss:$8 sps:$4 sm:$0xff]   ;;  %v15797_v24 = vld [vmem:[%s17525_s14 + $0x15b0] ss:$8 sps:$4 sm:$0xff]   ;;  %v15803_v3 = vld [vmem:[%s17525_s14 + $0x15a0] ss:$8 sps:$4 sm:$0xff]  }
 0x2ec   : > { %v11206_v45 = vpop.f32.mrf.mxu1  ;;  %11500 = vmatprep.subr.bf16.mxu1 %v15733_v61  ;;  %v18347_v12 = vadd.f32 %v11204_v5, %v11164_v6  ;;  %v11166_v51 = vadd.f32 %v11165_v8, %v18270_v16  ;;  %11489 = vmatprep.mubr.bf16.mxu0 %v2207_v59  ;;  %v15742_v16 = vld [vmem:[%s17525_s14 + $0x1444] ss:$8 sps:$4 sm:$0xff]   ;;  %v15799_v59 = vld [vmem:[%s17525_s14 + $0x15b4] ss:$8 sps:$4 sm:$0xff]  }
 0x2ed   : > { %11530 = vmatprep.mubr.bf16.mxu1 %v2217_v2  ;;  %v11167_v52 = vpop.f32.mrf.mxu0  ;;  %v15802_v61 = vld [vmem:[%s17525_s14 + $0x14a4] ss:$8 sps:$4 sm:$0xff]   ;;  %v15800_v2 = vld [vmem:[%s17525_s14 + $0x14a0] ss:$8 sps:$4 sm:$0xff]   ;;  %v15808_v5 = vld [vmem:[%s17525_s14 + $0x1494] ss:$8 sps:$4 sm:$0xff]  }
 0x2ee   : > { %v11208_v40 = vpop.f32.mrf.mxu1  ;;  %v18352_v15 = vadd.f32 %v11206_v45, %v11166_v51  ;;  %11460 = vmatpush1.bf16.msra.mxu0 %v15728_v0  ;;  %v15805_v0 = vld [vmem:[%s17525_s14 + $0x15a4] ss:$8 sps:$4 sm:$0xff]   ;;  %v15811_v6 = vld [vmem:[%s17525_s14 + $0x1594] ss:$8 sps:$4 sm:$0xff]   ;;  %v15809_v45 = vld [vmem:[%s17525_s14 + $0x1590] ss:$8 sps:$4 sm:$0xff]  }
 0x2ef   : > { %11501 = vmatpush1.bf16.msra.mxu1 %v15731_v1  ;;  %v11168_v17 = vpop.f32.mrf.mxu0  ;;  %11461 = vmatprep.subr.bf16.mxu0 %v15736_v9  ;;  %v2170_v1 = vcombine.high %v18315_v30, %v18315_v30  ;;  %v15806_v30 = vld [vmem:[%s17525_s14 + $0x1490] ss:$8 sps:$4 sm:$0xff]   ;;  %v15814_v9 = vld [vmem:[%s17525_s14 + $0x1484] ss:$8 sps:$4 sm:$0xff]   ;;  %v15815_v52 = vld [vmem:[%s17525_s14 + $0x1580] ss:$8 sps:$4 sm:$0xff]  }
 0x2f0   : > { %v11209_v18 = vpop.f32.mrf.mxu1  ;;  %11502 = vmatprep.subr.bf16.mxu1 %v15739_v10  ;;  %v15817_v10 = vld [vmem:[%s17525_s14 + $0x1584] ss:$8 sps:$4 sm:$0xff]   ;;  %v15820_v40 = vld [vmem:[%s17525_s14 + $0x1674] ss:$8 sps:$4 sm:$0xff]  }
 0x2f1   : > { %v18403_v8 = vrot.slane %v2170_v1, %v17594_v50  ;;  %v15823_v17 = vld [vmem:[%s17525_s14 + $0x1774] ss:$8 sps:$4 sm:$0xff]   ;;  %v15818_v18 = vld [vmem:[%s17525_s14 + $0x1670] ss:$8 sps:$4 sm:$0xff]  }
 0x2f2   : > { %11462 = vmatpush1.bf16.msra.mxu0 %v15734_v13  ;;  %v2193_v13 = vrot.slane %v18323_v46, %v17594_v50  ;;  %v15826_v46 = vld [vmem:[%s17525_s14 + $0x1664] ss:$8 sps:$4 sm:$0xff]   ;;  %v15871_v1 = vld [vmem:[%s17525_s14 + $0x17f4] ss:$8 sps:$4 sm:$0xff]  }
 0x2f3   : > { %11503 = vmatpush1.bf16.msra.mxu1 %v15737_v14  ;;  %11463 = vmatprep.subr.bf16.mxu0 %v15742_v16  ;;  %v2186_v51 = vcombine.high %v18403_v8, %v18403_v8  ;;  %v15812_v14 = vld [vmem:[%s17525_s14 + $0x1480] ss:$8 sps:$4 sm:$0xff]   ;;  %v15821_v16 = vld [vmem:[%s17525_s14 + $0x1770] ss:$8 sps:$4 sm:$0xff]  }
 0x2f4   : > { %11504 = vmatprep.subr.bf16.mxu1 %v15745_v19 }
 0x2f5   : > { %v2214_v19 = vrot.slane %v2186_v51, %v17594_v50  ;;  %v15878_v51 = vld [vmem:[%s17525_s14 + $0x16d0] ss:$8 sps:$4 sm:$0xff]  }
 0x2f6   : > { %11464 = vmatpush1.bf16.msra.mxu0 %v15740_v20  ;;  %v2215_v20 = vcombine.high %v2193_v13, %v2193_v13 }
 0x2f7   : > { %11505 = vmatpush1.bf16.msra.mxu1 %v15743_v22  ;;  %11465 = vmatprep.subr.bf16.mxu0 %v15748_v23  ;;  %v15829_v22 = vld [vmem:[%s17525_s14 + $0x1764] ss:$8 sps:$4 sm:$0xff]   ;;  %v15824_v23 = vld [vmem:[%s17525_s14 + $0x1660] ss:$8 sps:$4 sm:$0xff]  }
 0x2f8   : > { %11506 = vmatprep.subr.bf16.mxu1 %v15751_v56  ;;  %v15827_v56 = vld [vmem:[%s17525_s14 + $0x1760] ss:$8 sps:$4 sm:$0xff]  }
 0x2fa   : > { %11466 = vmatpush1.bf16.msra.mxu0 %v15746_v58  ;;  %v2218_v58 = vcombine.high %v2214_v19, %v2214_v19 }
 0x2fb   : > { %11507 = vmatpush1.bf16.msra.mxu1 %v15749_v25  ;;  %11467 = vmatprep.subr.bf16.mxu0 %v15754_v28 }
 0x2fc   : > { %11508 = vmatprep.subr.bf16.mxu1 %v15757_v63 }
 0x2fe   : > { %11468 = vmatpush1.bf16.msra.mxu0 %v15752_v29 }
 0x2ff   : > { %11509 = vmatpush1.bf16.msra.mxu1 %v15755_v31  ;;  %11469 = vmatprep.subr.bf16.mxu0 %v15760_v4  ;;  %v15832_v4 = vld [vmem:[%s17525_s14 + $0x1654] ss:$8 sps:$4 sm:$0xff]  }
 0x300   : > { %11510 = vmatprep.subr.bf16.mxu1 %v15763_v57  ;;  %v15835_v57 = vld [vmem:[%s17525_s14 + $0x1754] ss:$8 sps:$4 sm:$0xff]  }
 0x302   : > { %11470 = vmatpush1.bf16.msra.mxu0 %v15758_v34 }
 0x303   : > { %11511 = vmatpush1.bf16.msra.mxu1 %v15761_v35  ;;  %11471 = vmatprep.subr.bf16.mxu0 %v15766_v36  ;;  %v15830_v36 = vld [vmem:[%s17525_s14 + $0x1650] ss:$8 sps:$4 sm:$0xff]  }
 0x304   : > { %11512 = vmatprep.subr.bf16.mxu1 %v15769_v37  ;;  %v15833_v37 = vld [vmem:[%s17525_s14 + $0x1750] ss:$8 sps:$4 sm:$0xff]  }
 0x306   : > { %11472 = vmatpush1.bf16.msra.mxu0 %v15764_v38 }
 0x307   : > { %11513 = vmatpush1.bf16.msra.mxu1 %v15767_v62  ;;  %11473 = vmatprep.subr.bf16.mxu0 %v15772_v39 }
 0x308   : > { %11514 = vmatprep.subr.bf16.mxu1 %v15775_v11 }
 0x30a   : > { %11474 = vmatpush2.bf16.msra.mxu0 %v15770_v41  ;;  %v15841_v41 = vld [vmem:[%s17525_s14 + $0x1744] ss:$8 sps:$4 sm:$0xff]  }
 0x30b   : > { %11515 = vmatpush2.bf16.msra.mxu1 %v15773_v42  ;;  %11475 = vmatprep.subr.bf16.mxu0 %v15778_v43  ;;  %v15836_v42 = vld [vmem:[%s17525_s14 + $0x1640] ss:$8 sps:$4 sm:$0xff]  }
 0x30c   : > { %11516 = vmatprep.subr.bf16.mxu1 %v15781_v47  ;;  %v15839_v43 = vld [vmem:[%s17525_s14 + $0x1740] ss:$8 sps:$4 sm:$0xff]   ;;  %v15844_v47 = vld [vmem:[%s17525_s14 + $0x1634] ss:$8 sps:$4 sm:$0xff]  }
 0x30e   : > { %11476 = vmatpush2.bf16.msra.mxu0 %v15776_v48  ;;  %v15847_v48 = vld [vmem:[%s17525_s14 + $0x1734] ss:$8 sps:$4 sm:$0xff]  }
 0x30f   : > { %11517 = vmatpush2.bf16.msra.mxu1 %v15779_v21  ;;  %11477 = vmatprep.subr.bf16.mxu0 %v15784_v49  ;;  %v15842_v21 = vld [vmem:[%s17525_s14 + $0x1630] ss:$8 sps:$4 sm:$0xff]  }
 0x310   : > { %11518 = vmatprep.subr.bf16.mxu1 %v15787_v26  ;;  %v15845_v49 = vld [vmem:[%s17525_s14 + $0x1730] ss:$8 sps:$4 sm:$0xff]   ;;  %v15850_v26 = vld [vmem:[%s17525_s14 + $0x1624] ss:$8 sps:$4 sm:$0xff]  }
 0x312   : > { %11478 = vmatpush2.bf16.msra.mxu0 %v15782_v27  ;;  %v15853_v27 = vld [vmem:[%s17525_s14 + $0x1724] ss:$8 sps:$4 sm:$0xff]  }
 0x313   : > { %11519 = vmatpush2.bf16.msra.mxu1 %v15785_v53  ;;  %11479 = vmatprep.subr.bf16.mxu0 %v15790_v7  ;;  %v15848_v53 = vld [vmem:[%s17525_s14 + $0x1620] ss:$8 sps:$4 sm:$0xff]  }
 0x314   : > { %11520 = vmatprep.subr.bf16.mxu1 %v15793_v54  ;;  %v15851_v7 = vld [vmem:[%s17525_s14 + $0x1720] ss:$8 sps:$4 sm:$0xff]   ;;  %v15856_v54 = vld [vmem:[%s17525_s14 + $0x1614] ss:$8 sps:$4 sm:$0xff]  }
 0x316   : > { %11480 = vmatpush2.bf16.msra.mxu0 %v15788_v55  ;;  %v15859_v55 = vld [vmem:[%s17525_s14 + $0x1714] ss:$8 sps:$4 sm:$0xff]  }
 0x317   : > { %11521 = vmatpush2.bf16.msra.mxu1 %v15791_v32  ;;  %11481 = vmatprep.subr.bf16.mxu0 %v15796_v33  ;;  %v15854_v32 = vld [vmem:[%s17525_s14 + $0x1610] ss:$8 sps:$4 sm:$0xff]  }
 0x318   : > { %11522 = vmatprep.subr.bf16.mxu1 %v15799_v59  ;;  %v15857_v33 = vld [vmem:[%s17525_s14 + $0x1710] ss:$8 sps:$4 sm:$0xff]   ;;  %v15862_v59 = vld [vmem:[%s17525_s14 + $0x1604] ss:$8 sps:$4 sm:$0xff]  }
 0x31a   : > { %11482 = vmatpush2.bf16.msra.mxu0 %v15794_v60  ;;  %v15865_v60 = vld [vmem:[%s17525_s14 + $0x1704] ss:$8 sps:$4 sm:$0xff]  }
 0x31b   : > { %11523 = vmatpush2.bf16.msra.mxu1 %v15797_v24  ;;  %11483 = vmatprep.subr.bf16.mxu0 %v15802_v61  ;;  %v15860_v24 = vld [vmem:[%s17525_s14 + $0x1600] ss:$8 sps:$4 sm:$0xff]  }
 0x31c   : > { %11524 = vmatprep.subr.bf16.mxu1 %v15805_v0  ;;  %v15863_v61 = vld [vmem:[%s17525_s14 + $0x1700] ss:$8 sps:$4 sm:$0xff]   ;;  %v15868_v0 = vld [vmem:[%s17525_s14 + $0x16f4] ss:$8 sps:$4 sm:$0xff]  }
 0x31e   : > { %11484 = vmatpush2.bf16.msra.mxu0 %v15800_v2  ;;  %v15866_v2 = vld [vmem:[%s17525_s14 + $0x16f0] ss:$8 sps:$4 sm:$0xff]  }
 0x31f   : > { %11525 = vmatpush2.bf16.msra.mxu1 %v15803_v3  ;;  %11485 = vmatprep.subr.bf16.mxu0 %v15808_v5  ;;  %v15869_v3 = vld [vmem:[%s17525_s14 + $0x17f0] ss:$8 sps:$4 sm:$0xff]   ;;  %v15874_v5 = vld [vmem:[%s17525_s14 + $0x16e4] ss:$8 sps:$4 sm:$0xff]  }
 0x320   : > { %11526 = vmatprep.subr.bf16.mxu1 %v15811_v6  ;;  %v15877_v6 = vld [vmem:[%s17525_s14 + $0x17e4] ss:$8 sps:$4 sm:$0xff]  }
 0x322   : > { %11486 = vmatpush2.bf16.msra.mxu0 %v15806_v30  ;;  %v15872_v30 = vld [vmem:[%s17525_s14 + $0x16e0] ss:$8 sps:$4 sm:$0xff]  }
 0x323   : > { %11527 = vmatpush2.bf16.msra.mxu1 %v15809_v45  ;;  %11487 = vmatprep.subr.bf16.mxu0 %v15814_v9  ;;  %v15875_v45 = vld [vmem:[%s17525_s14 + $0x17e0] ss:$8 sps:$4 sm:$0xff]   ;;  %v15880_v9 = vld [vmem:[%s17525_s14 + $0x16d4] ss:$8 sps:$4 sm:$0xff]  }
 0x324   : > { %11528 = vmatprep.subr.bf16.mxu1 %v15817_v10  ;;  %v15883_v10 = vld [vmem:[%s17525_s14 + $0x17d4] ss:$8 sps:$4 sm:$0xff]  }
 0x326   : > { %11488 = vmatpush2.bf16.msra.mxu0 %v15812_v14  ;;  %v15886_v14 = vld [vmem:[%s17525_s14 + $0x16c4] ss:$8 sps:$4 sm:$0xff]  }
 0x327   : > { %11529 = vmatpush2.bf16.msra.mxu1 %v15815_v52  ;;  %11539 = vmatprep.subr.bf16.mxu0 %v15820_v40  ;;  %v15889_v52 = vld [vmem:[%s17525_s14 + $0x17c4] ss:$8 sps:$4 sm:$0xff]   ;;  %v15884_v40 = vld [vmem:[%s17525_s14 + $0x16c0] ss:$8 sps:$4 sm:$0xff]  }
 0x328   : > { %11580 = vmatprep.subr.bf16.mxu1 %v15823_v17  ;;  %v15887_v17 = vld [vmem:[%s17525_s14 + $0x17c0] ss:$8 sps:$4 sm:$0xff]  }
 0x329   : > { %v11245_v25 = vpop.f32.mrf.mxu0  ;;  %11490 = vmatmul.mubr.bf16.vlgmr.msra.gmra.mxu0 %v2193_v13  ;;  %v15881_v13 = vld [vmem:[%s17525_s14 + $0x17d0] ss:$8 sps:$4 sm:$0xff]  }
 0x32a   : > { %v11286_v28 = vpop.f32.mrf.mxu1  ;;  %11531 = vmatmul.mubr.bf16.vlgmr.msra.gmra.mxu1 %v2215_v20  ;;  %v11246_v63 = vadd.f32 %v11245_v25, %v18347_v12  ;;  %11540 = vmatpush1.bf16.msra.mxu0 %v15818_v18  ;;  %v15892_v18 = vld [vmem:[%s17525_s14 + $0x16b4] ss:$8 sps:$4 sm:$0xff]   ;;  %v15893_v20 = vld [vmem:[%s17525_s14 + $0x17b0] ss:$8 sps:$4 sm:$0xff]  }
 0x32b   : > { %11581 = vmatpush1.bf16.msra.mxu1 %v15821_v16  ;;  %v11247_v29 = vpop.f32.mrf.mxu0  ;;  %11541 = vmatprep.subr.bf16.mxu0 %v15826_v46  ;;  %v15895_v16 = vld [vmem:[%s17525_s14 + $0x17b4] ss:$8 sps:$4 sm:$0xff]   ;;  %v15898_v46 = vld [vmem:[%s17525_s14 + $0x16a4] ss:$8 sps:$4 sm:$0xff]  }
 0x32c   : > { %v11288_v31 = vpop.f32.mrf.mxu1  ;;  %11582 = vmatprep.subr.bf16.mxu1 %v15829_v22  ;;  %v18427_v34 = vadd.f32 %v11286_v28, %v11246_v63  ;;  %v11248_v35 = vadd.f32 %v11247_v29, %v18352_v15  ;;  %11571 = vmatprep.mubr.bf16.mxu0 %v2214_v19  ;;  %v15838_v15 = vld [vmem:[%s17525_s14 + $0x1644] ss:$8 sps:$4 sm:$0xff]   ;;  %v15890_v19 = vld [vmem:[%s17525_s14 + $0x16b0] ss:$8 sps:$4 sm:$0xff]   ;;  %v15904_v25 = vld [vmem:[%s17525_s14 + $0x1694] ss:$8 sps:$4 sm:$0xff]  }
 0x32d   : > { %11612 = vmatprep.mubr.bf16.mxu1 %v2218_v58  ;;  %v11249_v12 = vpop.f32.mrf.mxu0  ;;  %v15901_v22 = vld [vmem:[%s17525_s14 + $0x17a4] ss:$8 sps:$4 sm:$0xff]   ;;  %v15899_v58 = vld [vmem:[%s17525_s14 + $0x17a0] ss:$8 sps:$4 sm:$0xff]   ;;  %v15907_v28 = vld [vmem:[%s17525_s14 + $0x1794] ss:$8 sps:$4 sm:$0xff]  }
 0x32e   : > { %v11290_v38 = vpop.f32.mrf.mxu1  ;;  %v18432_v62 = vadd.f32 %v11288_v31, %v11248_v35  ;;  %11542 = vmatpush1.bf16.msra.mxu0 %v15824_v23  ;;  %v18477_v23 = vld [vmem:[%s17543_s23 + $0x30] sm:$0xff]  ;;  %v15911_v12 = vld [vmem:[%s17525_s14 + $0x1780] ss:$8 sps:$4 sm:$0xff]  }
 0x32f   : > { %11583 = vmatpush1.bf16.msra.mxu1 %v15827_v56  ;;  %v11250_v39 = vpop.f32.mrf.mxu0  ;;  %11543 = vmatprep.subr.bf16.mxu0 %v15832_v4  ;;  %v15896_v56 = vld [vmem:[%s17525_s14 + $0x16a0] ss:$8 sps:$4 sm:$0xff]   ;;  %v18485_v63 = vrot.slane %v18477_v23, %v17594_v50  ;;  %v15902_v29 = vld [vmem:[%s17525_s14 + $0x1690] ss:$8 sps:$4 sm:$0xff]   ;;  %v15910_v4 = vld [vmem:[%s17525_s14 + $0x1684] ss:$8 sps:$4 sm:$0xff]  }
 0x330   : > { %v11291_v11 = vpop.f32.mrf.mxu1  ;;  %11584 = vmatprep.subr.bf16.mxu1 %v15835_v57  ;;  %v15905_v31 = vld [vmem:[%s17525_s14 + $0x1790] ss:$8 sps:$4 sm:$0xff]   ;;  %v15913_v57 = vld [vmem:[%s17525_s14 + $0x1784] ss:$8 sps:$4 sm:$0xff]   ;;  %v15917_v38 = vld [vmem:[%s17525_s14 + $0x1874] ss:$8 sps:$4 sm:$0xff]  }
 0x331   : > { %v2234_v35 = vcombine.high %v18485_v63, %v18485_v63  ;;  %v15920_v39 = vld [vmem:[%s17525_s14 + $0x1974] ss:$8 sps:$4 sm:$0xff]   ;;  %v15915_v11 = vld [vmem:[%s17525_s14 + $0x1870] ss:$8 sps:$4 sm:$0xff]  }
 0x332   : > { %11544 = vmatpush1.bf16.msra.mxu0 %v15830_v36  ;;  %v2200_v36 = vrot.slane %v18403_v8, %v17594_v50  ;;  %v15923_v8 = vld [vmem:[%s17525_s14 + $0x1864] ss:$8 sps:$4 sm:$0xff]  }
 0x333   : > { %11585 = vmatpush1.bf16.msra.mxu1 %v15833_v37  ;;  %11545 = vmatprep.subr.bf16.mxu0 %v15838_v15  ;;  %v15908_v37 = vld [vmem:[%s17525_s14 + $0x1680] ss:$8 sps:$4 sm:$0xff]   ;;  %v15918_v15 = vld [vmem:[%s17525_s14 + $0x1970] ss:$8 sps:$4 sm:$0xff]  }
 0x334   : > { %11586 = vmatprep.subr.bf16.mxu1 %v15841_v41  ;;  %v2256_v41 = vrot.slane %v2234_v35, %v17594_v50  ;;  %v15980_v35 = vld [vmem:[%s17525_s14 + $0x19d4] ss:$8 sps:$4 sm:$0xff]  }
 0x336   : > { %11546 = vmatpush1.bf16.msra.mxu0 %v15836_v42  ;;  %v2216_v42 = vcombine.high %v2200_v36, %v2200_v36 }
 0x337   : > { %11587 = vmatpush1.bf16.msra.mxu1 %v15839_v43  ;;  %11547 = vmatprep.subr.bf16.mxu0 %v15844_v47  ;;  %v15926_v43 = vld [vmem:[%s17525_s14 + $0x1964] ss:$8 sps:$4 sm:$0xff]   ;;  %v15921_v47 = vld [vmem:[%s17525_s14 + $0x1860] ss:$8 sps:$4 sm:$0xff]  }
 0x338   : > { %11588 = vmatprep.subr.bf16.mxu1 %v15847_v48  ;;  %v15924_v48 = vld [vmem:[%s17525_s14 + $0x1960] ss:$8 sps:$4 sm:$0xff]  }
 0x33a   : > { %11548 = vmatpush1.bf16.msra.mxu0 %v15842_v21  ;;  %v2266_v21 = vcombine.high %v2256_v41, %v2256_v41 }
 0x33b   : > { %11589 = vmatpush1.bf16.msra.mxu1 %v15845_v49  ;;  %11549 = vmatprep.subr.bf16.mxu0 %v15850_v26 }
 0x33c   : > { %11590 = vmatprep.subr.bf16.mxu1 %v15853_v27 }
 0x33e   : > { %11550 = vmatpush1.bf16.msra.mxu0 %v15848_v53 }
 0x33f   : > { %11591 = vmatpush1.bf16.msra.mxu1 %v15851_v7  ;;  %11551 = vmatprep.subr.bf16.mxu0 %v15856_v54  ;;  %v15929_v54 = vld [vmem:[%s17525_s14 + $0x1854] ss:$8 sps:$4 sm:$0xff]  }
 0x340   : > { %11592 = vmatprep.subr.bf16.mxu1 %v15859_v55  ;;  %v15932_v55 = vld [vmem:[%s17525_s14 + $0x1954] ss:$8 sps:$4 sm:$0xff]  }
 0x342   : > { %11552 = vmatpush1.bf16.msra.mxu0 %v15854_v32 }
 0x343   : > { %11593 = vmatpush1.bf16.msra.mxu1 %v15857_v33  ;;  %11553 = vmatprep.subr.bf16.mxu0 %v15862_v59  ;;  %v15927_v59 = vld [vmem:[%s17525_s14 + $0x1850] ss:$8 sps:$4 sm:$0xff]  }
 0x344   : > { %11594 = vmatprep.subr.bf16.mxu1 %v15865_v60  ;;  %v15930_v60 = vld [vmem:[%s17525_s14 + $0x1950] ss:$8 sps:$4 sm:$0xff]  }
 0x346   : > { %11554 = vmatpush1.bf16.msra.mxu0 %v15860_v24 }
 0x347   : > { %11595 = vmatpush1.bf16.msra.mxu1 %v15863_v61  ;;  %11555 = vmatprep.subr.bf16.mxu0 %v15868_v0 }
 0x348   : > { %11596 = vmatprep.subr.bf16.mxu1 %v15871_v1 }
 0x34a   : > { %11556 = vmatpush2.bf16.msra.mxu0 %v15866_v2  ;;  %v15938_v2 = vld [vmem:[%s17525_s14 + $0x1944] ss:$8 sps:$4 sm:$0xff]  }
 0x34b   : > { %11597 = vmatpush2.bf16.msra.mxu1 %v15869_v3  ;;  %11557 = vmatprep.subr.bf16.mxu0 %v15874_v5  ;;  %v15933_v3 = vld [vmem:[%s17525_s14 + $0x1840] ss:$8 sps:$4 sm:$0xff]  }
 0x34c   : > { %11598 = vmatprep.subr.bf16.mxu1 %v15877_v6  ;;  %v15936_v5 = vld [vmem:[%s17525_s14 + $0x1940] ss:$8 sps:$4 sm:$0xff]   ;;  %v15941_v6 = vld [vmem:[%s17525_s14 + $0x1834] ss:$8 sps:$4 sm:$0xff]  }
 0x34e   : > { %11558 = vmatpush2.bf16.msra.mxu0 %v15872_v30  ;;  %v15944_v30 = vld [vmem:[%s17525_s14 + $0x1934] ss:$8 sps:$4 sm:$0xff]  }
 0x34f   : > { %11599 = vmatpush2.bf16.msra.mxu1 %v15875_v45  ;;  %11559 = vmatprep.subr.bf16.mxu0 %v15880_v9  ;;  %v15939_v45 = vld [vmem:[%s17525_s14 + $0x1830] ss:$8 sps:$4 sm:$0xff]  }
 0x350   : > { %11600 = vmatprep.subr.bf16.mxu1 %v15883_v10  ;;  %v15942_v9 = vld [vmem:[%s17525_s14 + $0x1930] ss:$8 sps:$4 sm:$0xff]   ;;  %v15947_v10 = vld [vmem:[%s17525_s14 + $0x1824] ss:$8 sps:$4 sm:$0xff]  }
 0x352   : > { %11560 = vmatpush2.bf16.msra.mxu0 %v15878_v51  ;;  %v15950_v51 = vld [vmem:[%s17525_s14 + $0x1924] ss:$8 sps:$4 sm:$0xff]  }
 0x353   : > { %11601 = vmatpush2.bf16.msra.mxu1 %v15881_v13  ;;  %11561 = vmatprep.subr.bf16.mxu0 %v15886_v14  ;;  %v15945_v13 = vld [vmem:[%s17525_s14 + $0x1820] ss:$8 sps:$4 sm:$0xff]  }
 0x354   : > { %11602 = vmatprep.subr.bf16.mxu1 %v15889_v52  ;;  %v15948_v14 = vld [vmem:[%s17525_s14 + $0x1920] ss:$8 sps:$4 sm:$0xff]   ;;  %v15953_v52 = vld [vmem:[%s17525_s14 + $0x1814] ss:$8 sps:$4 sm:$0xff]  }
 0x356   : > { %11562 = vmatpush2.bf16.msra.mxu0 %v15884_v40  ;;  %v15956_v40 = vld [vmem:[%s17525_s14 + $0x1914] ss:$8 sps:$4 sm:$0xff]  }
 0x357   : > { %11603 = vmatpush2.bf16.msra.mxu1 %v15887_v17  ;;  %11563 = vmatprep.subr.bf16.mxu0 %v15892_v18  ;;  %v15951_v17 = vld [vmem:[%s17525_s14 + $0x1810] ss:$8 sps:$4 sm:$0xff]  }
 0x358   : > { %11604 = vmatprep.subr.bf16.mxu1 %v15895_v16  ;;  %v15954_v18 = vld [vmem:[%s17525_s14 + $0x1910] ss:$8 sps:$4 sm:$0xff]   ;;  %v15959_v16 = vld [vmem:[%s17525_s14 + $0x1804] ss:$8 sps:$4 sm:$0xff]  }
 0x35a   : > { %11564 = vmatpush2.bf16.msra.mxu0 %v15890_v19  ;;  %v15962_v19 = vld [vmem:[%s17525_s14 + $0x1904] ss:$8 sps:$4 sm:$0xff]  }
 0x35b   : > { %11605 = vmatpush2.bf16.msra.mxu1 %v15893_v20  ;;  %11565 = vmatprep.subr.bf16.mxu0 %v15898_v46  ;;  %v15957_v20 = vld [vmem:[%s17525_s14 + $0x1800] ss:$8 sps:$4 sm:$0xff]  }
 0x35c   : > { %11606 = vmatprep.subr.bf16.mxu1 %v15901_v22  ;;  %v15960_v46 = vld [vmem:[%s17525_s14 + $0x1900] ss:$8 sps:$4 sm:$0xff]   ;;  %v15965_v22 = vld [vmem:[%s17525_s14 + $0x18f4] ss:$8 sps:$4 sm:$0xff]  }
 0x35e   : > { %11566 = vmatpush2.bf16.msra.mxu0 %v15896_v56  ;;  %v15968_v56 = vld [vmem:[%s17525_s14 + $0x19f4] ss:$8 sps:$4 sm:$0xff]  }
 0x35f   : > { %11607 = vmatpush2.bf16.msra.mxu1 %v15899_v58  ;;  %11567 = vmatprep.subr.bf16.mxu0 %v15904_v25  ;;  %v15963_v58 = vld [vmem:[%s17525_s14 + $0x18f0] ss:$8 sps:$4 sm:$0xff]  }
 0x360   : > { %11608 = vmatprep.subr.bf16.mxu1 %v15907_v28  ;;  %v15966_v25 = vld [vmem:[%s17525_s14 + $0x19f0] ss:$8 sps:$4 sm:$0xff]   ;;  %v15971_v28 = vld [vmem:[%s17525_s14 + $0x18e4] ss:$8 sps:$4 sm:$0xff]  }
 0x362   : > { %11568 = vmatpush2.bf16.msra.mxu0 %v15902_v29  ;;  %v15974_v29 = vld [vmem:[%s17525_s14 + $0x19e4] ss:$8 sps:$4 sm:$0xff]  }
 0x363   : > { %11609 = vmatpush2.bf16.msra.mxu1 %v15905_v31  ;;  %11569 = vmatprep.subr.bf16.mxu0 %v15910_v4  ;;  %v15969_v31 = vld [vmem:[%s17525_s14 + $0x18e0] ss:$8 sps:$4 sm:$0xff]  }
 0x364   : > { %11610 = vmatprep.subr.bf16.mxu1 %v15913_v57  ;;  %v15972_v4 = vld [vmem:[%s17525_s14 + $0x19e0] ss:$8 sps:$4 sm:$0xff]   ;;  %v15977_v57 = vld [vmem:[%s17525_s14 + $0x18d4] ss:$8 sps:$4 sm:$0xff]  }
 0x366   : > { %11570 = vmatpush2.bf16.msra.mxu0 %v15908_v37  ;;  %v15978_v37 = vld [vmem:[%s17525_s14 + $0x19d0] ss:$8 sps:$4 sm:$0xff]  }
 0x367   : > { %11611 = vmatpush2.bf16.msra.mxu1 %v15911_v12  ;;  %11621 = vmatprep.subr.bf16.mxu0 %v15917_v38  ;;  %v15983_v12 = vld [vmem:[%s17525_s14 + $0x18c4] ss:$8 sps:$4 sm:$0xff]  }
 0x368   : > { %11662 = vmatprep.subr.bf16.mxu1 %v15920_v39  ;;  %v15986_v38 = vld [vmem:[%s17525_s14 + $0x19c4] ss:$8 sps:$4 sm:$0xff]   ;;  %v15981_v39 = vld [vmem:[%s17525_s14 + $0x18c0] ss:$8 sps:$4 sm:$0xff]  }
 0x369   : > { %v11327_v49 = vpop.f32.mrf.mxu0  ;;  %11572 = vmatmul.mubr.bf16.vlgmr.msra.gmra.mxu0 %v2200_v36  ;;  %v15975_v36 = vld [vmem:[%s17525_s14 + $0x18d0] ss:$8 sps:$4 sm:$0xff]  }
 0x36a   : > { %v11368_v26 = vpop.f32.mrf.mxu1  ;;  %11613 = vmatmul.mubr.bf16.vlgmr.msra.gmra.mxu1 %v2216_v42  ;;  %v11328_v27 = vadd.f32 %v11327_v49, %v18427_v34  ;;  %11622 = vmatpush1.bf16.msra.mxu0 %v15915_v11  ;;  %v15984_v11 = vld [vmem:[%s17525_s14 + $0x19c0] ss:$8 sps:$4 sm:$0xff]   ;;  %v15987_v42 = vld [vmem:[%s17525_s14 + $0x18b0] ss:$8 sps:$4 sm:$0xff]  }
 0x36b   : > { %11663 = vmatpush1.bf16.msra.mxu1 %v15918_v15  ;;  %v11329_v53 = vpop.f32.mrf.mxu0  ;;  %11623 = vmatprep.subr.bf16.mxu0 %v15923_v8  ;;  %v15989_v15 = vld [vmem:[%s17525_s14 + $0x18b4] ss:$8 sps:$4 sm:$0xff]   ;;  %v15990_v8 = vld [vmem:[%s17525_s14 + $0x19b0] ss:$8 sps:$4 sm:$0xff]   ;;  %v15996_v49 = vld [vmem:[%s17525_s14 + $0x19a0] ss:$8 sps:$4 sm:$0xff]  }
 0x36c   : > { %v11370_v7 = vpop.f32.mrf.mxu1  ;;  %11664 = vmatprep.subr.bf16.mxu1 %v15926_v43  ;;  %v18509_v32 = vadd.f32 %v11368_v26, %v11328_v27  ;;  %v11330_v33 = vadd.f32 %v11329_v53, %v18432_v62  ;;  %11653 = vmatprep.mubr.bf16.mxu0 %v2256_v41  ;;  %v15935_v62 = vld [vmem:[%s17525_s14 + $0x1844] ss:$8 sps:$4 sm:$0xff]   ;;  %v15992_v41 = vld [vmem:[%s17525_s14 + $0x19b4] ss:$8 sps:$4 sm:$0xff]  }
 0x36d   : > { %11694 = vmatprep.mubr.bf16.mxu1 %v2266_v21  ;;  %v11331_v34 = vpop.f32.mrf.mxu0  ;;  %v15995_v43 = vld [vmem:[%s17525_s14 + $0x18a4] ss:$8 sps:$4 sm:$0xff]   ;;  %v15993_v21 = vld [vmem:[%s17525_s14 + $0x18a0] ss:$8 sps:$4 sm:$0xff]   ;;  %v16001_v26 = vld [vmem:[%s17525_s14 + $0x1894] ss:$8 sps:$4 sm:$0xff]  }
 0x36e   : > { %v11372_v24 = vpop.f32.mrf.mxu1  ;;  %v18514_v61 = vadd.f32 %v11370_v7, %v11330_v33  ;;  %11624 = vmatpush1.bf16.msra.mxu0 %v15921_v47  ;;  %v15998_v47 = vld [vmem:[%s17525_s14 + $0x19a4] ss:$8 sps:$4 sm:$0xff]   ;;  %v16004_v27 = vld [vmem:[%s17525_s14 + $0x1994] ss:$8 sps:$4 sm:$0xff]   ;;  %v16002_v7 = vld [vmem:[%s17525_s14 + $0x1990] ss:$8 sps:$4 sm:$0xff]  }
 0x36f   : > { %11665 = vmatpush1.bf16.msra.mxu1 %v15924_v48  ;;  %v11332_v0 = vpop.f32.mrf.mxu0  ;;  %11625 = vmatprep.subr.bf16.mxu0 %v15929_v54  ;;  %v2219_v48 = vcombine.high %v18477_v23, %v18477_v23  ;;  %v15999_v23 = vld [vmem:[%s17525_s14 + $0x1890] ss:$8 sps:$4 sm:$0xff]   ;;  %v16007_v54 = vld [vmem:[%s17525_s14 + $0x1884] ss:$8 sps:$4 sm:$0xff]   ;;  %v16008_v34 = vld [vmem:[%s17525_s14 + $0x1980] ss:$8 sps:$4 sm:$0xff]  }
 0x370   : > { %v11373_v1 = vpop.f32.mrf.mxu1  ;;  %11666 = vmatprep.subr.bf16.mxu1 %v15932_v55  ;;  %v16010_v55 = vld [vmem:[%s17525_s14 + $0x1984] ss:$8 sps:$4 sm:$0xff]   ;;  %v16013_v24 = vld [vmem:[%s17525_s14 + $0x1a74] ss:$8 sps:$4 sm:$0xff]  }
 0x371   : > { %v18565_v53 = vrot.slane %v2219_v48, %v17594_v50  ;;  %v16016_v0 = vld [vmem:[%s17525_s14 + $0x1b74] ss:$8 sps:$4 sm:$0xff]   ;;  %v16011_v1 = vld [vmem:[%s17525_s14 + $0x1a70] ss:$8 sps:$4 sm:$0xff]  }
 0x372   : > { %11626 = vmatpush1.bf16.msra.mxu0 %v15927_v59  ;;  %v2242_v59 = vrot.slane %v18485_v63, %v17594_v50  ;;  %v16019_v63 = vld [vmem:[%s17525_s14 + $0x1a64] ss:$8 sps:$4 sm:$0xff]   ;;  %v16064_v48 = vld [vmem:[%s17525_s14 + $0x1bf4] ss:$8 sps:$4 sm:$0xff]  }
 0x373   : > { %11667 = vmatpush1.bf16.msra.mxu1 %v15930_v60  ;;  %11627 = vmatprep.subr.bf16.mxu0 %v15935_v62  ;;  %v2235_v33 = vcombine.high %v18565_v53, %v18565_v53  ;;  %v16005_v60 = vld [vmem:[%s17525_s14 + $0x1880] ss:$8 sps:$4 sm:$0xff]   ;;  %v16014_v62 = vld [vmem:[%s17525_s14 + $0x1b70] ss:$8 sps:$4 sm:$0xff]  }
 0x374   : > { %11668 = vmatprep.subr.bf16.mxu1 %v15938_v2 }
 0x375   : > { %v2263_v2 = vrot.slane %v2235_v33, %v17594_v50  ;;  %v16071_v33 = vld [vmem:[%s17525_s14 + $0x1ad0] ss:$8 sps:$4 sm:$0xff]  }
 0x376   : > { %11628 = vmatpush1.bf16.msra.mxu0 %v15933_v3  ;;  %v2264_v3 = vcombine.high %v2242_v59, %v2242_v59 }
 0x377   : > { %11669 = vmatpush1.bf16.msra.mxu1 %v15936_v5  ;;  %11629 = vmatprep.subr.bf16.mxu0 %v15941_v6  ;;  %v16022_v5 = vld [vmem:[%s17525_s14 + $0x1b64] ss:$8 sps:$4 sm:$0xff]   ;;  %v16017_v6 = vld [vmem:[%s17525_s14 + $0x1a60] ss:$8 sps:$4 sm:$0xff]  }
 0x378   : > { %11670 = vmatprep.subr.bf16.mxu1 %v15944_v30  ;;  %v16020_v30 = vld [vmem:[%s17525_s14 + $0x1b60] ss:$8 sps:$4 sm:$0xff]  }
 0x37a   : > { %11630 = vmatpush1.bf16.msra.mxu0 %v15939_v45  ;;  %v2267_v45 = vcombine.high %v2263_v2, %v2263_v2 }
 0x37b   : > { %11671 = vmatpush1.bf16.msra.mxu1 %v15942_v9  ;;  %11631 = vmatprep.subr.bf16.mxu0 %v15947_v10 }
 0x37c   : > { %11672 = vmatprep.subr.bf16.mxu1 %v15950_v51 }
 0x37e   : > { %11632 = vmatpush1.bf16.msra.mxu0 %v15945_v13 }
 0x37f   : > { %11673 = vmatpush1.bf16.msra.mxu1 %v15948_v14  ;;  %11633 = vmatprep.subr.bf16.mxu0 %v15953_v52  ;;  %v16025_v52 = vld [vmem:[%s17525_s14 + $0x1a54] ss:$8 sps:$4 sm:$0xff]  }
 0x380   : > { %11674 = vmatprep.subr.bf16.mxu1 %v15956_v40  ;;  %v16028_v40 = vld [vmem:[%s17525_s14 + $0x1b54] ss:$8 sps:$4 sm:$0xff]  }
 0x382   : > { %11634 = vmatpush1.bf16.msra.mxu0 %v15951_v17 }
 0x383   : > { %11675 = vmatpush1.bf16.msra.mxu1 %v15954_v18  ;;  %11635 = vmatprep.subr.bf16.mxu0 %v15959_v16  ;;  %v16023_v16 = vld [vmem:[%s17525_s14 + $0x1a50] ss:$8 sps:$4 sm:$0xff]  }
 0x384   : > { %11676 = vmatprep.subr.bf16.mxu1 %v15962_v19  ;;  %v16026_v19 = vld [vmem:[%s17525_s14 + $0x1b50] ss:$8 sps:$4 sm:$0xff]  }
 0x386   : > { %11636 = vmatpush1.bf16.msra.mxu0 %v15957_v20 }
 0x387   : > { %11677 = vmatpush1.bf16.msra.mxu1 %v15960_v46  ;;  %11637 = vmatprep.subr.bf16.mxu0 %v15965_v22 }
 0x388   : > { %11678 = vmatprep.subr.bf16.mxu1 %v15968_v56 }
 0x38a   : > { %11638 = vmatpush2.bf16.msra.mxu0 %v15963_v58  ;;  %v16034_v58 = vld [vmem:[%s17525_s14 + $0x1b44] ss:$8 sps:$4 sm:$0xff]  }
 0x38b   : > { %11679 = vmatpush2.bf16.msra.mxu1 %v15966_v25  ;;  %11639 = vmatprep.subr.bf16.mxu0 %v15971_v28  ;;  %v16029_v25 = vld [vmem:[%s17525_s14 + $0x1a40] ss:$8 sps:$4 sm:$0xff]  }
 0x38c   : > { %11680 = vmatprep.subr.bf16.mxu1 %v15974_v29  ;;  %v16032_v28 = vld [vmem:[%s17525_s14 + $0x1b40] ss:$8 sps:$4 sm:$0xff]   ;;  %v16037_v29 = vld [vmem:[%s17525_s14 + $0x1a34] ss:$8 sps:$4 sm:$0xff]  }
 0x38e   : > { %11640 = vmatpush2.bf16.msra.mxu0 %v15969_v31  ;;  %v16040_v31 = vld [vmem:[%s17525_s14 + $0x1b34] ss:$8 sps:$4 sm:$0xff]  }
 0x38f   : > { %11681 = vmatpush2.bf16.msra.mxu1 %v15972_v4  ;;  %11641 = vmatprep.subr.bf16.mxu0 %v15977_v57  ;;  %v16035_v4 = vld [vmem:[%s17525_s14 + $0x1a30] ss:$8 sps:$4 sm:$0xff]  }
 0x390   : > { %11682 = vmatprep.subr.bf16.mxu1 %v15980_v35  ;;  %v16038_v57 = vld [vmem:[%s17525_s14 + $0x1b30] ss:$8 sps:$4 sm:$0xff]   ;;  %v16043_v35 = vld [vmem:[%s17525_s14 + $0x1a24] ss:$8 sps:$4 sm:$0xff]  }
 0x392   : > { %11642 = vmatpush2.bf16.msra.mxu0 %v15975_v36  ;;  %v16046_v36 = vld [vmem:[%s17525_s14 + $0x1b24] ss:$8 sps:$4 sm:$0xff]  }
 0x393   : > { %11683 = vmatpush2.bf16.msra.mxu1 %v15978_v37  ;;  %11643 = vmatprep.subr.bf16.mxu0 %v15983_v12  ;;  %v16041_v37 = vld [vmem:[%s17525_s14 + $0x1a20] ss:$8 sps:$4 sm:$0xff]  }
 0x394   : > { %11684 = vmatprep.subr.bf16.mxu1 %v15986_v38  ;;  %v16044_v12 = vld [vmem:[%s17525_s14 + $0x1b20] ss:$8 sps:$4 sm:$0xff]   ;;  %v16049_v38 = vld [vmem:[%s17525_s14 + $0x1a14] ss:$8 sps:$4 sm:$0xff]  }
 0x396   : > { %11644 = vmatpush2.bf16.msra.mxu0 %v15981_v39  ;;  %v16052_v39 = vld [vmem:[%s17525_s14 + $0x1b14] ss:$8 sps:$4 sm:$0xff]  }
 0x397   : > { %11685 = vmatpush2.bf16.msra.mxu1 %v15984_v11  ;;  %11645 = vmatprep.subr.bf16.mxu0 %v15989_v15  ;;  %v16047_v11 = vld [vmem:[%s17525_s14 + $0x1a10] ss:$8 sps:$4 sm:$0xff]  }
 0x398   : > { %11686 = vmatprep.subr.bf16.mxu1 %v15992_v41  ;;  %v16050_v15 = vld [vmem:[%s17525_s14 + $0x1b10] ss:$8 sps:$4 sm:$0xff]   ;;  %v16055_v41 = vld [vmem:[%s17525_s14 + $0x1a04] ss:$8 sps:$4 sm:$0xff]  }
 0x39a   : > { %11646 = vmatpush2.bf16.msra.mxu0 %v15987_v42  ;;  %v16058_v42 = vld [vmem:[%s17525_s14 + $0x1b04] ss:$8 sps:$4 sm:$0xff]  }
 0x39b   : > { %11687 = vmatpush2.bf16.msra.mxu1 %v15990_v8  ;;  %11647 = vmatprep.subr.bf16.mxu0 %v15995_v43  ;;  %v16053_v8 = vld [vmem:[%s17525_s14 + $0x1a00] ss:$8 sps:$4 sm:$0xff]  }
 0x39c   : > { %11688 = vmatprep.subr.bf16.mxu1 %v15998_v47  ;;  %v16056_v43 = vld [vmem:[%s17525_s14 + $0x1b00] ss:$8 sps:$4 sm:$0xff]   ;;  %v16061_v47 = vld [vmem:[%s17525_s14 + $0x1af4] ss:$8 sps:$4 sm:$0xff]  }
 0x39e   : > { %11648 = vmatpush2.bf16.msra.mxu0 %v15993_v21  ;;  %v16059_v21 = vld [vmem:[%s17525_s14 + $0x1af0] ss:$8 sps:$4 sm:$0xff]  }
 0x39f   : > { %11689 = vmatpush2.bf16.msra.mxu1 %v15996_v49  ;;  %11649 = vmatprep.subr.bf16.mxu0 %v16001_v26  ;;  %v16062_v49 = vld [vmem:[%s17525_s14 + $0x1bf0] ss:$8 sps:$4 sm:$0xff]   ;;  %v16067_v26 = vld [vmem:[%s17525_s14 + $0x1ae4] ss:$8 sps:$4 sm:$0xff]  }
 0x3a0   : > { %11690 = vmatprep.subr.bf16.mxu1 %v16004_v27  ;;  %v16070_v27 = vld [vmem:[%s17525_s14 + $0x1be4] ss:$8 sps:$4 sm:$0xff]  }
 0x3a2   : > { %11650 = vmatpush2.bf16.msra.mxu0 %v15999_v23  ;;  %v16065_v23 = vld [vmem:[%s17525_s14 + $0x1ae0] ss:$8 sps:$4 sm:$0xff]  }
 0x3a3   : > { %11691 = vmatpush2.bf16.msra.mxu1 %v16002_v7  ;;  %11651 = vmatprep.subr.bf16.mxu0 %v16007_v54  ;;  %v16068_v7 = vld [vmem:[%s17525_s14 + $0x1be0] ss:$8 sps:$4 sm:$0xff]   ;;  %v16073_v54 = vld [vmem:[%s17525_s14 + $0x1ad4] ss:$8 sps:$4 sm:$0xff]  }
 0x3a4   : > { %11692 = vmatprep.subr.bf16.mxu1 %v16010_v55  ;;  %v16076_v55 = vld [vmem:[%s17525_s14 + $0x1bd4] ss:$8 sps:$4 sm:$0xff]  }
 0x3a6   : > { %11652 = vmatpush2.bf16.msra.mxu0 %v16005_v60  ;;  %v16079_v60 = vld [vmem:[%s17525_s14 + $0x1ac4] ss:$8 sps:$4 sm:$0xff]  }
 0x3a7   : > { %11693 = vmatpush2.bf16.msra.mxu1 %v16008_v34  ;;  %11703 = vmatprep.subr.bf16.mxu0 %v16013_v24  ;;  %v16082_v34 = vld [vmem:[%s17525_s14 + $0x1bc4] ss:$8 sps:$4 sm:$0xff]   ;;  %v16077_v24 = vld [vmem:[%s17525_s14 + $0x1ac0] ss:$8 sps:$4 sm:$0xff]  }
 0x3a8   : > { %11744 = vmatprep.subr.bf16.mxu1 %v16016_v0  ;;  %v16080_v0 = vld [vmem:[%s17525_s14 + $0x1bc0] ss:$8 sps:$4 sm:$0xff]  }
 0x3a9   : > { %v11409_v9 = vpop.f32.mrf.mxu0  ;;  %11654 = vmatmul.mubr.bf16.vlgmr.msra.gmra.mxu0 %v2242_v59  ;;  %v16074_v59 = vld [vmem:[%s17525_s14 + $0x1bd0] ss:$8 sps:$4 sm:$0xff]  }
 0x3aa   : > { %v11450_v10 = vpop.f32.mrf.mxu1  ;;  %11695 = vmatmul.mubr.bf16.vlgmr.msra.gmra.mxu1 %v2264_v3  ;;  %v11410_v51 = vadd.f32 %v11409_v9, %v18509_v32  ;;  %11704 = vmatpush1.bf16.msra.mxu0 %v16011_v1  ;;  %v16085_v1 = vld [vmem:[%s17525_s14 + $0x1ab4] ss:$8 sps:$4 sm:$0xff]   ;;  %v16086_v3 = vld [vmem:[%s17525_s14 + $0x1bb0] ss:$8 sps:$4 sm:$0xff]  }
 0x3ab   : > { %11745 = vmatpush1.bf16.msra.mxu1 %v16014_v62  ;;  %v11411_v13 = vpop.f32.mrf.mxu0  ;;  %11705 = vmatprep.subr.bf16.mxu0 %v16019_v63  ;;  %v16088_v62 = vld [vmem:[%s17525_s14 + $0x1bb4] ss:$8 sps:$4 sm:$0xff]   ;;  %v16091_v63 = vld [vmem:[%s17525_s14 + $0x1aa4] ss:$8 sps:$4 sm:$0xff]  }
 0x3ac   : > { %v11452_v14 = vpop.f32.mrf.mxu1  ;;  %11746 = vmatprep.subr.bf16.mxu1 %v16022_v5  ;;  %v18589_v17 = vadd.f32 %v11450_v10, %v11410_v51  ;;  %v11412_v18 = vadd.f32 %v11411_v13, %v18514_v61  ;;  %11735 = vmatprep.mubr.bf16.mxu0 %v2263_v2  ;;  %v16031_v61 = vld [vmem:[%s17525_s14 + $0x1a44] ss:$8 sps:$4 sm:$0xff]   ;;  %v16083_v2 = vld [vmem:[%s17525_s14 + $0x1ab0] ss:$8 sps:$4 sm:$0xff]   ;;  %v16097_v9 = vld [vmem:[%s17525_s14 + $0x1a94] ss:$8 sps:$4 sm:$0xff]  }
 0x3ad   : > { %11776 = vmatprep.mubr.bf16.mxu1 %v2267_v45  ;;  %v11413_v32 = vpop.f32.mrf.mxu0  ;;  %v16094_v5 = vld [vmem:[%s17525_s14 + $0x1ba4] ss:$8 sps:$4 sm:$0xff]   ;;  %v16092_v45 = vld [vmem:[%s17525_s14 + $0x1ba0] ss:$8 sps:$4 sm:$0xff]   ;;  %v16100_v10 = vld [vmem:[%s17525_s14 + $0x1b94] ss:$8 sps:$4 sm:$0xff]  }
 0x3ae   : > { %v11454_v20 = vpop.f32.mrf.mxu1  ;;  %v18594_v46 = vadd.f32 %v11452_v14, %v11412_v18  ;;  %11706 = vmatpush1.bf16.msra.mxu0 %v16017_v6  ;;  %v18639_v6 = vld [vmem:[%s17543_s23 + $0x38] sm:$0xff]  ;;  %v16104_v32 = vld [vmem:[%s17525_s14 + $0x1b80] ss:$8 sps:$4 sm:$0xff]  }
 0x3af   : > { %11747 = vmatpush1.bf16.msra.mxu1 %v16020_v30  ;;  %v11414_v22 = vpop.f32.mrf.mxu0  ;;  %11707 = vmatprep.subr.bf16.mxu0 %v16025_v52  ;;  %v16089_v30 = vld [vmem:[%s17525_s14 + $0x1aa0] ss:$8 sps:$4 sm:$0xff]   ;;  %v18647_v51 = vrot.slane %v18639_v6, %v17594_v50  ;;  %v16095_v13 = vld [vmem:[%s17525_s14 + $0x1a90] ss:$8 sps:$4 sm:$0xff]   ;;  %v16103_v52 = vld [vmem:[%s17525_s14 + $0x1a84] ss:$8 sps:$4 sm:$0xff]  }
 0x3b0   : > { %v11455_v56 = vpop.f32.mrf.mxu1  ;;  %11748 = vmatprep.subr.bf16.mxu1 %v16028_v40  ;;  %v16098_v14 = vld [vmem:[%s17525_s14 + $0x1b90] ss:$8 sps:$4 sm:$0xff]   ;;  %v16106_v40 = vld [vmem:[%s17525_s14 + $0x1b84] ss:$8 sps:$4 sm:$0xff]   ;;  %v16110_v20 = vld [vmem:[%s17525_s14 + $0x1c74] ss:$8 sps:$4 sm:$0xff]  }
 0x3b1   : > { %v2283_v18 = vcombine.high %v18647_v51, %v18647_v51  ;;  %v16113_v22 = vld [vmem:[%s17525_s14 + $0x1d74] ss:$8 sps:$4 sm:$0xff]  }
 0x3b2   : > { %11708 = vmatpush1.bf16.msra.mxu0 %v16023_v16  ;;  %v2249_v16 = vrot.slane %v18565_v53, %v17594_v50  ;;  %v16116_v53 = vld [vmem:[%s17525_s14 + $0x1c64] ss:$8 sps:$4 sm:$0xff]  }
 0x3b3   : > { %11749 = vmatpush1.bf16.msra.mxu1 %v16026_v19  ;;  %11709 = vmatprep.subr.bf16.mxu0 %v16031_v61  ;;  %v16101_v19 = vld [vmem:[%s17525_s14 + $0x1a80] ss:$8 sps:$4 sm:$0xff]   ;;  %v2305_v56 = vrot.slane %v2283_v18, %v17594_v50  ;;  %v16173_v18 = vld [vmem:[%s17525_s14 + $0x1dd4] ss:$8 sps:$4 sm:$0xff]  }
 0x3b4   : > { %11750 = vmatprep.subr.bf16.mxu1 %v16034_v58  ;;  %v2265_v61 = vcombine.high %v2249_v16, %v2249_v16  ;;  %v16108_v58 = vld [vmem:[%s17525_s14 + $0x1c70] ss:$8 sps:$4 sm:$0xff]  }
 0x3b6   : > { %11710 = vmatpush1.bf16.msra.mxu0 %v16029_v25  ;;  %v16111_v25 = vld [vmem:[%s17525_s14 + $0x1d70] ss:$8 sps:$4 sm:$0xff]  }
 0x3b7   : > { %11751 = vmatpush1.bf16.msra.mxu1 %v16032_v28  ;;  %11711 = vmatprep.subr.bf16.mxu0 %v16037_v29  ;;  %v16119_v28 = vld [vmem:[%s17525_s14 + $0x1d64] ss:$8 sps:$4 sm:$0xff]   ;;  %v2315_v29 = vcombine.high %v2305_v56, %v2305_v56 }
 0x3b8   : > { %11752 = vmatprep.subr.bf16.mxu1 %v16040_v31 }
 0x3ba   : > { %11712 = vmatpush1.bf16.msra.mxu0 %v16035_v4 }
 0x3bb   : > { %11753 = vmatpush1.bf16.msra.mxu1 %v16038_v57  ;;  %11713 = vmatprep.subr.bf16.mxu0 %v16043_v35  ;;  %v16114_v35 = vld [vmem:[%s17525_s14 + $0x1c60] ss:$8 sps:$4 sm:$0xff]  }
 0x3bc   : > { %11754 = vmatprep.subr.bf16.mxu1 %v16046_v36  ;;  %v16117_v36 = vld [vmem:[%s17525_s14 + $0x1d60] ss:$8 sps:$4 sm:$0xff]  }
 0x3be   : > { %11714 = vmatpush1.bf16.msra.mxu0 %v16041_v37 }
 0x3bf   : > { %11755 = vmatpush1.bf16.msra.mxu1 %v16044_v12  ;;  %11715 = vmatprep.subr.bf16.mxu0 %v16049_v38  ;;  %v16122_v38 = vld [vmem:[%s17525_s14 + $0x1c54] ss:$8 sps:$4 sm:$0xff]  }
 0x3c0   : > { %11756 = vmatprep.subr.bf16.mxu1 %v16052_v39  ;;  %v16125_v39 = vld [vmem:[%s17525_s14 + $0x1d54] ss:$8 sps:$4 sm:$0xff]  }
 0x3c2   : > { %11716 = vmatpush1.bf16.msra.mxu0 %v16047_v11 }
 0x3c3   : > { %11757 = vmatpush1.bf16.msra.mxu1 %v16050_v15  ;;  %11717 = vmatprep.subr.bf16.mxu0 %v16055_v41 }
 0x3c4   : > { %11758 = vmatprep.subr.bf16.mxu1 %v16058_v42 }
 0x3c6   : > { %11718 = vmatpush1.bf16.msra.mxu0 %v16053_v8  ;;  %v16120_v8 = vld [vmem:[%s17525_s14 + $0x1c50] ss:$8 sps:$4 sm:$0xff]  }
 0x3c7   : > { %11759 = vmatpush1.bf16.msra.mxu1 %v16056_v43  ;;  %11719 = vmatprep.subr.bf16.mxu0 %v16061_v47  ;;  %v16123_v43 = vld [vmem:[%s17525_s14 + $0x1d50] ss:$8 sps:$4 sm:$0xff]  }
 0x3c8   : > { %11760 = vmatprep.subr.bf16.mxu1 %v16064_v48 }
 0x3ca   : > { %11720 = vmatpush2.bf16.msra.mxu0 %v16059_v21  ;;  %v16131_v21 = vld [vmem:[%s17525_s14 + $0x1d44] ss:$8 sps:$4 sm:$0xff]  }
 0x3cb   : > { %11761 = vmatpush2.bf16.msra.mxu1 %v16062_v49  ;;  %11721 = vmatprep.subr.bf16.mxu0 %v16067_v26  ;;  %v16126_v49 = vld [vmem:[%s17525_s14 + $0x1c40] ss:$8 sps:$4 sm:$0xff]  }
 0x3cc   : > { %11762 = vmatprep.subr.bf16.mxu1 %v16070_v27  ;;  %v16129_v26 = vld [vmem:[%s17525_s14 + $0x1d40] ss:$8 sps:$4 sm:$0xff]   ;;  %v16134_v27 = vld [vmem:[%s17525_s14 + $0x1c34] ss:$8 sps:$4 sm:$0xff]  }
 0x3ce   : > { %11722 = vmatpush2.bf16.msra.mxu0 %v16065_v23  ;;  %v16137_v23 = vld [vmem:[%s17525_s14 + $0x1d34] ss:$8 sps:$4 sm:$0xff]  }
 0x3cf   : > { %11763 = vmatpush2.bf16.msra.mxu1 %v16068_v7  ;;  %11723 = vmatprep.subr.bf16.mxu0 %v16073_v54  ;;  %v16132_v7 = vld [vmem:[%s17525_s14 + $0x1c30] ss:$8 sps:$4 sm:$0xff]  }
 0x3d0   : > { %11764 = vmatprep.subr.bf16.mxu1 %v16076_v55  ;;  %v16135_v54 = vld [vmem:[%s17525_s14 + $0x1d30] ss:$8 sps:$4 sm:$0xff]   ;;  %v16140_v55 = vld [vmem:[%s17525_s14 + $0x1c24] ss:$8 sps:$4 sm:$0xff]  }
 0x3d2   : > { %11724 = vmatpush2.bf16.msra.mxu0 %v16071_v33  ;;  %v16143_v33 = vld [vmem:[%s17525_s14 + $0x1d24] ss:$8 sps:$4 sm:$0xff]  }
 0x3d3   : > { %11765 = vmatpush2.bf16.msra.mxu1 %v16074_v59  ;;  %11725 = vmatprep.subr.bf16.mxu0 %v16079_v60  ;;  %v16138_v59 = vld [vmem:[%s17525_s14 + $0x1c20] ss:$8 sps:$4 sm:$0xff]  }
 0x3d4   : > { %11766 = vmatprep.subr.bf16.mxu1 %v16082_v34  ;;  %v16141_v60 = vld [vmem:[%s17525_s14 + $0x1d20] ss:$8 sps:$4 sm:$0xff]   ;;  %v16146_v34 = vld [vmem:[%s17525_s14 + $0x1c14] ss:$8 sps:$4 sm:$0xff]  }
 0x3d6   : > { %11726 = vmatpush2.bf16.msra.mxu0 %v16077_v24  ;;  %v16149_v24 = vld [vmem:[%s17525_s14 + $0x1d14] ss:$8 sps:$4 sm:$0xff]  }
 0x3d7   : > { %11767 = vmatpush2.bf16.msra.mxu1 %v16080_v0  ;;  %11727 = vmatprep.subr.bf16.mxu0 %v16085_v1  ;;  %v16144_v0 = vld [vmem:[%s17525_s14 + $0x1c10] ss:$8 sps:$4 sm:$0xff]  }
 0x3d8   : > { %11768 = vmatprep.subr.bf16.mxu1 %v16088_v62  ;;  %v16147_v1 = vld [vmem:[%s17525_s14 + $0x1d10] ss:$8 sps:$4 sm:$0xff]   ;;  %v16152_v62 = vld [vmem:[%s17525_s14 + $0x1c04] ss:$8 sps:$4 sm:$0xff]  }
 0x3da   : > { %11728 = vmatpush2.bf16.msra.mxu0 %v16083_v2  ;;  %v16155_v2 = vld [vmem:[%s17525_s14 + $0x1d04] ss:$8 sps:$4 sm:$0xff]  }
 0x3db   : > { %11769 = vmatpush2.bf16.msra.mxu1 %v16086_v3  ;;  %11729 = vmatprep.subr.bf16.mxu0 %v16091_v63  ;;  %v16150_v3 = vld [vmem:[%s17525_s14 + $0x1c00] ss:$8 sps:$4 sm:$0xff]  }
 0x3dc   : > { %11770 = vmatprep.subr.bf16.mxu1 %v16094_v5  ;;  %v16153_v63 = vld [vmem:[%s17525_s14 + $0x1d00] ss:$8 sps:$4 sm:$0xff]   ;;  %v16158_v5 = vld [vmem:[%s17525_s14 + $0x1cf4] ss:$8 sps:$4 sm:$0xff]  }
 0x3de   : > { %11730 = vmatpush2.bf16.msra.mxu0 %v16089_v30  ;;  %v16161_v30 = vld [vmem:[%s17525_s14 + $0x1df4] ss:$8 sps:$4 sm:$0xff]  }
 0x3df   : > { %11771 = vmatpush2.bf16.msra.mxu1 %v16092_v45  ;;  %11731 = vmatprep.subr.bf16.mxu0 %v16097_v9  ;;  %v16156_v45 = vld [vmem:[%s17525_s14 + $0x1cf0] ss:$8 sps:$4 sm:$0xff]  }
 0x3e0   : > { %11772 = vmatprep.subr.bf16.mxu1 %v16100_v10  ;;  %v16159_v9 = vld [vmem:[%s17525_s14 + $0x1df0] ss:$8 sps:$4 sm:$0xff]   ;;  %v16164_v10 = vld [vmem:[%s17525_s14 + $0x1ce4] ss:$8 sps:$4 sm:$0xff]  }
 0x3e2   : > { %11732 = vmatpush2.bf16.msra.mxu0 %v16095_v13  ;;  %v16167_v13 = vld [vmem:[%s17525_s14 + $0x1de4] ss:$8 sps:$4 sm:$0xff]  }
 0x3e3   : > { %11773 = vmatpush2.bf16.msra.mxu1 %v16098_v14  ;;  %11733 = vmatprep.subr.bf16.mxu0 %v16103_v52  ;;  %v16162_v14 = vld [vmem:[%s17525_s14 + $0x1ce0] ss:$8 sps:$4 sm:$0xff]  }
 0x3e4   : > { %11774 = vmatprep.subr.bf16.mxu1 %v16106_v40  ;;  %v16165_v52 = vld [vmem:[%s17525_s14 + $0x1de0] ss:$8 sps:$4 sm:$0xff]   ;;  %v16170_v40 = vld [vmem:[%s17525_s14 + $0x1cd4] ss:$8 sps:$4 sm:$0xff]  }
 0x3e6   : > { %11734 = vmatpush2.bf16.msra.mxu0 %v16101_v19  ;;  %v16171_v19 = vld [vmem:[%s17525_s14 + $0x1dd0] ss:$8 sps:$4 sm:$0xff]  }
 0x3e7   : > { %11775 = vmatpush2.bf16.msra.mxu1 %v16104_v32  ;;  %11785 = vmatprep.subr.bf16.mxu0 %v16110_v20  ;;  %v16176_v32 = vld [vmem:[%s17525_s14 + $0x1cc4] ss:$8 sps:$4 sm:$0xff]  }
 0x3e8   : > { %11826 = vmatprep.subr.bf16.mxu1 %v16113_v22  ;;  %v16179_v20 = vld [vmem:[%s17525_s14 + $0x1dc4] ss:$8 sps:$4 sm:$0xff]   ;;  %v16174_v22 = vld [vmem:[%s17525_s14 + $0x1cc0] ss:$8 sps:$4 sm:$0xff]  }
 0x3e9   : > { %v11491_v31 = vpop.f32.mrf.mxu0  ;;  %11736 = vmatmul.mubr.bf16.vlgmr.msra.gmra.mxu0 %v2249_v16  ;;  %v16168_v16 = vld [vmem:[%s17525_s14 + $0x1cd0] ss:$8 sps:$4 sm:$0xff]  }
 0x3ea   : > { %v11532_v4 = vpop.f32.mrf.mxu1  ;;  %11777 = vmatmul.mubr.bf16.vlgmr.msra.gmra.mxu1 %v2265_v61  ;;  %v11492_v57 = vadd.f32 %v11491_v31, %v18589_v17  ;;  %11786 = vmatpush1.bf16.msra.mxu0 %v16108_v58  ;;  %v16182_v61 = vld [vmem:[%s17525_s14 + $0x1cb4] ss:$8 sps:$4 sm:$0xff]   ;;  %v2268_v31 = vcombine.high %v18639_v6, %v18639_v6  ;;  %v16192_v6 = vld [vmem:[%s17525_s14 + $0x1c90] ss:$8 sps:$4 sm:$0xff]  }
 0x3eb   : > { %11827 = vmatpush1.bf16.msra.mxu1 %v16111_v25  ;;  %v11493_v37 = vpop.f32.mrf.mxu0  ;;  %11787 = vmatprep.subr.bf16.mxu0 %v16116_v53  ;;  %v16185_v58 = vld [vmem:[%s17525_s14 + $0x1db4] ss:$8 sps:$4 sm:$0xff]   ;;  %v16180_v25 = vld [vmem:[%s17525_s14 + $0x1cb0] ss:$8 sps:$4 sm:$0xff]  }
 0x3ec   : > { %v11534_v12 = vpop.f32.mrf.mxu1  ;;  %11828 = vmatprep.subr.bf16.mxu1 %v16119_v28  ;;  %v18671_v11 = vadd.f32 %v11532_v4, %v11492_v57  ;;  %v11494_v15 = vadd.f32 %v11493_v37, %v18594_v46  ;;  %11817 = vmatprep.mubr.bf16.mxu0 %v2305_v56  ;;  %v16128_v46 = vld [vmem:[%s17525_s14 + $0x1c44] ss:$8 sps:$4 sm:$0xff]   ;;  %v16177_v56 = vld [vmem:[%s17525_s14 + $0x1dc0] ss:$8 sps:$4 sm:$0xff]   ;;  %v16183_v53 = vld [vmem:[%s17525_s14 + $0x1db0] ss:$8 sps:$4 sm:$0xff]   ;;  %v18727_v37 = vrot.slane %v2268_v31, %v17594_v50 }
 0x3ed   : > { %11858 = vmatprep.mubr.bf16.mxu1 %v2315_v29  ;;  %v11495_v17 = vpop.f32.mrf.mxu0  ;;  %v16188_v28 = vld [vmem:[%s17525_s14 + $0x1ca4] ss:$8 sps:$4 sm:$0xff]   ;;  %v16186_v4 = vld [vmem:[%s17525_s14 + $0x1ca0] ss:$8 sps:$4 sm:$0xff]   ;;  %v16257_v31 = vld [vmem:[%s17525_s14 + $0x1ff4] ss:$8 sps:$4 sm:$0xff]  }
 0x3ee   : > { %v11536_v41 = vpop.f32.mrf.mxu1  ;;  %v18674_v42 = vadd.f32 %v11534_v12, %v11494_v15  ;;  %11788 = vmatpush1.bf16.msra.mxu0 %v16114_v35  ;;  %v16191_v29 = vld [vmem:[%s17525_s14 + $0x1da4] ss:$8 sps:$4 sm:$0xff]   ;;  %v16189_v57 = vld [vmem:[%s17525_s14 + $0x1da0] ss:$8 sps:$4 sm:$0xff]   ;;  %v16194_v35 = vld [vmem:[%s17525_s14 + $0x1c94] ss:$8 sps:$4 sm:$0xff]   ;;  %v2284_v15 = vcombine.high %v18727_v37, %v18727_v37  ;;  %v2291_v17 = vrot.slane %v18647_v51, %v17594_v50 }
 0x3ef   : > { %11829 = vmatpush1.bf16.msra.mxu1 %v16117_v36  ;;  %v11496_v47 = vpop.f32.mrf.mxu0  ;;  %11789 = vmatprep.subr.bf16.mxu0 %v16122_v38  ;;  %v16197_v36 = vld [vmem:[%s17525_s14 + $0x1d94] ss:$8 sps:$4 sm:$0xff]   ;;  %v16195_v12 = vld [vmem:[%s17525_s14 + $0x1d90] ss:$8 sps:$4 sm:$0xff]   ;;  %v16200_v38 = vld [vmem:[%s17525_s14 + $0x1c84] ss:$8 sps:$4 sm:$0xff]  }
 0x3f0   : > { %v11537_v48 = vpop.f32.mrf.mxu1  ;;  %11830 = vmatprep.subr.bf16.mxu1 %v16125_v39  ;;  %v16203_v39 = vld [vmem:[%s17525_s14 + $0x1d84] ss:$8 sps:$4 sm:$0xff]   ;;  %v16198_v41 = vld [vmem:[%s17525_s14 + $0x1c80] ss:$8 sps:$4 sm:$0xff]   ;;  %v16209_v47 = vld [vmem:[%s17525_s14 + $0x1f74] ss:$8 sps:$4 sm:$0xff]  }
 0x3f1   : > { %v2312_v48 = vrot.slane %v2284_v15, %v17594_v50  ;;  %v16212_v51 = vld [vmem:[%s17525_s14 + $0x1e64] ss:$8 sps:$4 sm:$0xff]   ;;  %v16264_v15 = vld [vmem:[%s17525_s14 + $0x1ed0] ss:$8 sps:$4 sm:$0xff]  }
 0x3f2   : > { %11790 = vmatpush1.bf16.msra.mxu0 %v16120_v8  ;;  %v16201_v8 = vld [vmem:[%s17525_s14 + $0x1d80] ss:$8 sps:$4 sm:$0xff]  }
 0x3f3   : > { %11831 = vmatpush1.bf16.msra.mxu1 %v16123_v43  ;;  %11791 = vmatprep.subr.bf16.mxu0 %v16128_v46  ;;  %v16206_v43 = vld [vmem:[%s17525_s14 + $0x1e74] ss:$8 sps:$4 sm:$0xff]   ;;  %v2313_v46 = vcombine.high %v2291_v17, %v2291_v17 }
 0x3f4   : > { %11832 = vmatprep.subr.bf16.mxu1 %v16131_v21  ;;  %v16204_v21 = vld [vmem:[%s17525_s14 + $0x1e70] ss:$8 sps:$4 sm:$0xff]  }
 0x3f6   : > { %11792 = vmatpush1.bf16.msra.mxu0 %v16126_v49  ;;  %v16207_v49 = vld [vmem:[%s17525_s14 + $0x1f70] ss:$8 sps:$4 sm:$0xff]  }
 0x3f7   : > { %11833 = vmatpush1.bf16.msra.mxu1 %v16129_v26  ;;  %11793 = vmatprep.subr.bf16.mxu0 %v16134_v27  ;;  %v16215_v26 = vld [vmem:[%s17525_s14 + $0x1f64] ss:$8 sps:$4 sm:$0xff]   ;;  %v2316_v27 = vcombine.high %v2312_v48, %v2312_v48 }
 0x3f8   : > { %11834 = vmatprep.subr.bf16.mxu1 %v16137_v23 }
 0x3fa   : > { %11794 = vmatpush1.bf16.msra.mxu0 %v16132_v7 }
 0x3fb   : > { %11835 = vmatpush1.bf16.msra.mxu1 %v16135_v54  ;;  %11795 = vmatprep.subr.bf16.mxu0 %v16140_v55  ;;  %v16210_v55 = vld [vmem:[%s17525_s14 + $0x1e60] ss:$8 sps:$4 sm:$0xff]  }
 0x3fc   : > { %11836 = vmatprep.subr.bf16.mxu1 %v16143_v33  ;;  %v16213_v33 = vld [vmem:[%s17525_s14 + $0x1f60] ss:$8 sps:$4 sm:$0xff]  }
 0x3fe   : > { %11796 = vmatpush1.bf16.msra.mxu0 %v16138_v59 }
 0x3ff   : > { %11837 = vmatpush1.bf16.msra.mxu1 %v16141_v60  ;;  %11797 = vmatprep.subr.bf16.mxu0 %v16146_v34  ;;  %v16218_v34 = vld [vmem:[%s17525_s14 + $0x1e54] ss:$8 sps:$4 sm:$0xff]  }
 0x400   : > { %11838 = vmatprep.subr.bf16.mxu1 %v16149_v24  ;;  %v16221_v24 = vld [vmem:[%s17525_s14 + $0x1f54] ss:$8 sps:$4 sm:$0xff]  }
 0x402   : > { %11798 = vmatpush1.bf16.msra.mxu0 %v16144_v0 }
 0x403   : > { %11839 = vmatpush1.bf16.msra.mxu1 %v16147_v1  ;;  %11799 = vmatprep.subr.bf16.mxu0 %v16152_v62 }
 0x404   : > { %11840 = vmatprep.subr.bf16.mxu1 %v16155_v2 }
 0x406   : > { %11800 = vmatpush1.bf16.msra.mxu0 %v16150_v3  ;;  %v16216_v3 = vld [vmem:[%s17525_s14 + $0x1e50] ss:$8 sps:$4 sm:$0xff]  }
 0x407   : > { %11841 = vmatpush1.bf16.msra.mxu1 %v16153_v63  ;;  %11801 = vmatprep.subr.bf16.mxu0 %v16158_v5  ;;  %v16219_v63 = vld [vmem:[%s17525_s14 + $0x1f50] ss:$8 sps:$4 sm:$0xff]  }
 0x408   : > { %11842 = vmatprep.subr.bf16.mxu1 %v16161_v30 }
 0x40a   : > { %11802 = vmatpush2.bf16.msra.mxu0 %v16156_v45  ;;  %v16227_v45 = vld [vmem:[%s17525_s14 + $0x1f44] ss:$8 sps:$4 sm:$0xff]  }
 0x40b   : > { %11843 = vmatpush2.bf16.msra.mxu1 %v16159_v9  ;;  %11803 = vmatprep.subr.bf16.mxu0 %v16164_v10  ;;  %v16222_v9 = vld [vmem:[%s17525_s14 + $0x1e40] ss:$8 sps:$4 sm:$0xff]  }
 0x40c   : > { %11844 = vmatprep.subr.bf16.mxu1 %v16167_v13  ;;  %v16225_v10 = vld [vmem:[%s17525_s14 + $0x1f40] ss:$8 sps:$4 sm:$0xff]   ;;  %v16230_v13 = vld [vmem:[%s17525_s14 + $0x1e34] ss:$8 sps:$4 sm:$0xff]  }
 0x40e   : > { %11804 = vmatpush2.bf16.msra.mxu0 %v16162_v14  ;;  %v16233_v14 = vld [vmem:[%s17525_s14 + $0x1f34] ss:$8 sps:$4 sm:$0xff]  }
 0x40f   : > { %11845 = vmatpush2.bf16.msra.mxu1 %v16165_v52  ;;  %11805 = vmatprep.subr.bf16.mxu0 %v16170_v40  ;;  %v16228_v52 = vld [vmem:[%s17525_s14 + $0x1e30] ss:$8 sps:$4 sm:$0xff]  }
 0x410   : > { %11846 = vmatprep.subr.bf16.mxu1 %v16173_v18  ;;  %v16231_v40 = vld [vmem:[%s17525_s14 + $0x1f30] ss:$8 sps:$4 sm:$0xff]   ;;  %v16236_v18 = vld [vmem:[%s17525_s14 + $0x1e24] ss:$8 sps:$4 sm:$0xff]  }
 0x412   : > { %11806 = vmatpush2.bf16.msra.mxu0 %v16168_v16  ;;  %v16239_v16 = vld [vmem:[%s17525_s14 + $0x1f24] ss:$8 sps:$4 sm:$0xff]  }
 0x413   : > { %11847 = vmatpush2.bf16.msra.mxu1 %v16171_v19  ;;  %11807 = vmatprep.subr.bf16.mxu0 %v16176_v32  ;;  %v16234_v19 = vld [vmem:[%s17525_s14 + $0x1e20] ss:$8 sps:$4 sm:$0xff]  }
 0x414   : > { %11848 = vmatprep.subr.bf16.mxu1 %v16179_v20  ;;  %v16237_v32 = vld [vmem:[%s17525_s14 + $0x1f20] ss:$8 sps:$4 sm:$0xff]   ;;  %v16242_v20 = vld [vmem:[%s17525_s14 + $0x1e14] ss:$8 sps:$4 sm:$0xff]  }
 0x416   : > { %11808 = vmatpush2.bf16.msra.mxu0 %v16174_v22  ;;  %v16245_v22 = vld [vmem:[%s17525_s14 + $0x1f14] ss:$8 sps:$4 sm:$0xff]  }
 0x417   : > { %11849 = vmatpush2.bf16.msra.mxu1 %v16177_v56  ;;  %11809 = vmatprep.subr.bf16.mxu0 %v16182_v61  ;;  %v16240_v56 = vld [vmem:[%s17525_s14 + $0x1e10] ss:$8 sps:$4 sm:$0xff]  }
 0x418   : > { %11850 = vmatprep.subr.bf16.mxu1 %v16185_v58  ;;  %v16243_v61 = vld [vmem:[%s17525_s14 + $0x1f10] ss:$8 sps:$4 sm:$0xff]   ;;  %v16248_v58 = vld [vmem:[%s17525_s14 + $0x1e04] ss:$8 sps:$4 sm:$0xff]  }
 0x41a   : > { %11810 = vmatpush2.bf16.msra.mxu0 %v16180_v25  ;;  %v16251_v25 = vld [vmem:[%s17525_s14 + $0x1f04] ss:$8 sps:$4 sm:$0xff]  }
 0x41b   : > { %11851 = vmatpush2.bf16.msra.mxu1 %v16183_v53  ;;  %11811 = vmatprep.subr.bf16.mxu0 %v16188_v28  ;;  %v16246_v53 = vld [vmem:[%s17525_s14 + $0x1e00] ss:$8 sps:$4 sm:$0xff]  }
 0x41c   : > { %11852 = vmatprep.subr.bf16.mxu1 %v16191_v29  ;;  %v16249_v28 = vld [vmem:[%s17525_s14 + $0x1f00] ss:$8 sps:$4 sm:$0xff]   ;;  %v16254_v29 = vld [vmem:[%s17525_s14 + $0x1ef4] ss:$8 sps:$4 sm:$0xff]  }
 0x41e   : > { %11812 = vmatpush2.bf16.msra.mxu0 %v16186_v4  ;;  %v16252_v4 = vld [vmem:[%s17525_s14 + $0x1ef0] ss:$8 sps:$4 sm:$0xff]  }
 0x41f   : > { %11853 = vmatpush2.bf16.msra.mxu1 %v16189_v57  ;;  %11813 = vmatprep.subr.bf16.mxu0 %v16194_v35  ;;  %v16255_v57 = vld [vmem:[%s17525_s14 + $0x1ff0] ss:$8 sps:$4 sm:$0xff]   ;;  %v16260_v35 = vld [vmem:[%s17525_s14 + $0x1ee4] ss:$8 sps:$4 sm:$0xff]  }
 0x420   : > { %11854 = vmatprep.subr.bf16.mxu1 %v16197_v36  ;;  %v16263_v36 = vld [vmem:[%s17525_s14 + $0x1fe4] ss:$8 sps:$4 sm:$0xff]  }
 0x422   : > { %11814 = vmatpush2.bf16.msra.mxu0 %v16192_v6  ;;  %v16258_v6 = vld [vmem:[%s17525_s14 + $0x1ee0] ss:$8 sps:$4 sm:$0xff]  }
 0x423   : > { %11855 = vmatpush2.bf16.msra.mxu1 %v16195_v12  ;;  %11815 = vmatprep.subr.bf16.mxu0 %v16200_v38  ;;  %v16261_v12 = vld [vmem:[%s17525_s14 + $0x1fe0] ss:$8 sps:$4 sm:$0xff]   ;;  %v16266_v38 = vld [vmem:[%s17525_s14 + $0x1ed4] ss:$8 sps:$4 sm:$0xff]  }
 0x424   : > { %11856 = vmatprep.subr.bf16.mxu1 %v16203_v39  ;;  %v16269_v39 = vld [vmem:[%s17525_s14 + $0x1fd4] ss:$8 sps:$4 sm:$0xff]  }
 0x426   : > { %11816 = vmatpush2.bf16.msra.mxu0 %v16198_v41  ;;  %v16272_v41 = vld [vmem:[%s17525_s14 + $0x1ec4] ss:$8 sps:$4 sm:$0xff]  }
 0x427   : > { %11857 = vmatpush2.bf16.msra.mxu1 %v16201_v8  ;;  %11867 = vmatprep.subr.bf16.mxu0 %v16206_v43  ;;  %v16275_v8 = vld [vmem:[%s17525_s14 + $0x1fc4] ss:$8 sps:$4 sm:$0xff]   ;;  %v16270_v43 = vld [vmem:[%s17525_s14 + $0x1ec0] ss:$8 sps:$4 sm:$0xff]  }
 0x428   : > { %11908 = vmatprep.subr.bf16.mxu1 %v16209_v47  ;;  %v16273_v47 = vld [vmem:[%s17525_s14 + $0x1fc0] ss:$8 sps:$4 sm:$0xff]  }
 0x429   : > { %v11573_v23 = vpop.f32.mrf.mxu0  ;;  %11818 = vmatmul.mubr.bf16.vlgmr.msra.gmra.mxu0 %v2291_v17  ;;  %v16267_v17 = vld [vmem:[%s17525_s14 + $0x1fd0] ss:$8 sps:$4 sm:$0xff]  }
 0x42a   : > { %v11614_v7 = vpop.f32.mrf.mxu1  ;;  %11859 = vmatmul.mubr.bf16.vlgmr.msra.gmra.mxu1 %v2313_v46  ;;  %v11574_v54 = vadd.f32 %v11573_v23, %v18671_v11  ;;  %11868 = vmatpush1.bf16.msra.mxu0 %v16204_v21  ;;  %v16281_v46 = vld [vmem:[%s17525_s14 + $0x1fb4] ss:$8 sps:$4 sm:$0xff]   ;;  %v16276_v21 = vld [vmem:[%s17525_s14 + $0x1eb0] ss:$8 sps:$4 sm:$0xff]   ;;  %v16282_v23 = vld [vmem:[%s17525_s14 + $0x1ea0] ss:$8 sps:$4 sm:$0xff]  }
 0x42b   : > { %11909 = vmatpush1.bf16.msra.mxu1 %v16207_v49  ;;  %v11575_v59 = vpop.f32.mrf.mxu0  ;;  %11869 = vmatprep.subr.bf16.mxu0 %v16212_v51  ;;  %v16279_v49 = vld [vmem:[%s17525_s14 + $0x1fb0] ss:$8 sps:$4 sm:$0xff]   ;;  %v16284_v51 = vld [vmem:[%s17525_s14 + $0x1ea4] ss:$8 sps:$4 sm:$0xff]  }
 0x42c   : > { %v11616_v60 = vpop.f32.mrf.mxu1  ;;  %11910 = vmatprep.subr.bf16.mxu1 %v16215_v26  ;;  %v18751_v0 = vadd.f32 %v11614_v7, %v11574_v54  ;;  %v11576_v1 = vadd.f32 %v11575_v59, %v18674_v42  ;;  %11899 = vmatprep.mubr.bf16.mxu0 %v2312_v48  ;;  %v16224_v42 = vld [vmem:[%s17525_s14 + $0x1e44] ss:$8 sps:$4 sm:$0xff]   ;;  %v16278_v48 = vld [vmem:[%s17525_s14 + $0x1eb4] ss:$8 sps:$4 sm:$0xff]   ;;  %v16285_v7 = vld [vmem:[%s17525_s14 + $0x1fa0] ss:$8 sps:$4 sm:$0xff]  }
 0x42d   : > { %11940 = vmatprep.mubr.bf16.mxu1 %v2316_v27  ;;  %v11577_v11 = vpop.f32.mrf.mxu0  ;;  %v16287_v26 = vld [vmem:[%s17525_s14 + $0x1fa4] ss:$8 sps:$4 sm:$0xff]   ;;  %v18801_v27 = vld [vmem:[%s17543_s23 + $0x40] sm:$0xff]  ;;  %v16288_v59 = vld [vmem:[%s17525_s14 + $0x1e90] ss:$8 sps:$4 sm:$0xff]  }
 0x42e   : > { %v11618_v62 = vpop.f32.mrf.mxu1  ;;  %v18754_v2 = vadd.f32 %v11616_v60, %v11576_v1  ;;  %11870 = vmatpush1.bf16.msra.mxu0 %v16210_v55  ;;  %v16290_v54 = vld [vmem:[%s17525_s14 + $0x1e94] ss:$8 sps:$4 sm:$0xff]   ;;  %v16291_v60 = vld [vmem:[%s17525_s14 + $0x1f90] ss:$8 sps:$4 sm:$0xff]   ;;  %v2298_v11 = vrot.slane %v18727_v37, %v17594_v50  ;;  %v16309_v37 = vld [vmem:[%s17525_s14 + $0x2064] ss:$8 sps:$4 sm:$0xff]  }
 0x42f   : > { %11911 = vmatpush1.bf16.msra.mxu1 %v16213_v33  ;;  %v11578_v5 = vpop.f32.mrf.mxu0  ;;  %11871 = vmatprep.subr.bf16.mxu0 %v16218_v34  ;;  %v16293_v55 = vld [vmem:[%s17525_s14 + $0x1f94] ss:$8 sps:$4 sm:$0xff]   ;;  %v18809_v33 = vrot.slane %v18801_v27, %v17594_v50  ;;  %v16296_v34 = vld [vmem:[%s17525_s14 + $0x1e84] ss:$8 sps:$4 sm:$0xff]   ;;  %v16294_v62 = vld [vmem:[%s17525_s14 + $0x1e80] ss:$8 sps:$4 sm:$0xff]  }
 0x430   : > { %v11619_v30 = vpop.f32.mrf.mxu1  ;;  %11912 = vmatprep.subr.bf16.mxu1 %v16221_v24  ;;  %v16299_v24 = vld [vmem:[%s17525_s14 + $0x1f84] ss:$8 sps:$4 sm:$0xff]   ;;  %v16306_v5 = vld [vmem:[%s17525_s14 + $0x2174] ss:$8 sps:$4 sm:$0xff]  }
 0x431   : > { %v2332_v1 = vcombine.high %v18809_v33, %v18809_v33 }
 0x432   : > { %11872 = vmatpush1.bf16.msra.mxu0 %v16216_v3  ;;  %v16297_v3 = vld [vmem:[%s17525_s14 + $0x1f80] ss:$8 sps:$4 sm:$0xff]  }
 0x433   : > { %11913 = vmatpush1.bf16.msra.mxu1 %v16219_v63  ;;  %11873 = vmatprep.subr.bf16.mxu0 %v16224_v42  ;;  %v16303_v63 = vld [vmem:[%s17525_s14 + $0x2074] ss:$8 sps:$4 sm:$0xff]   ;;  %v2354_v30 = vrot.slane %v2332_v1, %v17594_v50  ;;  %v2314_v42 = vcombine.high %v2298_v11, %v2298_v11 }
 0x434   : > { %11914 = vmatprep.subr.bf16.mxu1 %v16227_v45  ;;  %v16301_v45 = vld [vmem:[%s17525_s14 + $0x2070] ss:$8 sps:$4 sm:$0xff]   ;;  %v16366_v1 = vld [vmem:[%s17525_s14 + $0x21d4] ss:$8 sps:$4 sm:$0xff]  }
 0x436   : > { %11874 = vmatpush1.bf16.msra.mxu0 %v16222_v9  ;;  %v16304_v9 = vld [vmem:[%s17525_s14 + $0x2170] ss:$8 sps:$4 sm:$0xff]  }
 0x437   : > { %11915 = vmatpush1.bf16.msra.mxu1 %v16225_v10  ;;  %11875 = vmatprep.subr.bf16.mxu0 %v16230_v13  ;;  %v16312_v10 = vld [vmem:[%s17525_s14 + $0x2164] ss:$8 sps:$4 sm:$0xff]   ;;  %v2364_v13 = vcombine.high %v2354_v30, %v2354_v30 }
 0x438   : > { %11916 = vmatprep.subr.bf16.mxu1 %v16233_v14 }
 0x43a   : > { %11876 = vmatpush1.bf16.msra.mxu0 %v16228_v52 }
 0x43b   : > { %11917 = vmatpush1.bf16.msra.mxu1 %v16231_v40  ;;  %11877 = vmatprep.subr.bf16.mxu0 %v16236_v18  ;;  %v16307_v18 = vld [vmem:[%s17525_s14 + $0x2060] ss:$8 sps:$4 sm:$0xff]  }
 0x43c   : > { %11918 = vmatprep.subr.bf16.mxu1 %v16239_v16  ;;  %v16310_v16 = vld [vmem:[%s17525_s14 + $0x2160] ss:$8 sps:$4 sm:$0xff]  }
 0x43e   : > { %11878 = vmatpush1.bf16.msra.mxu0 %v16234_v19 }
 0x43f   : > { %11919 = vmatpush1.bf16.msra.mxu1 %v16237_v32  ;;  %11879 = vmatprep.subr.bf16.mxu0 %v16242_v20  ;;  %v16315_v20 = vld [vmem:[%s17525_s14 + $0x2054] ss:$8 sps:$4 sm:$0xff]  }
 0x440   : > { %11920 = vmatprep.subr.bf16.mxu1 %v16245_v22  ;;  %v16318_v22 = vld [vmem:[%s17525_s14 + $0x2154] ss:$8 sps:$4 sm:$0xff]  }
 0x442   : > { %11880 = vmatpush1.bf16.msra.mxu0 %v16240_v56 }
 0x443   : > { %11921 = vmatpush1.bf16.msra.mxu1 %v16243_v61  ;;  %11881 = vmatprep.subr.bf16.mxu0 %v16248_v58 }
 0x444   : > { %11922 = vmatprep.subr.bf16.mxu1 %v16251_v25 }
 0x446   : > { %11882 = vmatpush1.bf16.msra.mxu0 %v16246_v53  ;;  %v16313_v53 = vld [vmem:[%s17525_s14 + $0x2050] ss:$8 sps:$4 sm:$0xff]  }
 0x447   : > { %11923 = vmatpush1.bf16.msra.mxu1 %v16249_v28  ;;  %11883 = vmatprep.subr.bf16.mxu0 %v16254_v29  ;;  %v16316_v28 = vld [vmem:[%s17525_s14 + $0x2150] ss:$8 sps:$4 sm:$0xff]  }
 0x448   : > { %11924 = vmatprep.subr.bf16.mxu1 %v16257_v31 }
 0x44a   : > { %11884 = vmatpush2.bf16.msra.mxu0 %v16252_v4  ;;  %v16324_v4 = vld [vmem:[%s17525_s14 + $0x2144] ss:$8 sps:$4 sm:$0xff]  }
 0x44b   : > { %11925 = vmatpush2.bf16.msra.mxu1 %v16255_v57  ;;  %11885 = vmatprep.subr.bf16.mxu0 %v16260_v35  ;;  %v16319_v57 = vld [vmem:[%s17525_s14 + $0x2040] ss:$8 sps:$4 sm:$0xff]  }
 0x44c   : > { %11926 = vmatprep.subr.bf16.mxu1 %v16263_v36  ;;  %v16322_v35 = vld [vmem:[%s17525_s14 + $0x2140] ss:$8 sps:$4 sm:$0xff]   ;;  %v16327_v36 = vld [vmem:[%s17525_s14 + $0x2034] ss:$8 sps:$4 sm:$0xff]  }
 0x44e   : > { %11886 = vmatpush2.bf16.msra.mxu0 %v16258_v6  ;;  %v16330_v6 = vld [vmem:[%s17525_s14 + $0x2134] ss:$8 sps:$4 sm:$0xff]  }
 0x44f   : > { %11927 = vmatpush2.bf16.msra.mxu1 %v16261_v12  ;;  %11887 = vmatprep.subr.bf16.mxu0 %v16266_v38  ;;  %v16325_v12 = vld [vmem:[%s17525_s14 + $0x2030] ss:$8 sps:$4 sm:$0xff]  }
 0x450   : > { %11928 = vmatprep.subr.bf16.mxu1 %v16269_v39  ;;  %v16328_v38 = vld [vmem:[%s17525_s14 + $0x2130] ss:$8 sps:$4 sm:$0xff]   ;;  %v16333_v39 = vld [vmem:[%s17525_s14 + $0x2024] ss:$8 sps:$4 sm:$0xff]  }
 0x452   : > { %11888 = vmatpush2.bf16.msra.mxu0 %v16264_v15  ;;  %v16336_v15 = vld [vmem:[%s17525_s14 + $0x2124] ss:$8 sps:$4 sm:$0xff]  }
 0x453   : > { %11929 = vmatpush2.bf16.msra.mxu1 %v16267_v17  ;;  %11889 = vmatprep.subr.bf16.mxu0 %v16272_v41  ;;  %v16331_v17 = vld [vmem:[%s17525_s14 + $0x2020] ss:$8 sps:$4 sm:$0xff]  }
 0x454   : > { %11930 = vmatprep.subr.bf16.mxu1 %v16275_v8  ;;  %v16334_v41 = vld [vmem:[%s17525_s14 + $0x2120] ss:$8 sps:$4 sm:$0xff]   ;;  %v16339_v8 = vld [vmem:[%s17525_s14 + $0x2014] ss:$8 sps:$4 sm:$0xff]  }
 0x456   : > { %11890 = vmatpush2.bf16.msra.mxu0 %v16270_v43  ;;  %v16342_v43 = vld [vmem:[%s17525_s14 + $0x2114] ss:$8 sps:$4 sm:$0xff]  }
 0x457   : > { %11931 = vmatpush2.bf16.msra.mxu1 %v16273_v47  ;;  %11891 = vmatprep.subr.bf16.mxu0 %v16278_v48  ;;  %v16337_v47 = vld [vmem:[%s17525_s14 + $0x2010] ss:$8 sps:$4 sm:$0xff]  }
 0x458   : > { %11932 = vmatprep.subr.bf16.mxu1 %v16281_v46  ;;  %v16340_v48 = vld [vmem:[%s17525_s14 + $0x2110] ss:$8 sps:$4 sm:$0xff]   ;;  %v16345_v46 = vld [vmem:[%s17525_s14 + $0x2004] ss:$8 sps:$4 sm:$0xff]  }
 0x45a   : > { %11892 = vmatpush2.bf16.msra.mxu0 %v16276_v21  ;;  %v16348_v21 = vld [vmem:[%s17525_s14 + $0x2104] ss:$8 sps:$4 sm:$0xff]  }
 0x45b   : > { %11933 = vmatpush2.bf16.msra.mxu1 %v16279_v49  ;;  %11893 = vmatprep.subr.bf16.mxu0 %v16284_v51  ;;  %v16343_v49 = vld [vmem:[%s17525_s14 + $0x2000] ss:$8 sps:$4 sm:$0xff]  }
 0x45c   : > { %11934 = vmatprep.subr.bf16.mxu1 %v16287_v26  ;;  %v16346_v51 = vld [vmem:[%s17525_s14 + $0x2100] ss:$8 sps:$4 sm:$0xff]   ;;  %v16351_v26 = vld [vmem:[%s17525_s14 + $0x20f4] ss:$8 sps:$4 sm:$0xff]  }
 0x45e   : > { %11894 = vmatpush2.bf16.msra.mxu0 %v16282_v23  ;;  %v16354_v23 = vld [vmem:[%s17525_s14 + $0x21f4] ss:$8 sps:$4 sm:$0xff]  }
 0x45f   : > { %11935 = vmatpush2.bf16.msra.mxu1 %v16285_v7  ;;  %11895 = vmatprep.subr.bf16.mxu0 %v16290_v54  ;;  %v16349_v7 = vld [vmem:[%s17525_s14 + $0x20f0] ss:$8 sps:$4 sm:$0xff]  }
 0x460   : > { %11936 = vmatprep.subr.bf16.mxu1 %v16293_v55  ;;  %v16352_v54 = vld [vmem:[%s17525_s14 + $0x21f0] ss:$8 sps:$4 sm:$0xff]   ;;  %v16357_v55 = vld [vmem:[%s17525_s14 + $0x20e4] ss:$8 sps:$4 sm:$0xff]  }
 0x462   : > { %11896 = vmatpush2.bf16.msra.mxu0 %v16288_v59  ;;  %v16360_v59 = vld [vmem:[%s17525_s14 + $0x21e4] ss:$8 sps:$4 sm:$0xff]  }
 0x463   : > { %11937 = vmatpush2.bf16.msra.mxu1 %v16291_v60  ;;  %11897 = vmatprep.subr.bf16.mxu0 %v16296_v34  ;;  %v16355_v60 = vld [vmem:[%s17525_s14 + $0x20e0] ss:$8 sps:$4 sm:$0xff]  }
 0x464   : > { %11938 = vmatprep.subr.bf16.mxu1 %v16299_v24  ;;  %v16358_v34 = vld [vmem:[%s17525_s14 + $0x21e0] ss:$8 sps:$4 sm:$0xff]   ;;  %v16363_v24 = vld [vmem:[%s17525_s14 + $0x20d4] ss:$8 sps:$4 sm:$0xff]  }
 0x466   : > { %11898 = vmatpush2.bf16.msra.mxu0 %v16294_v62  ;;  %v16364_v62 = vld [vmem:[%s17525_s14 + $0x21d0] ss:$8 sps:$4 sm:$0xff]  }
 0x467   : > { %11939 = vmatpush2.bf16.msra.mxu1 %v16297_v3  ;;  %11949 = vmatprep.subr.bf16.mxu0 %v16303_v63  ;;  %v16369_v3 = vld [vmem:[%s17525_s14 + $0x20c4] ss:$8 sps:$4 sm:$0xff]  }
 0x468   : > { %11990 = vmatprep.subr.bf16.mxu1 %v16306_v5  ;;  %v16372_v63 = vld [vmem:[%s17525_s14 + $0x21c4] ss:$8 sps:$4 sm:$0xff]   ;;  %v16367_v5 = vld [vmem:[%s17525_s14 + $0x20c0] ss:$8 sps:$4 sm:$0xff]  }
 0x469   : > { %v11655_v14 = vpop.f32.mrf.mxu0  ;;  %11900 = vmatmul.mubr.bf16.vlgmr.msra.gmra.mxu0 %v2298_v11  ;;  %v16361_v11 = vld [vmem:[%s17525_s14 + $0x20d0] ss:$8 sps:$4 sm:$0xff]  }
 0x46a   : > { %v11696_v52 = vpop.f32.mrf.mxu1  ;;  %11941 = vmatmul.mubr.bf16.vlgmr.msra.gmra.mxu1 %v2314_v42  ;;  %v11656_v40 = vadd.f32 %v11655_v14, %v18751_v0  ;;  %11950 = vmatpush1.bf16.msra.mxu0 %v16301_v45  ;;  %v16375_v42 = vld [vmem:[%s17525_s14 + $0x20b4] ss:$8 sps:$4 sm:$0xff]   ;;  %v2317_v14 = vcombine.high %v18801_v27, %v18801_v27  ;;  %v16385_v27 = vld [vmem:[%s17525_s14 + $0x2090] ss:$8 sps:$4 sm:$0xff]  }
 0x46b   : > { %11991 = vmatpush1.bf16.msra.mxu1 %v16304_v9  ;;  %v11657_v19 = vpop.f32.mrf.mxu0  ;;  %11951 = vmatprep.subr.bf16.mxu0 %v16309_v37  ;;  %v16378_v45 = vld [vmem:[%s17525_s14 + $0x21b4] ss:$8 sps:$4 sm:$0xff]   ;;  %v16373_v9 = vld [vmem:[%s17525_s14 + $0x20b0] ss:$8 sps:$4 sm:$0xff]  }
 0x46c   : > { %v11698_v32 = vpop.f32.mrf.mxu1  ;;  %11992 = vmatprep.subr.bf16.mxu1 %v16312_v10  ;;  %v18833_v56 = vadd.f32 %v11696_v52, %v11656_v40  ;;  %v11658_v61 = vadd.f32 %v11657_v19, %v18754_v2  ;;  %11981 = vmatprep.mubr.bf16.mxu0 %v2354_v30  ;;  %v16321_v2 = vld [vmem:[%s17525_s14 + $0x2044] ss:$8 sps:$4 sm:$0xff]   ;;  %v16370_v30 = vld [vmem:[%s17525_s14 + $0x21c0] ss:$8 sps:$4 sm:$0xff]   ;;  %v16376_v37 = vld [vmem:[%s17525_s14 + $0x21b0] ss:$8 sps:$4 sm:$0xff]   ;;  %v18889_v19 = vrot.slane %v2317_v14, %v17594_v50 }
 0x46d   : > { %12022 = vmatprep.mubr.bf16.mxu1 %v2364_v13  ;;  %v11659_v0 = vpop.f32.mrf.mxu0  ;;  %v16381_v10 = vld [vmem:[%s17525_s14 + $0x20a4] ss:$8 sps:$4 sm:$0xff]   ;;  %v16379_v52 = vld [vmem:[%s17525_s14 + $0x20a0] ss:$8 sps:$4 sm:$0xff]   ;;  %v16450_v14 = vld [vmem:[%s17525_s14 + $0x23f4] ss:$8 sps:$4 sm:$0xff]  }
 0x46e   : > { %v11700_v58 = vpop.f32.mrf.mxu1  ;;  %v18836_v25 = vadd.f32 %v11698_v32, %v11658_v61  ;;  %11952 = vmatpush1.bf16.msra.mxu0 %v16307_v18  ;;  %v16384_v13 = vld [vmem:[%s17525_s14 + $0x21a4] ss:$8 sps:$4 sm:$0xff]   ;;  %v16382_v40 = vld [vmem:[%s17525_s14 + $0x21a0] ss:$8 sps:$4 sm:$0xff]   ;;  %v16387_v18 = vld [vmem:[%s17525_s14 + $0x2094] ss:$8 sps:$4 sm:$0xff]   ;;  %v2333_v61 = vcombine.high %v18889_v19, %v18889_v19  ;;  %v2340_v0 = vrot.slane %v18809_v33, %v17594_v50 }
 0x46f   : > { %11993 = vmatpush1.bf16.msra.mxu1 %v16310_v16  ;;  %v11660_v29 = vpop.f32.mrf.mxu0  ;;  %11953 = vmatprep.subr.bf16.mxu0 %v16315_v20  ;;  %v16390_v16 = vld [vmem:[%s17525_s14 + $0x2194] ss:$8 sps:$4 sm:$0xff]   ;;  %v16388_v32 = vld [vmem:[%s17525_s14 + $0x2190] ss:$8 sps:$4 sm:$0xff]   ;;  %v16393_v20 = vld [vmem:[%s17525_s14 + $0x2084] ss:$8 sps:$4 sm:$0xff]  }
 0x470   : > { %v11701_v31 = vpop.f32.mrf.mxu1  ;;  %11994 = vmatprep.subr.bf16.mxu1 %v16318_v22  ;;  %v16396_v22 = vld [vmem:[%s17525_s14 + $0x2184] ss:$8 sps:$4 sm:$0xff]   ;;  %v16391_v58 = vld [vmem:[%s17525_s14 + $0x2080] ss:$8 sps:$4 sm:$0xff]   ;;  %v16402_v29 = vld [vmem:[%s17525_s14 + $0x2374] ss:$8 sps:$4 sm:$0xff]  }
 0x471   : > { %v2361_v31 = vrot.slane %v2333_v61, %v17594_v50  ;;  %v16405_v33 = vld [vmem:[%s17525_s14 + $0x2264] ss:$8 sps:$4 sm:$0xff]   ;;  %v16457_v61 = vld [vmem:[%s17525_s14 + $0x22d0] ss:$8 sps:$4 sm:$0xff]  }
 0x472   : > { %11954 = vmatpush1.bf16.msra.mxu0 %v16313_v53  ;;  %v16394_v53 = vld [vmem:[%s17525_s14 + $0x2180] ss:$8 sps:$4 sm:$0xff]  }
 0x473   : > { %11995 = vmatpush1.bf16.msra.mxu1 %v16316_v28  ;;  %11955 = vmatprep.subr.bf16.mxu0 %v16321_v2  ;;  %v16399_v28 = vld [vmem:[%s17525_s14 + $0x2274] ss:$8 sps:$4 sm:$0xff]   ;;  %v2362_v2 = vcombine.high %v2340_v0, %v2340_v0 }
 0x474   : > { %11996 = vmatprep.subr.bf16.mxu1 %v16324_v4  ;;  %v16397_v4 = vld [vmem:[%s17525_s14 + $0x2270] ss:$8 sps:$4 sm:$0xff]  }
 0x476   : > { %11956 = vmatpush1.bf16.msra.mxu0 %v16319_v57  ;;  %v16400_v57 = vld [vmem:[%s17525_s14 + $0x2370] ss:$8 sps:$4 sm:$0xff]  }
 0x477   : > { %11997 = vmatpush1.bf16.msra.mxu1 %v16322_v35  ;;  %11957 = vmatprep.subr.bf16.mxu0 %v16327_v36  ;;  %v16408_v35 = vld [vmem:[%s17525_s14 + $0x2364] ss:$8 sps:$4 sm:$0xff]   ;;  %v2365_v36 = vcombine.high %v2361_v31, %v2361_v31 }
 0x478   : > { %11998 = vmatprep.subr.bf16.mxu1 %v16330_v6 }
 0x47a   : > { %11958 = vmatpush1.bf16.msra.mxu0 %v16325_v12 }
 0x47b   : > { %11999 = vmatpush1.bf16.msra.mxu1 %v16328_v38  ;;  %11959 = vmatprep.subr.bf16.mxu0 %v16333_v39  ;;  %v16403_v39 = vld [vmem:[%s17525_s14 + $0x2260] ss:$8 sps:$4 sm:$0xff]  }
 0x47c   : > { %12000 = vmatprep.subr.bf16.mxu1 %v16336_v15  ;;  %v16406_v15 = vld [vmem:[%s17525_s14 + $0x2360] ss:$8 sps:$4 sm:$0xff]  }
 0x47e   : > { %11960 = vmatpush1.bf16.msra.mxu0 %v16331_v17 }
 0x47f   : > { %12001 = vmatpush1.bf16.msra.mxu1 %v16334_v41  ;;  %11961 = vmatprep.subr.bf16.mxu0 %v16339_v8  ;;  %v16411_v8 = vld [vmem:[%s17525_s14 + $0x2254] ss:$8 sps:$4 sm:$0xff]  }
 0x480   : > { %12002 = vmatprep.subr.bf16.mxu1 %v16342_v43  ;;  %v16414_v43 = vld [vmem:[%s17525_s14 + $0x2354] ss:$8 sps:$4 sm:$0xff]  }
 0x482   : > { %11962 = vmatpush1.bf16.msra.mxu0 %v16337_v47 }
 0x483   : > { %12003 = vmatpush1.bf16.msra.mxu1 %v16340_v48  ;;  %11963 = vmatprep.subr.bf16.mxu0 %v16345_v46 }
 0x484   : > { %12004 = vmatprep.subr.bf16.mxu1 %v16348_v21 }
 0x486   : > { %11964 = vmatpush1.bf16.msra.mxu0 %v16343_v49  ;;  %v16409_v49 = vld [vmem:[%s17525_s14 + $0x2250] ss:$8 sps:$4 sm:$0xff]  }
 0x487   : > { %12005 = vmatpush1.bf16.msra.mxu1 %v16346_v51  ;;  %11965 = vmatprep.subr.bf16.mxu0 %v16351_v26  ;;  %v16412_v51 = vld [vmem:[%s17525_s14 + $0x2350] ss:$8 sps:$4 sm:$0xff]  }
 0x488   : > { %12006 = vmatprep.subr.bf16.mxu1 %v16354_v23 }
 0x48a   : > { %11966 = vmatpush2.bf16.msra.mxu0 %v16349_v7  ;;  %v16420_v7 = vld [vmem:[%s17525_s14 + $0x2344] ss:$8 sps:$4 sm:$0xff]  }
 0x48b   : > { %12007 = vmatpush2.bf16.msra.mxu1 %v16352_v54  ;;  %11967 = vmatprep.subr.bf16.mxu0 %v16357_v55  ;;  %v16415_v54 = vld [vmem:[%s17525_s14 + $0x2240] ss:$8 sps:$4 sm:$0xff]  }
 0x48c   : > { %12008 = vmatprep.subr.bf16.mxu1 %v16360_v59  ;;  %v16418_v55 = vld [vmem:[%s17525_s14 + $0x2340] ss:$8 sps:$4 sm:$0xff]   ;;  %v16423_v59 = vld [vmem:[%s17525_s14 + $0x2234] ss:$8 sps:$4 sm:$0xff]  }
 0x48e   : > { %11968 = vmatpush2.bf16.msra.mxu0 %v16355_v60  ;;  %v16426_v60 = vld [vmem:[%s17525_s14 + $0x2334] ss:$8 sps:$4 sm:$0xff]  }
 0x48f   : > { %12009 = vmatpush2.bf16.msra.mxu1 %v16358_v34  ;;  %11969 = vmatprep.subr.bf16.mxu0 %v16363_v24  ;;  %v16421_v34 = vld [vmem:[%s17525_s14 + $0x2230] ss:$8 sps:$4 sm:$0xff]  }
 0x490   : > { %12010 = vmatprep.subr.bf16.mxu1 %v16366_v1  ;;  %v16424_v24 = vld [vmem:[%s17525_s14 + $0x2330] ss:$8 sps:$4 sm:$0xff]   ;;  %v16429_v1 = vld [vmem:[%s17525_s14 + $0x2224] ss:$8 sps:$4 sm:$0xff]  }
 0x492   : > { %11970 = vmatpush2.bf16.msra.mxu0 %v16361_v11  ;;  %v16432_v11 = vld [vmem:[%s17525_s14 + $0x2324] ss:$8 sps:$4 sm:$0xff]  }
 0x493   : > { %12011 = vmatpush2.bf16.msra.mxu1 %v16364_v62  ;;  %11971 = vmatprep.subr.bf16.mxu0 %v16369_v3  ;;  %v16427_v62 = vld [vmem:[%s17525_s14 + $0x2220] ss:$8 sps:$4 sm:$0xff]  }
 0x494   : > { %12012 = vmatprep.subr.bf16.mxu1 %v16372_v63  ;;  %v16430_v3 = vld [vmem:[%s17525_s14 + $0x2320] ss:$8 sps:$4 sm:$0xff]   ;;  %v16435_v63 = vld [vmem:[%s17525_s14 + $0x2214] ss:$8 sps:$4 sm:$0xff]  }
 0x496   : > { %11972 = vmatpush2.bf16.msra.mxu0 %v16367_v5  ;;  %v16438_v5 = vld [vmem:[%s17525_s14 + $0x2314] ss:$8 sps:$4 sm:$0xff]  }
 0x497   : > { %12013 = vmatpush2.bf16.msra.mxu1 %v16370_v30  ;;  %11973 = vmatprep.subr.bf16.mxu0 %v16375_v42  ;;  %v16433_v30 = vld [vmem:[%s17525_s14 + $0x2210] ss:$8 sps:$4 sm:$0xff]  }
 0x498   : > { %12014 = vmatprep.subr.bf16.mxu1 %v16378_v45  ;;  %v16436_v42 = vld [vmem:[%s17525_s14 + $0x2310] ss:$8 sps:$4 sm:$0xff]   ;;  %v16441_v45 = vld [vmem:[%s17525_s14 + $0x2204] ss:$8 sps:$4 sm:$0xff]  }
 0x49a   : > { %11974 = vmatpush2.bf16.msra.mxu0 %v16373_v9  ;;  %v16444_v9 = vld [vmem:[%s17525_s14 + $0x2304] ss:$8 sps:$4 sm:$0xff]  }
 0x49b   : > { %12015 = vmatpush2.bf16.msra.mxu1 %v16376_v37  ;;  %11975 = vmatprep.subr.bf16.mxu0 %v16381_v10  ;;  %v16439_v37 = vld [vmem:[%s17525_s14 + $0x2200] ss:$8 sps:$4 sm:$0xff]  }
 0x49c   : > { %12016 = vmatprep.subr.bf16.mxu1 %v16384_v13  ;;  %v16442_v10 = vld [vmem:[%s17525_s14 + $0x2300] ss:$8 sps:$4 sm:$0xff]   ;;  %v16447_v13 = vld [vmem:[%s17525_s14 + $0x22f4] ss:$8 sps:$4 sm:$0xff]  }
 0x49e   : > { %11976 = vmatpush2.bf16.msra.mxu0 %v16379_v52  ;;  %v16445_v52 = vld [vmem:[%s17525_s14 + $0x22f0] ss:$8 sps:$4 sm:$0xff]  }
 0x49f   : > { %12017 = vmatpush2.bf16.msra.mxu1 %v16382_v40  ;;  %11977 = vmatprep.subr.bf16.mxu0 %v16387_v18  ;;  %v16448_v40 = vld [vmem:[%s17525_s14 + $0x23f0] ss:$8 sps:$4 sm:$0xff]   ;;  %v16453_v18 = vld [vmem:[%s17525_s14 + $0x22e4] ss:$8 sps:$4 sm:$0xff]  }
 0x4a0   : > { %12018 = vmatprep.subr.bf16.mxu1 %v16390_v16  ;;  %v16456_v16 = vld [vmem:[%s17525_s14 + $0x23e4] ss:$8 sps:$4 sm:$0xff]  }
 0x4a2   : > { %11978 = vmatpush2.bf16.msra.mxu0 %v16385_v27  ;;  %v16451_v27 = vld [vmem:[%s17525_s14 + $0x22e0] ss:$8 sps:$4 sm:$0xff]  }
 0x4a3   : > { %12019 = vmatpush2.bf16.msra.mxu1 %v16388_v32  ;;  %11979 = vmatprep.subr.bf16.mxu0 %v16393_v20  ;;  %v16454_v32 = vld [vmem:[%s17525_s14 + $0x23e0] ss:$8 sps:$4 sm:$0xff]   ;;  %v16459_v20 = vld [vmem:[%s17525_s14 + $0x22d4] ss:$8 sps:$4 sm:$0xff]  }
 0x4a4   : > { %12020 = vmatprep.subr.bf16.mxu1 %v16396_v22  ;;  %v16462_v22 = vld [vmem:[%s17525_s14 + $0x23d4] ss:$8 sps:$4 sm:$0xff]  }
 0x4a6   : > { %11980 = vmatpush2.bf16.msra.mxu0 %v16391_v58  ;;  %v16465_v58 = vld [vmem:[%s17525_s14 + $0x22c4] ss:$8 sps:$4 sm:$0xff]  }
 0x4a7   : > { %12021 = vmatpush2.bf16.msra.mxu1 %v16394_v53  ;;  %12031 = vmatprep.subr.bf16.mxu0 %v16399_v28  ;;  %v16468_v53 = vld [vmem:[%s17525_s14 + $0x23c4] ss:$8 sps:$4 sm:$0xff]   ;;  %v16463_v28 = vld [vmem:[%s17525_s14 + $0x22c0] ss:$8 sps:$4 sm:$0xff]  }
 0x4a8   : > { %12072 = vmatprep.subr.bf16.mxu1 %v16402_v29  ;;  %v16466_v29 = vld [vmem:[%s17525_s14 + $0x23c0] ss:$8 sps:$4 sm:$0xff]  }
 0x4a9   : > { %v11737_v6 = vpop.f32.mrf.mxu0  ;;  %11982 = vmatmul.mubr.bf16.vlgmr.msra.gmra.mxu0 %v2340_v0  ;;  %v16460_v0 = vld [vmem:[%s17525_s14 + $0x23d0] ss:$8 sps:$4 sm:$0xff]  }
 0x4aa   : > { %v11778_v12 = vpop.f32.mrf.mxu1  ;;  %12023 = vmatmul.mubr.bf16.vlgmr.msra.gmra.mxu1 %v2362_v2  ;;  %v11738_v38 = vadd.f32 %v11737_v6, %v18833_v56  ;;  %12032 = vmatpush1.bf16.msra.mxu0 %v16397_v4  ;;  %v16474_v2 = vld [vmem:[%s17525_s14 + $0x23b4] ss:$8 sps:$4 sm:$0xff]   ;;  %v16469_v4 = vld [vmem:[%s17525_s14 + $0x22b0] ss:$8 sps:$4 sm:$0xff]   ;;  %v16475_v6 = vld [vmem:[%s17525_s14 + $0x22a0] ss:$8 sps:$4 sm:$0xff]  }
 0x4ab   : > { %12073 = vmatpush1.bf16.msra.mxu1 %v16400_v57  ;;  %v11739_v17 = vpop.f32.mrf.mxu0  ;;  %12033 = vmatprep.subr.bf16.mxu0 %v16405_v33  ;;  %v16472_v57 = vld [vmem:[%s17525_s14 + $0x23b0] ss:$8 sps:$4 sm:$0xff]   ;;  %v16477_v33 = vld [vmem:[%s17525_s14 + $0x22a4] ss:$8 sps:$4 sm:$0xff]  }
 0x4ac   : > { %v11780_v41 = vpop.f32.mrf.mxu1  ;;  %12074 = vmatprep.subr.bf16.mxu1 %v16408_v35  ;;  %v18913_v47 = vadd.f32 %v11778_v12, %v11738_v38  ;;  %v11740_v48 = vadd.f32 %v11739_v17, %v18836_v25  ;;  %12063 = vmatprep.mubr.bf16.mxu0 %v2361_v31  ;;  %v16417_v25 = vld [vmem:[%s17525_s14 + $0x2244] ss:$8 sps:$4 sm:$0xff]   ;;  %v16471_v31 = vld [vmem:[%s17525_s14 + $0x22b4] ss:$8 sps:$4 sm:$0xff]   ;;  %v16478_v12 = vld [vmem:[%s17525_s14 + $0x23a0] ss:$8 sps:$4 sm:$0xff]  }
 0x4ad   : > { %12104 = vmatprep.mubr.bf16.mxu1 %v2365_v36  ;;  %v11741_v56 = vpop.f32.mrf.mxu0  ;;  %v16480_v35 = vld [vmem:[%s17525_s14 + $0x23a4] ss:$8 sps:$4 sm:$0xff]   ;;  %v16483_v38 = vld [vmem:[%s17525_s14 + $0x2294] ss:$8 sps:$4 sm:$0xff]   ;;  %v16481_v17 = vld [vmem:[%s17525_s14 + $0x2290] ss:$8 sps:$4 sm:$0xff]  }
 0x4ae   : > { %v11782_v46 = vpop.f32.mrf.mxu1  ;;  %v18916_v21 = vadd.f32 %v11780_v41, %v11740_v48  ;;  %12034 = vmatpush1.bf16.msra.mxu0 %v16403_v39  ;;  %v18963_v36 = vld [vmem:[%s17543_s23 + $0x48] sm:$0xff]  ;;  %v16486_v39 = vld [vmem:[%s17525_s14 + $0x2394] ss:$8 sps:$4 sm:$0xff]   ;;  %v16484_v41 = vld [vmem:[%s17525_s14 + $0x2390] ss:$8 sps:$4 sm:$0xff]   ;;  %v2347_v56 = vrot.slane %v18889_v19, %v17594_v50 }
 0x4af   : > { %12075 = vmatpush1.bf16.msra.mxu1 %v16406_v15  ;;  %v11742_v26 = vpop.f32.mrf.mxu0  ;;  %12035 = vmatprep.subr.bf16.mxu0 %v16411_v8  ;;  %v18971_v15 = vrot.slane %v18963_v36, %v17594_v50  ;;  %v16489_v8 = vld [vmem:[%s17525_s14 + $0x2284] ss:$8 sps:$4 sm:$0xff]   ;;  %v16487_v46 = vld [vmem:[%s17525_s14 + $0x2280] ss:$8 sps:$4 sm:$0xff]  }
 0x4b0   : > { %v11783_v23 = vpop.f32.mrf.mxu1  ;;  %12076 = vmatprep.subr.bf16.mxu1 %v16414_v43  ;;  %v16492_v43 = vld [vmem:[%s17525_s14 + $0x2384] ss:$8 sps:$4 sm:$0xff]   ;;  %v16499_v26 = vld [vmem:[%s17525_s14 + $0x2574] ss:$8 sps:$4 sm:$0xff]  }
 0x4b1   : > { %v2381_v48 = vcombine.high %v18971_v15, %v18971_v15  ;;  %v16502_v19 = vld [vmem:[%s17525_s14 + $0x2464] ss:$8 sps:$4 sm:$0xff]  }
 0x4b2   : > { %12036 = vmatpush1.bf16.msra.mxu0 %v16409_v49  ;;  %v16490_v49 = vld [vmem:[%s17525_s14 + $0x2380] ss:$8 sps:$4 sm:$0xff]  }
 0x4b3   : > { %12077 = vmatpush1.bf16.msra.mxu1 %v16412_v51  ;;  %12037 = vmatprep.subr.bf16.mxu0 %v16417_v25  ;;  %v16496_v51 = vld [vmem:[%s17525_s14 + $0x2474] ss:$8 sps:$4 sm:$0xff]   ;;  %v2403_v23 = vrot.slane %v2381_v48, %v17594_v50  ;;  %v2363_v25 = vcombine.high %v2347_v56, %v2347_v56 }
 0x4b4   : > { %12078 = vmatprep.subr.bf16.mxu1 %v16420_v7  ;;  %v16494_v7 = vld [vmem:[%s17525_s14 + $0x2470] ss:$8 sps:$4 sm:$0xff]   ;;  %v16559_v48 = vld [vmem:[%s17525_s14 + $0x25d4] ss:$8 sps:$4 sm:$0xff]  }
 0x4b6   : > { %12038 = vmatpush1.bf16.msra.mxu0 %v16415_v54  ;;  %v16497_v54 = vld [vmem:[%s17525_s14 + $0x2570] ss:$8 sps:$4 sm:$0xff]  }
 0x4b7   : > { %12079 = vmatpush1.bf16.msra.mxu1 %v16418_v55  ;;  %12039 = vmatprep.subr.bf16.mxu0 %v16423_v59  ;;  %v16505_v55 = vld [vmem:[%s17525_s14 + $0x2564] ss:$8 sps:$4 sm:$0xff]   ;;  %v2413_v59 = vcombine.high %v2403_v23, %v2403_v23 }
 0x4b8   : > { %12080 = vmatprep.subr.bf16.mxu1 %v16426_v60 }
 0x4ba   : > { %12040 = vmatpush1.bf16.msra.mxu0 %v16421_v34 }
 0x4bb   : > { %12081 = vmatpush1.bf16.msra.mxu1 %v16424_v24  ;;  %12041 = vmatprep.subr.bf16.mxu0 %v16429_v1  ;;  %v16500_v1 = vld [vmem:[%s17525_s14 + $0x2460] ss:$8 sps:$4 sm:$0xff]  }
 0x4bc   : > { %12082 = vmatprep.subr.bf16.mxu1 %v16432_v11  ;;  %v16503_v11 = vld [vmem:[%s17525_s14 + $0x2560] ss:$8 sps:$4 sm:$0xff]  }
 0x4be   : > { %12042 = vmatpush1.bf16.msra.mxu0 %v16427_v62 }
 0x4bf   : > { %12083 = vmatpush1.bf16.msra.mxu1 %v16430_v3  ;;  %12043 = vmatprep.subr.bf16.mxu0 %v16435_v63  ;;  %v16508_v63 = vld [vmem:[%s17525_s14 + $0x2454] ss:$8 sps:$4 sm:$0xff]  }
 0x4c0   : > { %12084 = vmatprep.subr.bf16.mxu1 %v16438_v5  ;;  %v16511_v5 = vld [vmem:[%s17525_s14 + $0x2554] ss:$8 sps:$4 sm:$0xff]  }
 0x4c2   : > { %12044 = vmatpush1.bf16.msra.mxu0 %v16433_v30 }
 0x4c3   : > { %12085 = vmatpush1.bf16.msra.mxu1 %v16436_v42  ;;  %12045 = vmatprep.subr.bf16.mxu0 %v16441_v45 }
 0x4c4   : > { %12086 = vmatprep.subr.bf16.mxu1 %v16444_v9 }
 0x4c6   : > { %12046 = vmatpush1.bf16.msra.mxu0 %v16439_v37  ;;  %v16506_v37 = vld [vmem:[%s17525_s14 + $0x2450] ss:$8 sps:$4 sm:$0xff]  }
 0x4c7   : > { %12087 = vmatpush1.bf16.msra.mxu1 %v16442_v10  ;;  %12047 = vmatprep.subr.bf16.mxu0 %v16447_v13  ;;  %v16509_v10 = vld [vmem:[%s17525_s14 + $0x2550] ss:$8 sps:$4 sm:$0xff]  }
 0x4c8   : > { %12088 = vmatprep.subr.bf16.mxu1 %v16450_v14 }
 0x4ca   : > { %12048 = vmatpush2.bf16.msra.mxu0 %v16445_v52  ;;  %v16517_v52 = vld [vmem:[%s17525_s14 + $0x2544] ss:$8 sps:$4 sm:$0xff]  }
 0x4cb   : > { %12089 = vmatpush2.bf16.msra.mxu1 %v16448_v40  ;;  %12049 = vmatprep.subr.bf16.mxu0 %v16453_v18  ;;  %v16512_v40 = vld [vmem:[%s17525_s14 + $0x2440] ss:$8 sps:$4 sm:$0xff]  }
 0x4cc   : > { %12090 = vmatprep.subr.bf16.mxu1 %v16456_v16  ;;  %v16515_v18 = vld [vmem:[%s17525_s14 + $0x2540] ss:$8 sps:$4 sm:$0xff]   ;;  %v16520_v16 = vld [vmem:[%s17525_s14 + $0x2434] ss:$8 sps:$4 sm:$0xff]  }
 0x4ce   : > { %12050 = vmatpush2.bf16.msra.mxu0 %v16451_v27  ;;  %v16523_v27 = vld [vmem:[%s17525_s14 + $0x2534] ss:$8 sps:$4 sm:$0xff]  }
 0x4cf   : > { %12091 = vmatpush2.bf16.msra.mxu1 %v16454_v32  ;;  %12051 = vmatprep.subr.bf16.mxu0 %v16459_v20  ;;  %v16518_v32 = vld [vmem:[%s17525_s14 + $0x2430] ss:$8 sps:$4 sm:$0xff]  }
 0x4d0   : > { %12092 = vmatprep.subr.bf16.mxu1 %v16462_v22  ;;  %v16521_v20 = vld [vmem:[%s17525_s14 + $0x2530] ss:$8 sps:$4 sm:$0xff]   ;;  %v16526_v22 = vld [vmem:[%s17525_s14 + $0x2424] ss:$8 sps:$4 sm:$0xff]  }
 0x4d2   : > { %12052 = vmatpush2.bf16.msra.mxu0 %v16457_v61  ;;  %v16529_v61 = vld [vmem:[%s17525_s14 + $0x2524] ss:$8 sps:$4 sm:$0xff]  }
 0x4d3   : > { %12093 = vmatpush2.bf16.msra.mxu1 %v16460_v0  ;;  %12053 = vmatprep.subr.bf16.mxu0 %v16465_v58  ;;  %v16524_v0 = vld [vmem:[%s17525_s14 + $0x2420] ss:$8 sps:$4 sm:$0xff]  }
 0x4d4   : > { %12094 = vmatprep.subr.bf16.mxu1 %v16468_v53  ;;  %v16527_v58 = vld [vmem:[%s17525_s14 + $0x2520] ss:$8 sps:$4 sm:$0xff]   ;;  %v16532_v53 = vld [vmem:[%s17525_s14 + $0x2414] ss:$8 sps:$4 sm:$0xff]  }
 0x4d6   : > { %12054 = vmatpush2.bf16.msra.mxu0 %v16463_v28  ;;  %v16535_v28 = vld [vmem:[%s17525_s14 + $0x2514] ss:$8 sps:$4 sm:$0xff]  }
 0x4d7   : > { %12095 = vmatpush2.bf16.msra.mxu1 %v16466_v29  ;;  %12055 = vmatprep.subr.bf16.mxu0 %v16471_v31  ;;  %v16530_v29 = vld [vmem:[%s17525_s14 + $0x2410] ss:$8 sps:$4 sm:$0xff]  }
 0x4d8   : > { %12096 = vmatprep.subr.bf16.mxu1 %v16474_v2  ;;  %v16533_v31 = vld [vmem:[%s17525_s14 + $0x2510] ss:$8 sps:$4 sm:$0xff]   ;;  %v16538_v2 = vld [vmem:[%s17525_s14 + $0x2404] ss:$8 sps:$4 sm:$0xff]  }
 0x4da   : > { %12056 = vmatpush2.bf16.msra.mxu0 %v16469_v4  ;;  %v16541_v4 = vld [vmem:[%s17525_s14 + $0x2504] ss:$8 sps:$4 sm:$0xff]  }
 0x4db   : > { %12097 = vmatpush2.bf16.msra.mxu1 %v16472_v57  ;;  %12057 = vmatprep.subr.bf16.mxu0 %v16477_v33  ;;  %v16536_v57 = vld [vmem:[%s17525_s14 + $0x2400] ss:$8 sps:$4 sm:$0xff]  }
 0x4dc   : > { %12098 = vmatprep.subr.bf16.mxu1 %v16480_v35  ;;  %v16539_v33 = vld [vmem:[%s17525_s14 + $0x2500] ss:$8 sps:$4 sm:$0xff]   ;;  %v16544_v35 = vld [vmem:[%s17525_s14 + $0x24f4] ss:$8 sps:$4 sm:$0xff]  }
 0x4de   : > { %12058 = vmatpush2.bf16.msra.mxu0 %v16475_v6  ;;  %v16547_v6 = vld [vmem:[%s17525_s14 + $0x25f4] ss:$8 sps:$4 sm:$0xff]  }
 0x4df   : > { %12099 = vmatpush2.bf16.msra.mxu1 %v16478_v12  ;;  %12059 = vmatprep.subr.bf16.mxu0 %v16483_v38  ;;  %v16542_v12 = vld [vmem:[%s17525_s14 + $0x24f0] ss:$8 sps:$4 sm:$0xff]  }
 0x4e0   : > { %12100 = vmatprep.subr.bf16.mxu1 %v16486_v39  ;;  %v16545_v38 = vld [vmem:[%s17525_s14 + $0x25f0] ss:$8 sps:$4 sm:$0xff]   ;;  %v16550_v39 = vld [vmem:[%s17525_s14 + $0x24e4] ss:$8 sps:$4 sm:$0xff]  }
 0x4e2   : > { %12060 = vmatpush2.bf16.msra.mxu0 %v16481_v17  ;;  %v16553_v17 = vld [vmem:[%s17525_s14 + $0x25e4] ss:$8 sps:$4 sm:$0xff]  }
 0x4e3   : > { %12101 = vmatpush2.bf16.msra.mxu1 %v16484_v41  ;;  %12061 = vmatprep.subr.bf16.mxu0 %v16489_v8  ;;  %v16548_v41 = vld [vmem:[%s17525_s14 + $0x24e0] ss:$8 sps:$4 sm:$0xff]  }
 0x4e4   : > { %12102 = vmatprep.subr.bf16.mxu1 %v16492_v43  ;;  %v16551_v8 = vld [vmem:[%s17525_s14 + $0x25e0] ss:$8 sps:$4 sm:$0xff]   ;;  %v16556_v43 = vld [vmem:[%s17525_s14 + $0x24d4] ss:$8 sps:$4 sm:$0xff]  }
 0x4e6   : > { %12062 = vmatpush2.bf16.msra.mxu0 %v16487_v46  ;;  %v16557_v46 = vld [vmem:[%s17525_s14 + $0x25d0] ss:$8 sps:$4 sm:$0xff]  }
 0x4e7   : > { %12103 = vmatpush2.bf16.msra.mxu1 %v16490_v49  ;;  %12113 = vmatprep.subr.bf16.mxu0 %v16496_v51  ;;  %v16562_v49 = vld [vmem:[%s17525_s14 + $0x24c4] ss:$8 sps:$4 sm:$0xff]  }
 0x4e8   : > { %12154 = vmatprep.subr.bf16.mxu1 %v16499_v26  ;;  %v16565_v51 = vld [vmem:[%s17525_s14 + $0x25c4] ss:$8 sps:$4 sm:$0xff]   ;;  %v16560_v26 = vld [vmem:[%s17525_s14 + $0x24c0] ss:$8 sps:$4 sm:$0xff]  }
 0x4e9   : > { %v11819_v60 = vpop.f32.mrf.mxu0  ;;  %12064 = vmatmul.mubr.bf16.vlgmr.msra.gmra.mxu0 %v2347_v56  ;;  %v16554_v56 = vld [vmem:[%s17525_s14 + $0x24d0] ss:$8 sps:$4 sm:$0xff]  }
 0x4ea   : > { %v11860_v34 = vpop.f32.mrf.mxu1  ;;  %12105 = vmatmul.mubr.bf16.vlgmr.msra.gmra.mxu1 %v2363_v25  ;;  %v11820_v24 = vadd.f32 %v11819_v60, %v18913_v47  ;;  %12114 = vmatpush1.bf16.msra.mxu0 %v16494_v7  ;;  %v16568_v25 = vld [vmem:[%s17525_s14 + $0x24b4] ss:$8 sps:$4 sm:$0xff]   ;;  %v2366_v60 = vcombine.high %v18963_v36, %v18963_v36  ;;  %v16578_v36 = vld [vmem:[%s17525_s14 + $0x2490] ss:$8 sps:$4 sm:$0xff]  }
 0x4eb   : > { %12155 = vmatpush1.bf16.msra.mxu1 %v16497_v54  ;;  %v11821_v62 = vpop.f32.mrf.mxu0  ;;  %12115 = vmatprep.subr.bf16.mxu0 %v16502_v19  ;;  %v16571_v7 = vld [vmem:[%s17525_s14 + $0x25b4] ss:$8 sps:$4 sm:$0xff]   ;;  %v16566_v54 = vld [vmem:[%s17525_s14 + $0x24b0] ss:$8 sps:$4 sm:$0xff]  }
 0x4ec   : > { %v11862_v3 = vpop.f32.mrf.mxu1  ;;  %12156 = vmatprep.subr.bf16.mxu1 %v16505_v55  ;;  %v18995_v30 = vadd.f32 %v11860_v34, %v11820_v24  ;;  %v11822_v42 = vadd.f32 %v11821_v62, %v18916_v21  ;;  %12145 = vmatprep.mubr.bf16.mxu0 %v2403_v23  ;;  %v16514_v21 = vld [vmem:[%s17525_s14 + $0x2444] ss:$8 sps:$4 sm:$0xff]   ;;  %v16563_v23 = vld [vmem:[%s17525_s14 + $0x25c0] ss:$8 sps:$4 sm:$0xff]   ;;  %v16569_v19 = vld [vmem:[%s17525_s14 + $0x25b0] ss:$8 sps:$4 sm:$0xff]   ;;  %v19051_v62 = vrot.slane %v2366_v60, %v17594_v50 }
 0x4ed   : > { %12186 = vmatprep.mubr.bf16.mxu1 %v2413_v59  ;;  %v11823_v47 = vpop.f32.mrf.mxu0  ;;  %v16574_v55 = vld [vmem:[%s17525_s14 + $0x24a4] ss:$8 sps:$4 sm:$0xff]   ;;  %v16572_v34 = vld [vmem:[%s17525_s14 + $0x24a0] ss:$8 sps:$4 sm:$0xff]   ;;  %v16643_v60 = vld [vmem:[%s17525_s14 + $0x27f4] ss:$8 sps:$4 sm:$0xff]  }
 0x4ee   : > { %v11864_v45 = vpop.f32.mrf.mxu1  ;;  %v18998_v9 = vadd.f32 %v11862_v3, %v11822_v42  ;;  %12116 = vmatpush1.bf16.msra.mxu0 %v16500_v1  ;;  %v16577_v59 = vld [vmem:[%s17525_s14 + $0x25a4] ss:$8 sps:$4 sm:$0xff]   ;;  %v16575_v24 = vld [vmem:[%s17525_s14 + $0x25a0] ss:$8 sps:$4 sm:$0xff]   ;;  %v16580_v1 = vld [vmem:[%s17525_s14 + $0x2494] ss:$8 sps:$4 sm:$0xff]   ;;  %v2382_v42 = vcombine.high %v19051_v62, %v19051_v62  ;;  %v2389_v47 = vrot.slane %v18971_v15, %v17594_v50 }
 0x4ef   : > { %12157 = vmatpush1.bf16.msra.mxu1 %v16503_v11  ;;  %v11824_v13 = vpop.f32.mrf.mxu0  ;;  %12117 = vmatprep.subr.bf16.mxu0 %v16508_v63  ;;  %v16583_v11 = vld [vmem:[%s17525_s14 + $0x2594] ss:$8 sps:$4 sm:$0xff]   ;;  %v16581_v3 = vld [vmem:[%s17525_s14 + $0x2590] ss:$8 sps:$4 sm:$0xff]   ;;  %v16586_v63 = vld [vmem:[%s17525_s14 + $0x2484] ss:$8 sps:$4 sm:$0xff]  }
 0x4f0   : > { %v11865_v14 = vpop.f32.mrf.mxu1  ;;  %12158 = vmatprep.subr.bf16.mxu1 %v16511_v5  ;;  %v16589_v5 = vld [vmem:[%s17525_s14 + $0x2584] ss:$8 sps:$4 sm:$0xff]   ;;  %v16584_v45 = vld [vmem:[%s17525_s14 + $0x2480] ss:$8 sps:$4 sm:$0xff]   ;;  %v16595_v13 = vld [vmem:[%s17525_s14 + $0x2774] ss:$8 sps:$4 sm:$0xff]  }
 0x4f1   : > { %v2410_v14 = vrot.slane %v2382_v42, %v17594_v50  ;;  %v16598_v15 = vld [vmem:[%s17525_s14 + $0x2664] ss:$8 sps:$4 sm:$0xff]   ;;  %v16650_v42 = vld [vmem:[%s17525_s14 + $0x26d0] ss:$8 sps:$4 sm:$0xff]  }
 0x4f2   : > { %12118 = vmatpush1.bf16.msra.mxu0 %v16506_v37  ;;  %v16587_v37 = vld [vmem:[%s17525_s14 + $0x2580] ss:$8 sps:$4 sm:$0xff]  }
 0x4f3   : > { %12159 = vmatpush1.bf16.msra.mxu1 %v16509_v10  ;;  %12119 = vmatprep.subr.bf16.mxu0 %v16514_v21  ;;  %v16592_v10 = vld [vmem:[%s17525_s14 + $0x2674] ss:$8 sps:$4 sm:$0xff]   ;;  %v2411_v21 = vcombine.high %v2389_v47, %v2389_v47 }
 0x4f4   : > { %12160 = vmatprep.subr.bf16.mxu1 %v16517_v52  ;;  %v16590_v52 = vld [vmem:[%s17525_s14 + $0x2670] ss:$8 sps:$4 sm:$0xff]  }
 0x4f6   : > { %12120 = vmatpush1.bf16.msra.mxu0 %v16512_v40  ;;  %v16593_v40 = vld [vmem:[%s17525_s14 + $0x2770] ss:$8 sps:$4 sm:$0xff]  }
 0x4f7   : > { %12161 = vmatpush1.bf16.msra.mxu1 %v16515_v18  ;;  %12121 = vmatprep.subr.bf16.mxu0 %v16520_v16  ;;  %v16601_v18 = vld [vmem:[%s17525_s14 + $0x2764] ss:$8 sps:$4 sm:$0xff]   ;;  %v2414_v16 = vcombine.high %v2410_v14, %v2410_v14 }
 0x4f8   : > { %12162 = vmatprep.subr.bf16.mxu1 %v16523_v27 }
 0x4fa   : > { %12122 = vmatpush1.bf16.msra.mxu0 %v16518_v32 }
 0x4fb   : > { %12163 = vmatpush1.bf16.msra.mxu1 %v16521_v20  ;;  %12123 = vmatprep.subr.bf16.mxu0 %v16526_v22  ;;  %v16596_v22 = vld [vmem:[%s17525_s14 + $0x2660] ss:$8 sps:$4 sm:$0xff]  }
 0x4fc   : > { %12164 = vmatprep.subr.bf16.mxu1 %v16529_v61  ;;  %v16599_v61 = vld [vmem:[%s17525_s14 + $0x2760] ss:$8 sps:$4 sm:$0xff]  }
 0x4fe   : > { %12124 = vmatpush1.bf16.msra.mxu0 %v16524_v0 }
 0x4ff   : > { %12165 = vmatpush1.bf16.msra.mxu1 %v16527_v58  ;;  %12125 = vmatprep.subr.bf16.mxu0 %v16532_v53  ;;  %v16604_v53 = vld [vmem:[%s17525_s14 + $0x2654] ss:$8 sps:$4 sm:$0xff]  }
 0x500   : > { %12166 = vmatprep.subr.bf16.mxu1 %v16535_v28  ;;  %v16607_v28 = vld [vmem:[%s17525_s14 + $0x2754] ss:$8 sps:$4 sm:$0xff]  }
 0x502   : > { %12126 = vmatpush1.bf16.msra.mxu0 %v16530_v29 }
 0x503   : > { %12167 = vmatpush1.bf16.msra.mxu1 %v16533_v31  ;;  %12127 = vmatprep.subr.bf16.mxu0 %v16538_v2 }
 0x504   : > { %12168 = vmatprep.subr.bf16.mxu1 %v16541_v4 }
 0x506   : > { %12128 = vmatpush1.bf16.msra.mxu0 %v16536_v57  ;;  %v16602_v57 = vld [vmem:[%s17525_s14 + $0x2650] ss:$8 sps:$4 sm:$0xff]  }
 0x507   : > { %12169 = vmatpush1.bf16.msra.mxu1 %v16539_v33  ;;  %12129 = vmatprep.subr.bf16.mxu0 %v16544_v35  ;;  %v16605_v33 = vld [vmem:[%s17525_s14 + $0x2750] ss:$8 sps:$4 sm:$0xff]  }
 0x508   : > { %12170 = vmatprep.subr.bf16.mxu1 %v16547_v6 }
 0x50a   : > { %12130 = vmatpush2.bf16.msra.mxu0 %v16542_v12  ;;  %v16613_v12 = vld [vmem:[%s17525_s14 + $0x2744] ss:$8 sps:$4 sm:$0xff]  }
 0x50b   : > { %12171 = vmatpush2.bf16.msra.mxu1 %v16545_v38  ;;  %12131 = vmatprep.subr.bf16.mxu0 %v16550_v39  ;;  %v16608_v38 = vld [vmem:[%s17525_s14 + $0x2640] ss:$8 sps:$4 sm:$0xff]  }
 0x50c   : > { %12172 = vmatprep.subr.bf16.mxu1 %v16553_v17  ;;  %v16611_v39 = vld [vmem:[%s17525_s14 + $0x2740] ss:$8 sps:$4 sm:$0xff]   ;;  %v16616_v17 = vld [vmem:[%s17525_s14 + $0x2634] ss:$8 sps:$4 sm:$0xff]  }
 0x50e   : > { %12132 = vmatpush2.bf16.msra.mxu0 %v16548_v41  ;;  %v16619_v41 = vld [vmem:[%s17525_s14 + $0x2734] ss:$8 sps:$4 sm:$0xff]  }
 0x50f   : > { %12173 = vmatpush2.bf16.msra.mxu1 %v16551_v8  ;;  %12133 = vmatprep.subr.bf16.mxu0 %v16556_v43  ;;  %v16614_v8 = vld [vmem:[%s17525_s14 + $0x2630] ss:$8 sps:$4 sm:$0xff]  }
 0x510   : > { %12174 = vmatprep.subr.bf16.mxu1 %v16559_v48  ;;  %v16617_v43 = vld [vmem:[%s17525_s14 + $0x2730] ss:$8 sps:$4 sm:$0xff]   ;;  %v16622_v48 = vld [vmem:[%s17525_s14 + $0x2624] ss:$8 sps:$4 sm:$0xff]  }
 0x512   : > { %12134 = vmatpush2.bf16.msra.mxu0 %v16554_v56  ;;  %v16625_v56 = vld [vmem:[%s17525_s14 + $0x2724] ss:$8 sps:$4 sm:$0xff]  }
 0x513   : > { %12175 = vmatpush2.bf16.msra.mxu1 %v16557_v46  ;;  %12135 = vmatprep.subr.bf16.mxu0 %v16562_v49  ;;  %v16620_v46 = vld [vmem:[%s17525_s14 + $0x2620] ss:$8 sps:$4 sm:$0xff]  }
 0x514   : > { %12176 = vmatprep.subr.bf16.mxu1 %v16565_v51  ;;  %v16623_v49 = vld [vmem:[%s17525_s14 + $0x2720] ss:$8 sps:$4 sm:$0xff]   ;;  %v16628_v51 = vld [vmem:[%s17525_s14 + $0x2614] ss:$8 sps:$4 sm:$0xff]  }
 0x516   : > { %12136 = vmatpush2.bf16.msra.mxu0 %v16560_v26  ;;  %v16631_v26 = vld [vmem:[%s17525_s14 + $0x2714] ss:$8 sps:$4 sm:$0xff]  }
 0x517   : > { %12177 = vmatpush2.bf16.msra.mxu1 %v16563_v23  ;;  %12137 = vmatprep.subr.bf16.mxu0 %v16568_v25  ;;  %v16626_v23 = vld [vmem:[%s17525_s14 + $0x2610] ss:$8 sps:$4 sm:$0xff]  }
 0x518   : > { %12178 = vmatprep.subr.bf16.mxu1 %v16571_v7  ;;  %v16629_v25 = vld [vmem:[%s17525_s14 + $0x2710] ss:$8 sps:$4 sm:$0xff]   ;;  %v16634_v7 = vld [vmem:[%s17525_s14 + $0x2604] ss:$8 sps:$4 sm:$0xff]  }
 0x51a   : > { %12138 = vmatpush2.bf16.msra.mxu0 %v16566_v54  ;;  %v16637_v54 = vld [vmem:[%s17525_s14 + $0x2704] ss:$8 sps:$4 sm:$0xff]  }
 0x51b   : > { %12179 = vmatpush2.bf16.msra.mxu1 %v16569_v19  ;;  %12139 = vmatprep.subr.bf16.mxu0 %v16574_v55  ;;  %v16632_v19 = vld [vmem:[%s17525_s14 + $0x2600] ss:$8 sps:$4 sm:$0xff]  }
 0x51c   : > { %12180 = vmatprep.subr.bf16.mxu1 %v16577_v59  ;;  %v16635_v55 = vld [vmem:[%s17525_s14 + $0x2700] ss:$8 sps:$4 sm:$0xff]   ;;  %v16640_v59 = vld [vmem:[%s17525_s14 + $0x26f4] ss:$8 sps:$4 sm:$0xff]  }
 0x51e   : > { %12140 = vmatpush2.bf16.msra.mxu0 %v16572_v34  ;;  %v16638_v34 = vld [vmem:[%s17525_s14 + $0x26f0] ss:$8 sps:$4 sm:$0xff]  }
 0x51f   : > { %12181 = vmatpush2.bf16.msra.mxu1 %v16575_v24  ;;  %12141 = vmatprep.subr.bf16.mxu0 %v16580_v1  ;;  %v16641_v24 = vld [vmem:[%s17525_s14 + $0x27f0] ss:$8 sps:$4 sm:$0xff]   ;;  %v16646_v1 = vld [vmem:[%s17525_s14 + $0x26e4] ss:$8 sps:$4 sm:$0xff]  }
 0x520   : > { %12182 = vmatprep.subr.bf16.mxu1 %v16583_v11  ;;  %v16649_v11 = vld [vmem:[%s17525_s14 + $0x27e4] ss:$8 sps:$4 sm:$0xff]  }
 0x522   : > { %12142 = vmatpush2.bf16.msra.mxu0 %v16578_v36  ;;  %v16644_v36 = vld [vmem:[%s17525_s14 + $0x26e0] ss:$8 sps:$4 sm:$0xff]  }
 0x523   : > { %12183 = vmatpush2.bf16.msra.mxu1 %v16581_v3  ;;  %12143 = vmatprep.subr.bf16.mxu0 %v16586_v63  ;;  %v16647_v3 = vld [vmem:[%s17525_s14 + $0x27e0] ss:$8 sps:$4 sm:$0xff]   ;;  %v16652_v63 = vld [vmem:[%s17525_s14 + $0x26d4] ss:$8 sps:$4 sm:$0xff]  }
 0x524   : > { %12184 = vmatprep.subr.bf16.mxu1 %v16589_v5  ;;  %v16655_v5 = vld [vmem:[%s17525_s14 + $0x27d4] ss:$8 sps:$4 sm:$0xff]  }
 0x526   : > { %12144 = vmatpush2.bf16.msra.mxu0 %v16584_v45  ;;  %v16658_v45 = vld [vmem:[%s17525_s14 + $0x26c4] ss:$8 sps:$4 sm:$0xff]  }
 0x527   : > { %12185 = vmatpush2.bf16.msra.mxu1 %v16587_v37  ;;  %12195 = vmatprep.subr.bf16.mxu0 %v16592_v10  ;;  %v16661_v37 = vld [vmem:[%s17525_s14 + $0x27c4] ss:$8 sps:$4 sm:$0xff]   ;;  %v16656_v10 = vld [vmem:[%s17525_s14 + $0x26c0] ss:$8 sps:$4 sm:$0xff]  }
 0x528   : > { %12236 = vmatprep.subr.bf16.mxu1 %v16595_v13  ;;  %v16659_v13 = vld [vmem:[%s17525_s14 + $0x27c0] ss:$8 sps:$4 sm:$0xff]  }
 0x529   : > { %v11901_v27 = vpop.f32.mrf.mxu0  ;;  %12146 = vmatmul.mubr.bf16.vlgmr.msra.gmra.mxu0 %v2389_v47  ;;  %v16653_v47 = vld [vmem:[%s17525_s14 + $0x27d0] ss:$8 sps:$4 sm:$0xff]  }
 0x52a   : > { %v11942_v32 = vpop.f32.mrf.mxu1  ;;  %12187 = vmatmul.mubr.bf16.vlgmr.msra.gmra.mxu1 %v2411_v21  ;;  %v11902_v20 = vadd.f32 %v11901_v27, %v18995_v30  ;;  %12196 = vmatpush1.bf16.msra.mxu0 %v16590_v52  ;;  %v16667_v21 = vld [vmem:[%s17525_s14 + $0x27b4] ss:$8 sps:$4 sm:$0xff]   ;;  %v16662_v52 = vld [vmem:[%s17525_s14 + $0x26b0] ss:$8 sps:$4 sm:$0xff]   ;;  %v16668_v27 = vld [vmem:[%s17525_s14 + $0x26a0] ss:$8 sps:$4 sm:$0xff]  }
 0x52b   : > { %12237 = vmatpush1.bf16.msra.mxu1 %v16593_v40  ;;  %v11903_v0 = vpop.f32.mrf.mxu0  ;;  %12197 = vmatprep.subr.bf16.mxu0 %v16598_v15  ;;  %v16665_v40 = vld [vmem:[%s17525_s14 + $0x27b0] ss:$8 sps:$4 sm:$0xff]   ;;  %v16670_v15 = vld [vmem:[%s17525_s14 + $0x26a4] ss:$8 sps:$4 sm:$0xff]  }
 0x52c   : > { %v11944_v58 = vpop.f32.mrf.mxu1  ;;  %12238 = vmatprep.subr.bf16.mxu1 %v16601_v18  ;;  %v19075_v29 = vadd.f32 %v11942_v32, %v11902_v20  ;;  %v11904_v31 = vadd.f32 %v11903_v0, %v18998_v9  ;;  %12227 = vmatprep.mubr.bf16.mxu0 %v2410_v14  ;;  %v16610_v9 = vld [vmem:[%s17525_s14 + $0x2644] ss:$8 sps:$4 sm:$0xff]   ;;  %v16664_v14 = vld [vmem:[%s17525_s14 + $0x26b4] ss:$8 sps:$4 sm:$0xff]   ;;  %v16671_v32 = vld [vmem:[%s17525_s14 + $0x27a0] ss:$8 sps:$4 sm:$0xff]  }
 0x52d   : > { %12268 = vmatprep.mubr.bf16.mxu1 %v2414_v16  ;;  %v11905_v30 = vpop.f32.mrf.mxu0  ;;  %v16673_v18 = vld [vmem:[%s17525_s14 + $0x27a4] ss:$8 sps:$4 sm:$0xff]   ;;  %v16676_v20 = vld [vmem:[%s17525_s14 + $0x2694] ss:$8 sps:$4 sm:$0xff]   ;;  %v16674_v0 = vld [vmem:[%s17525_s14 + $0x2690] ss:$8 sps:$4 sm:$0xff]  }
 0x52e   : > { %v11946_v2 = vpop.f32.mrf.mxu1  ;;  %v19078_v4 = vadd.f32 %v11944_v58, %v11904_v31  ;;  %12198 = vmatpush1.bf16.msra.mxu0 %v16596_v22  ;;  %v19125_v16 = vld [vmem:[%s17543_s23 + $0x50] sm:$0xff]  ;;  %v16679_v22 = vld [vmem:[%s17525_s14 + $0x2794] ss:$8 sps:$4 sm:$0xff]   ;;  %v2396_v30 = vrot.slane %v19051_v62, %v17594_v50 }
 0x52f   : > { %12239 = vmatpush1.bf16.msra.mxu1 %v16599_v61  ;;  %v11906_v35 = vpop.f32.mrf.mxu0  ;;  %12199 = vmatprep.subr.bf16.mxu0 %v16604_v53  ;;  %v19133_v61 = vrot.slane %v19125_v16, %v17594_v50  ;;  %v16677_v58 = vld [vmem:[%s17525_s14 + $0x2790] ss:$8 sps:$4 sm:$0xff]   ;;  %v16682_v53 = vld [vmem:[%s17525_s14 + $0x2684] ss:$8 sps:$4 sm:$0xff]   ;;  %v16680_v2 = vld [vmem:[%s17525_s14 + $0x2680] ss:$8 sps:$4 sm:$0xff]  }
 0x530   : > { %v11947_v6 = vpop.f32.mrf.mxu1  ;;  %12240 = vmatprep.subr.bf16.mxu1 %v16607_v28  ;;  %v16685_v28 = vld [vmem:[%s17525_s14 + $0x2784] ss:$8 sps:$4 sm:$0xff]   ;;  %v16692_v35 = vld [vmem:[%s17525_s14 + $0x2974] ss:$8 sps:$4 sm:$0xff]  }
 0x531   : > { %v2430_v31 = vcombine.high %v19133_v61, %v19133_v61  ;;  %v16695_v62 = vld [vmem:[%s17525_s14 + $0x2864] ss:$8 sps:$4 sm:$0xff]  }
 0x532   : > { %12200 = vmatpush1.bf16.msra.mxu0 %v16602_v57  ;;  %v16683_v57 = vld [vmem:[%s17525_s14 + $0x2780] ss:$8 sps:$4 sm:$0xff]  }
 0x533   : > { %12241 = vmatpush1.bf16.msra.mxu1 %v16605_v33  ;;  %12201 = vmatprep.subr.bf16.mxu0 %v16610_v9  ;;  %v16689_v33 = vld [vmem:[%s17525_s14 + $0x2874] ss:$8 sps:$4 sm:$0xff]   ;;  %v2452_v6 = vrot.slane %v2430_v31, %v17594_v50  ;;  %v2412_v9 = vcombine.high %v2396_v30, %v2396_v30 }
 0x534   : > { %12242 = vmatprep.subr.bf16.mxu1 %v16613_v12  ;;  %v16687_v12 = vld [vmem:[%s17525_s14 + $0x2870] ss:$8 sps:$4 sm:$0xff]   ;;  %v16752_v31 = vld [vmem:[%s17525_s14 + $0x29d4] ss:$8 sps:$4 sm:$0xff]  }
 0x536   : > { %12202 = vmatpush1.bf16.msra.mxu0 %v16608_v38  ;;  %v16690_v38 = vld [vmem:[%s17525_s14 + $0x2970] ss:$8 sps:$4 sm:$0xff]  }
 0x537   : > { %12243 = vmatpush1.bf16.msra.mxu1 %v16611_v39  ;;  %12203 = vmatprep.subr.bf16.mxu0 %v16616_v17  ;;  %v16698_v39 = vld [vmem:[%s17525_s14 + $0x2964] ss:$8 sps:$4 sm:$0xff]   ;;  %v2462_v17 = vcombine.high %v2452_v6, %v2452_v6 }
 0x538   : > { %12244 = vmatprep.subr.bf16.mxu1 %v16619_v41 }
 0x53a   : > { %12204 = vmatpush1.bf16.msra.mxu0 %v16614_v8 }
 0x53b   : > { %12245 = vmatpush1.bf16.msra.mxu1 %v16617_v43  ;;  %12205 = vmatprep.subr.bf16.mxu0 %v16622_v48  ;;  %v16693_v48 = vld [vmem:[%s17525_s14 + $0x2860] ss:$8 sps:$4 sm:$0xff]  }
 0x53c   : > { %12246 = vmatprep.subr.bf16.mxu1 %v16625_v56  ;;  %v16696_v56 = vld [vmem:[%s17525_s14 + $0x2960] ss:$8 sps:$4 sm:$0xff]  }
 0x53e   : > { %12206 = vmatpush1.bf16.msra.mxu0 %v16620_v46 }
 0x53f   : > { %12247 = vmatpush1.bf16.msra.mxu1 %v16623_v49  ;;  %12207 = vmatprep.subr.bf16.mxu0 %v16628_v51  ;;  %v16701_v51 = vld [vmem:[%s17525_s14 + $0x2854] ss:$8 sps:$4 sm:$0xff]  }
 0x540   : > { %12248 = vmatprep.subr.bf16.mxu1 %v16631_v26  ;;  %v16704_v26 = vld [vmem:[%s17525_s14 + $0x2954] ss:$8 sps:$4 sm:$0xff]  }
 0x542   : > { %12208 = vmatpush1.bf16.msra.mxu0 %v16626_v23 }
 0x543   : > { %12249 = vmatpush1.bf16.msra.mxu1 %v16629_v25  ;;  %12209 = vmatprep.subr.bf16.mxu0 %v16634_v7 }
 0x544   : > { %12250 = vmatprep.subr.bf16.mxu1 %v16637_v54 }
 0x546   : > { %12210 = vmatpush1.bf16.msra.mxu0 %v16632_v19  ;;  %v16699_v19 = vld [vmem:[%s17525_s14 + $0x2850] ss:$8 sps:$4 sm:$0xff]  }
 0x547   : > { %12251 = vmatpush1.bf16.msra.mxu1 %v16635_v55  ;;  %12211 = vmatprep.subr.bf16.mxu0 %v16640_v59  ;;  %v16702_v55 = vld [vmem:[%s17525_s14 + $0x2950] ss:$8 sps:$4 sm:$0xff]  }
 0x548   : > { %12252 = vmatprep.subr.bf16.mxu1 %v16643_v60 }
 0x54a   : > { %12212 = vmatpush2.bf16.msra.mxu0 %v16638_v34  ;;  %v16710_v34 = vld [vmem:[%s17525_s14 + $0x2944] ss:$8 sps:$4 sm:$0xff]  }
 0x54b   : > { %12253 = vmatpush2.bf16.msra.mxu1 %v16641_v24  ;;  %12213 = vmatprep.subr.bf16.mxu0 %v16646_v1  ;;  %v16705_v24 = vld [vmem:[%s17525_s14 + $0x2840] ss:$8 sps:$4 sm:$0xff]  }
 0x54c   : > { %12254 = vmatprep.subr.bf16.mxu1 %v16649_v11  ;;  %v16708_v1 = vld [vmem:[%s17525_s14 + $0x2940] ss:$8 sps:$4 sm:$0xff]   ;;  %v16713_v11 = vld [vmem:[%s17525_s14 + $0x2834] ss:$8 sps:$4 sm:$0xff]  }
 0x54e   : > { %12214 = vmatpush2.bf16.msra.mxu0 %v16644_v36  ;;  %v16716_v36 = vld [vmem:[%s17525_s14 + $0x2934] ss:$8 sps:$4 sm:$0xff]  }
 0x54f   : > { %12255 = vmatpush2.bf16.msra.mxu1 %v16647_v3  ;;  %12215 = vmatprep.subr.bf16.mxu0 %v16652_v63  ;;  %v16711_v3 = vld [vmem:[%s17525_s14 + $0x2830] ss:$8 sps:$4 sm:$0xff]  }
 0x550   : > { %12256 = vmatprep.subr.bf16.mxu1 %v16655_v5  ;;  %v16714_v63 = vld [vmem:[%s17525_s14 + $0x2930] ss:$8 sps:$4 sm:$0xff]   ;;  %v16719_v5 = vld [vmem:[%s17525_s14 + $0x2824] ss:$8 sps:$4 sm:$0xff]  }
 0x552   : > { %12216 = vmatpush2.bf16.msra.mxu0 %v16650_v42  ;;  %v16722_v42 = vld [vmem:[%s17525_s14 + $0x2924] ss:$8 sps:$4 sm:$0xff]  }
 0x553   : > { %12257 = vmatpush2.bf16.msra.mxu1 %v16653_v47  ;;  %12217 = vmatprep.subr.bf16.mxu0 %v16658_v45  ;;  %v16717_v47 = vld [vmem:[%s17525_s14 + $0x2820] ss:$8 sps:$4 sm:$0xff]  }
 0x554   : > { %12258 = vmatprep.subr.bf16.mxu1 %v16661_v37  ;;  %v16720_v45 = vld [vmem:[%s17525_s14 + $0x2920] ss:$8 sps:$4 sm:$0xff]   ;;  %v16725_v37 = vld [vmem:[%s17525_s14 + $0x2814] ss:$8 sps:$4 sm:$0xff]  }
 0x556   : > { %12218 = vmatpush2.bf16.msra.mxu0 %v16656_v10  ;;  %v16728_v10 = vld [vmem:[%s17525_s14 + $0x2914] ss:$8 sps:$4 sm:$0xff]  }
 0x557   : > { %12259 = vmatpush2.bf16.msra.mxu1 %v16659_v13  ;;  %12219 = vmatprep.subr.bf16.mxu0 %v16664_v14  ;;  %v16723_v13 = vld [vmem:[%s17525_s14 + $0x2810] ss:$8 sps:$4 sm:$0xff]  }
 0x558   : > { %12260 = vmatprep.subr.bf16.mxu1 %v16667_v21  ;;  %v16726_v14 = vld [vmem:[%s17525_s14 + $0x2910] ss:$8 sps:$4 sm:$0xff]   ;;  %v16731_v21 = vld [vmem:[%s17525_s14 + $0x2804] ss:$8 sps:$4 sm:$0xff]  }
 0x55a   : > { %12220 = vmatpush2.bf16.msra.mxu0 %v16662_v52  ;;  %v16734_v52 = vld [vmem:[%s17525_s14 + $0x2904] ss:$8 sps:$4 sm:$0xff]  }
 0x55b   : > { %12261 = vmatpush2.bf16.msra.mxu1 %v16665_v40  ;;  %12221 = vmatprep.subr.bf16.mxu0 %v16670_v15  ;;  %v16729_v40 = vld [vmem:[%s17525_s14 + $0x2800] ss:$8 sps:$4 sm:$0xff]  }
 0x55c   : > { %12262 = vmatprep.subr.bf16.mxu1 %v16673_v18  ;;  %v16732_v15 = vld [vmem:[%s17525_s14 + $0x2900] ss:$8 sps:$4 sm:$0xff]   ;;  %v16737_v18 = vld [vmem:[%s17525_s14 + $0x28f4] ss:$8 sps:$4 sm:$0xff]  }
 0x55e   : > { %12222 = vmatpush2.bf16.msra.mxu0 %v16668_v27  ;;  %v16740_v27 = vld [vmem:[%s17525_s14 + $0x29f4] ss:$8 sps:$4 sm:$0xff]  }
 0x55f   : > { %12263 = vmatpush2.bf16.msra.mxu1 %v16671_v32  ;;  %12223 = vmatprep.subr.bf16.mxu0 %v16676_v20  ;;  %v16735_v32 = vld [vmem:[%s17525_s14 + $0x28f0] ss:$8 sps:$4 sm:$0xff]  }
 0x560   : > { %12264 = vmatprep.subr.bf16.mxu1 %v16679_v22  ;;  %v16738_v20 = vld [vmem:[%s17525_s14 + $0x29f0] ss:$8 sps:$4 sm:$0xff]   ;;  %v16743_v22 = vld [vmem:[%s17525_s14 + $0x28e4] ss:$8 sps:$4 sm:$0xff]  }
 0x562   : > { %12224 = vmatpush2.bf16.msra.mxu0 %v16674_v0  ;;  %v16746_v0 = vld [vmem:[%s17525_s14 + $0x29e4] ss:$8 sps:$4 sm:$0xff]  }
 0x563   : > { %12265 = vmatpush2.bf16.msra.mxu1 %v16677_v58  ;;  %12225 = vmatprep.subr.bf16.mxu0 %v16682_v53  ;;  %v16741_v58 = vld [vmem:[%s17525_s14 + $0x28e0] ss:$8 sps:$4 sm:$0xff]  }
 0x564   : > { %12266 = vmatprep.subr.bf16.mxu1 %v16685_v28  ;;  %v16744_v53 = vld [vmem:[%s17525_s14 + $0x29e0] ss:$8 sps:$4 sm:$0xff]   ;;  %v16749_v28 = vld [vmem:[%s17525_s14 + $0x28d4] ss:$8 sps:$4 sm:$0xff]  }
 0x566   : > { %12226 = vmatpush2.bf16.msra.mxu0 %v16680_v2  ;;  %v16750_v2 = vld [vmem:[%s17525_s14 + $0x29d0] ss:$8 sps:$4 sm:$0xff]  }
 0x567   : > { %12267 = vmatpush2.bf16.msra.mxu1 %v16683_v57  ;;  %12277 = vmatprep.subr.bf16.mxu0 %v16689_v33  ;;  %v16755_v57 = vld [vmem:[%s17525_s14 + $0x28c4] ss:$8 sps:$4 sm:$0xff]  }
 0x568   : > { %12318 = vmatprep.subr.bf16.mxu1 %v16692_v35  ;;  %v16758_v33 = vld [vmem:[%s17525_s14 + $0x29c4] ss:$8 sps:$4 sm:$0xff]   ;;  %v16753_v35 = vld [vmem:[%s17525_s14 + $0x28c0] ss:$8 sps:$4 sm:$0xff]  }
 0x569   : > { %v11983_v41 = vpop.f32.mrf.mxu0  ;;  %12228 = vmatmul.mubr.bf16.vlgmr.msra.gmra.mxu0 %v2396_v30  ;;  %v16747_v30 = vld [vmem:[%s17525_s14 + $0x28d0] ss:$8 sps:$4 sm:$0xff]  }
 0x56a   : > { %v12024_v8 = vpop.f32.mrf.mxu1  ;;  %12269 = vmatmul.mubr.bf16.vlgmr.msra.gmra.mxu1 %v2412_v9  ;;  %v11984_v43 = vadd.f32 %v11983_v41, %v19075_v29  ;;  %12278 = vmatpush1.bf16.msra.mxu0 %v16687_v12  ;;  %v16761_v9 = vld [vmem:[%s17525_s14 + $0x28b4] ss:$8 sps:$4 sm:$0xff]   ;;  %v2415_v41 = vcombine.high %v19125_v16, %v19125_v16  ;;  %v16771_v16 = vld [vmem:[%s17525_s14 + $0x2890] ss:$8 sps:$4 sm:$0xff]  }
 0x56b   : > { %12319 = vmatpush1.bf16.msra.mxu1 %v16690_v38  ;;  %v11985_v46 = vpop.f32.mrf.mxu0  ;;  %12279 = vmatprep.subr.bf16.mxu0 %v16695_v62  ;;  %v16764_v12 = vld [vmem:[%s17525_s14 + $0x29b4] ss:$8 sps:$4 sm:$0xff]   ;;  %v16759_v38 = vld [vmem:[%s17525_s14 + $0x28b0] ss:$8 sps:$4 sm:$0xff]  }
 0x56c   : > { %v12026_v49 = vpop.f32.mrf.mxu1  ;;  %12320 = vmatprep.subr.bf16.mxu1 %v16698_v39  ;;  %v19157_v23 = vadd.f32 %v12024_v8, %v11984_v43  ;;  %v11986_v25 = vadd.f32 %v11985_v46, %v19078_v4  ;;  %12309 = vmatprep.mubr.bf16.mxu0 %v2452_v6  ;;  %v16707_v4 = vld [vmem:[%s17525_s14 + $0x2844] ss:$8 sps:$4 sm:$0xff]   ;;  %v16756_v6 = vld [vmem:[%s17525_s14 + $0x29c0] ss:$8 sps:$4 sm:$0xff]   ;;  %v16762_v62 = vld [vmem:[%s17525_s14 + $0x29b0] ss:$8 sps:$4 sm:$0xff]   ;;  %v19213_v46 = vrot.slane %v2415_v41, %v17594_v50 }
 0x56d   : > { %12350 = vmatprep.mubr.bf16.mxu1 %v2462_v17  ;;  %v11987_v29 = vpop.f32.mrf.mxu0  ;;  %v16767_v39 = vld [vmem:[%s17525_s14 + $0x28a4] ss:$8 sps:$4 sm:$0xff]   ;;  %v16765_v8 = vld [vmem:[%s17525_s14 + $0x28a0] ss:$8 sps:$4 sm:$0xff]   ;;  %v16836_v41 = vld [vmem:[%s17525_s14 + $0x2bf4] ss:$8 sps:$4 sm:$0xff]  }
 0x56e   : > { %v12028_v7 = vpop.f32.mrf.mxu1  ;;  %v19160_v54 = vadd.f32 %v12026_v49, %v11986_v25  ;;  %12280 = vmatpush1.bf16.msra.mxu0 %v16693_v48  ;;  %v16770_v17 = vld [vmem:[%s17525_s14 + $0x29a4] ss:$8 sps:$4 sm:$0xff]   ;;  %v16768_v43 = vld [vmem:[%s17525_s14 + $0x29a0] ss:$8 sps:$4 sm:$0xff]   ;;  %v16773_v48 = vld [vmem:[%s17525_s14 + $0x2894] ss:$8 sps:$4 sm:$0xff]   ;;  %v2431_v25 = vcombine.high %v19213_v46, %v19213_v46  ;;  %v2438_v29 = vrot.slane %v19133_v61, %v17594_v50 }
 0x56f   : > { %12321 = vmatpush1.bf16.msra.mxu1 %v16696_v56  ;;  %v11988_v59 = vpop.f32.mrf.mxu0  ;;  %12281 = vmatprep.subr.bf16.mxu0 %v16701_v51  ;;  %v16776_v56 = vld [vmem:[%s17525_s14 + $0x2994] ss:$8 sps:$4 sm:$0xff]   ;;  %v16774_v49 = vld [vmem:[%s17525_s14 + $0x2990] ss:$8 sps:$4 sm:$0xff]   ;;  %v16779_v51 = vld [vmem:[%s17525_s14 + $0x2884] ss:$8 sps:$4 sm:$0xff]  }
 0x570   : > { %v12029_v60 = vpop.f32.mrf.mxu1  ;;  %12322 = vmatprep.subr.bf16.mxu1 %v16704_v26  ;;  %v16782_v26 = vld [vmem:[%s17525_s14 + $0x2984] ss:$8 sps:$4 sm:$0xff]   ;;  %v16777_v7 = vld [vmem:[%s17525_s14 + $0x2880] ss:$8 sps:$4 sm:$0xff]   ;;  %v16788_v59 = vld [vmem:[%s17525_s14 + $0x2b74] ss:$8 sps:$4 sm:$0xff]  }
 0x571   : > { %v2459_v60 = vrot.slane %v2431_v25, %v17594_v50  ;;  %v16791_v61 = vld [vmem:[%s17525_s14 + $0x2a64] ss:$8 sps:$4 sm:$0xff]   ;;  %v16843_v25 = vld [vmem:[%s17525_s14 + $0x2ad0] ss:$8 sps:$4 sm:$0xff]  }
 0x572   : > { %12282 = vmatpush1.bf16.msra.mxu0 %v16699_v19  ;;  %v16780_v19 = vld [vmem:[%s17525_s14 + $0x2980] ss:$8 sps:$4 sm:$0xff]  }
 0x573   : > { %12323 = vmatpush1.bf16.msra.mxu1 %v16702_v55  ;;  %12283 = vmatprep.subr.bf16.mxu0 %v16707_v4  ;;  %v16785_v55 = vld [vmem:[%s17525_s14 + $0x2a74] ss:$8 sps:$4 sm:$0xff]   ;;  %v2460_v4 = vcombine.high %v2438_v29, %v2438_v29 }
 0x574   : > { %12324 = vmatprep.subr.bf16.mxu1 %v16710_v34  ;;  %v16783_v34 = vld [vmem:[%s17525_s14 + $0x2a70] ss:$8 sps:$4 sm:$0xff]  }
 0x576   : > { %12284 = vmatpush1.bf16.msra.mxu0 %v16705_v24  ;;  %v16786_v24 = vld [vmem:[%s17525_s14 + $0x2b70] ss:$8 sps:$4 sm:$0xff]  }
 0x577   : > { %12325 = vmatpush1.bf16.msra.mxu1 %v16708_v1  ;;  %12285 = vmatprep.subr.bf16.mxu0 %v16713_v11  ;;  %v16794_v1 = vld [vmem:[%s17525_s14 + $0x2b64] ss:$8 sps:$4 sm:$0xff]   ;;  %v2463_v11 = vcombine.high %v2459_v60, %v2459_v60 }
 0x578   : > { %12326 = vmatprep.subr.bf16.mxu1 %v16716_v36 }
 0x57a   : > { %12286 = vmatpush1.bf16.msra.mxu0 %v16711_v3 }
 0x57b   : > { %12327 = vmatpush1.bf16.msra.mxu1 %v16714_v63  ;;  %12287 = vmatprep.subr.bf16.mxu0 %v16719_v5  ;;  %v16789_v5 = vld [vmem:[%s17525_s14 + $0x2a60] ss:$8 sps:$4 sm:$0xff]  }
 0x57c   : > { %12328 = vmatprep.subr.bf16.mxu1 %v16722_v42  ;;  %v16792_v42 = vld [vmem:[%s17525_s14 + $0x2b60] ss:$8 sps:$4 sm:$0xff]  }
 0x57e   : > { %12288 = vmatpush1.bf16.msra.mxu0 %v16717_v47 }
 0x57f   : > { %12329 = vmatpush1.bf16.msra.mxu1 %v16720_v45  ;;  %12289 = vmatprep.subr.bf16.mxu0 %v16725_v37  ;;  %v16797_v37 = vld [vmem:[%s17525_s14 + $0x2a54] ss:$8 sps:$4 sm:$0xff]  }
 0x580   : > { %12330 = vmatprep.subr.bf16.mxu1 %v16728_v10  ;;  %v16800_v10 = vld [vmem:[%s17525_s14 + $0x2b54] ss:$8 sps:$4 sm:$0xff]  }
 0x582   : > { %12290 = vmatpush1.bf16.msra.mxu0 %v16723_v13 }
 0x583   : > { %12331 = vmatpush1.bf16.msra.mxu1 %v16726_v14  ;;  %12291 = vmatprep.subr.bf16.mxu0 %v16731_v21 }
 0x584   : > { %12332 = vmatprep.subr.bf16.mxu1 %v16734_v52 }
 0x586   : > { %12292 = vmatpush1.bf16.msra.mxu0 %v16729_v40  ;;  %v16795_v40 = vld [vmem:[%s17525_s14 + $0x2a50] ss:$8 sps:$4 sm:$0xff]  }
 0x587   : > { %12333 = vmatpush1.bf16.msra.mxu1 %v16732_v15  ;;  %12293 = vmatprep.subr.bf16.mxu0 %v16737_v18  ;;  %v16798_v15 = vld [vmem:[%s17525_s14 + $0x2b50] ss:$8 sps:$4 sm:$0xff]  }
 0x588   : > { %12334 = vmatprep.subr.bf16.mxu1 %v16740_v27 }
 0x58a   : > { %12294 = vmatpush2.bf16.msra.mxu0 %v16735_v32  ;;  %v16806_v32 = vld [vmem:[%s17525_s14 + $0x2b44] ss:$8 sps:$4 sm:$0xff]  }
 0x58b   : > { %12335 = vmatpush2.bf16.msra.mxu1 %v16738_v20  ;;  %12295 = vmatprep.subr.bf16.mxu0 %v16743_v22  ;;  %v16801_v20 = vld [vmem:[%s17525_s14 + $0x2a40] ss:$8 sps:$4 sm:$0xff]  }
 0x58c   : > { %12336 = vmatprep.subr.bf16.mxu1 %v16746_v0  ;;  %v16804_v22 = vld [vmem:[%s17525_s14 + $0x2b40] ss:$8 sps:$4 sm:$0xff]   ;;  %v16809_v0 = vld [vmem:[%s17525_s14 + $0x2a34] ss:$8 sps:$4 sm:$0xff]  }
 0x58e   : > { %12296 = vmatpush2.bf16.msra.mxu0 %v16741_v58  ;;  %v16812_v58 = vld [vmem:[%s17525_s14 + $0x2b34] ss:$8 sps:$4 sm:$0xff]  }
 0x58f   : > { %12337 = vmatpush2.bf16.msra.mxu1 %v16744_v53  ;;  %12297 = vmatprep.subr.bf16.mxu0 %v16749_v28  ;;  %v16807_v53 = vld [vmem:[%s17525_s14 + $0x2a30] ss:$8 sps:$4 sm:$0xff]  }
 0x590   : > { %12338 = vmatprep.subr.bf16.mxu1 %v16752_v31  ;;  %v16810_v28 = vld [vmem:[%s17525_s14 + $0x2b30] ss:$8 sps:$4 sm:$0xff]   ;;  %v16815_v31 = vld [vmem:[%s17525_s14 + $0x2a24] ss:$8 sps:$4 sm:$0xff]  }
 0x592   : > { %12298 = vmatpush2.bf16.msra.mxu0 %v16747_v30  ;;  %v16818_v30 = vld [vmem:[%s17525_s14 + $0x2b24] ss:$8 sps:$4 sm:$0xff]  }
 0x593   : > { %12339 = vmatpush2.bf16.msra.mxu1 %v16750_v2  ;;  %12299 = vmatprep.subr.bf16.mxu0 %v16755_v57  ;;  %v16813_v2 = vld [vmem:[%s17525_s14 + $0x2a20] ss:$8 sps:$4 sm:$0xff]  }
 0x594   : > { %12340 = vmatprep.subr.bf16.mxu1 %v16758_v33  ;;  %v16816_v57 = vld [vmem:[%s17525_s14 + $0x2b20] ss:$8 sps:$4 sm:$0xff]   ;;  %v16821_v33 = vld [vmem:[%s17525_s14 + $0x2a14] ss:$8 sps:$4 sm:$0xff]  }
 0x596   : > { %12300 = vmatpush2.bf16.msra.mxu0 %v16753_v35  ;;  %v16824_v35 = vld [vmem:[%s17525_s14 + $0x2b14] ss:$8 sps:$4 sm:$0xff]  }
 0x597   : > { %12341 = vmatpush2.bf16.msra.mxu1 %v16756_v6  ;;  %12301 = vmatprep.subr.bf16.mxu0 %v16761_v9  ;;  %v16819_v6 = vld [vmem:[%s17525_s14 + $0x2a10] ss:$8 sps:$4 sm:$0xff]  }
 0x598   : > { %12342 = vmatprep.subr.bf16.mxu1 %v16764_v12  ;;  %v16822_v9 = vld [vmem:[%s17525_s14 + $0x2b10] ss:$8 sps:$4 sm:$0xff]   ;;  %v16827_v12 = vld [vmem:[%s17525_s14 + $0x2a04] ss:$8 sps:$4 sm:$0xff]  }
 0x59a   : > { %12302 = vmatpush2.bf16.msra.mxu0 %v16759_v38  ;;  %v16830_v38 = vld [vmem:[%s17525_s14 + $0x2b04] ss:$8 sps:$4 sm:$0xff]  }
 0x59b   : > { %12343 = vmatpush2.bf16.msra.mxu1 %v16762_v62  ;;  %12303 = vmatprep.subr.bf16.mxu0 %v16767_v39  ;;  %v16825_v62 = vld [vmem:[%s17525_s14 + $0x2a00] ss:$8 sps:$4 sm:$0xff]  }
 0x59c   : > { %12344 = vmatprep.subr.bf16.mxu1 %v16770_v17  ;;  %v16828_v39 = vld [vmem:[%s17525_s14 + $0x2b00] ss:$8 sps:$4 sm:$0xff]   ;;  %v16833_v17 = vld [vmem:[%s17525_s14 + $0x2af4] ss:$8 sps:$4 sm:$0xff]  }
 0x59e   : > { %12304 = vmatpush2.bf16.msra.mxu0 %v16765_v8  ;;  %v16831_v8 = vld [vmem:[%s17525_s14 + $0x2af0] ss:$8 sps:$4 sm:$0xff]  }
 0x59f   : > { %12345 = vmatpush2.bf16.msra.mxu1 %v16768_v43  ;;  %12305 = vmatprep.subr.bf16.mxu0 %v16773_v48  ;;  %v16834_v43 = vld [vmem:[%s17525_s14 + $0x2bf0] ss:$8 sps:$4 sm:$0xff]   ;;  %v16839_v48 = vld [vmem:[%s17525_s14 + $0x2ae4] ss:$8 sps:$4 sm:$0xff]  }
 0x5a0   : > { %12346 = vmatprep.subr.bf16.mxu1 %v16776_v56  ;;  %v16842_v56 = vld [vmem:[%s17525_s14 + $0x2be4] ss:$8 sps:$4 sm:$0xff]  }
 0x5a2   : > { %12306 = vmatpush2.bf16.msra.mxu0 %v16771_v16  ;;  %v16837_v16 = vld [vmem:[%s17525_s14 + $0x2ae0] ss:$8 sps:$4 sm:$0xff]  }
 0x5a3   : > { %12347 = vmatpush2.bf16.msra.mxu1 %v16774_v49  ;;  %12307 = vmatprep.subr.bf16.mxu0 %v16779_v51  ;;  %v16840_v49 = vld [vmem:[%s17525_s14 + $0x2be0] ss:$8 sps:$4 sm:$0xff]   ;;  %v16845_v51 = vld [vmem:[%s17525_s14 + $0x2ad4] ss:$8 sps:$4 sm:$0xff]  }
 0x5a4   : > { %12348 = vmatprep.subr.bf16.mxu1 %v16782_v26  ;;  %v16848_v26 = vld [vmem:[%s17525_s14 + $0x2bd4] ss:$8 sps:$4 sm:$0xff]  }
 0x5a6   : > { %12308 = vmatpush2.bf16.msra.mxu0 %v16777_v7  ;;  %v16851_v7 = vld [vmem:[%s17525_s14 + $0x2ac4] ss:$8 sps:$4 sm:$0xff]  }
 0x5a7   : > { %12349 = vmatpush2.bf16.msra.mxu1 %v16780_v19  ;;  %12359 = vmatprep.subr.bf16.mxu0 %v16785_v55  ;;  %v16854_v19 = vld [vmem:[%s17525_s14 + $0x2bc4] ss:$8 sps:$4 sm:$0xff]   ;;  %v16849_v55 = vld [vmem:[%s17525_s14 + $0x2ac0] ss:$8 sps:$4 sm:$0xff]  }
 0x5a8   : > { %12400 = vmatprep.subr.bf16.mxu1 %v16788_v59  ;;  %v16852_v59 = vld [vmem:[%s17525_s14 + $0x2bc0] ss:$8 sps:$4 sm:$0xff]  }
 0x5a9   : > { %v12065_v36 = vpop.f32.mrf.mxu0  ;;  %12310 = vmatmul.mubr.bf16.vlgmr.msra.gmra.mxu0 %v2438_v29  ;;  %v16846_v29 = vld [vmem:[%s17525_s14 + $0x2bd0] ss:$8 sps:$4 sm:$0xff]  }
 0x5aa   : > { %v12106_v3 = vpop.f32.mrf.mxu1  ;;  %12351 = vmatmul.mubr.bf16.vlgmr.msra.gmra.mxu1 %v2460_v4  ;;  %v12066_v63 = vadd.f32 %v12065_v36, %v19157_v23  ;;  %12360 = vmatpush1.bf16.msra.mxu0 %v16783_v34  ;;  %v16860_v4 = vld [vmem:[%s17525_s14 + $0x2bb4] ss:$8 sps:$4 sm:$0xff]   ;;  %v16855_v34 = vld [vmem:[%s17525_s14 + $0x2ab0] ss:$8 sps:$4 sm:$0xff]   ;;  %v16861_v36 = vld [vmem:[%s17525_s14 + $0x2aa0] ss:$8 sps:$4 sm:$0xff]  }
 0x5ab   : > { %12401 = vmatpush1.bf16.msra.mxu1 %v16786_v24  ;;  %v12067_v47 = vpop.f32.mrf.mxu0  ;;  %12361 = vmatprep.subr.bf16.mxu0 %v16791_v61  ;;  %v16858_v24 = vld [vmem:[%s17525_s14 + $0x2bb0] ss:$8 sps:$4 sm:$0xff]   ;;  %v16863_v61 = vld [vmem:[%s17525_s14 + $0x2aa4] ss:$8 sps:$4 sm:$0xff]  }
 0x5ac   : > { %v12108_v45 = vpop.f32.mrf.mxu1  ;;  %12402 = vmatprep.subr.bf16.mxu1 %v16794_v1  ;;  %v19237_v13 = vadd.f32 %v12106_v3, %v12066_v63  ;;  %v12068_v14 = vadd.f32 %v12067_v47, %v19160_v54  ;;  %12391 = vmatprep.mubr.bf16.mxu0 %v2459_v60  ;;  %v16803_v54 = vld [vmem:[%s17525_s14 + $0x2a44] ss:$8 sps:$4 sm:$0xff]   ;;  %v16857_v60 = vld [vmem:[%s17525_s14 + $0x2ab4] ss:$8 sps:$4 sm:$0xff]   ;;  %v16864_v3 = vld [vmem:[%s17525_s14 + $0x2ba0] ss:$8 sps:$4 sm:$0xff]  }
 0x5ad   : > { %12432 = vmatprep.mubr.bf16.mxu1 %v2463_v11  ;;  %v12069_v23 = vpop.f32.mrf.mxu0  ;;  %v16866_v1 = vld [vmem:[%s17525_s14 + $0x2ba4] ss:$8 sps:$4 sm:$0xff]   ;;  %v19287_v11 = vld [vmem:[%s17543_s23 + $0x58] sm:$0xff] }
 0x5ae   : > { %v12110_v21 = vpop.f32.mrf.mxu1  ;;  %v19240_v52 = vadd.f32 %v12108_v45, %v12068_v14  ;;  %12362 = vmatpush1.bf16.msra.mxu0 %v16789_v5  ;;  %v16869_v63 = vld [vmem:[%s17525_s14 + $0x2a94] ss:$8 sps:$4 sm:$0xff]   ;;  %v16867_v47 = vld [vmem:[%s17525_s14 + $0x2a90] ss:$8 sps:$4 sm:$0xff]   ;;  %v2445_v23 = vrot.slane %v19213_v46, %v17594_v50  ;;  %v16888_v46 = vld [vmem:[%s17525_s14 + $0x2c64] ss:$8 sps:$4 sm:$0xff]  }
 0x5af   : > { %12403 = vmatpush1.bf16.msra.mxu1 %v16792_v42  ;;  %v12070_v18 = vpop.f32.mrf.mxu0  ;;  %12363 = vmatprep.subr.bf16.mxu0 %v16797_v37  ;;  %v16872_v5 = vld [vmem:[%s17525_s14 + $0x2b94] ss:$8 sps:$4 sm:$0xff]   ;;  %v19295_v42 = vrot.slane %v19287_v11, %v17594_v50  ;;  %v16870_v45 = vld [vmem:[%s17525_s14 + $0x2b90] ss:$8 sps:$4 sm:$0xff]   ;;  %v16875_v37 = vld [vmem:[%s17525_s14 + $0x2a84] ss:$8 sps:$4 sm:$0xff]  }
 0x5b0   : > { %v12111_v27 = vpop.f32.mrf.mxu1  ;;  %12404 = vmatprep.subr.bf16.mxu1 %v16800_v10  ;;  %v16878_v10 = vld [vmem:[%s17525_s14 + $0x2b84] ss:$8 sps:$4 sm:$0xff]   ;;  %v16873_v21 = vld [vmem:[%s17525_s14 + $0x2a80] ss:$8 sps:$4 sm:$0xff]   ;;  %v16885_v18 = vld [vmem:[%s17525_s14 + $0x2d74] ss:$8 sps:$4 sm:$0xff]  }
 0x5b1   : > { %v2479_v14 = vcombine.high %v19295_v42, %v19295_v42 }
 0x5b2   : > { %12364 = vmatpush1.bf16.msra.mxu0 %v16795_v40  ;;  %v16876_v40 = vld [vmem:[%s17525_s14 + $0x2b80] ss:$8 sps:$4 sm:$0xff]  }
 0x5b3   : > { %12405 = vmatpush1.bf16.msra.mxu1 %v16798_v15  ;;  %12365 = vmatprep.subr.bf16.mxu0 %v16803_v54  ;;  %v16882_v15 = vld [vmem:[%s17525_s14 + $0x2c74] ss:$8 sps:$4 sm:$0xff]   ;;  %v2501_v27 = vrot.slane %v2479_v14, %v17594_v50  ;;  %v2461_v54 = vcombine.high %v2445_v23, %v2445_v23 }
 0x5b4   : > { %12406 = vmatprep.subr.bf16.mxu1 %v16806_v32  ;;  %v16880_v32 = vld [vmem:[%s17525_s14 + $0x2c70] ss:$8 sps:$4 sm:$0xff]   ;;  %v16945_v14 = vld [vmem:[%s17525_s14 + $0x2dd4] ss:$8 sps:$4 sm:$0xff]  }
 0x5b6   : > { %12366 = vmatpush1.bf16.msra.mxu0 %v16801_v20  ;;  %v16883_v20 = vld [vmem:[%s17525_s14 + $0x2d70] ss:$8 sps:$4 sm:$0xff]  }
 0x5b7   : > { %12407 = vmatpush1.bf16.msra.mxu1 %v16804_v22  ;;  %12367 = vmatprep.subr.bf16.mxu0 %v16809_v0  ;;  %v16891_v22 = vld [vmem:[%s17525_s14 + $0x2d64] ss:$8 sps:$4 sm:$0xff]   ;;  %v2511_v0 = vcombine.high %v2501_v27, %v2501_v27 }
 0x5b8   : > { %12408 = vmatprep.subr.bf16.mxu1 %v16812_v58 }
 0x5ba   : > { %12368 = vmatpush1.bf16.msra.mxu0 %v16807_v53 }
 0x5bb   : > { %12409 = vmatpush1.bf16.msra.mxu1 %v16810_v28  ;;  %12369 = vmatprep.subr.bf16.mxu0 %v16815_v31  ;;  %v16886_v31 = vld [vmem:[%s17525_s14 + $0x2c60] ss:$8 sps:$4 sm:$0xff]  }
 0x5bc   : > { %12410 = vmatprep.subr.bf16.mxu1 %v16818_v30  ;;  %v16889_v30 = vld [vmem:[%s17525_s14 + $0x2d60] ss:$8 sps:$4 sm:$0xff]  }
 0x5be   : > { %12370 = vmatpush1.bf16.msra.mxu0 %v16813_v2 }
 0x5bf   : > { %12411 = vmatpush1.bf16.msra.mxu1 %v16816_v57  ;;  %12371 = vmatprep.subr.bf16.mxu0 %v16821_v33  ;;  %v16894_v33 = vld [vmem:[%s17525_s14 + $0x2c54] ss:$8 sps:$4 sm:$0xff]  }
 0x5c0   : > { %12412 = vmatprep.subr.bf16.mxu1 %v16824_v35  ;;  %v16897_v35 = vld [vmem:[%s17525_s14 + $0x2d54] ss:$8 sps:$4 sm:$0xff]  }
 0x5c2   : > { %12372 = vmatpush1.bf16.msra.mxu0 %v16819_v6 }
 0x5c3   : > { %12413 = vmatpush1.bf16.msra.mxu1 %v16822_v9  ;;  %12373 = vmatprep.subr.bf16.mxu0 %v16827_v12 }
 0x5c4   : > { %12414 = vmatprep.subr.bf16.mxu1 %v16830_v38 }
 0x5c6   : > { %12374 = vmatpush1.bf16.msra.mxu0 %v16825_v62  ;;  %v16892_v62 = vld [vmem:[%s17525_s14 + $0x2c50] ss:$8 sps:$4 sm:$0xff]  }
 0x5c7   : > { %12415 = vmatpush1.bf16.msra.mxu1 %v16828_v39  ;;  %12375 = vmatprep.subr.bf16.mxu0 %v16833_v17  ;;  %v16895_v39 = vld [vmem:[%s17525_s14 + $0x2d50] ss:$8 sps:$4 sm:$0xff]  }
 0x5c8   : > { %12416 = vmatprep.subr.bf16.mxu1 %v16836_v41 }
 0x5ca   : > { %12376 = vmatpush2.bf16.msra.mxu0 %v16831_v8  ;;  %v16903_v8 = vld [vmem:[%s17525_s14 + $0x2d44] ss:$8 sps:$4 sm:$0xff]  }
 0x5cb   : > { %12417 = vmatpush2.bf16.msra.mxu1 %v16834_v43  ;;  %12377 = vmatprep.subr.bf16.mxu0 %v16839_v48  ;;  %v16898_v43 = vld [vmem:[%s17525_s14 + $0x2c40] ss:$8 sps:$4 sm:$0xff]  }
 0x5cc   : > { %12418 = vmatprep.subr.bf16.mxu1 %v16842_v56  ;;  %v16901_v48 = vld [vmem:[%s17525_s14 + $0x2d40] ss:$8 sps:$4 sm:$0xff]   ;;  %v16906_v56 = vld [vmem:[%s17525_s14 + $0x2c34] ss:$8 sps:$4 sm:$0xff]  }
 0x5ce   : > { %12378 = vmatpush2.bf16.msra.mxu0 %v16837_v16  ;;  %v16909_v16 = vld [vmem:[%s17525_s14 + $0x2d34] ss:$8 sps:$4 sm:$0xff]  }
 0x5cf   : > { %12419 = vmatpush2.bf16.msra.mxu1 %v16840_v49  ;;  %12379 = vmatprep.subr.bf16.mxu0 %v16845_v51  ;;  %v16904_v49 = vld [vmem:[%s17525_s14 + $0x2c30] ss:$8 sps:$4 sm:$0xff]  }
 0x5d0   : > { %12420 = vmatprep.subr.bf16.mxu1 %v16848_v26  ;;  %v16907_v51 = vld [vmem:[%s17525_s14 + $0x2d30] ss:$8 sps:$4 sm:$0xff]   ;;  %v16912_v26 = vld [vmem:[%s17525_s14 + $0x2c24] ss:$8 sps:$4 sm:$0xff]  }
 0x5d2   : > { %12380 = vmatpush2.bf16.msra.mxu0 %v16843_v25  ;;  %v16915_v25 = vld [vmem:[%s17525_s14 + $0x2d24] ss:$8 sps:$4 sm:$0xff]  }
 0x5d3   : > { %12421 = vmatpush2.bf16.msra.mxu1 %v16846_v29  ;;  %12381 = vmatprep.subr.bf16.mxu0 %v16851_v7  ;;  %v16910_v29 = vld [vmem:[%s17525_s14 + $0x2c20] ss:$8 sps:$4 sm:$0xff]  }
 0x5d4   : > { %12422 = vmatprep.subr.bf16.mxu1 %v16854_v19  ;;  %v16913_v7 = vld [vmem:[%s17525_s14 + $0x2d20] ss:$8 sps:$4 sm:$0xff]   ;;  %v16918_v19 = vld [vmem:[%s17525_s14 + $0x2c14] ss:$8 sps:$4 sm:$0xff]  }
 0x5d6   : > { %12382 = vmatpush2.bf16.msra.mxu0 %v16849_v55  ;;  %v16921_v55 = vld [vmem:[%s17525_s14 + $0x2d14] ss:$8 sps:$4 sm:$0xff]  }
 0x5d7   : > { %12423 = vmatpush2.bf16.msra.mxu1 %v16852_v59  ;;  %12383 = vmatprep.subr.bf16.mxu0 %v16857_v60  ;;  %v16916_v59 = vld [vmem:[%s17525_s14 + $0x2c10] ss:$8 sps:$4 sm:$0xff]  }
 0x5d8   : > { %12424 = vmatprep.subr.bf16.mxu1 %v16860_v4  ;;  %v16919_v60 = vld [vmem:[%s17525_s14 + $0x2d10] ss:$8 sps:$4 sm:$0xff]   ;;  %v16924_v4 = vld [vmem:[%s17525_s14 + $0x2c04] ss:$8 sps:$4 sm:$0xff]  }
 0x5da   : > { %12384 = vmatpush2.bf16.msra.mxu0 %v16855_v34  ;;  %v16927_v34 = vld [vmem:[%s17525_s14 + $0x2d04] ss:$8 sps:$4 sm:$0xff]  }
 0x5db   : > { %12425 = vmatpush2.bf16.msra.mxu1 %v16858_v24  ;;  %12385 = vmatprep.subr.bf16.mxu0 %v16863_v61  ;;  %v16922_v24 = vld [vmem:[%s17525_s14 + $0x2c00] ss:$8 sps:$4 sm:$0xff]  }
 0x5dc   : > { %12426 = vmatprep.subr.bf16.mxu1 %v16866_v1  ;;  %v16925_v61 = vld [vmem:[%s17525_s14 + $0x2d00] ss:$8 sps:$4 sm:$0xff]   ;;  %v16930_v1 = vld [vmem:[%s17525_s14 + $0x2cf4] ss:$8 sps:$4 sm:$0xff]  }
 0x5de   : > { %12386 = vmatpush2.bf16.msra.mxu0 %v16861_v36  ;;  %v16933_v36 = vld [vmem:[%s17525_s14 + $0x2df4] ss:$8 sps:$4 sm:$0xff]  }
 0x5df   : > { %12427 = vmatpush2.bf16.msra.mxu1 %v16864_v3  ;;  %12387 = vmatprep.subr.bf16.mxu0 %v16869_v63  ;;  %v16928_v3 = vld [vmem:[%s17525_s14 + $0x2cf0] ss:$8 sps:$4 sm:$0xff]  }
 0x5e0   : > { %12428 = vmatprep.subr.bf16.mxu1 %v16872_v5  ;;  %v16931_v63 = vld [vmem:[%s17525_s14 + $0x2df0] ss:$8 sps:$4 sm:$0xff]   ;;  %v16936_v5 = vld [vmem:[%s17525_s14 + $0x2ce4] ss:$8 sps:$4 sm:$0xff]  }
 0x5e2   : > { %12388 = vmatpush2.bf16.msra.mxu0 %v16867_v47  ;;  %v16939_v47 = vld [vmem:[%s17525_s14 + $0x2de4] ss:$8 sps:$4 sm:$0xff]  }
 0x5e3   : > { %12429 = vmatpush2.bf16.msra.mxu1 %v16870_v45  ;;  %12389 = vmatprep.subr.bf16.mxu0 %v16875_v37  ;;  %v16934_v45 = vld [vmem:[%s17525_s14 + $0x2ce0] ss:$8 sps:$4 sm:$0xff]  }
 0x5e4   : > { %12430 = vmatprep.subr.bf16.mxu1 %v16878_v10  ;;  %v16937_v37 = vld [vmem:[%s17525_s14 + $0x2de0] ss:$8 sps:$4 sm:$0xff]   ;;  %v16942_v10 = vld [vmem:[%s17525_s14 + $0x2cd4] ss:$8 sps:$4 sm:$0xff]  }
 0x5e6   : > { %12390 = vmatpush2.bf16.msra.mxu0 %v16873_v21  ;;  %v16943_v21 = vld [vmem:[%s17525_s14 + $0x2dd0] ss:$8 sps:$4 sm:$0xff]  }
 0x5e7   : > { %12431 = vmatpush2.bf16.msra.mxu1 %v16876_v40  ;;  %12441 = vmatprep.subr.bf16.mxu0 %v16882_v15  ;;  %v16948_v40 = vld [vmem:[%s17525_s14 + $0x2cc4] ss:$8 sps:$4 sm:$0xff]  }
 0x5e8   : > { %12482 = vmatprep.subr.bf16.mxu1 %v16885_v18  ;;  %v16951_v15 = vld [vmem:[%s17525_s14 + $0x2dc4] ss:$8 sps:$4 sm:$0xff]   ;;  %v16946_v18 = vld [vmem:[%s17525_s14 + $0x2cc0] ss:$8 sps:$4 sm:$0xff]  }
 0x5e9   : > { %v12147_v58 = vpop.f32.mrf.mxu0  ;;  %12392 = vmatmul.mubr.bf16.vlgmr.msra.gmra.mxu0 %v2445_v23  ;;  %v16940_v23 = vld [vmem:[%s17525_s14 + $0x2cd0] ss:$8 sps:$4 sm:$0xff]  }
 0x5ea   : > { %v12188_v53 = vpop.f32.mrf.mxu1  ;;  %12433 = vmatmul.mubr.bf16.vlgmr.msra.gmra.mxu1 %v2461_v54  ;;  %v12148_v28 = vadd.f32 %v12147_v58, %v19237_v13  ;;  %12442 = vmatpush1.bf16.msra.mxu0 %v16880_v32  ;;  %v16954_v54 = vld [vmem:[%s17525_s14 + $0x2cb4] ss:$8 sps:$4 sm:$0xff]   ;;  %v2464_v58 = vcombine.high %v19287_v11, %v19287_v11  ;;  %v16964_v11 = vld [vmem:[%s17525_s14 + $0x2c90] ss:$8 sps:$4 sm:$0xff]  }
 0x5eb   : > { %12483 = vmatpush1.bf16.msra.mxu1 %v16883_v20  ;;  %v12149_v2 = vpop.f32.mrf.mxu0  ;;  %12443 = vmatprep.subr.bf16.mxu0 %v16888_v46  ;;  %v16957_v32 = vld [vmem:[%s17525_s14 + $0x2db4] ss:$8 sps:$4 sm:$0xff]   ;;  %v16952_v20 = vld [vmem:[%s17525_s14 + $0x2cb0] ss:$8 sps:$4 sm:$0xff]  }
 0x5ec   : > { %v12190_v57 = vpop.f32.mrf.mxu1  ;;  %12484 = vmatprep.subr.bf16.mxu1 %v16891_v22  ;;  %v19319_v6 = vadd.f32 %v12188_v53, %v12148_v28  ;;  %v12150_v9 = vadd.f32 %v12149_v2, %v19240_v52  ;;  %12473 = vmatprep.mubr.bf16.mxu0 %v2501_v27  ;;  %v16900_v52 = vld [vmem:[%s17525_s14 + $0x2c44] ss:$8 sps:$4 sm:$0xff]   ;;  %v16949_v27 = vld [vmem:[%s17525_s14 + $0x2dc0] ss:$8 sps:$4 sm:$0xff]   ;;  %v16955_v46 = vld [vmem:[%s17525_s14 + $0x2db0] ss:$8 sps:$4 sm:$0xff]   ;;  %v19375_v2 = vrot.slane %v2464_v58, %v17594_v50 }
 0x5ed   : > { %12514 = vmatprep.mubr.bf16.mxu1 %v2511_v0  ;;  %v12151_v13 = vpop.f32.mrf.mxu0  ;;  %v16960_v22 = vld [vmem:[%s17525_s14 + $0x2ca4] ss:$8 sps:$4 sm:$0xff]   ;;  %v16958_v53 = vld [vmem:[%s17525_s14 + $0x2ca0] ss:$8 sps:$4 sm:$0xff]   ;;  %v17029_v58 = vld [vmem:[%s17525_s14 + $0x2ff4] ss:$8 sps:$4 sm:$0xff]  }
 0x5ee   : > { %v12192_v12 = vpop.f32.mrf.mxu1  ;;  %v19322_v38 = vadd.f32 %v12190_v57, %v12150_v9  ;;  %12444 = vmatpush1.bf16.msra.mxu0 %v16886_v31  ;;  %v16963_v0 = vld [vmem:[%s17525_s14 + $0x2da4] ss:$8 sps:$4 sm:$0xff]   ;;  %v16961_v28 = vld [vmem:[%s17525_s14 + $0x2da0] ss:$8 sps:$4 sm:$0xff]   ;;  %v16966_v31 = vld [vmem:[%s17525_s14 + $0x2c94] ss:$8 sps:$4 sm:$0xff]   ;;  %v2480_v9 = vcombine.high %v19375_v2, %v19375_v2  ;;  %v2487_v13 = vrot.slane %v19295_v42, %v17594_v50 }
 0x5ef   : > { %12485 = vmatpush1.bf16.msra.mxu1 %v16889_v30  ;;  %v12152_v17 = vpop.f32.mrf.mxu0  ;;  %12445 = vmatprep.subr.bf16.mxu0 %v16894_v33  ;;  %v16969_v30 = vld [vmem:[%s17525_s14 + $0x2d94] ss:$8 sps:$4 sm:$0xff]   ;;  %v16967_v57 = vld [vmem:[%s17525_s14 + $0x2d90] ss:$8 sps:$4 sm:$0xff]   ;;  %v16972_v33 = vld [vmem:[%s17525_s14 + $0x2c84] ss:$8 sps:$4 sm:$0xff]  }
 0x5f0   : > { %v12193_v41 = vpop.f32.mrf.mxu1  ;;  %12486 = vmatprep.subr.bf16.mxu1 %v16897_v35  ;;  %v16975_v35 = vld [vmem:[%s17525_s14 + $0x2d84] ss:$8 sps:$4 sm:$0xff]   ;;  %v16970_v12 = vld [vmem:[%s17525_s14 + $0x2c80] ss:$8 sps:$4 sm:$0xff]   ;;  %v16981_v17 = vld [vmem:[%s17525_s14 + $0x2f74] ss:$8 sps:$4 sm:$0xff]  }
 0x5f1   : > { %v2508_v41 = vrot.slane %v2480_v9, %v17594_v50  ;;  %v16984_v42 = vld [vmem:[%s17525_s14 + $0x2e64] ss:$8 sps:$4 sm:$0xff]   ;;  %v17036_v9 = vld [vmem:[%s17525_s14 + $0x2ed0] ss:$8 sps:$4 sm:$0xff]  }
 0x5f2   : > { %12446 = vmatpush1.bf16.msra.mxu0 %v16892_v62  ;;  %v16973_v62 = vld [vmem:[%s17525_s14 + $0x2d80] ss:$8 sps:$4 sm:$0xff]  }
 0x5f3   : > { %12487 = vmatpush1.bf16.msra.mxu1 %v16895_v39  ;;  %12447 = vmatprep.subr.bf16.mxu0 %v16900_v52  ;;  %v16978_v39 = vld [vmem:[%s17525_s14 + $0x2e74] ss:$8 sps:$4 sm:$0xff]   ;;  %v2509_v52 = vcombine.high %v2487_v13, %v2487_v13 }
 0x5f4   : > { %12488 = vmatprep.subr.bf16.mxu1 %v16903_v8  ;;  %v16976_v8 = vld [vmem:[%s17525_s14 + $0x2e70] ss:$8 sps:$4 sm:$0xff]  }
 0x5f6   : > { %12448 = vmatpush1.bf16.msra.mxu0 %v16898_v43  ;;  %v16979_v43 = vld [vmem:[%s17525_s14 + $0x2f70] ss:$8 sps:$4 sm:$0xff]  }
 0x5f7   : > { %12489 = vmatpush1.bf16.msra.mxu1 %v16901_v48  ;;  %12449 = vmatprep.subr.bf16.mxu0 %v16906_v56  ;;  %v16987_v48 = vld [vmem:[%s17525_s14 + $0x2f64] ss:$8 sps:$4 sm:$0xff]   ;;  %v2512_v56 = vcombine.high %v2508_v41, %v2508_v41 }
 0x5f8   : > { %12490 = vmatprep.subr.bf16.mxu1 %v16909_v16 }
 0x5fa   : > { %12450 = vmatpush1.bf16.msra.mxu0 %v16904_v49 }
 0x5fb   : > { %12491 = vmatpush1.bf16.msra.mxu1 %v16907_v51  ;;  %12451 = vmatprep.subr.bf16.mxu0 %v16912_v26  ;;  %v16982_v26 = vld [vmem:[%s17525_s14 + $0x2e60] ss:$8 sps:$4 sm:$0xff]  }
 0x5fc   : > { %12492 = vmatprep.subr.bf16.mxu1 %v16915_v25  ;;  %v16985_v25 = vld [vmem:[%s17525_s14 + $0x2f60] ss:$8 sps:$4 sm:$0xff]  }
 0x5fe   : > { %12452 = vmatpush1.bf16.msra.mxu0 %v16910_v29 }
 0x5ff   : > { %12493 = vmatpush1.bf16.msra.mxu1 %v16913_v7  ;;  %12453 = vmatprep.subr.bf16.mxu0 %v16918_v19  ;;  %v16990_v19 = vld [vmem:[%s17525_s14 + $0x2e54] ss:$8 sps:$4 sm:$0xff]  }
 0x600   : > { %12494 = vmatprep.subr.bf16.mxu1 %v16921_v55  ;;  %v16993_v55 = vld [vmem:[%s17525_s14 + $0x2f54] ss:$8 sps:$4 sm:$0xff]  }
 0x602   : > { %12454 = vmatpush1.bf16.msra.mxu0 %v16916_v59 }
 0x603   : > { %12495 = vmatpush1.bf16.msra.mxu1 %v16919_v60  ;;  %12455 = vmatprep.subr.bf16.mxu0 %v16924_v4 }
 0x604   : > { %12496 = vmatprep.subr.bf16.mxu1 %v16927_v34 }
 0x606   : > { %12456 = vmatpush1.bf16.msra.mxu0 %v16922_v24  ;;  %v16988_v24 = vld [vmem:[%s17525_s14 + $0x2e50] ss:$8 sps:$4 sm:$0xff]  }
 0x607   : > { %12497 = vmatpush1.bf16.msra.mxu1 %v16925_v61  ;;  %12457 = vmatprep.subr.bf16.mxu0 %v16930_v1  ;;  %v16991_v61 = vld [vmem:[%s17525_s14 + $0x2f50] ss:$8 sps:$4 sm:$0xff]  }
 0x608   : > { %12498 = vmatprep.subr.bf16.mxu1 %v16933_v36 }
 0x60a   : > { %12458 = vmatpush2.bf16.msra.mxu0 %v16928_v3  ;;  %v16999_v3 = vld [vmem:[%s17525_s14 + $0x2f44] ss:$8 sps:$4 sm:$0xff]  }
 0x60b   : > { %12499 = vmatpush2.bf16.msra.mxu1 %v16931_v63  ;;  %12459 = vmatprep.subr.bf16.mxu0 %v16936_v5  ;;  %v16994_v63 = vld [vmem:[%s17525_s14 + $0x2e40] ss:$8 sps:$4 sm:$0xff]  }
 0x60c   : > { %12500 = vmatprep.subr.bf16.mxu1 %v16939_v47  ;;  %v16997_v5 = vld [vmem:[%s17525_s14 + $0x2f40] ss:$8 sps:$4 sm:$0xff]   ;;  %v17002_v47 = vld [vmem:[%s17525_s14 + $0x2e34] ss:$8 sps:$4 sm:$0xff]  }
 0x60e   : > { %12460 = vmatpush2.bf16.msra.mxu0 %v16934_v45  ;;  %v17005_v45 = vld [vmem:[%s17525_s14 + $0x2f34] ss:$8 sps:$4 sm:$0xff]  }
 0x60f   : > { %12501 = vmatpush2.bf16.msra.mxu1 %v16937_v37  ;;  %12461 = vmatprep.subr.bf16.mxu0 %v16942_v10  ;;  %v17000_v37 = vld [vmem:[%s17525_s14 + $0x2e30] ss:$8 sps:$4 sm:$0xff]  }
 0x610   : > { %12502 = vmatprep.subr.bf16.mxu1 %v16945_v14  ;;  %v17003_v10 = vld [vmem:[%s17525_s14 + $0x2f30] ss:$8 sps:$4 sm:$0xff]   ;;  %v17008_v14 = vld [vmem:[%s17525_s14 + $0x2e24] ss:$8 sps:$4 sm:$0xff]  }
 0x612   : > { %12462 = vmatpush2.bf16.msra.mxu0 %v16940_v23  ;;  %v17011_v23 = vld [vmem:[%s17525_s14 + $0x2f24] ss:$8 sps:$4 sm:$0xff]  }
 0x613   : > { %12503 = vmatpush2.bf16.msra.mxu1 %v16943_v21  ;;  %12463 = vmatprep.subr.bf16.mxu0 %v16948_v40  ;;  %v17006_v21 = vld [vmem:[%s17525_s14 + $0x2e20] ss:$8 sps:$4 sm:$0xff]  }
 0x614   : > { %12504 = vmatprep.subr.bf16.mxu1 %v16951_v15  ;;  %v17009_v40 = vld [vmem:[%s17525_s14 + $0x2f20] ss:$8 sps:$4 sm:$0xff]   ;;  %v17014_v15 = vld [vmem:[%s17525_s14 + $0x2e14] ss:$8 sps:$4 sm:$0xff]  }
 0x616   : > { %12464 = vmatpush2.bf16.msra.mxu0 %v16946_v18  ;;  %v17017_v18 = vld [vmem:[%s17525_s14 + $0x2f14] ss:$8 sps:$4 sm:$0xff]  }
 0x617   : > { %12505 = vmatpush2.bf16.msra.mxu1 %v16949_v27  ;;  %12465 = vmatprep.subr.bf16.mxu0 %v16954_v54  ;;  %v17012_v27 = vld [vmem:[%s17525_s14 + $0x2e10] ss:$8 sps:$4 sm:$0xff]  }
 0x618   : > { %12506 = vmatprep.subr.bf16.mxu1 %v16957_v32  ;;  %v17015_v54 = vld [vmem:[%s17525_s14 + $0x2f10] ss:$8 sps:$4 sm:$0xff]   ;;  %v17020_v32 = vld [vmem:[%s17525_s14 + $0x2e04] ss:$8 sps:$4 sm:$0xff]  }
 0x61a   : > { %12466 = vmatpush2.bf16.msra.mxu0 %v16952_v20  ;;  %v17023_v20 = vld [vmem:[%s17525_s14 + $0x2f04] ss:$8 sps:$4 sm:$0xff]  }
 0x61b   : > { %12507 = vmatpush2.bf16.msra.mxu1 %v16955_v46  ;;  %12467 = vmatprep.subr.bf16.mxu0 %v16960_v22  ;;  %v17018_v46 = vld [vmem:[%s17525_s14 + $0x2e00] ss:$8 sps:$4 sm:$0xff]  }
 0x61c   : > { %12508 = vmatprep.subr.bf16.mxu1 %v16963_v0  ;;  %v17021_v22 = vld [vmem:[%s17525_s14 + $0x2f00] ss:$8 sps:$4 sm:$0xff]   ;;  %v17026_v0 = vld [vmem:[%s17525_s14 + $0x2ef4] ss:$8 sps:$4 sm:$0xff]  }
 0x61e   : > { %12468 = vmatpush2.bf16.msra.mxu0 %v16958_v53  ;;  %v17024_v53 = vld [vmem:[%s17525_s14 + $0x2ef0] ss:$8 sps:$4 sm:$0xff]  }
 0x61f   : > { %12509 = vmatpush2.bf16.msra.mxu1 %v16961_v28  ;;  %12469 = vmatprep.subr.bf16.mxu0 %v16966_v31  ;;  %v17027_v28 = vld [vmem:[%s17525_s14 + $0x2ff0] ss:$8 sps:$4 sm:$0xff]   ;;  %v17032_v31 = vld [vmem:[%s17525_s14 + $0x2ee4] ss:$8 sps:$4 sm:$0xff]  }
 0x620   : > { %12510 = vmatprep.subr.bf16.mxu1 %v16969_v30  ;;  %v17035_v30 = vld [vmem:[%s17525_s14 + $0x2fe4] ss:$8 sps:$4 sm:$0xff]  }
 0x622   : > { %12470 = vmatpush2.bf16.msra.mxu0 %v16964_v11  ;;  %v17030_v11 = vld [vmem:[%s17525_s14 + $0x2ee0] ss:$8 sps:$4 sm:$0xff]  }
 0x623   : > { %12511 = vmatpush2.bf16.msra.mxu1 %v16967_v57  ;;  %12471 = vmatprep.subr.bf16.mxu0 %v16972_v33  ;;  %v17033_v57 = vld [vmem:[%s17525_s14 + $0x2fe0] ss:$8 sps:$4 sm:$0xff]   ;;  %v17038_v33 = vld [vmem:[%s17525_s14 + $0x2ed4] ss:$8 sps:$4 sm:$0xff]  }
 0x624   : > { %12512 = vmatprep.subr.bf16.mxu1 %v16975_v35  ;;  %v17041_v35 = vld [vmem:[%s17525_s14 + $0x2fd4] ss:$8 sps:$4 sm:$0xff]  }
 0x626   : > { %12472 = vmatpush2.bf16.msra.mxu0 %v16970_v12  ;;  %v17044_v12 = vld [vmem:[%s17525_s14 + $0x2ec4] ss:$8 sps:$4 sm:$0xff]  }
 0x627   : > { %12513 = vmatpush2.bf16.msra.mxu1 %v16973_v62  ;;  %12523 = vmatprep.subr.bf16.mxu0 %v16978_v39  ;;  %v17047_v62 = vld [vmem:[%s17525_s14 + $0x2fc4] ss:$8 sps:$4 sm:$0xff]   ;;  %v17042_v39 = vld [vmem:[%s17525_s14 + $0x2ec0] ss:$8 sps:$4 sm:$0xff]  }
 0x628   : > { %12564 = vmatprep.subr.bf16.mxu1 %v16981_v17  ;;  %v17045_v17 = vld [vmem:[%s17525_s14 + $0x2fc0] ss:$8 sps:$4 sm:$0xff]  }
 0x629   : > { %v12229_v16 = vpop.f32.mrf.mxu0  ;;  %12474 = vmatmul.mubr.bf16.vlgmr.msra.gmra.mxu0 %v2487_v13  ;;  %v17039_v13 = vld [vmem:[%s17525_s14 + $0x2fd0] ss:$8 sps:$4 sm:$0xff]  }
 0x62a   : > { %v12270_v49 = vpop.f32.mrf.mxu1  ;;  %12515 = vmatmul.mubr.bf16.vlgmr.msra.gmra.mxu1 %v2509_v52  ;;  %v12230_v51 = vadd.f32 %v12229_v16, %v19319_v6  ;;  %12524 = vmatpush1.bf16.msra.mxu0 %v16976_v8  ;;  %v17053_v52 = vld [vmem:[%s17525_s14 + $0x2fb4] ss:$8 sps:$4 sm:$0xff]   ;;  %v17048_v8 = vld [vmem:[%s17525_s14 + $0x2eb0] ss:$8 sps:$4 sm:$0xff]   ;;  %v17057_v16 = vld [vmem:[%s17525_s14 + $0x2fa0] ss:$8 sps:$4 sm:$0xff]  }
 0x62b   : > { %12565 = vmatpush1.bf16.msra.mxu1 %v16979_v43  ;;  %v12231_v29 = vpop.f32.mrf.mxu0  ;;  %12525 = vmatprep.subr.bf16.mxu0 %v16984_v42  ;;  %v17051_v43 = vld [vmem:[%s17525_s14 + $0x2fb0] ss:$8 sps:$4 sm:$0xff]   ;;  %v17056_v42 = vld [vmem:[%s17525_s14 + $0x2ea4] ss:$8 sps:$4 sm:$0xff]  }
 0x62c   : > { %v12272_v7 = vpop.f32.mrf.mxu1  ;;  %12566 = vmatprep.subr.bf16.mxu1 %v16987_v48  ;;  %v19399_v59 = vadd.f32 %v12270_v49, %v12230_v51  ;;  %v12232_v60 = vadd.f32 %v12231_v29, %v19322_v38  ;;  %12555 = vmatprep.mubr.bf16.mxu0 %v2508_v41  ;;  %v16996_v38 = vld [vmem:[%s17525_s14 + $0x2e44] ss:$8 sps:$4 sm:$0xff]   ;;  %v17050_v41 = vld [vmem:[%s17525_s14 + $0x2eb4] ss:$8 sps:$4 sm:$0xff]   ;;  %v17063_v29 = vld [vmem:[%s17525_s14 + $0x2f90] ss:$8 sps:$4 sm:$0xff]  }
 0x62d   : > { %12596 = vmatprep.mubr.bf16.mxu1 %v2512_v56  ;;  %v12233_v6 = vpop.f32.mrf.mxu0  ;;  %v17059_v48 = vld [vmem:[%s17525_s14 + $0x2fa4] ss:$8 sps:$4 sm:$0xff]   ;;  %v17054_v56 = vld [vmem:[%s17525_s14 + $0x2ea0] ss:$8 sps:$4 sm:$0xff]   ;;  %v17062_v49 = vld [vmem:[%s17525_s14 + $0x2e94] ss:$8 sps:$4 sm:$0xff]  }
 0x62e   : > { %v12274_v4 = vpop.f32.mrf.mxu1  ;;  %v19402_v34 = vadd.f32 %v12272_v7, %v12232_v60  ;;  %12526 = vmatpush1.bf16.msra.mxu0 %v16982_v26  ;;  %v17065_v51 = vld [vmem:[%s17525_s14 + $0x2f94] ss:$8 sps:$4 sm:$0xff]   ;;  %v17068_v7 = vld [vmem:[%s17525_s14 + $0x2e84] ss:$8 sps:$4 sm:$0xff]   ;;  %v2494_v60 = vrot.slane %v19375_v2, %v17594_v50  ;;  %v17066_v6 = vld [vmem:[%s17525_s14 + $0x2e80] ss:$8 sps:$4 sm:$0xff]  }
 0x62f   : > { %12567 = vmatpush1.bf16.msra.mxu1 %v16985_v25  ;;  %v12234_v1 = vpop.f32.mrf.mxu0  ;;  %12527 = vmatprep.subr.bf16.mxu0 %v16990_v19  ;;  %v19453_v26 = vld.sshfl [vmem:[%s17543_s23 + $0x60] sm:$0x33 pattern:$0x75316420]  ;;  %v17060_v25 = vld [vmem:[%s17525_s14 + $0x2e90] ss:$8 sps:$4 sm:$0xff]  }
 0x630   : > { %v12275_v36 = vpop.f32.mrf.mxu1  ;;  %12568 = vmatprep.subr.bf16.mxu1 %v16993_v55  ;;  %v17071_v19 = vld [vmem:[%s17525_s14 + $0x2f84] ss:$8 sps:$4 sm:$0xff]   ;;  %v2520_v55 = vcombine.high %v19453_v26, %v19453_v26  ;;  %v17069_v4 = vld [vmem:[%s17525_s14 + $0x2f80] ss:$8 sps:$4 sm:$0xff]  }
 0x631   : > { %v2510_v36 = vcombine.high %v2494_v60, %v2494_v60  ;;  %v17081_v2 = vld [vmem:[%s17525_s14 + $0x3064] ss:$8 sps:$4 sm:$0xff]  }
 0x632   : > { %12528 = vmatpush1.bf16.msra.mxu0 %v16988_v24  ;;  %v17075_v24 = vld [vmem:[%s17525_s14 + $0x3074] ss:$8 sps:$4 sm:$0xff]   ;;  %v2534_v1 = vrot.slane %v2520_v55, %v17594_v50  ;;  %v17133_v55 = vld [vmem:[%s17525_s14 + $0x30d0] ss:$8 sps:$4 sm:$0xff]  }
 0x633   : > { %12569 = vmatpush1.bf16.msra.mxu1 %v16991_v61  ;;  %12529 = vmatprep.subr.bf16.mxu0 %v16996_v38  ;;  %v17078_v61 = vld [vmem:[%s17525_s14 + $0x3174] ss:$8 sps:$4 sm:$0xff]   ;;  %v17073_v38 = vld [vmem:[%s17525_s14 + $0x3070] ss:$8 sps:$4 sm:$0xff]  }
 0x634   : > { %12570 = vmatprep.subr.bf16.mxu1 %v16999_v3  ;;  %v17076_v3 = vld [vmem:[%s17525_s14 + $0x3170] ss:$8 sps:$4 sm:$0xff]  }
 0x636   : > { %12530 = vmatpush1.bf16.msra.mxu0 %v16994_v63  ;;  %v17084_v63 = vld [vmem:[%s17525_s14 + $0x3164] ss:$8 sps:$4 sm:$0xff]  }
 0x637   : > { %12571 = vmatpush1.bf16.msra.mxu1 %v16997_v5  ;;  %12531 = vmatprep.subr.bf16.mxu0 %v17002_v47  ;;  %v2536_v5 = vcombine.high %v2534_v1, %v2534_v1 }
 0x638   : > { %12572 = vmatprep.subr.bf16.mxu1 %v17005_v45 }
 0x63a   : > { %12532 = vmatpush1.bf16.msra.mxu0 %v17000_v37 }
 0x63b   : > { %12573 = vmatpush1.bf16.msra.mxu1 %v17003_v10  ;;  %12533 = vmatprep.subr.bf16.mxu0 %v17008_v14  ;;  %v17079_v10 = vld [vmem:[%s17525_s14 + $0x3060] ss:$8 sps:$4 sm:$0xff]  }
 0x63c   : > { %12574 = vmatprep.subr.bf16.mxu1 %v17011_v23  ;;  %v17082_v14 = vld [vmem:[%s17525_s14 + $0x3160] ss:$8 sps:$4 sm:$0xff]  }
 0x63e   : > { %12534 = vmatpush1.bf16.msra.mxu0 %v17006_v21 }
 0x63f   : > { %12575 = vmatpush1.bf16.msra.mxu1 %v17009_v40  ;;  %12535 = vmatprep.subr.bf16.mxu0 %v17014_v15  ;;  %v17087_v40 = vld [vmem:[%s17525_s14 + $0x3054] ss:$8 sps:$4 sm:$0xff]  }
 0x640   : > { %12576 = vmatprep.subr.bf16.mxu1 %v17017_v18  ;;  %v17090_v15 = vld [vmem:[%s17525_s14 + $0x3154] ss:$8 sps:$4 sm:$0xff]  }
 0x642   : > { %12536 = vmatpush1.bf16.msra.mxu0 %v17012_v27 }
 0x643   : > { %12577 = vmatpush1.bf16.msra.mxu1 %v17015_v54  ;;  %12537 = vmatprep.subr.bf16.mxu0 %v17020_v32 }
 0x644   : > { %12578 = vmatprep.subr.bf16.mxu1 %v17023_v20  ;;  %v17085_v20 = vld [vmem:[%s17525_s14 + $0x3050] ss:$8 sps:$4 sm:$0xff]  }
 0x646   : > { %12538 = vmatpush1.bf16.msra.mxu0 %v17018_v46  ;;  %v17088_v46 = vld [vmem:[%s17525_s14 + $0x3150] ss:$8 sps:$4 sm:$0xff]  }
 0x647   : > { %12579 = vmatpush1.bf16.msra.mxu1 %v17021_v22  ;;  %12539 = vmatprep.subr.bf16.mxu0 %v17026_v0 }
 0x648   : > { %12580 = vmatprep.subr.bf16.mxu1 %v17029_v58  ;;  %v17096_v58 = vld [vmem:[%s17525_s14 + $0x3144] ss:$8 sps:$4 sm:$0xff]  }
 0x64a   : > { %12540 = vmatpush2.bf16.msra.mxu0 %v17024_v53  ;;  %v17091_v53 = vld [vmem:[%s17525_s14 + $0x3040] ss:$8 sps:$4 sm:$0xff]  }
 0x64b   : > { %12581 = vmatpush2.bf16.msra.mxu1 %v17027_v28  ;;  %12541 = vmatprep.subr.bf16.mxu0 %v17032_v31  ;;  %v17094_v28 = vld [vmem:[%s17525_s14 + $0x3140] ss:$8 sps:$4 sm:$0xff]   ;;  %v17099_v31 = vld [vmem:[%s17525_s14 + $0x3034] ss:$8 sps:$4 sm:$0xff]  }
 0x64c   : > { %12582 = vmatprep.subr.bf16.mxu1 %v17035_v30  ;;  %v17102_v30 = vld [vmem:[%s17525_s14 + $0x3134] ss:$8 sps:$4 sm:$0xff]  }
 0x64e   : > { %12542 = vmatpush2.bf16.msra.mxu0 %v17030_v11  ;;  %v17097_v11 = vld [vmem:[%s17525_s14 + $0x3030] ss:$8 sps:$4 sm:$0xff]  }
 0x64f   : > { %12583 = vmatpush2.bf16.msra.mxu1 %v17033_v57  ;;  %12543 = vmatprep.subr.bf16.mxu0 %v17038_v33  ;;  %v17100_v57 = vld [vmem:[%s17525_s14 + $0x3130] ss:$8 sps:$4 sm:$0xff]   ;;  %v17105_v33 = vld [vmem:[%s17525_s14 + $0x3024] ss:$8 sps:$4 sm:$0xff]  }
 0x650   : > { %12584 = vmatprep.subr.bf16.mxu1 %v17041_v35  ;;  %v17108_v35 = vld [vmem:[%s17525_s14 + $0x3124] ss:$8 sps:$4 sm:$0xff]  }
 0x652   : > { %12544 = vmatpush2.bf16.msra.mxu0 %v17036_v9  ;;  %v17103_v9 = vld [vmem:[%s17525_s14 + $0x3020] ss:$8 sps:$4 sm:$0xff]  }
 0x653   : > { %12585 = vmatpush2.bf16.msra.mxu1 %v17039_v13  ;;  %12545 = vmatprep.subr.bf16.mxu0 %v17044_v12  ;;  %v17106_v13 = vld [vmem:[%s17525_s14 + $0x3120] ss:$8 sps:$4 sm:$0xff]   ;;  %v17111_v12 = vld [vmem:[%s17525_s14 + $0x3014] ss:$8 sps:$4 sm:$0xff]  }
 0x654   : > { %12586 = vmatprep.subr.bf16.mxu1 %v17047_v62  ;;  %v17114_v62 = vld [vmem:[%s17525_s14 + $0x3114] ss:$8 sps:$4 sm:$0xff]  }
 0x656   : > { %12546 = vmatpush2.bf16.msra.mxu0 %v17042_v39  ;;  %v17109_v39 = vld [vmem:[%s17525_s14 + $0x3010] ss:$8 sps:$4 sm:$0xff]  }
 0x657   : > { %12587 = vmatpush2.bf16.msra.mxu1 %v17045_v17  ;;  %12547 = vmatprep.subr.bf16.mxu0 %v17050_v41  ;;  %v17112_v17 = vld [vmem:[%s17525_s14 + $0x3110] ss:$8 sps:$4 sm:$0xff]   ;;  %v17117_v41 = vld [vmem:[%s17525_s14 + $0x3004] ss:$8 sps:$4 sm:$0xff]  }
 0x658   : > { %12588 = vmatprep.subr.bf16.mxu1 %v17053_v52  ;;  %v17120_v52 = vld [vmem:[%s17525_s14 + $0x3104] ss:$8 sps:$4 sm:$0xff]  }
 0x65a   : > { %12548 = vmatpush2.bf16.msra.mxu0 %v17048_v8  ;;  %v17115_v8 = vld [vmem:[%s17525_s14 + $0x3000] ss:$8 sps:$4 sm:$0xff]  }
 0x65b   : > { %12589 = vmatpush2.bf16.msra.mxu1 %v17051_v43  ;;  %12549 = vmatprep.subr.bf16.mxu0 %v17056_v42  ;;  %v17118_v43 = vld [vmem:[%s17525_s14 + $0x3100] ss:$8 sps:$4 sm:$0xff]   ;;  %v17123_v42 = vld [vmem:[%s17525_s14 + $0x30f4] ss:$8 sps:$4 sm:$0xff]  }
 0x65c   : > { %12590 = vmatprep.subr.bf16.mxu1 %v17059_v48  ;;  %v17126_v48 = vld [vmem:[%s17525_s14 + $0x31f4] ss:$8 sps:$4 sm:$0xff]  }
 0x65e   : > { %12550 = vmatpush2.bf16.msra.mxu0 %v17054_v56  ;;  %v17121_v56 = vld [vmem:[%s17525_s14 + $0x30f0] ss:$8 sps:$4 sm:$0xff]  }
 0x65f   : > { %12591 = vmatpush2.bf16.msra.mxu1 %v17057_v16  ;;  %12551 = vmatprep.subr.bf16.mxu0 %v17062_v49  ;;  %v17124_v16 = vld [vmem:[%s17525_s14 + $0x31f0] ss:$8 sps:$4 sm:$0xff]   ;;  %v17129_v49 = vld [vmem:[%s17525_s14 + $0x30e4] ss:$8 sps:$4 sm:$0xff]  }
 0x660   : > { %12592 = vmatprep.subr.bf16.mxu1 %v17065_v51  ;;  %v17132_v51 = vld [vmem:[%s17525_s14 + $0x31e4] ss:$8 sps:$4 sm:$0xff]  }
 0x662   : > { %12552 = vmatpush2.bf16.msra.mxu0 %v17060_v25  ;;  %v17127_v25 = vld [vmem:[%s17525_s14 + $0x30e0] ss:$8 sps:$4 sm:$0xff]  }
 0x663   : > { %12593 = vmatpush2.bf16.msra.mxu1 %v17063_v29  ;;  %12553 = vmatprep.subr.bf16.mxu0 %v17068_v7  ;;  %v17130_v29 = vld [vmem:[%s17525_s14 + $0x31e0] ss:$8 sps:$4 sm:$0xff]   ;;  %v17135_v7 = vld [vmem:[%s17525_s14 + $0x30d4] ss:$8 sps:$4 sm:$0xff]  }
 0x664   : > { %12594 = vmatprep.subr.bf16.mxu1 %v17071_v19  ;;  %v17138_v19 = vld [vmem:[%s17525_s14 + $0x31d4] ss:$8 sps:$4 sm:$0xff]  }
 0x666   : > { %12554 = vmatpush2.bf16.msra.mxu0 %v17066_v6  ;;  %v17141_v6 = vld [vmem:[%s17525_s14 + $0x30c4] ss:$8 sps:$4 sm:$0xff]  }
 0x667   : > { %12595 = vmatpush2.bf16.msra.mxu1 %v17069_v4  ;;  %12605 = vmatprep.subr.bf16.mxu0 %v17075_v24  ;;  %v17144_v4 = vld [vmem:[%s17525_s14 + $0x31c4] ss:$8 sps:$4 sm:$0xff]   ;;  %v17139_v24 = vld [vmem:[%s17525_s14 + $0x30c0] ss:$8 sps:$4 sm:$0xff]  }
 0x668   : > { %12646 = vmatprep.subr.bf16.mxu1 %v17078_v61  ;;  %v17142_v61 = vld [vmem:[%s17525_s14 + $0x31c0] ss:$8 sps:$4 sm:$0xff]  }
 0x669   : > { %v12311_v47 = vpop.f32.mrf.mxu0  ;;  %12556 = vmatmul.mubr.bf16.vlgmr.msra.gmra.mxu0 %v2494_v60  ;;  %v17136_v60 = vld [vmem:[%s17525_s14 + $0x31d0] ss:$8 sps:$4 sm:$0xff]  }
 0x66a   : > { %v12352_v45 = vpop.f32.mrf.mxu1  ;;  %12597 = vmatmul.mubr.bf16.vlgmr.msra.gmra.mxu1 %v2510_v36  ;;  %v12312_v37 = vadd.f32 %v12311_v47, %v19399_v59  ;;  %12606 = vmatpush1.bf16.msra.mxu0 %v17073_v38  ;;  %v17150_v36 = vld [vmem:[%s17525_s14 + $0x31b4] ss:$8 sps:$4 sm:$0xff]   ;;  %v17145_v38 = vld [vmem:[%s17525_s14 + $0x30b0] ss:$8 sps:$4 sm:$0xff]   ;;  %v17154_v47 = vld [vmem:[%s17525_s14 + $0x31a0] ss:$8 sps:$4 sm:$0xff]  }
 0x66b   : > { %12647 = vmatpush1.bf16.msra.mxu1 %v17076_v3  ;;  %v12313_v23 = vpop.f32.mrf.mxu0  ;;  %12607 = vmatprep.subr.bf16.mxu0 %v17081_v2  ;;  %v17148_v3 = vld [vmem:[%s17525_s14 + $0x31b0] ss:$8 sps:$4 sm:$0xff]   ;;  %v17153_v2 = vld [vmem:[%s17525_s14 + $0x30a4] ss:$8 sps:$4 sm:$0xff]  }
 0x66c   : > { %v12354_v21 = vpop.f32.mrf.mxu1  ;;  %12648 = vmatprep.subr.bf16.mxu1 %v17084_v63  ;;  %v19477_v18 = vadd.f32 %v12352_v45, %v12312_v37  ;;  %v12314_v27 = vadd.f32 %v12313_v23, %v19402_v34  ;;  %12637 = vmatprep.mubr.bf16.mxu0 %v2534_v1  ;;  %v17093_v34 = vld [vmem:[%s17525_s14 + $0x3044] ss:$8 sps:$4 sm:$0xff]   ;;  %v17147_v1 = vld [vmem:[%s17525_s14 + $0x30b4] ss:$8 sps:$4 sm:$0xff]  }
 0x66d   : > { %12678 = vmatprep.mubr.bf16.mxu1 %v2536_v5  ;;  %v12315_v59 = vpop.f32.mrf.mxu0  ;;  %v17156_v63 = vld [vmem:[%s17525_s14 + $0x31a4] ss:$8 sps:$4 sm:$0xff]   ;;  %v17151_v5 = vld [vmem:[%s17525_s14 + $0x30a0] ss:$8 sps:$4 sm:$0xff]   ;;  %v17159_v45 = vld [vmem:[%s17525_s14 + $0x3094] ss:$8 sps:$4 sm:$0xff]  }
 0x66e   : > { %v12356_v54 = vpop.f32.mrf.mxu1  ;;  %v19480_v32 = vadd.f32 %v12354_v21, %v12314_v27  ;;  %12608 = vmatpush1.bf16.msra.mxu0 %v17079_v10  ;;  %v17162_v37 = vld [vmem:[%s17525_s14 + $0x3194] ss:$8 sps:$4 sm:$0xff]   ;;  %v17157_v10 = vld [vmem:[%s17525_s14 + $0x3090] ss:$8 sps:$4 sm:$0xff]   ;;  %v17165_v23 = vld [vmem:[%s17525_s14 + $0x3084] ss:$8 sps:$4 sm:$0xff]  }
 0x66f   : > { %12649 = vmatpush1.bf16.msra.mxu1 %v17082_v14  ;;  %v12316_v22 = vpop.f32.mrf.mxu0  ;;  %12609 = vmatprep.subr.bf16.mxu0 %v17087_v40  ;;  %v17160_v14 = vld [vmem:[%s17525_s14 + $0x3190] ss:$8 sps:$4 sm:$0xff]   ;;  %v17168_v21 = vld [vmem:[%s17525_s14 + $0x3184] ss:$8 sps:$4 sm:$0xff]   ;;  %v2527_v40 = vrot.slane %v19453_v26, %v17594_v50  ;;  %v17166_v27 = vld [vmem:[%s17525_s14 + $0x3180] ss:$8 sps:$4 sm:$0xff]  }
 0x670   : > { %v12357_v0 = vpop.f32.mrf.mxu1  ;;  %12650 = vmatprep.subr.bf16.mxu1 %v17090_v15  ;;  %v17163_v15 = vld [vmem:[%s17525_s14 + $0x3080] ss:$8 sps:$4 sm:$0xff]  }
 0x671   : > { %v2535_v59 = vcombine.high %v2527_v40, %v2527_v40 }
 0x672   : > { %12610 = vmatpush1.bf16.msra.mxu0 %v17085_v20 }
 0x673   : > { %12651 = vmatpush1.bf16.msra.mxu1 %v17088_v46  ;;  %12611 = vmatprep.subr.bf16.mxu0 %v17093_v34 }
 0x674   : > { %12652 = vmatprep.subr.bf16.mxu1 %v17096_v58 }
 0x676   : > { %12612 = vmatpush1.bf16.msra.mxu0 %v17091_v53 }
 0x677   : > { %12653 = vmatpush1.bf16.msra.mxu1 %v17094_v28  ;;  %12613 = vmatprep.subr.bf16.mxu0 %v17099_v31 }
 0x678   : > { %12654 = vmatprep.subr.bf16.mxu1 %v17102_v30 }
 0x67a   : > { %12614 = vmatpush1.bf16.msra.mxu0 %v17097_v11 }
 0x67b   : > { %12655 = vmatpush1.bf16.msra.mxu1 %v17100_v57  ;;  %12615 = vmatprep.subr.bf16.mxu0 %v17105_v33 }
 0x67c   : > { %12656 = vmatprep.subr.bf16.mxu1 %v17108_v35 }
 0x67e   : > { %12616 = vmatpush1.bf16.msra.mxu0 %v17103_v9 }
 0x67f   : > { %12657 = vmatpush1.bf16.msra.mxu1 %v17106_v13  ;;  %12617 = vmatprep.subr.bf16.mxu0 %v17111_v12 }
 0x680   : > { %12658 = vmatprep.subr.bf16.mxu1 %v17114_v62 }
 0x682   : > { %12618 = vmatpush1.bf16.msra.mxu0 %v17109_v39 }
 0x683   : > { %12659 = vmatpush1.bf16.msra.mxu1 %v17112_v17  ;;  %12619 = vmatprep.subr.bf16.mxu0 %v17117_v41 }
 0x684   : > { %12660 = vmatprep.subr.bf16.mxu1 %v17120_v52 }
 0x686   : > { %12620 = vmatpush1.bf16.msra.mxu0 %v17115_v8 }
 0x687   : > { %12661 = vmatpush1.bf16.msra.mxu1 %v17118_v43  ;;  %12621 = vmatprep.subr.bf16.mxu0 %v17123_v42 }
 0x688   : > { %12662 = vmatprep.subr.bf16.mxu1 %v17126_v48 }
 0x68a   : > { %12622 = vmatpush2.bf16.msra.mxu0 %v17121_v56 }
 0x68b   : > { %12663 = vmatpush2.bf16.msra.mxu1 %v17124_v16  ;;  %12623 = vmatprep.subr.bf16.mxu0 %v17129_v49 }
 0x68c   : > { %12664 = vmatprep.subr.bf16.mxu1 %v17132_v51 }
 0x68e   : > { %12624 = vmatpush2.bf16.msra.mxu0 %v17127_v25  ;;  %v17373_v25 = vmov 1983009808  }
 0x68f   : > { %12665 = vmatpush2.bf16.msra.mxu1 %v17130_v29  ;;  %12625 = vmatprep.subr.bf16.mxu0 %v17135_v7  ;;  %v12691_v29 = vunpack.c.l.s4 %v17373_v25 }
 0x690   : > { %12666 = vmatprep.subr.bf16.mxu1 %v17138_v19 }
 0x692   : > { %12626 = vmatpush2.bf16.msra.mxu0 %v17133_v55 }
 0x693   : > { %12667 = vmatpush2.bf16.msra.mxu1 %v17136_v60  ;;  %12627 = vmatprep.subr.bf16.mxu0 %v17141_v6  ;;  %v12692_v6 = vunpack.c.0.s8 %v12691_v29 }
 0x694   : > { %12668 = vmatprep.subr.bf16.mxu1 %v17144_v4 }
 0x696   : > { %12628 = vmatpush2.bf16.msra.mxu0 %v17139_v24 }
 0x697   : > { %12669 = vmatpush2.bf16.msra.mxu1 %v17142_v61  ;;  %12629 = vmatprep.subr.bf16.mxu0 %v17147_v1 }
 0x698   : > { %12670 = vmatprep.subr.bf16.mxu1 %v17150_v36 }
 0x69a   : > { %12630 = vmatpush2.bf16.msra.mxu0 %v17145_v38 }
 0x69b   : > { %12671 = vmatpush2.bf16.msra.mxu1 %v17148_v3  ;;  %12631 = vmatprep.subr.bf16.mxu0 %v17153_v2  ;;  %v12695_v2 = vsub.s32 %v12692_v6, %v17586_v44 }
 0x69c   : > { %12672 = vmatprep.subr.bf16.mxu1 %v17156_v63 }
 0x69e   : > { %12632 = vmatpush2.bf16.msra.mxu0 %v17151_v5 }
 0x69f   : > { %12673 = vmatpush2.bf16.msra.mxu1 %v17154_v47  ;;  %12633 = vmatprep.subr.bf16.mxu0 %v17159_v45  ;;  %v298_v45 = vld [vmem:[#allocation2] sm:$0xf] }
 0x6a0   : > { %12674 = vmatprep.subr.bf16.mxu1 %v17162_v37 }
 0x6a2   : > { %12634 = vmatpush2.bf16.msra.mxu0 %v17157_v10 }
 0x6a3   : > { %12675 = vmatpush2.bf16.msra.mxu1 %v17160_v14  ;;  %12635 = vmatprep.subr.bf16.mxu0 %v17165_v23 }
 0x6a4   : > { %12676 = vmatprep.subr.bf16.mxu1 %v17168_v21 }
 0x6a6   : > { %12636 = vmatpush2.bf16.msra.mxu0 %v17163_v15 }
 0x6a7   : > { %12677 = vmatpush2.bf16.msra.mxu1 %v17166_v27 }
 0x6a9   : > { %v12393_v54 = vpop.f32.mrf.mxu0  ;;  %12638 = vmatmul.mubr.bf16.vlgmr.msra.gmra.mxu0 %v2527_v40 }
 0x6aa   : > { %v12434_v20 = vpop.f32.mrf.mxu1  ;;  %12679 = vmatmul.mubr.bf16.vlgmr.msra.gmra.mxu1 %v2535_v59  ;;  %v12394_v46 = vadd.f32 %v12393_v54, %v19477_v18 }
 0x6ab   : > { %v12395_v22 = vpop.f32.mrf.mxu0 }
 0x6ac   : > { %v12436_v0 = vpop.f32.mrf.mxu1  ;;  %v12435_v34 = vadd.f32 %v12434_v20, %v12394_v46  ;;  %v12396_v50 = vadd.f32 %v12395_v22, %v19480_v32 }
 0x6ad   : > { %v12397_v26 = vpop.f32.mrf.mxu0 }
 0x6ae   : > { %v12438_v58 = vpop.f32.mrf.mxu1  ;;  %v12437_v53 = vadd.f32 %v12436_v0, %v12396_v50 }
 0x6af   : > { %v12398_v28 = vpop.f32.mrf.mxu0 }
 0x6b0   : > { %v12439_v31 = vpop.f32.mrf.mxu1 }
 0x6e9   : > { %v12475_v30 = vpop.f32.mrf.mxu0 }
 0x6ea   : > { %v12516_v11 = vpop.f32.mrf.mxu1  ;;  %v12476_v57 = vadd.f32 %v12475_v30, %v12435_v34 }
 0x6eb   : > { %v12477_v33 = vpop.f32.mrf.mxu0 }
 0x6ec   : > { %v12518_v35 = vpop.f32.mrf.mxu1  ;;  %v12517_v9 = vadd.f32 %v12516_v11, %v12476_v57  ;;  %v12478_v13 = vadd.f32 %v12477_v33, %v12437_v53 }
 0x6ed   : > { %v12479_v12 = vpop.f32.mrf.mxu0 }
 0x6ee   : > { %v12520_v62 = vpop.f32.mrf.mxu1  ;;  %v12519_v18 = vadd.f32 %v12518_v35, %v12478_v13 }
 0x6ef   : > { %v12480_v39 = vpop.f32.mrf.mxu0 }
 0x6f0   : > { %v12521_v17 = vpop.f32.mrf.mxu1 }
 0x729   : > { %v12557_v41 = vpop.f32.mrf.mxu0 }
 0x72a   : > { %v12598_v52 = vpop.f32.mrf.mxu1  ;;  %v12558_v32 = vadd.f32 %v12557_v41, %v12517_v9 }
 0x72b   : > { %v12559_v8 = vpop.f32.mrf.mxu0 }
 0x72c   : > { %v12600_v43 = vpop.f32.mrf.mxu1  ;;  %v12599_v42 = vadd.f32 %v12598_v52, %v12558_v32  ;;  %v12560_v51 = vadd.f32 %v12559_v8, %v12519_v18 }
 0x72d   : > { %v12561_v48 = vpop.f32.mrf.mxu0 }
 0x72e   : > { %v12602_v56 = vpop.f32.mrf.mxu1  ;;  %v12601_v55 = vadd.f32 %v12600_v43, %v12560_v51 }
 0x72f   : > { %v12562_v16 = vpop.f32.mrf.mxu0 }
 0x730   : > { %v12603_v49 = vpop.f32.mrf.mxu1 }
 0x769   : > { %v12639_v7 = vpop.f32.mrf.mxu0 }
 0x76a   : > { %v12680_v19 = vpop.f32.mrf.mxu1  ;;  %v12640_v60 = vadd.f32 %v12639_v7, %v12599_v42 }
 0x76b   : > { %v12641_v4 = vpop.f32.mrf.mxu0 }
 0x76c   : > { %v12682_v24 = vpop.f32.mrf.mxu1  ;;  %v12642_v61 = vadd.f32 %v12641_v4, %v12601_v55  ;;  %v12681_v38 = vadd.f32 %v12680_v19, %v12640_v60 }
 0x76d   : > { %v12643_v1 = vpop.f32.mrf.mxu0 }
 0x76e   : > { %v12684_v36 = vpop.f32.mrf.mxu1  ;;  %v12683_v3 = vadd.f32 %v12682_v24, %v12642_v61 }
 0x76f   : > { %v12644_v63 = vpop.f32.mrf.mxu0 }
 0x770   : > { %v12685_v5 = vpop.f32.mrf.mxu1  ;;  %v12689_v47 = vcombine.low %v12681_v38, %v12683_v3 }
 0x772   : > { %v12696_v37 = vrot.slane %v12689_v47, %v12695_v2  ;;  %12703 = sbr.rel (%p14624_p2) target bundleno = 2144 (0x860), region = 64 }
 0x774   : > { %v12698_v10 = vadd.f32 %v12696_v37, %v298_v45 }
 0x776   : > { %12699 = vst [vmem:[#allocation2] sm:$0xf] %v12698_v10 }
 0x777   : > { %v17169_v14 = vld [vmem:[#allocation8 + $0x78] sm:$0xff]   ;;  %v17171_v21 = vld [vmem:[#allocation8 + $0x70] sm:$0xff]   ;;  %v17173_v15 = vld [vmem:[#allocation8 + $0x68] sm:$0xff]   ;;  %v12709_v46 = vsub.s32 0, %v17586_v44  ;;  %v12713_v22 = vsub.s32 1, %v17586_v44 }
 0x778   : > { %v17170_v23 = vld [vmem:[#allocation8 + $0x38] sm:$0xff]   ;;  %14649 = vmatprep.subr.bf16.mxu0 %v17169_v14  ;;  %v17172_v40 = vld [vmem:[#allocation8 + $0x30] sm:$0xff]   ;;  %v17174_v27 = vld [vmem:[#allocation8 + $0x28] sm:$0xff]  }
 0x779   : > { %14650 = vmatpush3.bf16.msra.mxu0 %v17170_v23  ;;  %v17175_v59 = vld [vmem:[#allocation8 + $0x60] sm:$0xff]   ;;  %v17177_v20 = vld [vmem:[#allocation8 + $0x58] sm:$0xff]   ;;  %v17179_v34 = vld [vmem:[#allocation8 + $0x50] sm:$0xff]  }
 0x77a   : > { %14651 = vmatprep.subr.bf16.mxu0 %v17171_v21  ;;  %v17176_v54 = vld [vmem:[#allocation8 + $0x20] sm:$0xff]   ;;  %v17178_v0 = vld [vmem:[#allocation8 + $0x18] sm:$0xff]   ;;  %v17180_v53 = vld [vmem:[#allocation8 + $0x10] sm:$0xff]  }
 0x77b   : > { %v12705_v50 = vld [vmem:[#allocation6] sm:$0x3]  ;;  %v17181_v31 = vld [vmem:[#allocation8 + $0x48] sm:$0xff]   ;;  %v17183_v35 = vld [vmem:[#allocation8 + $0x40] sm:$0xff]  }
 0x77c   : > { %v12710_v26 = vrot.slane %v12705_v50, %v12709_v46  ;;  %v12714_v58 = vrot.slane %v12705_v50, %v12713_v22  ;;  %v17182_v57 = vld [vmem:[#allocation8 + $0x8] sm:$0xff]   ;;  %v17184_v9 = vld [vmem:[#allocation8] sm:$0xff]  }
 0x77d   : > { %14652 = vmatpush3.bf16.msra.mxu0 %v17172_v40  ;;  %v12704_v30 = vld [vmem:[#allocation2] sm:$0xf]  ;;  %v14625_v17 = vld [vmem:[#allocation9] ss:$0 sm:$0xff] }
 0x77e   : > { %14653 = vmatprep.subr.bf16.mxu0 %v17173_v15  ;;  %v12715_v28 = vcombine.low %v12710_v26, %v12714_v58 }
 0x780   : > { %v12722_v11 = vrot.slane %v12715_v28, %v12695_v2 }
 0x781   : > { %14654 = vmatpush3.bf16.msra.mxu0 %v17174_v27 }
 0x782   : > { %14655 = vmatprep.subr.bf16.mxu0 %v17175_v59  ;;  %v12724_v33 = vadd.f32 %v12722_v11, %v12704_v30 }
 0x784   : > { %v12725_v44 = vmax.f32 %v12724_v33, 0.0 }
 0x785   : > { %14656 = vmatpush3.bf16.msra.mxu0 %v17176_v54 }
 0x786   : > { %14657 = vmatprep.subr.bf16.mxu0 %v17177_v20  ;;  %v12733_v13 = vrot.slane %v12725_v44, %v12695_v2 }
 0x788   : > { %v12734_v12 = vcombine.high %v12733_v13, %v12733_v13  ;;  %v12737_v62 = vpack.c.bf16 %v12733_v13, %v12733_v13 }
 0x789   : > { %14658 = vmatpush3.bf16.msra.mxu0 %v17178_v0 }
 0x78a   : > { %14659 = vmatprep.subr.bf16.mxu0 %v17179_v34  ;;  %v12738_v18 = vpack.c.bf16 %v12734_v12, %v12734_v12 }
 0x78c   : > { %12906 = vmatprep.mubr.bf16.mxu0 %v12738_v18 }
 0x78d   : > { %14660 = vmatpush3.bf16.msra.mxu0 %v17180_v53 }
 0x78e   : > { %14661 = vmatprep.subr.bf16.mxu0 %v17181_v31 }
 0x791   : > { %14662 = vmatpush3.bf16.msra.mxu0 %v17182_v57 }
 0x792   : > { %14663 = vmatprep.subr.bf16.mxu0 %v17183_v35 }
 0x795   : > { %14664 = vmatpush3.bf16.msra.mxu0 %v17184_v9 }
 0x798   : > { %12907 = vmatmul.mubr.bf16.vlgmr.msra.gmra.mxu0 %v12737_v62 }
 0x858   : > { %v14665_v39 = vpop.f32.mrf.mxu0 }
 0x85a   : > { %v14666_v41 = vpop.f32.mrf.mxu0 }
 0x85b   : > { %v14667_v52 = vadd.f32 %v14666_v41, %v14665_v39 }
 0x85c   : > { %v14668_v32 = vpop.f32.mrf.mxu0 }
 0x85d   : > { %v12909_v8 = vadd.f32 %v14667_v52, %v14625_v17 }
 0x85e   : > { %v14669_v43 = vpop.f32.mrf.mxu0 }
 0x85f   : > { %12914 = vst [vmem:[#allocation11] sm:$0x3] %v12909_v8 }
 0x860 PF: > { %p14712_p3 = scmp.eq.s32.totalorder %s17424_s22, 7  ;;  %s17374_s12 = smov [#allocation11]  }
 0x861   : > { %s12922_s13 = sshll.u32 %s17374_s12, 4  ;;  %s12923_s13 = int_to_ptr.vmem [resolvable:$true] %s12922_s13 }
 0x862   : > { %s17291_s15 = scalar_lea.vmem %s12923_s13, 32  ;;  %p17298_p4 = scmp.lt.s32.totalorder %s12923_s13, %s12923_s13 }
 0x863   : > { %p17292_p7 = scmp.ne.s32.totalorder %s12923_s13, %s17291_s15  ;;  %p17299_p12 = scmp.lt.s32.totalorder %s17291_s15, %s17291_s15 }
 0x865   : > { %p17293_p10 = pnand %p17292_p7, %p14712_p3  ;;  %p17300_p13 = por %p17299_p12, %p17298_p4 }
 0x867   : > { %p17294_p8 = pneg %p17293_p10 }
 0x869   : > { %p17301_p0 = pnand %p17300_p13, %p17294_p8 }
 0x86b   : > { %17304 = shalt.err (!%p17301_p0)
}
 0x86c   : > { %14688 = dma.vmem_to_hbm [thread:$0]  (%p14712_p3), %s12923_s13, 32, %s19574_s5, [#allocation5]  }
 0x86d   : > { %17344 = dma.done.wait (%p14712_p3), [#allocation5], 32  }
 0x86e   : > { %17346 = vsyncadd (%p14712_p3), [#allocation5], 4294967264 }
 0x86f PF: > { %p18_p11 = scmp.ge.s32.totalorder %s17476_s25, 10   ;;  %s19589_s18 = smov %s17353_s19 }
 0x870   : > { %s19590_s19 = smov %s17357_s20  ;;  %s19591_s20 = smov %s17486_s28 }
 0x871   : > { %s19592_s21 = smov %s17476_s25  ;;  %20 = sbr.rel (!%p18_p11) target bundleno = 6 (0x6), region = 100 }
 0x876   :  { %12935 = vsyncpa [#allocation4], 1 }
 0x877   :  { %12937 = vsyncpa [#allocation4 + $0x1], 1 }
 0x878   :  { %12938 = vsyncpa [#allocation7], 1 }
 0x879   :  { %12939 = vsyncpa [#allocation10], 1 }
 0x87a   :  { %12940 = vsyncpa [#allocation5], 1 }
 0x87b   :  { %12942 = vsyncpa [#allocation5 + $0x1], 1 }

</bundles_post_ra>
